<compile_context>
chip_gen: v5e
topology: v5e:2x2
jax: 0.10.0
libtpu: 0.0.40
codegen_flags: <defaults>
</compile_context>

<pallas_src>
import functools
import math

import jax
import jax.numpy as jnp
from jax import lax
from jax.experimental import pallas as pl
from jax.experimental.pallas import tpu as pltpu


_NEG = -1e30  # finite mask value: keeps exp(m_prev - m_new) NaN-free in the online softmax


def _round_up(x, m):
    return (x + m - 1) // m * m


def _gelu_exact(x):
    # Matches torch.nn.GELU() default (erf-based, not tanh approximation).
    return 0.5 * x * (1.0 + lax.erf(x * (1.0 / math.sqrt(2.0))))


def _tpu_info():
    """(vmem_capacity_bytes, looks_like_256wide_mxu) with conservative fallbacks."""
    cap = 64 * 1024 * 1024          # v7x per-core capacity = safest lower bound
    wide_mxu = False
    try:
        info = pltpu.get_tpu_info()
        c = int(getattr(info, "vmem_capacity_bytes", 0) or 0)
        if c > 0:
            cap = c
        name = " ".join(
            str(getattr(info, a, "")) for a in ("chip_version", "version", "name")
        ).lower()
        wide_mxu = any(t in name for t in ("v6", "v7", "6e", "7x"))
    except Exception:
        pass
    return cap, wide_mxu


# --------------------------------------------------------------------------- #
# kernel A (tiled path): fused projections, one MXU pass per node block
#   zz = feat @ [W_out | W_res | W_out@a_dst | W_out@a_src] + fused biases
# --------------------------------------------------------------------------- #
def _proj_kernel(feat_ref, w_ref, b_ref, rate_ref, z_ref, h0r_ref, aux_ref):
    fout = z_ref.shape[-1]
    zz = jnp.dot(feat_ref[...], w_ref[...],
                 preferred_element_type=jnp.float32) + b_ref[...]
    z_ref[...] = zz[:, :fout].astype(z_ref.dtype)           # bf16 copy for the reducer matmul
    h0r_ref[...] = zz[:, fout:2 * fout] * rate_ref[0, 0]    # re_zero-scaled residual
    aux_ref[...] = zz[:, 2 * fout:2 * fout + 2]             # [s_dst, s_src] scores (f32)


# --------------------------------------------------------------------------- #
# kernel B (tiled path): flash-style masked softmax attention over src tiles
#   grid = (dst blocks "parallel", src blocks "arbitrary")
# --------------------------------------------------------------------------- #
def _attn_kernel(adj_ref, sdst_ref, ssrc_ref, z_ref, h0r_ref, out_ref,
                 m_sc, l_sc, acc_sc, *, n_valid, need_col_mask):
    j = pl.program_id(1)

    @pl.when(j == 0)
    def _init():
        m_sc[...] = jnp.full_like(m_sc, _NEG)
        l_sc[...] = jnp.zeros_like(l_sc)
        acc_sc[...] = jnp.zeros_like(acc_sc)

    tk = adj_ref.shape[-1]
    # Edge logits for this (dst block, src block): [TM,1] + [1,TK] -> [TM,TK].
    logits = _gelu_exact(sdst_ref[...] + ssrc_ref[...])
    mask = adj_ref[...].astype(jnp.float32) > 0.0           # native-dtype adjacency read
    if need_col_mask:  # static: compiled in only when N is not a tile multiple (adj never padded)
        col = lax.broadcasted_iota(jnp.int32, mask.shape, 1) + j * tk
        mask = jnp.logical_and(mask, col < n_valid)
    masked = jnp.where(mask, logits, _NEG)

    m_prev = m_sc[...]
    m_new = jnp.maximum(m_prev, jnp.max(masked, axis=1, keepdims=True))
    alpha = jnp.exp(m_prev - m_new)
    # Single mask application: once a real edge has been seen for a row the masked
    # entries are exp(-1e30 - m) == 0; fully-masked prefixes are washed out by
    # alpha -> 0 at the first real block (self-loops guarantee one per real row).
    p = jnp.exp(masked - m_new).astype(jnp.bfloat16)
    l_sc[...] = alpha * l_sc[...] + jnp.sum(p, axis=1, keepdims=True,
                                            dtype=jnp.float32)
    acc_sc[...] = alpha * acc_sc[...] + jnp.dot(p, z_ref[...],
                                                preferred_element_type=jnp.float32)
    m_sc[...] = m_new

    @pl.when(j == pl.num_programs(1) - 1)
    def _finalize():
        denom = jnp.maximum(l_sc[...], 1e-30)                # guard isolated rows
        out_ref[...] = (acc_sc[...] * pl.reciprocal(denom, approx=True)
                        + h0r_ref[...]).astype(out_ref.dtype)


# --------------------------------------------------------------------------- #
# fused kernel (small graphs): projection + attention in one pallas_call,
# no padding, no HBM round trip of intermediates.
# --------------------------------------------------------------------------- #
def _fused_kernel(feat_ref, w_ref, b_ref, a8_ref, adj_ref, rate_ref, out_ref):
    fout = out_ref.shape[-1]
    zz = jnp.dot(feat_ref[...], w_ref[...],
                 preferred_element_type=jnp.float32) + b_ref[...]
    z = zz[:, :fout]
    h0r = zz[:, fout:2 * fout] * rate_ref[0, 0]
    s_dst = zz[:, 2 * fout:2 * fout + 1]                     # [N, 1]
    # Lane-dense source-score row without any in-kernel transpose: row 0 of a8 is
    # a_src^T, so (a8 contracted with z over Fout)[0, :] == z @ a_src (bias included in z).
    srow = lax.dot_general(a8_ref[...], z, (((1,), (1,)), ((), ())),
                           preferred_element_type=jnp.float32)   # [8, N]
    s_src = srow[0:1, :]                                     # [1, N]
    logits = _gelu_exact(s_dst + s_src)
    mask = adj_ref[...].astype(jnp.float32) > 0.0
    masked = jnp.where(mask, logits, _NEG)
    m = jnp.max(masked, axis=1, keepdims=True)
    p = jnp.exp(masked - m).astype(jnp.bfloat16)             # masked entries underflow to 0
    denom = jnp.maximum(jnp.sum(p, axis=1, keepdims=True, dtype=jnp.float32), 1e-30)
    h = jnp.dot(p, z.astype(jnp.bfloat16), preferred_element_type=jnp.float32)
    out_ref[...] = (h * pl.reciprocal(denom, approx=True) + h0r).astype(out_ref.dtype)


@functools.partial(jax.jit, static_argnames=("block_m", "block_k", "force_tiled"))
def gcn_attention(feature, adj, w_out, b_out, a_src, a_dst, w_res, b_res, rate,
                  *, block_m=0, block_k=0, force_tiled=False):
    """GCN_Attention forward.

    adj[dst, src] != 0 marks an edge; pass it already as int8/bool (converted once
    by the caller) — it is streamed in its native dtype. rate encodes the residual
    config: re_zero parameter, 1.0 for plain res_add, 0.0 for no residual.
    """
    n, fin = feature.shape
    fout = w_out.shape[1]

    feature = feature.astype(jnp.float32)
    w_out = w_out.astype(jnp.float32)
    w_res = w_res.astype(jnp.float32)
    b_out = b_out.reshape(1, fout).astype(jnp.float32)
    b_res = b_res.reshape(1, fout).astype(jnp.float32)
    a_src = a_src.reshape(fout, 1).astype(jnp.float32)
    a_dst = a_dst.reshape(fout, 1).astype(jnp.float32)
    rate = jnp.asarray(rate, jnp.float32).reshape(1, 1)

    hi = lax.Precision.HIGHEST
    # Fold the 2-lane attention-vector matmul into the fused projection: one MXU
    # pass emits [z | h0 | s_dst | s_src] per node block (no lane-sparse second dot).
    w_all = jnp.concatenate(
        [w_out, w_res,
         jnp.dot(w_out, a_dst, precision=hi),
         jnp.dot(w_out, a_src, precision=hi)], axis=1)            # [Fin, 2*Fout+2]
    b_all = jnp.concatenate(
        [b_out, b_res,
         jnp.dot(b_out, a_dst, precision=hi),
         jnp.dot(b_out, a_src, precision=hi)], axis=1)            # [1, 2*Fout+2]

    vmem_cap, wide_mxu = _tpu_info()
    adj_bytes = jnp.dtype(adj.dtype).itemsize

    # ------------------ small-graph path: one fused pallas_call ------------------ #
    fused_est = n * n * (adj_bytes + 20) + n * (fin + 3 * (2 * fout + 2)) * 4
    if (not force_tiled) and n <= 2048 and fused_est <= vmem_cap // 4:
        a8 = jnp.zeros((8, fout), jnp.float32).at[0].set(a_src[:, 0])
        vmem_limit = int(min(3 * vmem_cap // 4,
                             max(4 * fused_est, 16 * 1024 * 1024)))
        return pl.pallas_call(
            _fused_kernel,
            out_shape=jax.ShapeDtypeStruct((n, fout), jnp.float32),
            grid=(1,),
            in_specs=[
                pl.BlockSpec((n, fin), lambda i: (0, 0)),
                pl.BlockSpec((fin, 2 * fout + 2), lambda i: (0, 0)),
                pl.BlockSpec((1, 2 * fout + 2), lambda i: (0, 0)),
                pl.BlockSpec((8, fout), lambda i: (0, 0)),
                pl.BlockSpec((n, n), lambda i: (0, 0)),
                pl.BlockSpec(memory_space=pltpu.MemorySpace.SMEM),   # rate scalar
            ],
            out_specs=pl.BlockSpec((n, fout), lambda i: (0, 0)),
            compiler_params=pltpu.CompilerParams(
                dimension_semantics=("arbitrary",),
                vmem_limit_bytes=vmem_limit),
        )(feature, w_all, b_all, a8, adj, rate)

    # -------------- large-graph path: projection + flash attention --------------- #
    # Destination tile: 256 on 256-wide-MXU parts (v6e/v7x), 128 otherwise.
    tm = block_m if block_m else (256 if wide_mxu else 128)
    tm = _round_up(max(8, min(tm, _round_up(n, 8))), 8)

    # Generation-aware source-tile sizing: keep double-buffered adj/z tiles +
    # f32 elementwise temps + accumulators well inside physical VMEM (64 MiB on
    # v7x vs 128 MiB on v5e/v6e).
    budget = int(0.35 * vmem_cap)
    fixed = 5 * tm * fout * 4 + 4 * tm * 8
    per_tk = 2 * tm * adj_bytes + 4 * fout + 16 * tm + 16
    tk_fit = max(128, (budget - fixed) // per_tk)
    tk_cap = 2048 if vmem_cap <= 80 * 1024 * 1024 else 4096
    tk = block_k if block_k else min(tk_fit, tk_cap)
    tk = max(128, min(int(tk), _round_up(n, 128)))
    tk = (tk // 128) * 128

    lcm = tm * tk // math.gcd(tm, tk)
    n_pad = _round_up(n, lcm)
    if n_pad != n:
        # Only the cheap O(dN*Fin) feature pad; the O(N^2) adjacency is NOT padded —
        # ragged last blocks are handled by the in-kernel column-validity mask.
        feature = jnp.pad(feature, ((0, n_pad - n), (0, 0)))

    need_b = (2 * tm * tk * adj_bytes + 2 * tk * fout * 2 + 2 * (tm + tk) * 8
              + 4 * tm * fout * 4 + tm * fout * 4 + 2 * tm * 4 + 6 * tm * tk * 4)
    need_a = (2 * tm * fin * 4 + fin * (2 * fout + 2) * 4
              + 2 * tm * (2 * fout * 4 + fout * 2 + 8) + 4096)
    vmem_limit = int(min(3 * vmem_cap // 4,
                         max(2 * max(need_a, need_b), 16 * 1024 * 1024)))
    cparams_a = pltpu.CompilerParams(dimension_semantics=("parallel",),
                                     vmem_limit_bytes=vmem_limit)
    cparams_b = pltpu.CompilerParams(dimension_semantics=("parallel", "arbitrary"),
                                     vmem_limit_bytes=vmem_limit)

    # ---- kernel A: fused projections + folded attention scores ----
    z_bf16, h0r, aux = pl.pallas_call(
        _proj_kernel,
        out_shape=(jax.ShapeDtypeStruct((n_pad, fout), jnp.bfloat16),
                   jax.ShapeDtypeStruct((n_pad, fout), jnp.float32),
                   jax.ShapeDtypeStruct((n_pad, 2), jnp.float32)),
        grid=(n_pad // tm,),
        in_specs=[
            pl.BlockSpec((tm, fin), lambda i: (i, 0)),
            pl.BlockSpec((fin, 2 * fout + 2), lambda i: (0, 0)),
            pl.BlockSpec((1, 2 * fout + 2), lambda i: (0, 0)),
            pl.BlockSpec(memory_space=pltpu.MemorySpace.SMEM),       # rate scalar
        ],
        out_specs=(
            pl.BlockSpec((tm, fout), lambda i: (i, 0)),
            pl.BlockSpec((tm, fout), lambda i: (i, 0)),
            pl.BlockSpec((tm, 2), lambda i: (i, 0)),
        ),
        compiler_params=cparams_a,
    )(feature, w_all, b_all, rate)

    s_dst_col = aux[:, 0:1]                    # [N_pad, 1]
    s_src_row = aux[:, 1].reshape(1, n_pad)    # [1, N_pad] lane-dense row, built once in XLA

    g_i, g_j = n_pad // tm, n_pad // tk
    cost = pl.CostEstimate(
        flops=int(2 * n_pad * n_pad * fout + 10 * n_pad * n_pad),
        transcendentals=int(2 * n_pad * n_pad),
        bytes_accessed=int(n * n * adj_bytes + g_i * n_pad * fout * 2
                           + n_pad * fout * 8 + n_pad * 16),
    )

    # ---- kernel B: flash-style masked softmax + bf16 reducer + residual ----
    # TODO(synk): if profiling on v5e still shows the adjacency DMA exposed, add
    # pipeline_mode=pl.Buffered(3) on the adj BlockSpec (VMEM is plentiful there).
    out = pl.pallas_call(
        functools.partial(_attn_kernel, n_valid=n, need_col_mask=(n != n_pad)),
        out_shape=jax.ShapeDtypeStruct((n_pad, fout), jnp.float32),
        grid=(g_i, g_j),
        in_specs=[
            pl.BlockSpec((tm, tk), lambda i, j: (i, j)),     # adjacency (native dtype)
            pl.BlockSpec((tm, 1), lambda i, j: (i, 0)),      # dst scores (not re-fetched over j)
            pl.BlockSpec((1, tk), lambda i, j: (0, j)),      # src scores row block
            pl.BlockSpec((tk, fout), lambda i, j: (j, 0)),   # z (bf16) src block
            pl.BlockSpec((tm, fout), lambda i, j: (i, 0)),   # re_zero residual
        ],
        out_specs=pl.BlockSpec((tm, fout), lambda i, j: (i, 0)),
        scratch_shapes=[pltpu.VMEM((tm, 1), jnp.float32),    # running max
                        pltpu.VMEM((tm, 1), jnp.float32),    # running sum
                        pltpu.VMEM((tm, fout), jnp.float32)],  # accumulator
        compiler_params=cparams_b,
        cost_estimate=cost,
    )(adj, s_dst_col, s_src_row, z_bf16, h0r)

    return out[:n]


def reference(feature, adj, w_out, b_out, a_src, a_dst, w_res, b_res, rate):
    with jax.default_matmul_precision("float32"):
        z = feature @ w_out + b_out
        logits = jax.nn.gelu((z @ a_dst) + (z @ a_src).T, approximate=False)
        masked = jnp.where(adj > 0, logits, -jnp.inf)
        attn = jax.nn.softmax(masked, axis=1)
        attn = jnp.where(adj > 0, attn, 0.0)
        h = attn @ z
        h0 = feature @ w_res + b_res
        return h + h0 * rate[0, 0]


if __name__ == "__main__":
    F_IN, F_OUT = 64, 128   # Fout=128 keeps the output lane-dense

    key = jax.random.PRNGKey(0)
    ks = jax.random.split(key, 10)
    scale = 0.1

    # Deterministic synthetic parameters (shapes follow the nn.Module __init__).
    w_out = scale * jax.random.normal(ks[0], (F_IN, F_OUT), jnp.float32)   # outlinear.weight^T
    b_out = scale * jax.random.normal(ks[1], (1, F_OUT), jnp.float32)      # outlinear.bias
    attn_w = scale * jax.random.normal(ks[2], (2 * F_OUT,), jnp.float32)   # attn_fc.weight (no bias)
    a_src = attn_w[:F_OUT].reshape(F_OUT, 1)                               # acts on edges.src['z']
    a_dst = attn_w[F_OUT:].reshape(F_OUT, 1)                               # acts on edges.dst['z']
    w_res = scale * jax.random.normal(ks[3], (F_IN, F_OUT), jnp.float32)   # res_linear.weight^T
    b_res = scale * jax.random.normal(ks[4], (1, F_OUT), jnp.float32)      # res_linear.bias
    rate = jnp.full((1, 1), 0.25, jnp.float32)                             # re_zero rate parameter

    def build_graph(n, kf, ka):
        feat = jax.random.normal(kf, (n, F_IN), jnp.float32)
        adj_f = jax.random.bernoulli(ka, 0.25, (n, n)).astype(jnp.float32)
        adj_f = jnp.maximum(adj_f, jnp.eye(n, dtype=jnp.float32))          # adj[dst, src] + self-loops
        adj_i8 = adj_f.astype(jnp.int8)      # converted ONCE outside the kernel path
        return feat, adj_f, adj_i8

    # 1) small graph -> fully fused single pallas_call (no intermediate HBM round trip)
    feat, adj_f, adj_i8 = build_graph(256, ks[5], ks[6])
    out = jax.block_until_ready(
        gcn_attention(feat, adj_i8, w_out, b_out, a_src, a_dst, w_res, b_res, rate))
    ref = reference(feat, adj_f, w_out, b_out, a_src, a_dst, w_res, b_res, rate)
    err_fused = float(jnp.max(jnp.abs(out - ref)))
    assert out.shape == (256, F_OUT)
    assert err_fused < 4e-2, err_fused

    # 2) ragged graph forced onto the tiled flash-softmax path (multiple src blocks,
    #    un-padded adjacency with in-kernel column-validity masking)
    feat, adj_f, adj_i8 = build_graph(300, ks[7], ks[8])
    out = jax.block_until_ready(
        gcn_attention(feat, adj_i8, w_out, b_out, a_src, a_dst, w_res, b_res, rate,
                      block_m=128, block_k=128, force_tiled=True))
    ref = reference(feat, adj_f, w_out, b_out, a_src, a_dst, w_res, b_res, rate)
    err_tiled = float(jnp.max(jnp.abs(out - ref)))
    assert out.shape == (300, F_OUT)
    assert err_tiled < 4e-2, err_tiled

    print("KERNEL_OK")
</pallas_src>

<mosaic_0001>
module attributes {stable_mosaic.version = 11 : i64} {
  func.func @_fused_kernel(%arg0: i32, %arg1: memref<256x64xf32, #tpu.memory_space<vmem>>, %arg2: memref<64x258xf32, #tpu.memory_space<vmem>>, %arg3: memref<1x258xf32, #tpu.memory_space<vmem>>, %arg4: memref<8x128xf32, #tpu.memory_space<vmem>>, %arg5: memref<256x256xi8, #tpu.memory_space<vmem>>, %arg6: memref<1x1xf32, #tpu.memory_space<smem>>, %arg7: memref<256x128xf32, #tpu.memory_space<vmem>>) attributes {dimension_semantics = [#tpu.dimension_semantics<arbitrary>], iteration_bounds = array<i64: 1>, scalar_prefetch = 0 : i64, scratch_operands = 0 : i64, tpu.core_type = #tpu.core_type<tc>, window_params = [{pipeline_mode = #tpu.pipeline_mode<synchronous>, transform_indices = @transform_0, window_bounds = array<i64: 256, 64>}, {pipeline_mode = #tpu.pipeline_mode<synchronous>, transform_indices = @transform_1, window_bounds = array<i64: 64, 258>}, {pipeline_mode = #tpu.pipeline_mode<synchronous>, transform_indices = @transform_2, window_bounds = array<i64: 1, 258>}, {pipeline_mode = #tpu.pipeline_mode<synchronous>, transform_indices = @transform_3, window_bounds = array<i64: 8, 128>}, {pipeline_mode = #tpu.pipeline_mode<synchronous>, transform_indices = @transform_4, window_bounds = array<i64: 256, 256>}, {transform_indices = @transform_5, window_bounds = array<i64: 1, 1>}, {pipeline_mode = #tpu.pipeline_mode<synchronous>, transform_indices = @transform_6, window_bounds = array<i64: 256, 128>}]} {
    %c0 = arith.constant 0 : index
    %c0_0 = arith.constant 0 : index
    %0 = vector.load %arg1[%c0, %c0_0] : memref<256x64xf32, #tpu.memory_space<vmem>>, vector<256x64xf32>
    %c0_1 = arith.constant 0 : index
    %c0_2 = arith.constant 0 : index
    %1 = vector.load %arg2[%c0_1, %c0_2] : memref<64x258xf32, #tpu.memory_space<vmem>>, vector<64x258xf32>
    %cst = arith.constant dense<0.000000e+00> : vector<256x258xf32>
    %2 = tpu.matmul %0, %1, %cst {dimension_numbers = #tpu.dot_dimension_numbers<[1], [0], [0], [1], [0, 0, 1, 1], [], []>} : vector<256x64xf32>, vector<64x258xf32>, vector<256x258xf32> -> vector<256x258xf32>
    %c0_3 = arith.constant 0 : index
    %c0_4 = arith.constant 0 : index
    %3 = vector.load %arg3[%c0_3, %c0_4] : memref<1x258xf32, #tpu.memory_space<vmem>>, vector<1x258xf32>
    %4 = vector.broadcast %3 : vector<1x258xf32> to vector<256x258xf32>
    %5 = arith.addf %2, %4 : vector<256x258xf32>
    %6 = vector.extract_strided_slice %5 {offsets = [0, 0], sizes = [256, 128], strides = [1, 1]} : vector<256x258xf32> to vector<256x128xf32>
    %7 = vector.extract_strided_slice %5 {offsets = [0, 128], sizes = [256, 128], strides = [1, 1]} : vector<256x258xf32> to vector<256x128xf32>
    %c0_5 = arith.constant 0 : index
    %c0_6 = arith.constant 0 : index
    %8 = memref.load %arg6[%c0_5, %c0_6] : memref<1x1xf32, #tpu.memory_space<smem>>
    %9 = vector.broadcast %8 : f32 to vector<256x128xf32>
    %10 = arith.mulf %7, %9 : vector<256x128xf32>
    %11 = vector.extract_strided_slice %5 {offsets = [0, 256], sizes = [256, 1], strides = [1, 1]} : vector<256x258xf32> to vector<256x1xf32>
    %c0_7 = arith.constant 0 : index
    %c0_8 = arith.constant 0 : index
    %12 = vector.load %arg4[%c0_7, %c0_8] : memref<8x128xf32, #tpu.memory_space<vmem>>, vector<8x128xf32>
    %cst_9 = arith.constant dense<0.000000e+00> : vector<8x256xf32>
    %13 = tpu.matmul %12, %6, %cst_9 {dimension_numbers = #tpu.dot_dimension_numbers<[1], [1], [0], [0], [0, 0, 1, 0], [], []>} : vector<8x128xf32>, vector<256x128xf32>, vector<8x256xf32> -> vector<8x256xf32>
    %14 = vector.extract_strided_slice %13 {offsets = [0, 0], sizes = [1, 256], strides = [1, 1]} : vector<8x256xf32> to vector<1x256xf32>
    %15 = vector.broadcast %11 : vector<256x1xf32> to vector<256x256xf32>
    %16 = vector.broadcast %14 : vector<1x256xf32> to vector<256x256xf32>
    %17 = arith.addf %15, %16 : vector<256x256xf32>
    %cst_10 = arith.constant 5.000000e-01 : f32
    %18 = vector.broadcast %cst_10 : f32 to vector<256x256xf32>
    %19 = arith.mulf %18, %17 : vector<256x256xf32>
    %cst_11 = arith.constant 0.707106769 : f32
    %20 = vector.broadcast %cst_11 : f32 to vector<256x256xf32>
    %21 = arith.mulf %17, %20 : vector<256x256xf32>
    %22 = math.erf %21 : vector<256x256xf32>
    %cst_12 = arith.constant 1.000000e+00 : f32
    %23 = vector.broadcast %cst_12 : f32 to vector<256x256xf32>
    %24 = arith.addf %23, %22 : vector<256x256xf32>
    %25 = arith.mulf %19, %24 : vector<256x256xf32>
    %c0_13 = arith.constant 0 : index
    %c0_14 = arith.constant 0 : index
    %26 = vector.load %arg5[%c0_13, %c0_14] : memref<256x256xi8, #tpu.memory_space<vmem>>, vector<256x256xi8>
    %27 = arith.sitofp %26 : vector<256x256xi8> to vector<256x256xf32>
    %cst_15 = arith.constant 0.000000e+00 : f32
    %28 = vector.broadcast %cst_15 : f32 to vector<256x256xf32>
    %29 = arith.cmpf ogt, %27, %28 : vector<256x256xf32>
    %cst_16 = arith.constant -1.000000e+30 : f32
    %30 = vector.broadcast %cst_16 : f32 to vector<256x256xf32>
    %31 = arith.select %29, %25, %30 : vector<256x256xi1>, vector<256x256xf32>
    %cst_17 = arith.constant dense<0xFF800000> : vector<256xf32>
    %32 = vector.multi_reduction <maximumf>, %31, %cst_17 [1] : vector<256x256xf32> to vector<256xf32>
    %33 = vector.shape_cast %32 : vector<256xf32> to vector<256x1xf32>
    %34 = vector.broadcast %33 : vector<256x1xf32> to vector<256x256xf32>
    %35 = arith.subf %31, %34 : vector<256x256xf32>
    %36 = math.exp %35 : vector<256x256xf32>
    %37 = arith.truncf %36 : vector<256x256xf32> to vector<256x256xbf16>
    %38 = arith.extf %37 : vector<256x256xbf16> to vector<256x256xf32>
    %cst_18 = arith.constant dense<0.000000e+00> : vector<256xf32>
    %39 = vector.multi_reduction <add>, %38, %cst_18 [1] : vector<256x256xf32> to vector<256xf32>
    %40 = vector.shape_cast %39 : vector<256xf32> to vector<256x1xf32>
    %cst_19 = arith.constant 1.000000e-30 : f32
    %41 = vector.broadcast %cst_19 : f32 to vector<256x1xf32>
    %42 = arith.maximumf %40, %41 : vector<256x1xf32>
    %43 = arith.truncf %6 : vector<256x128xf32> to vector<256x128xbf16>
    %cst_20 = arith.constant dense<0.000000e+00> : vector<256x128xf32>
    %44 = tpu.matmul %37, %43, %cst_20 {dimension_numbers = #tpu.dot_dimension_numbers<[1], [0], [0], [1], [0, 0, 1, 1], [], []>} : vector<256x256xbf16>, vector<256x128xbf16>, vector<256x128xf32> -> vector<256x128xf32>
    %45 = tpu.reciprocal %42 {approx = true} : vector<256x1xf32> -> vector<256x1xf32>
    %46 = vector.broadcast %45 : vector<256x1xf32> to vector<256x128xf32>
    %47 = arith.mulf %44, %46 : vector<256x128xf32>
    %48 = arith.addf %47, %10 : vector<256x128xf32>
    %c0_21 = arith.constant 0 : index
    %c0_22 = arith.constant 0 : index
    %49 = vector.load %arg7[%c0_21, %c0_22] : memref<256x128xf32, #tpu.memory_space<vmem>>, vector<256x128xf32>
    tpu.vector_store %arg7[%c0_21, %c0_22], %48 {strides = array<i32>} : memref<256x128xf32, #tpu.memory_space<vmem>>, vector<256x128xf32>,
    return
  }
  func.func @transform_0(%arg0: i32) -> (i32, i32) {
    %c0_i32 = arith.constant 0 : i32
    %c0_i32_0 = arith.constant 0 : i32
    %c0_i32_1 = arith.constant 0 : i32
    return %c0_i32, %c0_i32_0 : i32, i32
  }
  func.func @transform_1(%arg0: i32) -> (i32, i32) {
    %c0_i32 = arith.constant 0 : i32
    %c0_i32_0 = arith.constant 0 : i32
    %c0_i32_1 = arith.constant 0 : i32
    return %c0_i32, %c0_i32_0 : i32, i32
  }
  func.func @transform_2(%arg0: i32) -> (i32, i32) {
    %c0_i32 = arith.constant 0 : i32
    %c0_i32_0 = arith.constant 0 : i32
    %c0_i32_1 = arith.constant 0 : i32
    return %c0_i32, %c0_i32_0 : i32, i32
  }
  func.func @transform_3(%arg0: i32) -> (i32, i32) {
    %c0_i32 = arith.constant 0 : i32
    %c0_i32_0 = arith.constant 0 : i32
    %c0_i32_1 = arith.constant 0 : i32
    return %c0_i32, %c0_i32_0 : i32, i32
  }
  func.func @transform_4(%arg0: i32) -> (i32, i32) {
    %c0_i32 = arith.constant 0 : i32
    %c0_i32_0 = arith.constant 0 : i32
    %c0_i32_1 = arith.constant 0 : i32
    return %c0_i32, %c0_i32_0 : i32, i32
  }
  func.func @transform_5(%arg0: i32) -> (i32, i32) {
    %c0_i32 = arith.constant 0 : i32
    %c0_i32_0 = arith.constant 0 : i32
    %c0_i32_1 = arith.constant 0 : i32
    return %c0_i32, %c0_i32_0 : i32, i32
  }
  func.func @transform_6(%arg0: i32) -> (i32, i32) {
    %c0_i32 = arith.constant 0 : i32
    %c0_i32_0 = arith.constant 0 : i32
    %c0_i32_1 = arith.constant 0 : i32
    return %c0_i32, %c0_i32_0 : i32, i32
  }
}

</mosaic_0001>

<bundles_post_ra>
// kernel: gcn_attention.1
= control target key start
LH: loop header
LB: loop body
LE: loop exit
PB: predicated region body
PF: predicated region fallthrough
CT: control target
= control target key end

     0   :  { %s9786_s0 = inlined_call_operand.vmem [shape: f32[256,64], index: 0, kind: input, shape index: {}]   ;;  %s9787_s1 = inlined_call_operand.vmem [shape: f32[64,258], index: 1, kind: input, shape index: {}]   ;;  %s9788_s2 = inlined_call_operand.vmem [shape: f32[1,258], index: 2, kind: input, shape index: {}]   ;;  %s9789_s3 = inlined_call_operand.vmem [shape: f32[8,128], index: 3, kind: input, shape index: {}]   ;;  %s9790_s4 = inlined_call_operand.vmem [shape: s8[256,256], index: 4, kind: input, shape index: {}]   ;;  %s9791_s5 = inlined_call_operand.<no memory space> [shape: f32[1,1], index: 5, kind: input, shape index: {}]   ;;  %s9792_s6 = inlined_call_operand.hbm [shape: f32[256,128], index: 6, kind: output, shape index: {}]  }
   0x1   :  { %v78_v0 = vld [vmem:[%s9787_s1 + $0xa8] sm:$0xff]  ;;  %v75_v1 = vld [vmem:[%s9787_s1 + $0x90] sm:$0xff]  ;;  %v72_v2 = vld [vmem:[%s9787_s1 + $0x78] sm:$0xff] }
   0x2   :  { %194 = vmatpush.msra.mxu0 %v78_v0  ;;  %4926 = vmatpush.msra.mxu2 %v78_v0  ;;  %v69_v3 = vld [vmem:[%s9787_s1 + $0x60] sm:$0xff]  ;;  %v79_v4 = vld [vmem:[%s9787_s1 + $0xb0] sm:$0xff]  ;;  %v66_v5 = vld [vmem:[%s9787_s1 + $0x48] sm:$0xff] }
   0x3   :  { %307 = vmatpush.msra.mxu1 %v79_v4  ;;  %v76_v6 = vld [vmem:[%s9787_s1 + $0x98] sm:$0xff]  ;;  %v63_v7 = vld [vmem:[%s9787_s1 + $0x30] sm:$0xff] }
   0x4   :  { %195 = vmatpush.msra.mxu0 %v75_v1  ;;  %4927 = vmatpush.msra.mxu2 %v75_v1 }
   0x5   :  { %308 = vmatpush.msra.mxu1 %v76_v6 }
   0x6   :  { %196 = vmatpush.msra.mxu0 %v72_v2  ;;  %4928 = vmatpush.msra.mxu2 %v72_v2 }
   0x8   :  { %197 = vmatpush.msra.mxu0 %v69_v3  ;;  %4929 = vmatpush.msra.mxu2 %v69_v3 }
   0x9   :  { %12 = vsyncpa [#allocation4], 0  ;;  %v73_v8 = vld [vmem:[%s9787_s1 + $0x80] sm:$0xff]  ;;  %v60_v9 = vld [vmem:[%s9787_s1 + $0x18] sm:$0xff]  ;;  %vm89_vm0 = vcmask 523264   ;;  %s4754_s9 = sshll.u32 %s9792_s6, 4  ;;  %s4755_s9 = int_to_ptr.hbm [resolvable:$true] %s4754_s9 }
   0xa   :  { %198 = vmatpush.msra.mxu0 %v66_v5  ;;  %4930 = vmatpush.msra.mxu2 %v66_v5  ;;  %v70_v10 = vld [vmem:[%s9787_s1 + $0x68] sm:$0xff]  ;;  %v57_v11 = vld [vmem:[%s9787_s1] sm:$0xff]  ;;  %v67_v14 = vld [vmem:[%s9787_s1 + $0x50] sm:$0xff]  ;;  %s5311_s10 = smov 128   ;;  %s5312_s11 = smov 8  }
   0xb   :  { %309 = vmatpush.msra.mxu1 %v73_v8  ;;  %v5387_v12 = vld [vmem:[%s9786_s0] sm:$0xff]  ;;  %v5392_v13 = vld [vmem:[%s9786_s0 + $0xe8] sm:$0xff]  ;;  %v64_v15 = vld [vmem:[%s9787_s1 + $0x38] sm:$0xff] }
   0xc   :  { %199 = vmatpush.msra.mxu0 %v63_v7  ;;  %4931 = vmatpush.msra.mxu2 %v63_v7  ;;  %v61_v16 = vld [vmem:[%s9787_s1 + $0x20] sm:$0xff]  ;;  %v58_v17 = vld [vmem:[%s9787_s1 + $0x8] sm:$0xff]  ;;  %v5418_v19 = vld [vmem:[%s9786_s0 + $0xf0] sm:$0xff] }
   0xd   :  { %310 = vmatpush.msra.mxu1 %v70_v10  ;;  %v5413_v18 = vld [vmem:[%s9786_s0 + $0x8] sm:$0xff]  ;;  %v5429_v20 = vld [vmem:[%s9786_s0 + $0x10] sm:$0xff]  ;;  %v5434_v21 = vld [vmem:[%s9786_s0 + $0xf8] sm:$0xff] }
   0xe   :  { %200 = vmatpush.msra.mxu0 %v60_v9  ;;  %4932 = vmatpush.msra.mxu2 %v60_v9  ;;  %v5445_v22 = vld [vmem:[%s9786_s0 + $0x18] sm:$0xff]  ;;  %v5450_v23 = vld [vmem:[%s9786_s0 + $0xc8] sm:$0xff]  ;;  %v29_v24 = vld [vmem:[%s9786_s0 + $0x20] sm:$0xff] }
   0xf   :  { %311 = vmatpush.msra.mxu1 %v67_v14  ;;  %v5464_v25 = vld [vmem:[%s9786_s0 + $0xd0] sm:$0xff]  ;;  %v80_v26 = vld [vmem:[%s9787_s1 + $0xb8] sm:$0xff]  ;;  %v77_v27 = vld [vmem:[%s9787_s1 + $0xa0] sm:$0xff] }
  0x10   :  { %201 = vmatpush.msra.mxu0 %v57_v11  ;;  %4933 = vmatpush.msra.mxu2 %v57_v11  ;;  %v74_v28 = vld [vmem:[%s9787_s1 + $0x88] sm:$0xff]  ;;  %v71_v29 = vld [vmem:[%s9787_s1 + $0x70] sm:$0xff]  ;;  %v5489_v31 = vld [vmem:[%s9786_s0 + $0xd8] sm:$0xff] }
  0x11   :  { %4766 = vmatmul.msk.f32.vlgmr.msra.gmra.mxu0 %vm89_vm0, %v5387_v12  ;;  %4795 = vmatmul.msk.f32.vlgmr.msra.gmra.mxu2 %vm89_vm0, %v5392_v13  ;;  %v30_v30 = vld [vmem:[%s9786_s0 + $0x28] sm:$0xff]  ;;  %v68_v32 = vld [vmem:[%s9787_s1 + $0x58] sm:$0xff]  ;;  %v65_v33 = vld [vmem:[%s9787_s1 + $0x40] sm:$0xff] }
  0x12   :  { %4934 = vmatpush.msrb.mxu2 %v79_v4  ;;  %312 = vmatpush.msra.mxu1 %v64_v15  ;;  %v62_v34 = vld [vmem:[%s9787_s1 + $0x28] sm:$0xff]  ;;  %v59_v35 = vld [vmem:[%s9787_s1 + $0x10] sm:$0xff]  ;;  %v5513_v37 = vld [vmem:[%s9786_s0 + $0xe0] sm:$0xff] }
  0x13   :  { %v31_v36 = vld [vmem:[%s9786_s0 + $0x30] sm:$0xff]  ;;  %v32_v38 = vld [vmem:[%s9786_s0 + $0x38] sm:$0xff]  ;;  %v33_v39 = vld [vmem:[%s9786_s0 + $0x40] sm:$0xff] }
  0x14   :  { %4935 = vmatpush.msrb.mxu2 %v76_v6  ;;  %313 = vmatpush.msra.mxu1 %v61_v16  ;;  %v34_v40 = vld [vmem:[%s9786_s0 + $0x48] sm:$0xff]  ;;  %v35_v41 = vld [vmem:[%s9786_s0 + $0x50] sm:$0xff]  ;;  %v36_v42 = vld [vmem:[%s9786_s0 + $0x58] sm:$0xff] }
  0x15   :  { %v5557_v43 = vld [vmem:[%s9786_s0 + $0x60] sm:$0xff]  ;;  %v5567_v44 = vld [vmem:[%s9786_s0 + $0x68] sm:$0xff]  ;;  %v5578_v45 = vld [vmem:[%s9786_s0 + $0x70] sm:$0xff] }
  0x16   :  { %4936 = vmatpush.msrb.mxu2 %v73_v8  ;;  %314 = vmatpush.msra.mxu1 %v58_v17  ;;  %v5588_v46 = vld [vmem:[%s9786_s0 + $0x78] sm:$0xff]  ;;  %v5600_v48 = vld [vmem:[%s9786_s0 + $0x80] sm:$0xff]  ;;  %v5612_v51 = vld [vmem:[%s9786_s0 + $0x88] sm:$0xff] }
  0x17   :  { %4798 = vmatmul.msk.f32.vlgmr.msra.gmra.mxu1 %vm89_vm0, %v5387_v12  ;;  %v5624_v54 = vld [vmem:[%s9786_s0 + $0x90] sm:$0xff]  ;;  %v5636_v57 = vld [vmem:[%s9786_s0 + $0x98] sm:$0xff]  ;;  %v5646_v58 = vld [vmem:[%s9788_s2] sm:$0x7] }
  0x18   :  { %4937 = vmatpush.msrb.mxu2 %v70_v10  ;;  %v5655_v61 = vld [vmem:[%s9786_s0 + $0xa0] sm:$0xff]  ;;  %v5658_v62 = vperm.slane %v5646_v58, 0  ;;  %v46_v3 = vld [vmem:[%s9786_s0 + $0xa8] sm:$0xff]  ;;  %v5689_v7 = vld [vmem:[%s9786_s0 + $0xb0] sm:$0xff] }
  0x19   :  { %4767 = vmatmul.msk.f32.gmra.mxu0 %vm89_vm0, %v5413_v18  ;;  %4796 = vmatmul.msk.f32.gmra.mxu2 %vm89_vm0, %v5418_v19  ;;  %v5703_v11 = vld [vmem:[%s9786_s0 + $0xb8] sm:$0xff] }
  0x1a   :  { %4938 = vmatpush.msrb.mxu2 %v67_v14 }
  0x1c   :  { %4939 = vmatpush.msrb.mxu2 %v64_v15  ;;  %v5718_v15 = vld [vmem:[%s9786_s0 + $0xc0] sm:$0xff] }
  0x1e   :  { %4940 = vmatpush.msrb.mxu2 %v61_v16 }
  0x1f   :  { %4799 = vmatmul.msk.f32.gmra.mxu1 %vm89_vm0, %v5413_v18 }
  0x20   :  { %4941 = vmatpush.msrb.mxu2 %v58_v17 }
  0x21   :  { %4768 = vmatmul.msk.f32.gmra.mxu0 %vm89_vm0, %v5429_v20  ;;  %4797 = vmatmul.msk.f32.gmra.mxu2 %vm89_vm0, %v5434_v21 }
  0x22   :  { %420 = vmatpush.msra.mxu2 %v80_v26 }
  0x24   :  { %421 = vmatpush.msra.mxu2 %v77_v27 }
  0x26   :  { %422 = vmatpush.msra.mxu2 %v74_v28 }
  0x27   :  { %4800 = vmatmul.msk.f32.gmra.mxu1 %vm89_vm0, %v5429_v20 }
  0x28   :  { %423 = vmatpush.msra.mxu2 %v71_v29 }
  0x29   :  { %4769 = vmatmul.msk.f32.gmra.mxu0 %vm89_vm0, %v5445_v22  ;;  %4823 = vmatmul.msk.f32.vlgmr.msrb.gmra.mxu2 %vm89_vm0, %v5450_v23 }
  0x2a   :  { %424 = vmatpush.msra.mxu2 %v68_v32 }
  0x2c   :  { %425 = vmatpush.msra.mxu2 %v65_v33 }
  0x2e   :  { %426 = vmatpush.msra.mxu2 %v62_v34 }
  0x2f   :  { %4801 = vmatmul.msk.f32.gmra.mxu1 %vm89_vm0, %v5445_v22 }
  0x30   :  { %427 = vmatpush.msra.mxu2 %v59_v35 }
  0x31   :  { %4770 = vmatmul.msk.f32.gmra.mxu0 %vm89_vm0, %v29_v24  ;;  %4824 = vmatmul.msk.f32.gmra.mxu2 %vm89_vm0, %v5464_v25 }
  0x37   :  { %4802 = vmatmul.msk.f32.gmra.mxu1 %vm89_vm0, %v29_v24 }
  0x39   :  { %4771 = vmatmul.msk.f32.gmra.mxu0 %vm89_vm0, %v30_v30  ;;  %4825 = vmatmul.msk.f32.gmra.mxu2 %vm89_vm0, %v5489_v31 }
  0x3f   :  { %4803 = vmatmul.msk.f32.gmra.mxu1 %vm89_vm0, %v30_v30 }
  0x41   :  { %4772 = vmatmul.msk.f32.gmra.mxu0 %vm89_vm0, %v31_v36  ;;  %4826 = vmatmul.msk.f32.gmra.mxu2 %vm89_vm0, %v5513_v37 }
  0x47   :  { %4804 = vmatmul.msk.f32.gmra.mxu1 %vm89_vm0, %v31_v36 }
  0x49   :  { %4773 = vmatmul.msk.f32.gmra.mxu0 %vm89_vm0, %v32_v38  ;;  %4827 = vmatmul.msk.f32.gmra.mxu2 %vm89_vm0, %v5392_v13 }
  0x4f   :  { %4805 = vmatmul.msk.f32.gmra.mxu1 %vm89_vm0, %v32_v38 }
  0x51   :  { %4774 = vmatmul.msk.f32.gmra.mxu0 %vm89_vm0, %v33_v39  ;;  %4828 = vmatmul.msk.f32.gmra.mxu2 %vm89_vm0, %v5418_v19 }
  0x57   :  { %4806 = vmatmul.msk.f32.gmra.mxu1 %vm89_vm0, %v33_v39 }
  0x59   :  { %4775 = vmatmul.msk.f32.gmra.mxu0 %vm89_vm0, %v34_v40  ;;  %4829 = vmatmul.msk.f32.gmra.mxu2 %vm89_vm0, %v5434_v21 }
  0x5f   :  { %4807 = vmatmul.msk.f32.gmra.mxu1 %vm89_vm0, %v34_v40 }
  0x61   :  { %4776 = vmatmul.msk.f32.gmra.mxu0 %vm89_vm0, %v35_v41  ;;  %4830 = vmatmul.msk.f32.vlgmr.msra.gmra.mxu2 %vm89_vm0, %v5387_v12 }
  0x67   :  { %4808 = vmatmul.msk.f32.gmra.mxu1 %vm89_vm0, %v35_v41 }
  0x69   :  { %4777 = vmatmul.msk.f32.gmra.mxu0 %vm89_vm0, %v36_v42  ;;  %4831 = vmatmul.msk.f32.gmra.mxu2 %vm89_vm0, %v5413_v18 }
  0x6f   :  { %4809 = vmatmul.msk.f32.gmra.mxu1 %vm89_vm0, %v36_v42 }
  0x71   :  { %4778 = vmatmul.msk.f32.gmra.mxu0 %vm89_vm0, %v5557_v43  ;;  %4832 = vmatmul.msk.f32.gmra.mxu2 %vm89_vm0, %v5429_v20 }
  0x77   :  { %4810 = vmatmul.msk.f32.gmra.mxu1 %vm89_vm0, %v5557_v43 }
  0x79   :  { %4779 = vmatmul.msk.f32.gmra.mxu0 %vm89_vm0, %v5567_v44  ;;  %4833 = vmatmul.msk.f32.gmra.mxu2 %vm89_vm0, %v5445_v22 }
  0x7f   :  { %4811 = vmatmul.msk.f32.gmra.mxu1 %vm89_vm0, %v5567_v44 }
  0x81   :  { %4780 = vmatmul.msk.f32.gmra.mxu0 %vm89_vm0, %v5578_v45  ;;  %4834 = vmatmul.msk.f32.gmra.mxu2 %vm89_vm0, %v29_v24 }
  0x87   :  { %4812 = vmatmul.msk.f32.gmra.mxu1 %vm89_vm0, %v5578_v45 }
  0x89   :  { %4781 = vmatmul.msk.f32.gmra.mxu0 %vm89_vm0, %v5588_v46  ;;  %4835 = vmatmul.msk.f32.gmra.mxu2 %vm89_vm0, %v30_v30 }
  0x8e   :  { %v5595_v47 = vpop.f32.mrf.mxu0 }
  0x8f   :  { %4813 = vmatmul.msk.f32.gmra.mxu1 %vm89_vm0, %v5588_v46 }
  0x91   :  { %4782 = vmatmul.msk.f32.gmra.mxu0 %vm89_vm0, %v5600_v48  ;;  %4836 = vmatmul.msk.f32.gmra.mxu2 %vm89_vm0, %v31_v36 }
  0x94   :  { %v290_v49 = vpop.f32.mrf.mxu2 }
  0x95   :  { %v5679_v4 = vadd.f32 %v290_v49, %v5658_v62 }
  0x96   :  { %v5607_v50 = vpop.f32.mrf.mxu0 }
  0x97   :  { %4814 = vmatmul.msk.f32.gmra.mxu1 %vm89_vm0, %v5600_v48 }
  0x99   :  { %4783 = vmatmul.msk.f32.gmra.mxu0 %vm89_vm0, %v5612_v51  ;;  %4837 = vmatmul.msk.f32.gmra.mxu2 %vm89_vm0, %v32_v38 }
  0x9c   :  { %v293_v52 = vpop.f32.mrf.mxu2 }
  0x9d   :  { %v294_v1 = vadd.f32 %v293_v52, %v5658_v62 }
  0x9e   :  { %v5619_v53 = vpop.f32.mrf.mxu0 }
  0x9f   :  { %4815 = vmatmul.msk.f32.gmra.mxu1 %vm89_vm0, %v5612_v51 }
  0xa1   :  { %4784 = vmatmul.msk.f32.gmra.mxu0 %vm89_vm0, %v5624_v54  ;;  %4838 = vmatmul.msk.f32.gmra.mxu2 %vm89_vm0, %v33_v39 }
  0xa4   :  { %v296_v55 = vpop.f32.mrf.mxu2 }
  0xa5   :  { %v297_v63 = vadd.f32 %v296_v55, %v5658_v62 }
  0xa6   :  { %v5631_v56 = vpop.f32.mrf.mxu0 }
  0xa7   :  { %4816 = vmatmul.msk.f32.gmra.mxu1 %vm89_vm0, %v5624_v54  ;;  %580 = vmatpush.xpose.msra.mxu3 %v297_v63  ;;  %v4441_v8 = vpack.c.bf16 %v297_v63, %v294_v1 }
  0xa9   :  { %4785 = vmatmul.msk.f32.gmra.mxu0 %vm89_vm0, %v5636_v57  ;;  %4839 = vmatmul.msk.f32.gmra.mxu2 %vm89_vm0, %v34_v40 }
  0xaa   :  { %4531 = vmatpush.bf16.msrb.mxu0 %v4441_v8  ;;  %4942 = vmatpush.bf16.msrb.mxu1 %v4441_v8 }
  0xab   :  { %581 = vmatpush.xpose.msra.mxu3 %v294_v1 }
  0xac   :  { %v5648_v59 = vpop.f32.mrf.mxu2 }
  0xad   :  { %9941 = vst [vmem:[#allocation6_spill] sm:$0xff] %v5648_v59 }
  0xae   :  { %v5650_v60 = vpop.f32.mrf.mxu0 }
  0xaf   :  { %4817 = vmatmul.msk.f32.gmra.mxu1 %vm89_vm0, %v5636_v57  ;;  %582 = vmatpush.xpose.msra.mxu3 %v5679_v4 }
  0xb1   :  { %4786 = vmatmul.msk.f32.gmra.mxu0 %vm89_vm0, %v5655_v61  ;;  %4840 = vmatmul.msk.f32.gmra.mxu2 %vm89_vm0, %v35_v41  ;;  %v5767_v41 = vperm.slane %v5646_v58, 2 }
  0xb4   :  { %v5666_v0 = vpop.f32.mrf.mxu2 }
  0xb5   :  { %9942 = vst [vmem:[#allocation7_spill] sm:$0xff] %v5666_v0 }
  0xb6   :  { %v5669_v2 = vpop.f32.mrf.mxu0 }
  0xb7   :  { %4818 = vmatmul.msk.f32.gmra.mxu1 %vm89_vm0, %v5655_v61 }
  0xb9   :  { %4787 = vmatmul.msk.f32.gmra.mxu0 %vm89_vm0, %v46_v3  ;;  %4841 = vmatmul.msk.f32.gmra.mxu2 %vm89_vm0, %v36_v42 }
  0xbc   :  { %v5682_v5 = vpop.f32.mrf.mxu2 }
  0xbd   :  { %9943 = vst [vmem:[#allocation8_spill] sm:$0xff] %v5682_v5 }
  0xbe   :  { %v5684_v6 = vpop.f32.mrf.mxu0 }
  0xbf   :  { %4819 = vmatmul.msk.f32.gmra.mxu1 %vm89_vm0, %v46_v3 }
  0xc1   :  { %4788 = vmatmul.msk.f32.gmra.mxu0 %vm89_vm0, %v5689_v7  ;;  %4842 = vmatmul.msk.f32.gmra.mxu2 %vm89_vm0, %v5557_v43 }
  0xc4   :  { %v5696_v9 = vpop.f32.mrf.mxu2 }
  0xc5   :  { %9944 = vst [vmem:[#allocation9_spill] sm:$0xff] %v5696_v9 }
  0xc6   :  { %v5698_v10 = vpop.f32.mrf.mxu0 }
  0xc7   :  { %4820 = vmatmul.msk.f32.gmra.mxu1 %vm89_vm0, %v5689_v7 }
  0xc9   :  { %4789 = vmatmul.msk.f32.gmra.mxu0 %vm89_vm0, %v5703_v11  ;;  %4843 = vmatmul.msk.f32.gmra.mxu2 %vm89_vm0, %v5567_v44 }
  0xcc   :  { %v5711_v12 = vpop.f32.mrf.mxu2 }
  0xcd   :  { %9945 = vst [vmem:[#allocation10_spill] sm:$0xff] %v5711_v12 }
  0xce   :  { %v5713_v14 = vpop.f32.mrf.mxu0 }
  0xcf   :  { %4821 = vmatmul.msk.f32.gmra.mxu1 %vm89_vm0, %v5703_v11 }
  0xd1   :  { %4790 = vmatmul.msk.f32.gmra.mxu0 %vm89_vm0, %v5718_v15  ;;  %4844 = vmatmul.msk.f32.gmra.mxu2 %vm89_vm0, %v5578_v45 }
  0xd4   :  { %v5726_v16 = vpop.f32.mrf.mxu2 }
  0xd5   :  { %9946 = vst [vmem:[#allocation11_spill] sm:$0xff] %v5726_v16 }
  0xd6   :  { %v230_v17 = vpop.f32.mrf.mxu0 }
  0xd9   :  { %4791 = vmatmul.msk.f32.gmra.mxu0 %vm89_vm0, %v5450_v23  ;;  %4845 = vmatmul.msk.f32.gmra.mxu2 %vm89_vm0, %v5588_v46 }
  0xdc   :  { %v5732_v18 = vpop.f32.mrf.mxu2 }
  0xdd   :  { %9947 = vst [vmem:[#allocation12_spill] sm:$0xff] %v5732_v18 }
  0xde   :  { %v233_v20 = vpop.f32.mrf.mxu0 }
  0xdf   :  { %v5739_v26 = vadd.f32 %v233_v20, %v5658_v62 }
  0xe1   :  { %4792 = vmatmul.msk.f32.gmra.mxu0 %vm89_vm0, %v5464_v25  ;;  %4846 = vmatmul.msk.f32.gmra.mxu2 %vm89_vm0, %v5600_v48  ;;  %v5309_v48 = vmov 0  }
  0xe2   :  { %4954 = vset.pattern.permute.xlu0 %v5309_v48  ;;  %4955 = vset.pattern.permute.xlu1 %v5309_v48 }
  0xe3   :  { %4956 = vset.pattern.permute.xlu2 %v5309_v48 }
  0xe4   :  { %v429_v22 = vpop.f32.mrf.mxu2 }
  0xe5   :  { %v430_v45 = vadd.f32 %v429_v22, %v5767_v41 }
  0xe6   :  { %v236_v24 = vpop.f32.mrf.mxu0 }
  0xe7   :  { %v5742_v27 = vadd.f32 %v236_v24, %v5658_v62  ;;  %602 = vperm.xlu0 %4954, %v430_v45  }
  0xe9   :  { %4793 = vmatmul.msk.f32.gmra.mxu0 %vm89_vm0, %v5489_v31  ;;  %4847 = vmatmul.msk.f32.gmra.mxu2 %vm89_vm0, %v5612_v51  ;;  %v4431_v28 = vpack.c.bf16 %v5742_v27, %v5739_v26 }
  0xec   :  { %v432_v29 = vpop.f32.mrf.mxu2 }
  0xed   :  { %v433_v52 = vadd.f32 %v432_v29, %v5767_v41 }
  0xee   :  { %v239_v30 = vpop.f32.mrf.mxu0 }
  0xef   :  { %v5755_v34 = vadd.f32 %v239_v30, %v5658_v62  ;;  %607 = vperm.xlu0 %4954, %v433_v52  }
  0xf1   :  { %4794 = vmatmul.msk.f32.gmra.mxu0 %vm89_vm0, %v5513_v37  ;;  %4848 = vmatmul.msk.f32.gmra.mxu2 %vm89_vm0, %v5624_v54 }
  0xf4   :  { %v435_v32 = vpop.f32.mrf.mxu2 }
  0xf5   :  { %v436_v58 = vadd.f32 %v435_v32, %v5767_v41 }
  0xf6   :  { %v242_v33 = vpop.f32.mrf.mxu0 }
  0xf7   :  { %v5758_v35 = vadd.f32 %v242_v33, %v5658_v62  ;;  %612 = vperm.xlu1 %4955, %v436_v58  }
  0xf9   :  { %4849 = vmatmul.msk.f32.gmra.mxu2 %vm89_vm0, %v5636_v57  ;;  %v4432_v36 = vpack.c.bf16 %v5758_v35, %v5755_v34 }
  0xfc   :  { %v438_v38 = vpop.f32.mrf.mxu2 }
  0xfd   :  { %v439_v1 = vadd.f32 %v438_v38, %v5767_v41 }
  0xfe   :  { %v245_v39 = vpop.f32.mrf.mxu0 }
  0xff   :  { %v5770_v43 = vadd.f32 %v245_v39, %v5658_v62  ;;  %617 = vperm.xlu1 %4955, %v439_v1   ;;  %v5850_v39 = vadd.f32 %v5631_v56, %v5658_v62 }
 0x101   :  { %4850 = vmatmul.msk.f32.gmra.mxu2 %vm89_vm0, %v5655_v61 }
 0x104   :  { %v441_v40 = vpop.f32.mrf.mxu2 }
 0x106   :  { %v248_v42 = vpop.f32.mrf.mxu0 }
 0x107   :  { %v5773_v44 = vadd.f32 %v248_v42, %v5658_v62 }
 0x109   :  { %4851 = vmatmul.msk.f32.gmra.mxu2 %vm89_vm0, %v46_v3  ;;  %v4433_v46 = vpack.c.bf16 %v5773_v44, %v5770_v43  ;;  %v5800_v3 = vadd.f32 %v230_v17, %v5658_v62  ;;  %v5815_v17 = vadd.f32 %v5698_v10, %v5658_v62 }
 0x10a   :  { %560 = vmatpush.xpose.msrb.mxu2 %v5773_v44 }
 0x10c   :  { %v444_v49 = vpop.f32.mrf.mxu2 }
 0x10d   :  { %v445_v29 = vadd.f32 %v444_v49, %v5767_v41 }
 0x10e   :  { %561 = vmatpush.xpose.msrb.mxu2 %v5770_v43  ;;  %v5781_v51 = vpop.f32.mrf.mxu0 }
 0x111   :  { %4852 = vmatmul.msk.f32.gmra.mxu2 %vm89_vm0, %v5689_v7  ;;  %v5807_v7 = vadd.f32 %v5713_v14, %v5658_v62  ;;  %v5823_v14 = vadd.f32 %v5684_v6, %v5658_v62  ;;  %v5837_v6 = vadd.f32 %v5650_v60, %v5658_v62 }
 0x112   :  { %562 = vmatpush.xpose.msrb.mxu2 %v5758_v35 }
 0x114   :  { %v447_v54 = vpop.f32.mrf.mxu2 }
 0x115   :  { %v448_v57 = vadd.f32 %v447_v54, %v5767_v41 }
 0x116   :  { %563 = vmatpush.xpose.msrb.mxu2 %v5755_v34  ;;  %v5788_v55 = vpop.f32.mrf.mxu0 }
 0x117   :  { %632 = vperm.xlu0 %4954, %v448_v57  }
 0x119   :  { %4853 = vmatmul.msk.f32.gmra.mxu2 %vm89_vm0, %v5703_v11 }
 0x11a   :  { %564 = vmatpush.xpose.msrb.mxu2 %v5742_v27 }
 0x11c   :  { %v450_v61 = vpop.f32.mrf.mxu2 }
 0x11d   :  { %v451_v20 = vadd.f32 %v450_v61, %v5767_v41 }
 0x11e   :  { %565 = vmatpush.xpose.msrb.mxu2 %v5739_v26  ;;  %v5796_v63 = vpop.f32.mrf.mxu0 }
 0x11f   :  { %637 = vperm.xlu1 %4955, %v451_v20  }
 0x121   :  { %4854 = vmatmul.msk.f32.gmra.mxu2 %vm89_vm0, %v5718_v15  ;;  %v442_v15 = vadd.f32 %v441_v40, %v5767_v41  ;;  %v5861_v40 = vadd.f32 %v5619_v53, %v5658_v62  ;;  %v5874_v53 = vadd.f32 %v5595_v47, %v5658_v62 }
 0x122   :  { %566 = vmatpush.xpose.msrb.mxu2 %v5800_v3 }
 0x123   :  { %622 = vperm.xlu2 %4956, %v442_v15   ;;  %v4427_v34 = vpack.c.bf16 %v5850_v39, %v5861_v40 }
 0x124   :  { %v453_v8 = vpop.f32.mrf.mxu2 }
 0x125   :  { %v454_v38 = vadd.f32 %v453_v8, %v5767_v41  ;;  %v5890_v8 = vld [vmem:[%s9789_s3] sm:$0xff] }
 0x126   :  { %567 = vmatpush.xpose.msrb.mxu2 %v5807_v7  ;;  %v5810_v11 = vpop.f32.mrf.mxu0 }
 0x129   :  { %4855 = vmatmul.msk.f32.gmra.mxu2 %vm89_vm0, %v5450_v23  ;;  %v5830_v23 = vadd.f32 %v5669_v2, %v5658_v62 }
 0x12a   :  { %568 = vmatpush.xpose.msrb.mxu2 %v5815_v17 }
 0x12b   :  { %627 = vperm.xlu2 %4956, %v445_v29   ;;  %v4428_v43 = vpack.c.bf16 %v5830_v23, %v5837_v6 }
 0x12c   :  { %v456_v22 = vpop.f32.mrf.mxu2 }
 0x12d   :  { %v457_v24 = vadd.f32 %v456_v22, %v5767_v41 }
 0x12e   :  { %569 = vmatpush.xpose.msrb.mxu2 %v5823_v14  ;;  %v263_v10 = vpop.f32.mrf.mxu0 }
 0x12f   :  { %647 = vperm.xlu0 %4954, %v457_v24   ;;  %v5843_v2 = vadd.f32 %v263_v10, %v5658_v62 }
 0x131   :  { %4856 = vmatmul.msk.f32.gmra.mxu2 %vm89_vm0, %v5464_v25 }
 0x132   :  { %570 = vmatpush.xpose.msrb.mxu2 %v5830_v23 }
 0x133   :  { %642 = vperm.xlu2 %4956, %v454_v38  }
 0x134   :  { %v459_v30 = vpop.f32.mrf.mxu2 }
 0x135   :  { %v460_v32 = vadd.f32 %v459_v30, %v5767_v41 }
 0x136   :  { %571 = vmatpush.xpose.msrb.mxu2 %v5837_v6  ;;  %v266_v33 = vpop.f32.mrf.mxu0 }
 0x137   :  { %v5846_v25 = vadd.f32 %v266_v33, %v5658_v62  ;;  %652 = vperm.xlu1 %4955, %v460_v32  }
 0x139   :  { %4857 = vmatmul.msk.f32.gmra.mxu2 %vm89_vm0, %v5489_v31  ;;  %v5856_v60 = vpack.c.bf16 %v5846_v25, %v5843_v2  ;;  %v5867_v31 = vadd.f32 %v5607_v50, %v5658_v62 }
 0x13a   :  { %572 = vmatpush.xpose.msrb.mxu2 %v5850_v39 }
 0x13b   :  { %v4426_v26 = vpack.c.bf16 %v5867_v31, %v5874_v53 }
 0x13c   :  { %v462_v42 = vpop.f32.mrf.mxu2 }
 0x13d   :  { %v463_v56 = vadd.f32 %v462_v42, %v5767_v41 }
 0x13e   :  { %573 = vmatpush.xpose.msrb.mxu2 %v5861_v40  ;;  %v269_v45 = vpop.f32.mrf.mxu0 }
 0x13f   :  { %657 = vperm.xlu2 %4956, %v463_v56  }
 0x141   :  { %4858 = vmatmul.msk.f32.gmra.mxu2 %vm89_vm0, %v5513_v37 }
 0x142   :  { %574 = vmatpush.xpose.msrb.mxu2 %v5867_v31 }
 0x144   :  { %v465_v48 = vpop.f32.mrf.mxu2 }
 0x145   :  { %v466_v52 = vadd.f32 %v465_v48, %v5767_v41 }
 0x146   :  { %575 = vmatpush.xpose.msrb.mxu2 %v5874_v53  ;;  %v272_v49 = vpop.f32.mrf.mxu0 }
 0x147   :  { %662 = vperm.xlu2 %4956, %v466_v52   ;;  %v273_v52 = vadd.f32 %v272_v49, %v5658_v62  ;;  %v258_v49 = vadd.f32 %v5796_v63, %v5658_v62 }
 0x149   :  { %4859 = vmatmul.msk.f32.gmra.mxu2 %vm89_vm0, %v5392_v13 }
 0x14c   :  { %v468_v50 = vpop.f32.mrf.mxu2 }
 0x14d   :  { %v469_v37 = vadd.f32 %v468_v50, %v5767_v41  ;;  %v270_v50 = vadd.f32 %v269_v45, %v5658_v62 }
 0x14e   :  { %v275_v54 = vpop.f32.mrf.mxu0 }
 0x14f   :  { %667 = vperm.xlu2 %4956, %v469_v37   ;;  %v276_v48 = vadd.f32 %v275_v54, %v5658_v62  ;;  %v261_v54 = vadd.f32 %v5810_v11, %v5658_v62 }
 0x151   :  { %4860 = vmatmul.msk.f32.gmra.mxu2 %vm89_vm0, %v5418_v19 }
 0x154   :  { %v471_v47 = vpop.f32.mrf.mxu2 }
 0x155   :  { %v472_v57 = vadd.f32 %v471_v47, %v5767_v41 }
 0x156   :  { %v278_v58 = vpop.f32.mrf.mxu0 }
 0x157   :  { %672 = vperm.xlu1 %4955, %v472_v57   ;;  %v279_v38 = vadd.f32 %v278_v58, %v5658_v62  ;;  %v4437_v57 = vpack.c.bf16 %v273_v52, %v270_v50  ;;  %v255_v58 = vadd.f32 %v5788_v55, %v5658_v62 }
 0x159   :  { %4861 = vmatmul.msk.f32.gmra.mxu2 %vm89_vm0, %v5434_v21 }
 0x15c   :  { %v474_v61 = vpop.f32.mrf.mxu2 }
 0x15d   :  { %v475_v13 = vadd.f32 %v474_v61, %v5767_v41 }
 0x15e   :  { %v281_v1 = vpop.f32.mrf.mxu0 }
 0x15f   :  { %677 = vperm.xlu0 %4954, %v475_v13   ;;  %v282_v32 = vadd.f32 %v281_v1, %v5658_v62  ;;  %v4435_v13 = vpack.c.bf16 %v261_v54, %v258_v49  ;;  %v252_v1 = vadd.f32 %v5781_v51, %v5658_v62 }
 0x161   :  { %576 = vmatmul.f32.vlgmr.msrb.gmra.mxu2 %v5890_v8  ;;  %v4434_v63 = vpack.c.bf16 %v255_v58, %v252_v1 }
 0x164   :  { %v477_v19 = vpop.f32.mrf.mxu2 }
 0x165   :  { %v478_v20 = vadd.f32 %v477_v19, %v5767_v41 }
 0x166   :  { %v284_v15 = vpop.f32.mrf.mxu0 }
 0x167   :  { %682 = vperm.xlu1 %4955, %v478_v20   ;;  %v285_v29 = vadd.f32 %v284_v15, %v5658_v62 }
 0x169   :  { %v4439_v56 = vpack.c.bf16 %v285_v29, %v282_v32  ;;  %v5961_v39 = vpop.permute.xlu1 %612 }
 0x16a   :  { %9951 = vst [vmem:[#allocation16_spill] sm:$0xff] %v5961_v39 }
 0x16c   :  { %v480_v22 = vpop.f32.mrf.mxu2 }
 0x16d   :  { %v481_v21 = vadd.f32 %v480_v22, %v5767_v41 }
 0x16e   :  { %v287_v24 = vpop.f32.mrf.mxu0 }
 0x16f   :  { %v288_v10 = vadd.f32 %v287_v24, %v5658_v62  ;;  %687 = vperm.xlu0 %4954, %v481_v21  }
 0x171   :  { %583 = vmatpush.xpose.msra.mxu3 %v288_v10  ;;  %v4440_v30 = vpack.c.bf16 %v5679_v4, %v288_v10  ;;  %v4438_v4 = vpack.c.bf16 %v279_v38, %v276_v48  ;;  %v5983_v21 = vpop.permute.xlu1 %617 }
 0x172   :  { %9955 = vst [vmem:[#allocation20_spill] sm:$0xff] %v5983_v21 }
 0x173   :  { %4532 = vmatpush.bf16.msrb.mxu0 %v4440_v30  ;;  %4943 = vmatpush.bf16.msrb.mxu1 %v4440_v30 }
 0x174   :  { %v483_v33 = vpop.f32.mrf.mxu2 }
 0x175   :  { %v484_v42 = vadd.f32 %v483_v33, %v5767_v41  ;;  %584 = vmatpush.xpose.msra.mxu3 %v285_v29 }
 0x177   :  { %4533 = vmatpush.bf16.msrb.mxu0 %v4439_v56  ;;  %4944 = vmatpush.bf16.msrb.mxu1 %v4439_v56 }
 0x178   :  { %692 = vperm.xlu0 %4954, %v484_v42  }
 0x179   :  { %585 = vmatpush.xpose.msra.mxu3 %v282_v32 }
 0x17b   :  { %4534 = vmatpush.bf16.msrb.mxu0 %v4438_v4  ;;  %4945 = vmatpush.bf16.msrb.mxu1 %v4438_v4 }
 0x17c   :  { %v486_v37 = vpop.f32.mrf.mxu2 }
 0x17d   :  { %v487_v47 = vadd.f32 %v486_v37, %v5767_v41  ;;  %586 = vmatpush.xpose.msra.mxu3 %v279_v38 }
 0x17f   :  { %4535 = vmatpush.bf16.msrb.mxu0 %v4437_v57  ;;  %4946 = vmatpush.bf16.msrb.mxu1 %v4437_v57 }
 0x180   :  { %697 = vperm.xlu2 %4956, %v487_v47  }
 0x181   :  { %587 = vmatpush.xpose.msra.mxu3 %v276_v48 }
 0x183   :  { %4536 = vmatpush.bf16.msrb.mxu0 %v5856_v60  ;;  %4947 = vmatpush.bf16.msrb.mxu1 %v5856_v60 }
 0x184   :  { %v489_v45 = vpop.f32.mrf.mxu2 }
 0x185   :  { %v490_v61 = vadd.f32 %v489_v45, %v5767_v41  ;;  %588 = vmatpush.xpose.msra.mxu3 %v273_v52 }
 0x187   :  { %4537 = vmatpush.bf16.msrb.mxu0 %v4435_v13  ;;  %4948 = vmatpush.bf16.msrb.mxu1 %v4435_v13 }
 0x188   :  { %702 = vperm.xlu1 %4955, %v490_v61  }
 0x189   :  { %589 = vmatpush.xpose.msra.mxu3 %v270_v50 }
 0x18b   :  { %4538 = vmatpush.bf16.msrb.mxu0 %v4434_v63  ;;  %4949 = vmatpush.bf16.msrb.mxu1 %v4434_v63 }
 0x18c   :  { %v492_v11 = vpop.f32.mrf.mxu2 }
 0x18d   :  { %v493_v60 = vadd.f32 %v492_v11, %v5767_v41  ;;  %590 = vmatpush.xpose.msra.mxu3 %v5846_v25  ;;  %v4429_v25 = vpack.c.bf16 %v5815_v17, %v5823_v14  ;;  %v5957_v14 = vpop.permute.xlu0 %602 }
 0x18e   :  { %9949 = vst [vmem:[#allocation14_spill] sm:$0xff] %v5957_v14 }
 0x18f   :  { %707 = vperm.xlu0 %4954, %v493_v60  }
 0x191   :  { %591 = vmatpush.xpose.msra.mxu3 %v5843_v2  ;;  %v4430_v2 = vpack.c.bf16 %v5800_v3, %v5807_v7  ;;  %v5953_v7 = vpop.permute.xlu2 %622 }
 0x192   :  { %9948 = vst [vmem:[#allocation13_spill] sm:$0xff] %v5953_v7 }
 0x194   :  { %v495_v55 = vpop.f32.mrf.mxu2 }
 0x195   :  { %v496_v19 = vadd.f32 %v495_v55, %v5767_v41  ;;  %592 = vmatpush.xpose.msra.mxu3 %v261_v54  ;;  %v5967_v53 = vpop.permute.xlu0 %607 }
 0x196   :  { %9954 = vst [vmem:[#allocation19_spill] sm:$0xff] %v5967_v53 }
 0x197   :  { %712 = vperm.xlu0 %4954, %v496_v19  }
 0x199   :  { %593 = vmatpush.xpose.msra.mxu3 %v258_v49  ;;  %v5959_v23 = vpop.permute.xlu2 %627 }
 0x19a   :  { %9950 = vst [vmem:[#allocation15_spill] sm:$0xff] %v5959_v23 }
 0x19c   :  { %v498_v62 = vpop.f32.mrf.mxu2 }
 0x19d   :  { %v499_v51 = vadd.f32 %v498_v62, %v5767_v41  ;;  %594 = vmatpush.xpose.msra.mxu3 %v255_v58 }
 0x19f   :  { %717 = vperm.xlu2 %4956, %v499_v51  }
 0x1a1   :  { %595 = vmatpush.xpose.msra.mxu3 %v252_v1  ;;  %v5965_v31 = vpop.permute.xlu2 %642  ;;  %v6036_v1 = vpop.permute.xlu0 %632 }
 0x1a2   :  { %9953 = vst [vmem:[#allocation18_spill] sm:$0xff] %v5965_v31 }
 0x1a3   :  { %9960 = vst [vmem:[#allocation25_spill] sm:$0xff] %v6036_v1 }
 0x1a4   :  { %596 = vmatmul.f32.vlgmr.msra.gmra.mxu3 %v5890_v8  ;;  %v5937_v44 = vpop.f32.mrf.mxu2 }
 0x1a5   :  { %4442 = vmatpush.bf16.msrb.mxu3 %v4433_v46 }
 0x1a9   :  { %4443 = vmatpush.bf16.msrb.mxu3 %v4432_v36  ;;  %v5985_v24 = vpop.permute.xlu2 %657  ;;  %v6092_v16 = vpop.permute.xlu0 %647 }
 0x1aa   :  { %9956 = vst [vmem:[#allocation21_spill] sm:$0xff] %v5985_v24 }
 0x1ab   :  { %9969 = vst [vmem:[#allocation34_spill] sm:$0xff] %v6092_v16 }
 0x1ac   :  { %v504_v27 = vpop.f32.mrf.mxu2 }
 0x1ad   :  { %4444 = vmatpush.bf16.msrb.mxu3 %v4431_v28 }
 0x1b1   :  { %4445 = vmatpush.bf16.msrb.mxu3 %v4430_v2  ;;  %v6030_v45 = vpop.permute.xlu2 %662 }
 0x1b2   :  { %9959 = vst [vmem:[#allocation24_spill] sm:$0xff] %v6030_v45 }
 0x1b4   :  { %v5943_v28 = vpop.f32.mrf.mxu2 }
 0x1b5   :  { %4446 = vmatpush.bf16.msrb.mxu3 %v4429_v25 }
 0x1b9   :  { %4447 = vmatpush.bf16.msrb.mxu3 %v4428_v43 }
 0x1bc   :  { %v5945_v35 = vpop.f32.mrf.mxu2 }
 0x1bd   :  { %4448 = vmatpush.bf16.msrb.mxu3 %v4427_v34 }
 0x1c1   :  { %4449 = vmatpush.bf16.msrb.mxu3 %v4426_v26 }
 0x1c4   :  { %v5947_v36 = vpop.f32.mrf.mxu2 }
 0x1cc   :  { %v5949_v46 = vpop.f32.mrf.mxu2 }
 0x1d4   :  { %v5951_v3 = vpop.f32.mrf.mxu2 }
 0x1dc   :  { %v5955_v17 = vpop.f32.mrf.mxu2 }
 0x1e4   :  { %v577_v6 = vpop.f32.mrf.mxu2 }
 0x1e5   :  { %v5963_v40 = vperm.slane %v577_v6, 0 }
 0x1e7   :  { %9952 = vst [vmem:[#allocation17_spill] sm:$0xff] %v5963_v40  ;;  %v5971_v8 = vadd.f32 %v5963_v40, %v5959_v23  ;;  %v5975_v20 = vadd.f32 %v5963_v40, %v5967_v53  ;;  %v762_v10 = vadd.f32 %v5963_v40, %v5957_v14  ;;  %v5991_v29 = vadd.f32 %v5963_v40, %v5983_v21 }
 0x1e8   :  { %v766_v30 = vadd.f32 %v5963_v40, %v5961_v39  ;;  %v5997_v32 = vadd.f32 %v5963_v40, %v5953_v7  ;;  %v6012_v52 = vadd.f32 %v5963_v40, %v5965_v31  ;;  %v6040_v63 = vadd.f32 %v5963_v40, %v6036_v1 }
 0x1e9   :  { %v5978_v15 = vmul.f32 0.70710677, %v5971_v8  ;;  %v5981_v22 = vmul.f32 0.70710677, %v5975_v20  ;;  %v6003_v42 = vmul.f32 0.70710677, %v762_v10  ;;  %v6097_v0 = vadd.f32 %v5963_v40, %v6030_v45 }
 0x1ea   :  { %v6006_v56 = vmul.f32 0.70710677, %v5991_v29  ;;  %v6008_v48 = vmul.f32 0.70710677, %v766_v30  ;;  %v6017_v50 = vmul.f32 0.70710677, %v5997_v32  ;;  %v6101_v5 = vadd.f32 %v5963_v40, %v6092_v16 }
 0x1eb   :  { %v1354_v33 = vmul.f32 %v5978_v15, %v5978_v15  ;;  %v1034_v38 = vmul.f32 %v5981_v22, %v5981_v22  ;;  %v954_v47 = vmul.f32 %v6003_v42, %v6003_v42  ;;  %v6028_v49 = vmul.f32 0.70710677, %v6012_v52 }
 0x1ec   :  { %v1194_v57 = vmul.f32 %v6006_v56, %v6006_v56  ;;  %v1114_v54 = vmul.f32 %v6008_v48, %v6008_v48  ;;  %v1274_v13 = vmul.f32 %v6017_v50, %v6017_v50  ;;  %v6053_v25 = vmul.f32 0.70710677, %v6040_v63 }
 0x1ed   :  { %v6014_v4 = vmin.f32 %v1354_v33, 16.0  ;;  %v6019_v37 = vmin.f32 %v1034_v38, 16.0  ;;  %v6044_v60 = vmin.f32 %v954_v47, 16.0  ;;  %v1594_v19 = vmul.f32 %v6028_v49, %v6028_v49  ;;  %v6060_v33 = vpop.permute.xlu1 %637 }
 0x1ee   :  { %v6042_v11 = vmin.f32 %v1194_v57, 16.0  ;;  %v6046_v55 = vmin.f32 %v1114_v54, 16.0  ;;  %v6050_v2 = vmin.f32 %v1274_v13, 16.0  ;;  %9963 = vst [vmem:[#allocation28_spill] sm:$0xff] %v6060_v33  ;;  %v6064_v38 = vadd.f32 %v5937_v44, %v5767_v41 }
 0x1ef   :  { %9957 = vst [vmem:[#allocation22_spill] sm:$0xff] %v6014_v4  ;;  %v1356_v58 = vmul.f32 2.1237322e-06, %v6014_v4  ;;  %v1036_v61 = vmul.f32 2.1237322e-06, %v6019_v37  ;;  %v6058_v6 = vmin.f32 %v1594_v19, 16.0  ;;  %v6076_v13 = vadd.f32 %v5963_v40, %v6060_v33  ;;  %v6082_v19 = vpop.permute.xlu2 %667 }
 0x1f0   :  { %9958 = vst [vmem:[#allocation23_spill] sm:$0xff] %v6019_v37  ;;  %v1196_v43 = vmul.f32 2.1237322e-06, %v6042_v11  ;;  %v956_v34 = vmul.f32 2.1237322e-06, %v6044_v60  ;;  %v6080_v44 = vadd.f32 %v5963_v40, %v5985_v24  ;;  %v6170_v1 = vmul.f32 0.5, %v6012_v52 }
 0x1f1   :  { %9961 = vst [vmem:[#allocation26_spill] sm:$0xff] %v6042_v11  ;;  %v1357_v62 = vadd.f32 0.00028619796, %v1356_v58  ;;  %v1037_v51 = vadd.f32 0.00028619796, %v1036_v61  ;;  %v6070_v58 = vadd.f32 %v504_v27, %v5767_v41  ;;  %v1434_v61 = vmul.f32 %v6053_v25, %v6053_v25 }
 0x1f2   :  { %v1116_v26 = vmul.f32 2.1237322e-06, %v6046_v55  ;;  %9962 = vst [vmem:[#allocation27_spill] sm:$0xff] %v6058_v6  ;;  %v1276_v54 = vmul.f32 2.1237322e-06, %v6050_v2  ;;  %v6090_v27 = vadd.f32 %v5945_v35, %v5767_v41  ;;  %v6105_v35 = vadd.f32 %v5963_v40, %v6082_v19 }
 0x1f3   :  { %9964 = vst [vmem:[#allocation29_spill] sm:$0xff] %v6064_v38  ;;  %v1358_v47 = vmul.f32 %v1357_v62, %v6014_v4  ;;  %v1038_v57 = vmul.f32 %v1037_v51, %v6019_v37  ;;  %v6086_v62 = vadd.f32 %v5943_v28, %v5767_v41  ;;  %v1197_v51 = vadd.f32 0.00028619796, %v1196_v43 }
 0x1f4   :  { %9965 = vst [vmem:[#allocation30_spill] sm:$0xff] %v6070_v58  ;;  %v957_v18 = vadd.f32 0.00028619796, %v956_v34  ;;  %v1117_v12 = vadd.f32 0.00028619796, %v1116_v26  ;;  %v6108_v43 = vmul.f32 0.5, %v5971_v8 }
 0x1f5   :  { %9966 = vst [vmem:[#allocation31_spill] sm:$0xff] %v6082_v19  ;;  %v1596_v9 = vmul.f32 2.1237322e-06, %v6058_v6  ;;  %v1359_v28 = vadd.f32 0.0036580483, %v1358_v47  ;;  %v6110_v34 = vmin.f32 %v1434_v61, 16.0 }
 0x1f6   :  { %9967 = vst [vmem:[#allocation32_spill] sm:$0xff] %v6086_v62  ;;  %v1039_v59 = vadd.f32 0.0036580483, %v1038_v57  ;;  %v1277_v62 = vadd.f32 0.00028619796, %v1276_v54  ;;  %v6118_v58 = vmul.f32 0.5, %v762_v10  ;;  %v1198_v57 = vmul.f32 %v1197_v51, %v6042_v11 }
 0x1f7   :  { %9968 = vst [vmem:[#allocation33_spill] sm:$0xff] %v6090_v27  ;;  %v6113_v26 = vmul.f32 0.70710677, %v6076_v13  ;;  %v6116_v27 = vmul.f32 0.70710677, %v6080_v44  ;;  %v6120_v47 = vmul.f32 0.5, %v766_v30  ;;  %v958_v54 = vmul.f32 %v957_v18, %v6044_v60 }
 0x1f8   :  { %9970 = vst [vmem:[#allocation35_spill] sm:$0xff] %v6108_v43  ;;  %v1118_v38 = vmul.f32 %v1117_v12, %v6046_v55  ;;  %v1597_v8 = vadd.f32 0.00028619796, %v1596_v9  ;;  %v6126_v61 = vmul.f32 0.70710677, %v6097_v0  ;;  %v1360_v19 = vmul.f32 %v1359_v28, %v6014_v4 }
 0x1f9   :  { %9971 = vst [vmem:[#allocation36_spill] sm:$0xff] %v6110_v34  ;;  %v6129_v43 = vmul.f32 0.70710677, %v6101_v5  ;;  %v6133_v10 = vmul.f32 0.5, %v5997_v32  ;;  %v1040_v30 = vmul.f32 %v1039_v59, %v6019_v37  ;;  %v6137_v51 = vmul.f32 0.70710677, %v6105_v35 }
 0x1fa   :  { %9972 = vst [vmem:[#allocation37_spill] sm:$0xff] %v6118_v58  ;;  %v1278_v18 = vmul.f32 %v1277_v62, %v6050_v2  ;;  %v1436_v9 = vmul.f32 2.1237322e-06, %v6110_v34  ;;  %v1514_v12 = vmul.f32 %v6113_v26, %v6113_v26  ;;  %v1834_v58 = vmul.f32 %v6116_v27, %v6116_v27 }
 0x1fb   :  { %9973 = vst [vmem:[#allocation38_spill] sm:$0xff] %v6120_v47  ;;  %v6145_v47 = vpop.permute.xlu1 %652  ;;  %v6148_v32 = vmul.f32 0.5, %v5975_v20  ;;  %v1199_v28 = vadd.f32 0.0036580483, %v1198_v57  ;;  %v959_v59 = vadd.f32 0.0036580483, %v958_v54  ;;  %v1598_v62 = vmul.f32 %v1597_v8, %v6058_v6 }
 0x1fc   :  { %9974 = vst [vmem:[#allocation39_spill] sm:$0xff] %v6133_v10  ;;  %v6152_v10 = vadd.f32 %v5963_v40, %v6145_v47  ;;  %v1119_v45 = vadd.f32 0.0036580483, %v1118_v38  ;;  %v1914_v24 = vmul.f32 %v6126_v61, %v6126_v61  ;;  %v1674_v16 = vmul.f32 %v6129_v43, %v6129_v43 }
 0x1fd   :  { %9975 = vst [vmem:[#allocation40_spill] sm:$0xff] %v6137_v51  ;;  %v1361_v31 = vadd.f32 0.05243302, %v1360_v19  ;;  %v1041_v33 = vadd.f32 0.05243302, %v1040_v30  ;;  %v6160_v20 = vmul.f32 0.5, %v5991_v29  ;;  %v1994_v57 = vmul.f32 %v6137_v51, %v6137_v51 }
 0x1fe   :  { %9976 = vst [vmem:[#allocation41_spill] sm:$0xff] %v6145_v47  ;;  %v1279_v54 = vadd.f32 0.0036580483, %v1278_v18  ;;  %v6164_v47 = vmin.f32 %v1514_v12, 16.0  ;;  %v6166_v8 = vmin.f32 %v1834_v58, 16.0  ;;  %v1200_v38 = vmul.f32 %v1199_v28, %v6042_v11 }
 0x1ff   :  { %9977 = vst [vmem:[#allocation42_spill] sm:$0xff] %v6148_v32  ;;  %v1437_v32 = vadd.f32 0.00028619796, %v1436_v9  ;;  %v960_v19 = vmul.f32 %v959_v59, %v6044_v60  ;;  %v6174_v30 = vmul.f32 0.70710677, %v6152_v10  ;;  %v6177_v23 = vmin.f32 %v1914_v24, 16.0  ;;  %v6181_v9 = vpop.permute.xlu0 %677 }
 0x200   :  { %9978 = vst [vmem:[#allocation43_spill] sm:$0xff] %v6160_v20  ;;  %v1599_v29 = vadd.f32 0.0036580483, %v1598_v62  ;;  %v1120_v20 = vmul.f32 %v1119_v45, %v6046_v55  ;;  %v6179_v18 = vmin.f32 %v1674_v16, 16.0  ;;  %v1362_v58 = vmul.f32 %v1361_v31, %v6014_v4 }
 0x201   :  { %9979 = vst [vmem:[#allocation44_spill] sm:$0xff] %v6164_v47  ;;  %v1042_v12 = vmul.f32 %v1041_v33, %v6019_v37  ;;  %v6186_v52 = vmul.f32 0.5, %v6040_v63  ;;  %v6188_v28 = vmin.f32 %v1994_v57, 16.0  ;;  %v1438_v59 = vmul.f32 %v1437_v32, %v6110_v34 }
 0x202   :  { %9980 = vst [vmem:[#allocation45_spill] sm:$0xff] %v6166_v8  ;;  %v1280_v62 = vmul.f32 %v1279_v54, %v6050_v2  ;;  %v1516_v24 = vmul.f32 2.1237322e-06, %v6164_v47  ;;  %v1836_v16 = vmul.f32 2.1237322e-06, %v6166_v8  ;;  %v1754_v31 = vmul.f32 %v6174_v30, %v6174_v30 }
 0x203   :  { %9981 = vst [vmem:[#allocation46_spill] sm:$0xff] %v6170_v1  ;;  %v1201_v45 = vadd.f32 0.05243302, %v1200_v38  ;;  %v961_v1 = vadd.f32 0.05243302, %v960_v19  ;;  %v6198_v33 = vadd.f32 %v5963_v40, %v6181_v9  ;;  %v1600_v63 = vmul.f32 %v1599_v29, %v6058_v6 }
 0x204   :  { %9982 = vst [vmem:[#allocation47_spill] sm:$0xff] %v6174_v30  ;;  %v1121_v57 = vadd.f32 0.05243302, %v1120_v20  ;;  %v1916_v32 = vmul.f32 2.1237322e-06, %v6177_v23  ;;  %v6210_v30 = vadd.f32 %v5949_v46, %v5767_v41  ;;  %v6213_v14 = vmin.f32 %v1754_v31, 16.0  ;;  %v6222_v46 = vpop.permute.xlu1 %672 }
 0x205   :  { %9983 = vst [vmem:[#allocation48_spill] sm:$0xff] %v6177_v23  ;;  %v1676_v54 = vmul.f32 2.1237322e-06, %v6179_v18  ;;  %v1363_v38 = vadd.f32 0.18741608, %v1362_v58  ;;  %v1202_v20 = vmul.f32 %v1201_v45, %v6042_v11 }
 0x206   :  { %9984 = vst [vmem:[#allocation49_spill] sm:$0xff] %v6179_v18  ;;  %v1043_v19 = vadd.f32 0.18741608, %v1042_v12  ;;  %v1996_v7 = vmul.f32 2.1237322e-06, %v6188_v28 }
 0x207   :  { %9985 = vst [vmem:[#allocation50_spill] sm:$0xff] %v6186_v52  ;;  %v6205_v52 = vadd.f32 %v5947_v36, %v5767_v41  ;;  %v1439_v21 = vadd.f32 0.0036580483, %v1438_v59  ;;  %v1517_v39 = vadd.f32 0.00028619796, %v1516_v24  ;;  %v6220_v36 = vadd.f32 %v5951_v3, %v5767_v41 }
 0x208   :  { %9986 = vst [vmem:[#allocation51_spill] sm:$0xff] %v6188_v28  ;;  %v1837_v29 = vadd.f32 0.00028619796, %v1836_v16  ;;  %v1281_v53 = vadd.f32 0.05243302, %v1280_v62  ;;  %v1364_v59 = vmul.f32 %v1363_v38, %v6014_v4  ;;  %v1044_v24 = vmul.f32 %v1043_v19, %v6019_v37 }
 0x209   :  { %9987 = vst [vmem:[#allocation52_spill] sm:$0xff] %v6205_v52  ;;  %v6216_v51 = vmul.f32 0.70710677, %v6198_v33  ;;  %v1601_v58 = vadd.f32 0.05243302, %v1600_v63  ;;  %v6227_v62 = vmul.f32 0.5, %v6076_v13  ;;  %v1440_v45 = vmul.f32 %v1439_v21, %v6110_v34 }
 0x20a   :  { %9988 = vst [vmem:[#allocation53_spill] sm:$0xff] %v6210_v30  ;;  %v1917_v12 = vadd.f32 0.00028619796, %v1916_v32  ;;  %v1677_v52 = vadd.f32 0.00028619796, %v1676_v54  ;;  %v1518_v31 = vmul.f32 %v1517_v39, %v6164_v47  ;;  %v962_v3 = vmul.f32 %v961_v1, %v6044_v60 }
 0x20b   :  { %9989 = vst [vmem:[#allocation54_spill] sm:$0xff] %v6213_v14  ;;  %v1997_v16 = vadd.f32 0.00028619796, %v1996_v7  ;;  %v1838_v63 = vmul.f32 %v1837_v29, %v6166_v8  ;;  %v1203_v32 = vadd.f32 0.18741608, %v1202_v20  ;;  %v2154_v38 = vmul.f32 %v6216_v51, %v6216_v51 }
 0x20c   :  { %9990 = vst [vmem:[#allocation55_spill] sm:$0xff] %v6220_v36  ;;  %v1756_v54 = vmul.f32 2.1237322e-06, %v6213_v14  ;;  %v6238_v19 = vadd.f32 %v5963_v40, %v6222_v46  ;;  %v1602_v7 = vmul.f32 %v1601_v58, %v6058_v6  ;;  %v6242_v21 = vmul.f32 0.5, %v6080_v44 }
 0x20d   :  { %9991 = vst [vmem:[#allocation56_spill] sm:$0xff] %v6227_v62  ;;  %v1918_v39 = vmul.f32 %v1917_v12, %v6177_v23  ;;  %v1678_v1 = vmul.f32 %v1677_v52, %v6179_v18  ;;  %v1365_v13 = vadd.f32 1.1283791, %v1364_v59  ;;  %v1045_v29 = vadd.f32 1.1283791, %v1044_v24  ;;  %v6257_v52 = vpop.permute.xlu0 %687 }
 0x20e   :  { %9992 = vst [vmem:[#allocation57_spill] sm:$0xff] %v6242_v21  ;;  %v6247_v20 = vmul.f32 0.5, %v6097_v0  ;;  %v1998_v36 = vmul.f32 %v1997_v16, %v6188_v28  ;;  %v1441_v30 = vadd.f32 0.05243302, %v1440_v45  ;;  %v1519_v62 = vadd.f32 0.0036580483, %v1518_v31 }
 0x20f   :  { %v1122_v4 = vmul.f32 %v1121_v57, %v6046_v55  ;;  %v1839_v37 = vadd.f32 0.0036580483, %v1838_v63  ;;  %v1204_v58 = vmul.f32 %v1203_v32, %v6042_v11  ;;  %v1757_v44 = vadd.f32 0.00028619796, %v1756_v54 }
 0x210   :  { %9993 = vst [vmem:[#allocation58_spill] sm:$0xff] %v6247_v20  ;;  %v6252_v21 = vmin.f32 %v2154_v38, 16.0  ;;  %v6255_v12 = vmul.f32 0.70710677, %v6238_v19  ;;  %v6261_v0 = vadd.f32 %v5955_v17, %v5767_v41  ;;  %v1603_v59 = vadd.f32 0.18741608, %v1602_v7 }
 0x211   :  { %v1919_v24 = vadd.f32 0.0036580483, %v1918_v39  ;;  %v1679_v16 = vadd.f32 0.0036580483, %v1678_v1  ;;  %v1282_v57 = vmul.f32 %v1281_v53, %v6050_v2  ;;  %v963_v45 = vadd.f32 0.18741608, %v962_v3 }
 0x212   :  { %9994 = vst [vmem:[#allocation59_spill] sm:$0xff] %v6252_v21  ;;  %v1999_v31 = vadd.f32 0.0036580483, %v1998_v36  ;;  %v2156_v63 = vmul.f32 2.1237322e-06, %v6252_v21  ;;  %v6266_v32 = vmul.f32 %v1365_v13, %v5978_v15  ;;  %v1442_v54 = vmul.f32 %v1441_v30, %v6110_v34 }
 0x213   :  { %9995 = vst [vmem:[#allocation60_spill] sm:$0xff] %v6261_v0  ;;  %v1520_v38 = vmul.f32 %v1519_v62, %v6164_v47  ;;  %v1123_v20 = vadd.f32 0.18741608, %v1122_v4  ;;  %v1205_v11 = vadd.f32 1.1283791, %v1204_v58  ;;  %v1840_v41 = vmul.f32 %v1839_v37, %v6166_v8 }
 0x214   :  { %9996 = vst [vmem:[#allocation61_spill] sm:$0xff] %v6266_v32  ;;  %v1758_v17 = vmul.f32 %v1757_v44, %v6213_v14  ;;  %v2074_v53 = vmul.f32 %v6255_v12, %v6255_v12  ;;  %v6275_v36 = vmul.f32 %v1045_v29, %v5981_v22  ;;  %v1604_v15 = vmul.f32 %v1603_v59, %v6058_v6  ;;  %v10039_v6 = vld [vmem:[#allocation24_spill] sm:$0xff] }
 0x215   :  { %v1920_v3 = vmul.f32 %v1919_v24, %v6177_v23  ;;  %v1680_v30 = vmul.f32 %v1679_v16, %v6179_v18  ;;  %v1283_v62 = vadd.f32 0.18741608, %v1282_v57  ;;  %v964_v4 = vmul.f32 %v963_v45, %v6044_v60 }
 0x216   :  { %9997 = vst [vmem:[#allocation62_spill] sm:$0xff] %v6275_v36  ;;  %v2000_v37 = vmul.f32 %v1999_v31, %v6188_v28  ;;  %v2157_v39 = vadd.f32 0.00028619796, %v2156_v63  ;;  %v1443_v1 = vadd.f32 0.18741608, %v1442_v54  ;;  %v1124_v58 = vmul.f32 %v1123_v20, %v6046_v55 }
 0x217   :  { %v1521_v13 = vadd.f32 0.05243302, %v1520_v38  ;;  %v1841_v22 = vadd.f32 0.05243302, %v1840_v41  ;;  %v1759_v29 = vadd.f32 0.0036580483, %v1758_v17  ;;  %v6289_v59 = vadd.f32 %v5963_v40, %v6257_v52  ;;  %v6297_v38 = vpop.permute.xlu0 %692 }
 0x218   :  { %v6285_v0 = vmin.f32 %v2074_v53, 16.0  ;;  %v6292_v24 = vmul.f32 %v1205_v11, %v6006_v56  ;;  %v1605_v16 = vadd.f32 1.1283791, %v1604_v15  ;;  %v1921_v57 = vadd.f32 0.05243302, %v1920_v3 }
 0x219   :  { %v1681_v45 = vadd.f32 0.05243302, %v1680_v30  ;;  %v1284_v31 = vmul.f32 %v1283_v62, %v6050_v2  ;;  %v2001_v63 = vadd.f32 0.05243302, %v2000_v37  ;;  %v2158_v20 = vmul.f32 %v2157_v39, %v6252_v21 }
 0x21a   :  { %9999 = vst [vmem:[#allocation64_spill] sm:$0xff] %v6285_v0  ;;  %v2076_v54 = vmul.f32 2.1237322e-06, %v6285_v0  ;;  %v1444_v41 = vmul.f32 %v1443_v1, %v6110_v34  ;;  %v1522_v17 = vmul.f32 %v1521_v13, %v6164_v47  ;;  %v1842_v11 = vmul.f32 %v1841_v22, %v6166_v8 }
 0x21b   :  { %10000 = vst [vmem:[#allocation65_spill] sm:$0xff] %v6292_v24  ;;  %v1125_v53 = vadd.f32 1.1283791, %v1124_v58  ;;  %v1760_v15 = vmul.f32 %v1759_v29, %v6213_v14  ;;  %v6308_v3 = vmul.f32 0.70710677, %v6289_v59  ;;  %v1922_v30 = vmul.f32 %v1921_v57, %v6177_v23  ;;  %v6320_v58 = vpop.permute.xlu2 %697  ;;  %v10037_v24 = vld [vmem:[#allocation41_spill] sm:$0xff] }
 0x21c   :  { %v6312_v62 = vmul.f32 0.5, %v6101_v5  ;;  %v1682_v37 = vmul.f32 %v1681_v45, %v6179_v18  ;;  %v2002_v39 = vmul.f32 %v2001_v63, %v6188_v28  ;;  %v2159_v1 = vadd.f32 0.0036580483, %v2158_v20 }
 0x21d   :  { %v2077_v13 = vadd.f32 0.00028619796, %v2076_v54  ;;  %v6323_v22 = vmul.f32 %v1605_v16, %v6028_v49  ;;  %v1445_v29 = vadd.f32 1.1283791, %v1444_v41  ;;  %v1523_v57 = vadd.f32 0.18741608, %v1522_v17 }
 0x21e   :  { %10001 = vst [vmem:[#allocation66_spill] sm:$0xff] %v6312_v62  ;;  %v1843_v45 = vadd.f32 0.18741608, %v1842_v11  ;;  %v1761_v32 = vadd.f32 0.05243302, %v1760_v15  ;;  %v6338_v49 = vadd.f32 %v5963_v40, %v6320_v58  ;;  %v6341_v41 = vmul.f32 %v1125_v53, %v6008_v48 }
 0x21f   :  { %10002 = vst [vmem:[#allocation67_spill] sm:$0xff] %v6323_v22  ;;  %v1923_v63 = vadd.f32 0.18741608, %v1922_v30  ;;  %v1683_v20 = vadd.f32 0.18741608, %v1682_v37  ;;  %v2078_v17 = vmul.f32 %v2077_v13, %v6285_v0  ;;  %v6347_v11 = vmul.f32 0.5, %v6105_v35 }
 0x220   :  { %v2003_v16 = vadd.f32 0.18741608, %v2002_v39  ;;  %10005 = vst [vmem:[#allocation70_spill] sm:$0xff] %v6341_v41  ;;  %v6350_v15 = vmul.f32 0.5, %v6152_v10  ;;  %v1844_v37 = vmul.f32 %v1843_v45, %v6166_v8  ;;  %v1762_v48 = vmul.f32 %v1761_v32, %v6213_v14  ;;  %v10032_v22 = vld [vmem:[#allocation18_spill] sm:$0xff] }
 0x221   :  { %10006 = vst [vmem:[#allocation71_spill] sm:$0xff] %v6347_v11  ;;  %v1684_v35 = vmul.f32 %v1683_v20, %v6179_v18  ;;  %v6367_v13 = vmul.f32 0.70710677, %v6338_v49  ;;  %v2079_v32 = vadd.f32 0.0036580483, %v2078_v17  ;;  %v6381_v20 = vmul.f32 %v1445_v29, %v6053_v25  ;;  %v6392_v25 = vpop.permute.xlu1 %682 }
 0x222   :  { %10007 = vst [vmem:[#allocation72_spill] sm:$0xff] %v6350_v15  ;;  %v1763_v18 = vadd.f32 0.18741608, %v1762_v48 }
 0x223   :  { %10009 = vst [vmem:[#allocation74_spill] sm:$0xff] %v6367_v13  ;;  %v1685_v17 = vadd.f32 1.1283791, %v1684_v35 }
 0x224   :  { %10012 = vst [vmem:[#allocation77_spill] sm:$0xff] %v6381_v20  ;;  %v10033_v20 = vld [vmem:[#allocation34_spill] sm:$0xff] }
 0x227   :  { %v597_v7 = vpop.f32.mrf.mxu3 }
 0x228   :  { %v6283_v44 = vperm.slane %v597_v7, 0  ;;  %v965_v7 = vadd.f32 1.1283791, %v964_v4  ;;  %v6317_v4 = vadd.f32 %v5963_v40, %v6297_v38 }
 0x22a   :  { %9998 = vst [vmem:[#allocation63_spill] sm:$0xff] %v6283_v44  ;;  %v6303_v56 = vadd.f32 %v6283_v44, %v6181_v9  ;;  %v1285_v9 = vadd.f32 1.1283791, %v1284_v31  ;;  %v6329_v62 = vmul.f32 %v965_v7, %v6003_v42  ;;  %v2314_v31 = vmul.f32 %v6308_v3, %v6308_v3 }
 0x22b   :  { %v6334_v54 = vmul.f32 0.70710677, %v6317_v4  ;;  %v2160_v42 = vmul.f32 %v2159_v1, %v6252_v21  ;;  %v1524_v7 = vmul.f32 %v1523_v57, %v6164_v47  ;;  %v6358_v53 = vadd.f32 %v6283_v44, %v6222_v46 }
 0x22c   :  { %v6326_v5 = vmul.f32 0.70710677, %v6303_v56  ;;  %10003 = vst [vmem:[#allocation68_spill] sm:$0xff] %v6329_v62  ;;  %v6360_v39 = vmin.f32 %v2314_v31, 16.0  ;;  %v1924_v1 = vmul.f32 %v1923_v63, %v6177_v23  ;;  %v2004_v57 = vmul.f32 %v2003_v16, %v6188_v28 }
 0x22d   :  { %10004 = vst [vmem:[#allocation69_spill] sm:$0xff] %v6334_v54  ;;  %v2394_v10 = vmul.f32 %v6334_v54, %v6334_v54  ;;  %v2161_v45 = vadd.f32 0.05243302, %v2160_v42  ;;  %v1525_v46 = vadd.f32 1.1283791, %v1524_v7  ;;  %v6372_v31 = vmul.f32 0.5, %v6198_v33 }
 0x22e   :  { %v2194_v30 = vmul.f32 %v6326_v5, %v6326_v5  ;;  %10008 = vst [vmem:[#allocation73_spill] sm:$0xff] %v6360_v39  ;;  %v2316_v11 = vmul.f32 2.1237322e-06, %v6360_v39  ;;  %v6378_v63 = vadd.f32 %v6283_v44, %v6257_v52  ;;  %v1845_v54 = vadd.f32 1.1283791, %v1844_v37 }
 0x22f   :  { %10010 = vst [vmem:[#allocation75_spill] sm:$0xff] %v6372_v31  ;;  %v6384_v16 = vmul.f32 0.70710677, %v6358_v53  ;;  %v1925_v42 = vadd.f32 1.1283791, %v1924_v1  ;;  %v6386_v7 = vmin.f32 %v2394_v10, 16.0  ;;  %v2474_v33 = vmul.f32 %v6367_v13, %v6367_v13 }
 0x230   :  { %v6374_v8 = vmin.f32 %v2194_v30, 16.0  ;;  %v2005_v30 = vadd.f32 1.1283791, %v2004_v57  ;;  %v2162_v31 = vmul.f32 %v2161_v45, %v6252_v21  ;;  %v2080_v52 = vmul.f32 %v2079_v32, %v6285_v0 }
 0x231   :  { %10013 = vst [vmem:[#allocation78_spill] sm:$0xff] %v6386_v7  ;;  %v2317_v28 = vadd.f32 0.00028619796, %v2316_v11  ;;  %v6395_v29 = vmul.f32 %v1285_v9, %v6017_v50  ;;  %v6399_v48 = vmul.f32 0.70710677, %v6378_v63  ;;  %v6403_v35 = vmul.f32 %v1525_v46, %v6113_v26  ;;  %v10021_v46 = vld [vmem:[#allocation40_spill] sm:$0xff] }
 0x232   :  { %10011 = vst [vmem:[#allocation76_spill] sm:$0xff] %v6374_v8  ;;  %v2196_v37 = vmul.f32 2.1237322e-06, %v6374_v8  ;;  %v2396_v1 = vmul.f32 2.1237322e-06, %v6386_v7  ;;  %v6406_v10 = vmul.f32 %v1845_v54, %v6116_v27  ;;  %v1764_v11 = vmul.f32 %v1763_v18, %v6213_v14  ;;  %v10035_v14 = vld [vmem:[#allocation47_spill] sm:$0xff] }
 0x233   :  { %10014 = vst [vmem:[#allocation79_spill] sm:$0xff] %v6395_v29  ;;  %v2114_v57 = vmul.f32 %v6384_v16, %v6384_v16  ;;  %v6412_v50 = vmul.f32 %v1925_v42, %v6126_v61  ;;  %v6415_v9 = vmul.f32 %v1685_v17, %v6129_v43  ;;  %v6418_v45 = vmul.f32 0.5, %v6238_v19  ;;  %v10023_v17 = vld [vmem:[#allocation14_spill] sm:$0xff] }
 0x234   :  { %10015 = vst [vmem:[#allocation80_spill] sm:$0xff] %v6403_v35  ;;  %v6422_v26 = vadd.f32 %v5963_v40, %v6392_v25  ;;  %v2163_v27 = vadd.f32 0.18741608, %v2162_v31  ;;  %v2081_v54 = vadd.f32 0.05243302, %v2080_v52  ;;  %v2318_v18 = vmul.f32 %v2317_v28, %v6360_v39  ;;  %v10025_v28 = vld [vmem:[#allocation19_spill] sm:$0xff] }
 0x235   :  { %10016 = vst [vmem:[#allocation81_spill] sm:$0xff] %v6406_v10  ;;  %v6425_v32 = vmin.f32 %v2474_v33, 16.0  ;;  %v6428_v13 = vmul.f32 %v2005_v30, %v10021_v46  ;;  %v2197_v61 = vadd.f32 0.00028619796, %v2196_v37  ;;  %v2354_v43 = vmul.f32 %v6399_v48, %v6399_v48  ;;  %v10026_v30 = vld [vmem:[#allocation16_spill] sm:$0xff]  ;;  %v10038_v35 = vld [vmem:[#allocation21_spill] sm:$0xff] }
 0x236   :  { %10017 = vst [vmem:[#allocation82_spill] sm:$0xff] %v6412_v50  ;;  %v6432_v42 = vadd.f32 0.00028619796, %v2396_v1  ;;  %v1765_v19 = vadd.f32 1.1283791, %v1764_v11  ;;  %v763_v10 = vadd.f32 %v6283_v44, %v10023_v17  ;;  %v765_v33 = vadd.f32 %v6283_v44, %v10025_v28  ;;  %v10027_v37 = vld [vmem:[#allocation20_spill] sm:$0xff] }
 0x237   :  { %10018 = vst [vmem:[#allocation83_spill] sm:$0xff] %v6415_v9  ;;  %v6436_v9 = vmin.f32 %v2114_v57, 16.0  ;;  %v6439_v31 = vmul.f32 2.1237322e-06, %v6425_v32  ;;  %v767_v52 = vadd.f32 %v6283_v44, %v10026_v30  ;;  %v769_v46 = vadd.f32 %v6283_v44, %v10027_v37  ;;  %v10028_v1 = vld [vmem:[#allocation13_spill] sm:$0xff]  ;;  %v10031_v50 = vld [vmem:[#allocation28_spill] sm:$0xff] }
 0x238   :  { %10019 = vst [vmem:[#allocation84_spill] sm:$0xff] %v6418_v45  ;;  %v771_v11 = vadd.f32 %v6283_v44, %v10028_v1  ;;  %v10030_v57 = vld [vmem:[#allocation25_spill] sm:$0xff]  ;;  %v777_v15 = vadd.f32 %v6283_v44, %v10031_v50  ;;  %v779_v28 = vadd.f32 %v6283_v44, %v10032_v22  ;;  %v781_v30 = vadd.f32 %v6283_v44, %v10033_v20 }
 0x239   :  { %10020 = vst [vmem:[#allocation85_spill] sm:$0xff] %v6425_v32  ;;  %v775_v45 = vadd.f32 %v6283_v44, %v10030_v57  ;;  %v2164_v37 = vmul.f32 %v2163_v27, %v6252_v21  ;;  %v2198_v23 = vmul.f32 %v2197_v61, %v6374_v8  ;;  %v6461_v1 = vmin.f32 %v2354_v43, 16.0 }
 0x23a   :  { %10022 = vst [vmem:[#allocation40_spill] sm:$0xff] %v6428_v13  ;;  %v10029_v13 = vld [vmem:[#allocation15_spill] sm:$0xff]  ;;  %v783_v57 = vadd.f32 %v6283_v44, %v10037_v24  ;;  %v785_v50 = vadd.f32 %v6283_v44, %v10038_v35  ;;  %v2116_v22 = vmul.f32 2.1237322e-06, %v6436_v9  ;;  %v787_v20 = vadd.f32 %v6283_v44, %v10039_v6 }
 0x23b   :  { %10024 = vst [vmem:[#allocation14_spill] sm:$0xff] %v6436_v9  ;;  %v773_v17 = vadd.f32 %v6283_v44, %v10029_v13  ;;  %v6464_v13 = vmul.f32 %v1765_v19, %v10035_v14  ;;  %v6473_v29 = vmul.f32 0.5, %v763_v10  ;;  %v6475_v27 = vmul.f32 0.5, %v765_v33  ;;  %v10047_v35 = vld [vmem:[#allocation31_spill] sm:$0xff] }
 0x23c   :  { %10034 = vst [vmem:[#allocation19_spill] sm:$0xff] %v6461_v1  ;;  %v6477_v61 = vmul.f32 0.5, %v767_v52  ;;  %v6480_v14 = vmul.f32 0.5, %v6303_v56  ;;  %v6482_v43 = vmul.f32 0.5, %v769_v46  ;;  %v6484_v24 = vmul.f32 0.5, %v771_v11 }
 0x23d   :  { %10036 = vst [vmem:[#allocation16_spill] sm:$0xff] %v6464_v13  ;;  %v6486_v19 = vmul.f32 0.5, %v773_v17  ;;  %v789_v13 = vadd.f32 %v6283_v44, %v10047_v35  ;;  %v2165_v21 = vadd.f32 1.1283791, %v2164_v37  ;;  %v2199_v6 = vadd.f32 0.0036580483, %v2198_v23 }
 0x23e   :  { %10040 = vst [vmem:[#allocation20_spill] sm:$0xff] %v6473_v29  ;;  %v2356_v29 = vmul.f32 2.1237322e-06, %v6461_v1  ;;  %v6491_v34 = vmul.f32 0.5, %v775_v45  ;;  %v6495_v62 = vmul.f32 0.5, %v779_v28  ;;  %v6504_v35 = vadd.f32 %v6283_v44, %v6297_v38 }
 0x23f   :  { %10041 = vst [vmem:[#allocation13_spill] sm:$0xff] %v6475_v27  ;;  %v6493_v27 = vmul.f32 0.5, %v777_v15  ;;  %v2117_v56 = vadd.f32 0.00028619796, %v2116_v22  ;;  %v6506_v23 = vmul.f32 0.5, %v785_v50  ;;  %v6508_v37 = vmul.f32 0.5, %v787_v20 }
 0x240   :  { %10042 = vst [vmem:[#allocation15_spill] sm:$0xff] %v6477_v61  ;;  %v6513_v22 = vmul.f32 0.5, %v789_v13  ;;  %v6521_v38 = vmul.f32 0.70710677, %v771_v11 }
 0x241   :  { %10043 = vst [vmem:[#allocation25_spill] sm:$0xff] %v6480_v14  ;;  %v6497_v14 = vmul.f32 0.5, %v781_v30 }
 0x242   :  { %10044 = vst [vmem:[#allocation28_spill] sm:$0xff] %v6482_v43  ;;  %v6499_v43 = vmul.f32 0.5, %v783_v57 }
 0x243   :  { %10045 = vst [vmem:[#allocation18_spill] sm:$0xff] %v6484_v24  ;;  %v6517_v24 = vmul.f32 0.70710677, %v767_v52 }
 0x244   :  { %10046 = vst [vmem:[#allocation34_spill] sm:$0xff] %v6486_v19  ;;  %v2082_v19 = vmul.f32 %v2081_v54, %v6285_v0  ;;  %v6519_v54 = vmul.f32 0.70710677, %v769_v46 }
 0x245   :  { %10048 = vst [vmem:[#allocation47_spill] sm:$0xff] %v6491_v34  ;;  %v6510_v34 = vmul.f32 0.70710677, %v763_v10  ;;  %v6527_v10 = vmul.f32 0.70710677, %v773_v17 }
 0x246   :  { %10049 = vst [vmem:[#allocation41_spill] sm:$0xff] %v6493_v27  ;;  %v2319_v27 = vadd.f32 0.0036580483, %v2318_v18  ;;  %v2083_v18 = vadd.f32 0.18741608, %v2082_v19 }
 0x247   :  { %10050 = vst [vmem:[#allocation21_spill] sm:$0xff] %v6495_v62  ;;  %v2200_v62 = vmul.f32 %v2199_v6, %v6374_v8  ;;  %v6530_v6 = vmul.f32 0.70710677, %v6504_v35  ;;  %v994_v52 = vmul.f32 %v6510_v34, %v6510_v34  ;;  %v6544_v17 = vmul.f32 0.70710677, %v783_v57 }
 0x248   :  { %10051 = vst [vmem:[#allocation24_spill] sm:$0xff] %v6497_v14  ;;  %v6515_v14 = vmul.f32 0.70710677, %v765_v33  ;;  %v6532_v33 = vmul.f32 0.70710677, %v775_v45  ;;  %v2320_v46 = vmul.f32 %v2319_v27, %v6360_v39  ;;  %v6560_v57 = vmul.f32 0.5, %v6358_v53 }
 0x249   :  { %10052 = vst [vmem:[#allocation31_spill] sm:$0xff] %v6499_v43  ;;  %v2357_v43 = vadd.f32 0.00028619796, %v2356_v29  ;;  %v6534_v29 = vmul.f32 0.70710677, %v777_v15  ;;  %v1394_v53 = vmul.f32 %v6527_v10, %v6527_v10 }
 0x24a   :  { %10053 = vst [vmem:[#allocation86_spill] sm:$0xff] %v6506_v23  ;;  %v2118_v23 = vmul.f32 %v2117_v56, %v6436_v9  ;;  %v2201_v11 = vadd.f32 0.05243302, %v2200_v62  ;;  %v6539_v56 = vmul.f32 0.70710677, %v779_v28  ;;  %v1074_v15 = vmul.f32 %v6515_v14, %v6515_v14 }
 0x24b   :  { %10054 = vst [vmem:[#allocation87_spill] sm:$0xff] %v6508_v37  ;;  %v6525_v37 = vmul.f32 %v2165_v21, %v6216_v51  ;;  %v6541_v51 = vmul.f32 0.70710677, %v781_v30  ;;  %v2358_v21 = vmul.f32 %v2357_v43, %v6461_v1  ;;  %v6546_v19 = vmul.f32 0.70710677, %v785_v50 }
 0x24c   :  { %10055 = vst [vmem:[#allocation88_spill] sm:$0xff] %v6510_v34  ;;  %v2119_v45 = vadd.f32 0.0036580483, %v2118_v23  ;;  %v1154_v62 = vmul.f32 %v6517_v24, %v6517_v24  ;;  %v2434_v28 = vmul.f32 %v6530_v6, %v6530_v6  ;;  %v6557_v30 = vmul.f32 0.70710677, %v789_v13 }
 0x24d   :  { %10056 = vst [vmem:[#allocation89_spill] sm:$0xff] %v6513_v22  ;;  %v6550_v22 = vmul.f32 0.70710677, %v787_v20  ;;  %v1234_v50 = vmul.f32 %v6519_v54, %v6519_v54  ;;  %v2321_v27 = vadd.f32 0.05243302, %v2320_v46  ;;  %v2202_v20 = vmul.f32 %v2201_v11, %v6374_v8 }
 0x24e   :  { %10057 = vst [vmem:[#allocation90_spill] sm:$0xff] %v6515_v14  ;;  %v1314_v43 = vmul.f32 %v6521_v38, %v6521_v38  ;;  %v2359_v23 = vadd.f32 0.0036580483, %v2358_v21  ;;  %v2120_v13 = vmul.f32 %v2119_v45, %v6436_v9  ;;  %v1554_v46 = vmul.f32 %v6534_v29, %v6534_v29 }
 0x24f   :  { %10058 = vst [vmem:[#allocation91_spill] sm:$0xff] %v6517_v24  ;;  %v2398_v21 = vmul.f32 %v6432_v42, %v6386_v7  ;;  %v1714_v45 = vmul.f32 %v6541_v51, %v6541_v51  ;;  %v6614_v34 = vmin.f32 %v1074_v15, 16.0 }
 0x250   :  { %10059 = vst [vmem:[#allocation92_spill] sm:$0xff] %v6519_v54  ;;  %v6608_v54 = vmin.f32 %v994_v52, 16.0 }
 0x251   :  { %10060 = vst [vmem:[#allocation93_spill] sm:$0xff] %v6521_v38  ;;  %v6612_v38 = vmul.f32 0.5, %v6378_v63  ;;  %v6626_v63 = vmin.f32 %v1314_v43, 16.0 }
 0x252   :  { %10061 = vst [vmem:[#allocation94_spill] sm:$0xff] %v6525_v37  ;;  %v2084_v37 = vmul.f32 %v2083_v18, %v6285_v0  ;;  %v6569_v18 = vadd.f32 %v6283_v44, %v6392_v25  ;;  %v6582_v25 = vmin.f32 %v2434_v28, 16.0  ;;  %v1794_v0 = vmul.f32 %v6544_v17, %v6544_v17 }
 0x253   :  { %10062 = vst [vmem:[#allocation95_spill] sm:$0xff] %v6527_v10  ;;  %v6590_v10 = vmul.f32 0.70710677, %v6422_v26  ;;  %v2121_v28 = vadd.f32 0.05243302, %v2120_v13 }
 0x254   :  { %10063 = vst [vmem:[#allocation96_spill] sm:$0xff] %v6530_v6  ;;  %v1474_v6 = vmul.f32 %v6532_v33, %v6532_v33  ;;  %v2085_v11 = vadd.f32 1.1283791, %v2084_v37  ;;  %v2203_v37 = vadd.f32 0.18741608, %v2202_v20 }
 0x255   :  { %10064 = vst [vmem:[#allocation97_spill] sm:$0xff] %v6532_v33  ;;  %v2322_v33 = vmul.f32 %v2321_v27, %v6360_v39  ;;  %v6596_v42 = vmul.f32 0.70710677, %v6569_v18  ;;  %v6603_v27 = vmul.f32 0.5, %v6289_v59  ;;  %v2122_v52 = vmul.f32 %v2121_v28, %v6436_v9 }
 0x256   :  { %10065 = vst [vmem:[#allocation98_spill] sm:$0xff] %v6534_v29  ;;  %v2360_v29 = vmul.f32 %v2359_v23, %v6461_v1  ;;  %v6606_v20 = vmul.f32 %v2085_v11, %v6255_v12  ;;  %v2436_v23 = vmul.f32 2.1237322e-06, %v6582_v25  ;;  %v2204_v59 = vmul.f32 %v2203_v37, %v6374_v8 }
 0x257   :  { %10066 = vst [vmem:[#allocation99_spill] sm:$0xff] %v6539_v56  ;;  %v2323_v13 = vadd.f32 0.18741608, %v2322_v33  ;;  %v2274_v12 = vmul.f32 %v6596_v42, %v6596_v42  ;;  %v6624_v11 = vmin.f32 %v1234_v50, 16.0  ;;  %v6628_v33 = vmin.f32 %v1394_v53, 16.0 }
 0x258   :  { %10067 = vst [vmem:[#allocation100_spill] sm:$0xff] %v6541_v51  ;;  %v1954_v51 = vmul.f32 %v6550_v22, %v6550_v22  ;;  %v6630_v15 = vmin.f32 %v1474_v6, 16.0  ;;  %v2205_v50 = vadd.f32 1.1283791, %v2204_v59  ;;  %v6643_v53 = vmin.f32 %v1794_v0, 16.0 }
 0x259   :  { %10068 = vst [vmem:[#allocation101_spill] sm:$0xff] %v6544_v17  ;;  %v2034_v17 = vmul.f32 %v6557_v30, %v6557_v30  ;;  %v6645_v6 = vmin.f32 %v2274_v12, 16.0  ;;  %v996_v59 = vmul.f32 2.1237322e-06, %v6608_v54 }
 0x25a   :  { %10069 = vst [vmem:[#allocation102_spill] sm:$0xff] %v6546_v19 }
 0x25b   :  { %10070 = vst [vmem:[#allocation103_spill] sm:$0xff] %v6550_v22  ;;  %v6619_v22 = vmin.f32 %v1154_v62, 16.0  ;;  %v2324_v62 = vmul.f32 %v2323_v13, %v6360_v39  ;;  %v6660_v13 = vmul.f32 0.5, %v6317_v4 }
 0x25c   :  { %10071 = vst [vmem:[#allocation104_spill] sm:$0xff] %v6557_v30  ;;  %v2234_v30 = vmul.f32 %v6590_v10, %v6590_v10 }
 0x25d   :  { %10072 = vst [vmem:[#allocation105_spill] sm:$0xff] %v6560_v57  ;;  %v1634_v57 = vmul.f32 %v6539_v56, %v6539_v56  ;;  %v1874_v56 = vmul.f32 %v6546_v19, %v6546_v19  ;;  %v2399_v19 = vadd.f32 0.0036580483, %v2398_v21  ;;  %v6632_v21 = vmin.f32 %v1554_v46, 16.0 }
 0x25e   :  { %10073 = vst [vmem:[#allocation106_spill] sm:$0xff] %v6582_v25  ;;  %v6640_v28 = vmin.f32 %v2234_v30, 16.0  ;;  %v2123_v46 = vadd.f32 0.18741608, %v2122_v52  ;;  %v6656_v30 = vmin.f32 %v2034_v17, 16.0 }
 0x25f   :  { %10074 = vst [vmem:[#allocation107_spill] sm:$0xff] %v6603_v27  ;;  %v2361_v27 = vadd.f32 0.05243302, %v2360_v29  ;;  %v2400_v37 = vmul.f32 %v2399_v19, %v6386_v7  ;;  %v2437_v29 = vadd.f32 0.00028619796, %v2436_v23  ;;  %v6647_v8 = vmin.f32 %v1874_v56, 16.0 }
 0x260   :  { %10075 = vst [vmem:[#allocation108_spill] sm:$0xff] %v6606_v20  ;;  %v6638_v20 = vmin.f32 %v1714_v45, 16.0  ;;  %v6651_v19 = vadd.f32 %v6283_v44, %v6320_v58  ;;  %v6654_v45 = vmin.f32 %v1954_v51, 16.0  ;;  %v2325_v0 = vadd.f32 1.1283791, %v2324_v62 }
 0x261   :  { %10076 = vst [vmem:[#allocation109_spill] sm:$0xff] %v6612_v38  ;;  %v6636_v38 = vmin.f32 %v1634_v57, 16.0  ;;  %v2362_v43 = vmul.f32 %v2361_v27, %v6461_v1  ;;  %v2236_v57 = vmul.f32 2.1237322e-06, %v6640_v28  ;;  %v2401_v23 = vadd.f32 0.05243302, %v2400_v37 }
 0x262   :  { %10077 = vst [vmem:[#allocation110_spill] sm:$0xff] %v6651_v19  ;;  %v2438_v27 = vmul.f32 %v2437_v29, %v6582_v25  ;;  %v6663_v56 = vmul.f32 0.5, %v6504_v35  ;;  %v6667_v58 = vmul.f32 %v2205_v50, %v6326_v5  ;;  %v1076_v51 = vmul.f32 2.1237322e-06, %v6614_v34 }
 0x263   :  { %10078 = vst [vmem:[#allocation111_spill] sm:$0xff] %v6656_v30  ;;  %v2363_v12 = vadd.f32 0.18741608, %v2362_v43  ;;  %v2276_v17 = vmul.f32 2.1237322e-06, %v6645_v6  ;;  %v2124_v52 = vmul.f32 %v2123_v46, %v6436_v9  ;;  %v2402_v35 = vmul.f32 %v2401_v23, %v6386_v7 }
 0x264   :  { %10079 = vst [vmem:[#allocation112_spill] sm:$0xff] %v6660_v13  ;;  %v1156_v37 = vmul.f32 2.1237322e-06, %v6619_v22  ;;  %v6674_v4 = vmul.f32 0.70710677, %v6651_v19  ;;  %v6680_v50 = vmul.f32 %v2325_v0, %v6308_v3 }
 0x265   :  { %10080 = vst [vmem:[#allocation113_spill] sm:$0xff] %v6663_v56  ;;  %v2237_v29 = vadd.f32 0.00028619796, %v2236_v57  ;;  %v2439_v62 = vadd.f32 0.0036580483, %v2438_v27  ;;  %v2364_v19 = vmul.f32 %v2363_v12, %v6461_v1 }
 0x266   :  { %10081 = vst [vmem:[#allocation114_spill] sm:$0xff] %v6667_v58  ;;  %v1236_v56 = vmul.f32 2.1237322e-06, %v6624_v11  ;;  %v1316_v5 = vmul.f32 2.1237322e-06, %v6626_v63  ;;  %v2514_v3 = vmul.f32 %v6674_v4, %v6674_v4 }
 0x267   :  { %10082 = vst [vmem:[#allocation115_spill] sm:$0xff] %v6674_v4  ;;  %v1396_v43 = vmul.f32 2.1237322e-06, %v6628_v33  ;;  %v1476_v46 = vmul.f32 2.1237322e-06, %v6630_v15  ;;  %v2238_v0 = vmul.f32 %v2237_v29, %v6640_v28  ;;  %v2440_v58 = vmul.f32 %v2439_v62, %v6582_v25 }
 0x268   :  { %10083 = vst [vmem:[#allocation116_spill] sm:$0xff] %v6680_v50  ;;  %v2477_v13 = vadd.f32 0.00028619796, %v6439_v31  ;;  %v1556_v57 = vmul.f32 2.1237322e-06, %v6632_v21  ;;  %v6707_v61 = vmin.f32 %v2514_v3, 16.0 }
 0x269   :  { %v1636_v23 = vmul.f32 2.1237322e-06, %v6636_v38  ;;  %v2277_v27 = vadd.f32 0.00028619796, %v2276_v17  ;;  %v2125_v44 = vadd.f32 1.1283791, %v2124_v52 }
 0x26a   :  { %v1716_v39 = vmul.f32 2.1237322e-06, %v6638_v20  ;;  %v2403_v50 = vadd.f32 0.18741608, %v2402_v35  ;;  %v1796_v31 = vmul.f32 2.1237322e-06, %v6643_v53  ;;  %v2478_v52 = vmul.f32 %v2477_v13, %v6425_v32  ;;  %v6702_v35 = vpop.permute.xlu0 %707 }
 0x26b   :  { %v1876_v12 = vmul.f32 2.1237322e-06, %v6647_v8  ;;  %v1956_v1 = vmul.f32 2.1237322e-06, %v6654_v45  ;;  %v2036_v9 = vmul.f32 2.1237322e-06, %v6656_v30  ;;  %v2278_v29 = vmul.f32 %v2277_v27, %v6645_v6 }
 0x26c   :  { %v6698_v17 = vmul.f32 0.5, %v6338_v49  ;;  %v2365_v14 = vadd.f32 1.1283791, %v2364_v19  ;;  %v997_v4 = vadd.f32 0.00028619796, %v996_v59  ;;  %10085 = vst [vmem:[#allocation118_spill] sm:$0xff] %v6702_v35  ;;  %v6705_v62 = vmul.f32 %v2125_v44, %v6384_v16 }
 0x26d   :  { %v1077_v36 = vadd.f32 0.00028619796, %v1076_v51  ;;  %10086 = vst [vmem:[#allocation119_spill] sm:$0xff] %v6707_v61  ;;  %v1157_v47 = vadd.f32 0.00028619796, %v1156_v37  ;;  %v6710_v41 = vmul.f32 %v2403_v50, %v6386_v7  ;;  %v6713_v51 = vmul.f32 0.5, %v6422_v26 }
 0x26e   :  { %10084 = vst [vmem:[#allocation117_spill] sm:$0xff] %v6698_v17  ;;  %v2239_v24 = vadd.f32 0.0036580483, %v2238_v0  ;;  %v2441_v49 = vadd.f32 0.05243302, %v2440_v58  ;;  %v6717_v27 = vadd.f32 %v5963_v40, %v6702_v35  ;;  %v6720_v44 = vmul.f32 %v2365_v14, %v6399_v48 }
 0x26f   :  { %10087 = vst [vmem:[#allocation120_spill] sm:$0xff] %v6710_v41  ;;  %v1237_v17 = vadd.f32 0.00028619796, %v1236_v56  ;;  %v1317_v13 = vadd.f32 0.00028619796, %v1316_v5  ;;  %v10092_v5 = vld [vmem:[#allocation23_spill] sm:$0xff] }
 0x270   :  { %v2479_v19 = vadd.f32 0.0036580483, %v2478_v52  ;;  %v1397_v59 = vadd.f32 0.00028619796, %v1396_v43  ;;  %10088 = vst [vmem:[#allocation121_spill] sm:$0xff] %v6713_v51  ;;  %v2240_v56 = vmul.f32 %v2239_v24, %v6640_v28  ;;  %v6729_v43 = vmul.f32 %v2441_v49, %v6582_v25 }
 0x271   :  { %10089 = vst [vmem:[#allocation122_spill] sm:$0xff] %v6717_v27  ;;  %v1477_v16 = vadd.f32 0.00028619796, %v1476_v46  ;;  %v1557_v37 = vadd.f32 0.00028619796, %v1556_v57  ;;  %v1078_v27 = vmul.f32 %v1077_v36, %v6614_v34 }
 0x272   :  { %10090 = vst [vmem:[#allocation123_spill] sm:$0xff] %v6720_v44  ;;  %v2279_v3 = vadd.f32 0.0036580483, %v2278_v29  ;;  %v6723_v50 = vmul.f32 2.1237322e-06, %v6707_v61  ;;  %v6732_v48 = vmul.f32 %v2479_v19, %v6425_v32  ;;  %v998_v44 = vmul.f32 %v997_v4, %v6608_v54 }
 0x273   :  { %v1127_v58 = vmul.f32 3.8918573e-05, %v6046_v55  ;;  %v1047_v26 = vmul.f32 3.8918573e-05, %v10092_v5  ;;  %10093 = vst [vmem:[#allocation23_spill] sm:$0xff] %v6729_v43  ;;  %v6741_v19 = vmul.f32 0.5, %v6569_v18 }
 0x274   :  { %10091 = vst [vmem:[#allocation124_spill] sm:$0xff] %v6723_v50  ;;  %v1637_v0 = vadd.f32 0.00028619796, %v1636_v23  ;;  %v1717_v52 = vadd.f32 0.00028619796, %v1716_v39  ;;  %v2280_v24 = vmul.f32 %v2279_v3, %v6645_v6  ;;  %v1318_v3 = vmul.f32 %v1317_v13, %v6626_v63 }
 0x275   :  { %v1797_v41 = vadd.f32 0.00028619796, %v1796_v31  ;;  %10094 = vst [vmem:[#allocation125_spill] sm:$0xff] %v6732_v48  ;;  %v1128_v14 = vadd.f32 0.001143296, %v1127_v58  ;;  %v1158_v58 = vmul.f32 %v1157_v47, %v6619_v22 }
 0x276   :  { %v1048_v46 = vadd.f32 0.001143296, %v1047_v26  ;;  %v967_v57 = vmul.f32 3.8918573e-05, %v6044_v60  ;;  %v1877_v29 = vadd.f32 0.00028619796, %v1876_v12  ;;  %v1238_v12 = vmul.f32 %v1237_v17, %v6624_v11 }
 0x277   :  { %v1957_v35 = vadd.f32 0.00028619796, %v1956_v1  ;;  %v2241_v49 = vadd.f32 0.05243302, %v2240_v56  ;;  %v1129_v23 = vmul.f32 %v1128_v14, %v6046_v55  ;;  %v2037_v31 = vadd.f32 0.00028619796, %v2036_v9 }
 0x278   :  { %v1049_v39 = vmul.f32 %v1048_v46, %v10092_v5  ;;  %10095 = vst [vmem:[#allocation126_spill] sm:$0xff] %v6741_v19  ;;  %v968_v32 = vadd.f32 0.001143296, %v967_v57  ;;  %v2281_v36 = vadd.f32 0.05243302, %v2280_v24  ;;  %v1398_v1 = vmul.f32 %v1397_v59, %v6628_v33 }
 0x279   :  { %v1130_v26 = vadd.f32 0.014752088, %v1129_v23  ;;  %v1478_v56 = vmul.f32 %v1477_v16, %v6630_v15  ;;  %v1558_v14 = vmul.f32 %v1557_v37, %v6632_v21  ;;  %v2242_v9 = vmul.f32 %v2241_v49, %v6640_v28 }
 0x27a   :  { %v1050_v4 = vadd.f32 0.014752088, %v1049_v39  ;;  %v1638_v18 = vmul.f32 %v1637_v0, %v6636_v38  ;;  %v1167_v17 = vmul.f32 3.8918573e-05, %v6619_v22  ;;  %v1718_v13 = vmul.f32 %v1717_v52, %v6638_v20 }
 0x27b   :  { %v1131_v47 = vmul.f32 %v1130_v26, %v6046_v55  ;;  %v1798_v46 = vmul.f32 %v1797_v41, %v6643_v53  ;;  %v1878_v57 = vmul.f32 %v1877_v29, %v6647_v8  ;;  %v999_v24 = vadd.f32 0.0036580483, %v998_v44 }
 0x27c   :  { %v1051_v59 = vmul.f32 %v1050_v4, %v10092_v5  ;;  %v1168_v23 = vadd.f32 0.001143296, %v1167_v17  ;;  %v969_v37 = vmul.f32 %v968_v32, %v6044_v60  ;;  %v2282_v49 = vmul.f32 %v2281_v36, %v6645_v6 }
 0x27d   :  { %v1132_v16 = vadd.f32 0.112945676, %v1131_v47  ;;  %v1079_v0 = vadd.f32 0.0036580483, %v1078_v27  ;;  %v1159_v39 = vadd.f32 0.0036580483, %v1158_v58  ;;  %v1958_v4 = vmul.f32 %v1957_v35, %v6654_v45 }
 0x27e   :  { %v1052_v26 = vadd.f32 0.112945676, %v1051_v59  ;;  %v2243_v40 = vadd.f32 0.18741608, %v2242_v9  ;;  %v1239_v61 = vadd.f32 0.0036580483, %v1238_v12  ;;  %v1169_v41 = vmul.f32 %v1168_v23, %v6619_v22 }
 0x27f   :  { %v1133_v52 = vmul.f32 %v1132_v16, %v6046_v55  ;;  %v1319_v7 = vadd.f32 0.0036580483, %v1318_v3  ;;  %v1399_v29 = vadd.f32 0.0036580483, %v1398_v1  ;;  %v1479_v50 = vadd.f32 0.0036580483, %v1478_v56 }
 0x280   :  { %v1053_v44 = vmul.f32 %v1052_v26, %v10092_v5  ;;  %v1170_v32 = vadd.f32 0.014752088, %v1169_v41  ;;  %v970_v17 = vadd.f32 0.014752088, %v969_v37  ;;  %v2283_v36 = vadd.f32 0.18741608, %v2282_v49 }
 0x281   :  { %v1134_v47 = vadd.f32 0.4994258, %v1133_v52  ;;  %v2038_v27 = vmul.f32 %v2037_v31, %v6656_v30  ;;  %v1287_v12 = vmul.f32 3.8918573e-05, %v6050_v2  ;;  %v2244_v9 = vmul.f32 %v2243_v40, %v6640_v28 }
 0x282   :  { %v1054_v58 = vadd.f32 0.4994258, %v1053_v44  ;;  %v1559_v59 = vadd.f32 0.0036580483, %v1558_v14  ;;  %v1171_v1 = vmul.f32 %v1170_v32, %v6619_v22  ;;  %v1639_v56 = vadd.f32 0.0036580483, %v1638_v18 }
 0x283   :  { %v1135_v3 = vmul.f32 %v1134_v47, %v6046_v55  ;;  %v6768_v16 = vadd.f32 0.0036580483, %v1718_v13  ;;  %v1160_v35 = vmul.f32 %v1159_v39, %v6619_v22  ;;  %v1000_v37 = vmul.f32 %v999_v24, %v6608_v54 }
 0x284   :  { %v1055_v23 = vmul.f32 %v1054_v58, %v10092_v5  ;;  %v1172_v49 = vadd.f32 0.112945676, %v1171_v1  ;;  %v971_v26 = vmul.f32 %v970_v17, %v6044_v60  ;;  %v2284_v40 = vmul.f32 %v2283_v36, %v6645_v6 }
 0x285   :  { %v6773_v31 = vadd.f32 1.0, %v1135_v3  ;;  %v1799_v14 = vadd.f32 0.0036580483, %v1798_v46  ;;  %v1288_v52 = vadd.f32 0.001143296, %v1287_v12  ;;  %v1080_v24 = vmul.f32 %v1079_v0, %v6614_v34 }
 0x286   :  { %v6777_v55 = vadd.f32 1.0, %v1055_v23  ;;  %v2245_v18 = vadd.f32 1.1283791, %v2244_v9  ;;  %v6779_v13 = vadd.f32 0.0036580483, %v1878_v57  ;;  %v1173_v44 = vmul.f32 %v1172_v49, %v6619_v22 }
 0x287   :  { %v1959_v41 = vadd.f32 0.0036580483, %v1958_v4  ;;  %4957 = vrcp.f32 %v6773_v31  ;;  %v6782_v5 = vadd.f32 0.0036580483, %v2038_v27  ;;  %v1161_v39 = vadd.f32 0.05243302, %v1160_v35 }
 0x288   :  { %v1240_v47 = vmul.f32 %v1239_v61, %v6624_v11  ;;  %v1320_v46 = vmul.f32 %v1319_v7, %v6626_v63  ;;  %4959 = vrcp.f32 %v6777_v55  ;;  %v972_v32 = vadd.f32 0.112945676, %v971_v26 }
 0x289   :  { %10096 = vst [vmem:[#allocation127_spill] sm:$0xff] %v6782_v5  ;;  %v2285_v17 = vadd.f32 1.1283791, %v2284_v40  ;;  %v1400_v57 = vmul.f32 %v1399_v29, %v6628_v33  ;;  %v1174_v4 = vadd.f32 0.4994258, %v1173_v44  ;;  %v1289_v36 = vmul.f32 %v1288_v52, %v6050_v2 }
 0x28a   :  { %v6792_v27 = vmul.f32 %v2245_v18, %v6590_v10  ;;  %v1480_v0 = vmul.f32 %v1479_v50, %v6630_v15  ;;  %v1560_v58 = vmul.f32 %v1559_v59, %v6632_v21  ;;  %v1640_v61 = vmul.f32 %v1639_v56, %v6636_v38 }
 0x28b   :  { %v1800_v7 = vmul.f32 %v1799_v14, %v6643_v53  ;;  %v1001_v12 = vadd.f32 0.05243302, %v1000_v37  ;;  %v1162_v9 = vmul.f32 %v1161_v39, %v6619_v22  ;;  %v1175_v3 = vmul.f32 %v1174_v4, %v6619_v22 }
 0x28c   :  { %v1081_v1 = vadd.f32 0.05243302, %v1080_v24  ;;  %v1241_v35 = vadd.f32 0.05243302, %v1240_v47  ;;  %v1321_v23 = vadd.f32 0.05243302, %v1320_v46  ;;  %v973_v10 = vmul.f32 %v972_v32, %v6044_v60 }
 0x28d   :  { %v4958_v29 = vpop.eup %4957  ;;  %v1401_v49 = vadd.f32 0.05243302, %v1400_v57  ;;  %v6802_v26 = vadd.f32 1.0, %v1175_v3  ;;  %v1290_v59 = vadd.f32 0.014752088, %v1289_v36  ;;  %v1960_v37 = vmul.f32 %v1959_v41, %v6654_v45 }
 0x28e   :  { %v1138_v50 = vmul.f32 %v4958_v29, %v6773_v31  ;;  %v6804_v56 = vpop.eup %4959  ;;  %v1481_v40 = vadd.f32 0.05243302, %v1480_v0  ;;  %v1561_v14 = vadd.f32 0.05243302, %v1560_v58  ;;  %v1641_v52 = vadd.f32 0.05243302, %v1640_v61 }
 0x28f   :  { %v6807_v18 = vadd.f32 0.05243302, %v1800_v7  ;;  %v1163_v39 = vadd.f32 0.18741608, %v1162_v9  ;;  %4961 = vrcp.f32 %v6802_v26  ;;  %v6811_v44 = vmul.f32 %v2285_v17, %v6596_v42  ;;  %v6834_v7 = vld [vmem:[%s9790_s4] sm:$0xff] }
 0x290   :  { %v1139_v24 = vsub.f32 1.0, %v1138_v50  ;;  %v1146_v47 = vand.u32 2147483647, %v6773_v31  ;;  %v1148_v46 = vand.u32 2147483648, %v6773_v31  ;;  %v974_v32 = vadd.f32 0.4994258, %v973_v10 }
 0x291   :  { %vm1143_vm1 = vweird.f32 %v4958_v29  ;;  %v1058_v41 = vmul.f32 %v6804_v56, %v6777_v55  ;;  %v1291_v4 = vmul.f32 %v1290_v59, %v6050_v2  ;;  %v6818_v36 = vadd.f32 0.05243302, %v1960_v37 }
 0x292   :  { %v1140_v57 = vmul.f32 %v4958_v29, %v1139_v24  ;;  %v6821_v0 = vmul.f32 %v1001_v12, %v6608_v54  ;;  %v6824_v42 = vmul.f32 %v1081_v1, %v6614_v34  ;;  %v6827_v17 = vmul.f32 %v1241_v35, %v6624_v11 }
 0x293   :  { %vm1142_vm2 = vweird.f32 %v6773_v31  ;;  %v1164_v61 = vmul.f32 %v1163_v39, %v6619_v22  ;;  %v1087_v9 = vmul.f32 3.8918573e-05, %v6614_v34  ;;  %v6838_v12 = vmul.f32 %v1321_v23, %v6626_v63 }
 0x294   :  { %v1141_v58 = vadd.f32 %v4958_v29, %v1140_v57  ;;  %vm1144_vm3 = vmor %vm1142_vm2, %vm1143_vm1  ;;  %vm1147_vm4 = vcmp.eq.f32.partialorder %v1146_v47, 8.507059e+37  ;;  %v1149_v3 = vor.u32 1.1754944e-38, %v1148_v46  ;;  %v975_v1 = vmul.f32 %v974_v32, %v6044_v60  ;;  %v10097_v32 = vld [vmem:[#allocation70_spill] sm:$0xff] }
 0x295   :  { %v4962_v35 = vpop.eup %4961  ;;  %v1059_v31 = vsub.f32 1.0, %v1058_v41  ;;  %v1088_v50 = vadd.f32 0.001143296, %v1087_v9  ;;  %v1292_v22 = vadd.f32 0.112945676, %v1291_v4  ;;  %v6842_v59 = vmul.f32 %v1401_v49, %v6628_v33  ;;  %v6860_v41 = vld [vmem:[%s9790_s4 + $0x8] sm:$0xff] }
 0x296   :  { %v1145_v10 = vsel %vm1144_vm3, %v4958_v29, %v1141_v58  ;;  %v1178_v24 = vmul.f32 %v4962_v35, %v6802_v26  ;;  %v3662_v39 = vunpack.c.2.s8 %v6834_v7  ;;  %v6847_v23 = vmul.f32 %v1481_v40, %v6630_v15 }
 0x297   :  { %v1150_v37 = vsel %vm1147_vm4, %v1149_v3, %v1145_v10  ;;  %v6850_v47 = vmul.f32 %v1561_v14, %v6632_v21  ;;  %v1165_v60 = vadd.f32 1.1283791, %v1164_v61  ;;  %v1089_v29 = vmul.f32 %v1088_v50, %v6614_v34  ;;  %v10098_v10 = vld [vmem:[#allocation91_spill] sm:$0xff] }
 0x298   :  { %v6854_v46 = vmul.f32 %v1641_v52, %v6636_v38  ;;  %v1151_v49 = vmul.f32 %v1150_v37, %v10097_v32  ;;  %v1179_v57 = vsub.f32 1.0, %v1178_v24  ;;  %v6862_v4 = vadd.f32 1.0, %v975_v1 }
 0x299   :  { %v1188_v40 = vand.u32 2147483648, %v6802_v26  ;;  %v1060_v14 = vmul.f32 %v6804_v56, %v1059_v31  ;;  %v1090_v58 = vadd.f32 0.014752088, %v1089_v29  ;;  %v1293_v61 = vmul.f32 %v1292_v22, %v6050_v2 }
 0x29a   :  { %v1180_v9 = vmul.f32 %v4962_v35, %v1179_v57  ;;  %vm1183_vm5 = vweird.f32 %v4962_v35  ;;  %v1186_v52 = vand.u32 2147483647, %v6802_v26  ;;  %v3726_v3 = vcvt.s32.f32 %v3662_v39 }
 0x29b   :  { %v1166_v50 = vmul.f32 %v1165_v60, %v10098_v10  ;;  %v3663_v37 = vunpack.c.2.s8 %v6860_v41  ;;  %v1091_v24 = vmul.f32 %v1090_v58, %v6614_v34  ;;  %v1294_v1 = vadd.f32 0.4994258, %v1293_v61 }
 0x29c   :  { %v4866_v32 = vclamps-f32 %v1151_v49, 1.0  ;;  %v1181_v25 = vadd.f32 %v4962_v35, %v1180_v9  ;;  %vm1182_vm6 = vweird.f32 %v6802_v26  ;;  %4963 = vrcp.f32 %v6862_v4 }
 0x29d   :  { %vm1184_vm7 = vmor %vm1182_vm6, %vm1183_vm5  ;;  %v1189_v31 = vor.u32 1.1754944e-38, %v1188_v40  ;;  %v1061_v22 = vadd.f32 %v6804_v56, %v1060_v14  ;;  %vm1063_vm8 = vweird.f32 %v6804_v56  ;;  %v1092_v39 = vadd.f32 0.112945676, %v1091_v24 }
 0x29e   :  { %v1185_v29 = vsel %vm1184_vm7, %v4962_v35, %v1181_v25  ;;  %vm1187_vm9 = vcmp.eq.f32.partialorder %v1186_v52, 8.507059e+37  ;;  %v1068_v60 = vand.u32 2147483648, %v6777_v55  ;;  %v1295_v57 = vmul.f32 %v1294_v1, %v6050_v2  ;;  %v10101_v25 = vld [vmem:[#allocation44_spill] sm:$0xff] }
 0x29f   :  { %v1190_v58 = vsel %vm1187_vm9, %v1189_v31, %v1185_v29  ;;  %vm1062_vm10 = vweird.f32 %v6777_v55  ;;  %v1066_v26 = vand.u32 2147483647, %v6777_v55  ;;  %v1093_v49 = vmul.f32 %v1092_v39, %v6614_v34 }
 0x2a0   :  { %v1802_v40 = vmul.f32 %v6807_v18, %v6643_v53  ;;  %v1191_v14 = vmul.f32 %v1190_v58, %v1166_v50  ;;  %v3518_v61 = vadd.f32 1.0, %v4866_v32  ;;  %vm6882_vm11 = vmor %vm1062_vm10, %vm1063_vm8  ;;  %v1527_v35 = vmul.f32 3.8918573e-05, %v10101_v25 }
 0x2a1   :  { %v3727_v52 = vcvt.s32.f32 %v3663_v37  ;;  %v1065_v2 = vsel %vm6882_vm11, %v6804_v56, %v1061_v22  ;;  %v1094_v10 = vadd.f32 0.4994258, %v1093_v49  ;;  %v3660_v55 = vunpack.c.1.s8 %v6834_v7  ;;  %v10102_v56 = vld [vmem:[#allocation38_spill] sm:$0xff] }
 0x2a2   :  { %v6891_v24 = vpop.eup %4963  ;;  %v4867_v1 = vclamps-f32 %v1191_v14, 1.0  ;;  %v1083_v18 = vadd.f32 0.18741608, %v6824_v42  ;;  %v1069_v50 = vor.u32 1.1754944e-38, %v1068_v60  ;;  %v6894_v32 = vadd.f32 1.0, %v1295_v57  ;;  %v10103_v60 = vld [vmem:[#allocation15_spill] sm:$0xff] }
 0x2a3   :  { %v1962_v31 = vmul.f32 %v6818_v36, %v6654_v45  ;;  %vm3790_vm12 = vcmp.gt.f32.partialorder %v3726_v3, 0.0  ;;  %vm1067_vm13 = vcmp.eq.f32.partialorder %v1066_v26, 8.507059e+37  ;;  %v1095_v37 = vmul.f32 %v1094_v10, %v6614_v34 }
 0x2a4   :  { %v3519_v39 = vadd.f32 1.0, %v4867_v1  ;;  %v3582_v22 = vmul.f32 %v3518_v61, %v10102_v56  ;;  %v1070_v29 = vsel %vm1067_vm13, %v1069_v50, %v1065_v2  ;;  %v1528_v58 = vadd.f32 0.001143296, %v1527_v35  ;;  %v10104_v35 = vld [vmem:[#allocation62_spill] sm:$0xff] }
 0x2a5   :  { %vm3791_vm14 = vcmp.gt.f32.partialorder %v3727_v52, 0.0  ;;  %v6900_v49 = vadd.f32 1.0, %v1095_v37  ;;  %v6902_v14 = vcvt.s32.f32 %v3660_v55  ;;  %v978_v42 = vmul.f32 %v6891_v24, %v6862_v4 }
 0x2a6   :  { %v3583_v57 = vmul.f32 %v3519_v39, %v10103_v60  ;;  %v6908_v36 = vadd.f32 0.18741608, %v6821_v0  ;;  %v1084_v26 = vmul.f32 %v1083_v18, %v6614_v34  ;;  %4965 = vrcp.f32 %v6894_v32 }
 0x2a7   :  { %v6913_v61 = vadd.f32 0.18741608, %v6827_v17  ;;  %v6916_v9 = vadd.f32 0.18741608, %v6838_v12  ;;  %v1071_v52 = vmul.f32 %v1070_v29, %v10104_v35  ;;  %4967 = vrcp.f32 %v6900_v49 }
 0x2a8   :  { %v6921_v2 = vsel %vm3790_vm12, %v3582_v22, -1e+30  ;;  %v6923_v10 = vsel %vm3791_vm14, %v3583_v57, -1e+30  ;;  %v1007_v0 = vmul.f32 3.8918573e-05, %v6608_v54  ;;  %v1529_v34 = vmul.f32 %v1528_v58, %v10101_v25 }
 0x2a9   :  { %10105 = vst [vmem:[#allocation70_spill] sm:$0xff] %v6921_v2  ;;  %v3920_v17 = vmax.f32 %v6921_v2, %v6923_v10  ;;  %v6930_v55 = vadd.f32 0.18741608, %v6842_v59  ;;  %v6933_v12 = vadd.f32 0.18741608, %v6847_v23  ;;  %v979_v1 = vsub.f32 1.0, %v978_v42 }
 0x2aa   :  { %10106 = vst [vmem:[#allocation91_spill] sm:$0xff] %v6923_v10  ;;  %v6936_v3 = vadd.f32 0.18741608, %v6850_v47  ;;  %v1085_v18 = vadd.f32 1.1283791, %v1084_v26  ;;  %v3658_v37 = vunpack.c.0.s8 %v6834_v7  ;;  %v6941_v39 = vmul.f32 %v6768_v16, %v6638_v20  ;;  %v10108_v26 = vld [vmem:[#allocation90_spill] sm:$0xff] }
 0x2ab   :  { %v1008_v50 = vadd.f32 0.001143296, %v1007_v0  ;;  %3921 = vmax.xlane.f32.xlu2 %v3920_v17  ;;  %v6944_v56 = vadd.f32 0.18741608, %v6854_v46  ;;  %v6946_v59 = vadd.f32 0.18741608, %v1802_v40  ;;  %v980_v46 = vmul.f32 %v6891_v24, %v979_v1 }
 0x2ac   :  { %v4864_v23 = vclamps-f32 %v1071_v52, 1.0  ;;  %v6948_v22 = vpop.eup %4965  ;;  %vm3788_vm15 = vcmp.gt.f32.partialorder %v6902_v14, 0.0  ;;  %v986_v47 = vand.u32 2147483647, %v6862_v4  ;;  %v988_v29 = vand.u32 2147483648, %v6862_v4  ;;  %v10107_v40 = vld [vmem:[#allocation26_spill] sm:$0xff] }
 0x2ad   :  { %v1009_v58 = vmul.f32 %v1008_v50, %v6608_v54  ;;  %v1530_v42 = vadd.f32 0.014752088, %v1529_v34  ;;  %v4968_v16 = vpop.eup %4967  ;;  %v6954_v60 = vadd.f32 0.18741608, %v1962_v31  ;;  %vm982_vm1 = vweird.f32 %v6862_v4 }
 0x2ae   :  { %v1207_v57 = vmul.f32 3.8918573e-05, %v10107_v40  ;;  %v1086_v35 = vmul.f32 %v1085_v18, %v10108_v26  ;;  %v1098_v52 = vmul.f32 %v4968_v16, %v6900_v49  ;;  %v6961_v17 = vcvt.s32.f32 %v3658_v37 }
 0x2af   :  { %v1010_v0 = vadd.f32 0.014752088, %v1009_v58  ;;  %v3516_v10 = vadd.f32 1.0, %v4864_v23  ;;  %v1298_v34 = vmul.f32 %v6948_v22, %v6894_v32  ;;  %v1531_v31 = vmul.f32 %v1530_v42, %v10101_v25  ;;  %v6978_v42 = vld [vmem:[%s9790_s4 + $0x10] sm:$0xff] }
 0x2b0   :  { %v1208_v50 = vadd.f32 0.001143296, %v1207_v57  ;;  %v1099_v2 = vsub.f32 1.0, %v1098_v52  ;;  %vm983_vm2 = vweird.f32 %v6891_v24  ;;  %vm6967_vm3 = vcmp.eq.f32.partialorder %v986_v47, 8.507059e+37 }
 0x2b1   :  { %v989_v18 = vor.u32 1.1754944e-38, %v988_v29  ;;  %v1011_v26 = vmul.f32 %v1010_v0, %v6608_v54  ;;  %v1108_v37 = vand.u32 2147483648, %v6900_v49  ;;  %v3661_v23 = vunpack.c.1.s8 %v6860_v41  ;;  %v10111_v29 = vld [vmem:[#allocation42_spill] sm:$0xff]  ;;  %vm6989_vm6 = vmor %vm982_vm1, %vm983_vm2 }
 0x2b2   :  { %v981_v58 = vadd.f32 %v6891_v24, %v980_v46  ;;  %v1532_v57 = vadd.f32 0.112945676, %v1531_v31  ;;  %v1100_v52 = vmul.f32 %v4968_v16, %v1099_v2  ;;  %vm1103_vm4 = vweird.f32 %v4968_v16 }
 0x2b3   :  { %v1106_v47 = vand.u32 2147483647, %v6900_v49  ;;  %v1012_v48 = vadd.f32 0.112945676, %v1011_v26  ;;  %v3580_v19 = vmul.f32 %v3516_v10, %v10111_v29  ;;  %v1299_v0 = vsub.f32 1.0, %v1298_v34 }
 0x2b4   :  { %v1533_v43 = vmul.f32 %v1532_v57, %v10101_v25  ;;  %v1209_v51 = vmul.f32 %v1208_v50, %v10107_v40  ;;  %v1101_v5 = vadd.f32 %v4968_v16, %v1100_v52  ;;  %vm1102_vm5 = vweird.f32 %v6900_v49  ;;  %v10114_v49 = vld [vmem:[#allocation22_spill] sm:$0xff] }
 0x2b5   :  { %v1013_v46 = vmul.f32 %v1012_v48, %v6608_v54  ;;  %vm1104_vm7 = vmor %vm1102_vm5, %vm1103_vm4  ;;  %v1109_v34 = vor.u32 1.1754944e-38, %v1108_v37  ;;  %v3725_v31 = vcvt.s32.f32 %v3661_v23  ;;  %v985_v50 = vsel %vm6989_vm6, %v6891_v24, %v981_v58 }
 0x2b6   :  { %v1367_v26 = vmul.f32 3.8918573e-05, %v10114_v49  ;;  %v1105_v57 = vsel %vm1104_vm7, %v4968_v16, %v1101_v5  ;;  %vm1107_vm8 = vcmp.eq.f32.partialorder %v1106_v47, 8.507059e+37  ;;  %v1534_v52 = vadd.f32 0.4994258, %v1533_v43 }
 0x2b7   :  { %v1014_v4 = vadd.f32 0.4994258, %v1013_v46  ;;  %v1110_v29 = vsel %vm1107_vm8, %v1109_v34, %v1105_v57  ;;  %v7001_v30 = vsel %vm3788_vm15, %v3580_v19, -1e+30  ;;  %v1300_v48 = vmul.f32 %v6948_v22, %v1299_v0 }
 0x2b8   :  { %v1210_v10 = vadd.f32 0.014752088, %v1209_v51  ;;  %v1111_v37 = vmul.f32 %v1110_v29, %v1086_v35  ;;  %vm1302_vm9 = vweird.f32 %v6894_v32  ;;  %v1306_v24 = vand.u32 2147483647, %v6894_v32 }
 0x2b9   :  { %v1015_v23 = vmul.f32 %v1014_v4, %v6608_v54  ;;  %vm3789_vm10 = vcmp.gt.f32.partialorder %v3725_v31, 0.0  ;;  %v990_v5 = vsel %vm6967_vm3, %v989_v18, %v985_v50  ;;  %v1308_v43 = vand.u32 2147483648, %v6894_v32 }
 0x2ba   :  { %v1368_v16 = vadd.f32 0.001143296, %v1367_v26  ;;  %v4865_v14 = vclamps-f32 %v1111_v37, 1.0  ;;  %v1004_v19 = vmul.f32 %v6908_v36, %v6608_v54  ;;  %v1535_v51 = vmul.f32 %v1534_v52, %v10101_v25  ;;  %v10115_v54 = vld [vmem:[#allocation68_spill] sm:$0xff] }
 0x2bb   :  { %v7012_v58 = vadd.f32 1.0, %v1015_v23  ;;  %v7017_v35 = vmul.f32 %v6913_v61, %v6624_v11  ;;  %v1301_v47 = vadd.f32 %v6948_v22, %v1300_v48  ;;  %vm1303_vm11 = vweird.f32 %v6948_v22 }
 0x2bc   :  { %v1211_v1 = vmul.f32 %v1210_v10, %v10107_v40  ;;  %v3517_v18 = vadd.f32 1.0, %v4865_v14  ;;  %v7024_v0 = vmul.f32 %v6916_v9, %v6626_v63  ;;  %v991_v36 = vmul.f32 %v990_v5, %v10115_v54  ;;  %v10116_v10 = vld [vmem:[#allocation13_spill] sm:$0xff]  ;;  %vm7045_vm12 = vmor %vm1302_vm9, %vm1303_vm11 }
 0x2bd   :  { %4969 = vrcp.f32 %v7012_v58  ;;  %v7030_v25 = vmul.f32 %v6930_v55, %v6628_v33  ;;  %v7034_v61 = vmul.f32 %v6933_v12, %v6630_v15  ;;  %v1327_v2 = vmul.f32 3.8918573e-05, %v6626_v63  ;;  %v10119_v12 = vld [vmem:[#allocation36_spill] sm:$0xff] }
 0x2be   :  { %v1369_v46 = vmul.f32 %v1368_v16, %v10114_v49  ;;  %v3581_v34 = vmul.f32 %v3517_v18, %v10116_v10  ;;  %v7041_v9 = vmul.f32 %v6936_v3, %v6632_v21  ;;  %v7049_v55 = vadd.f32 1.0, %v1535_v51 }
 0x2bf   :  { %v1447_v26 = vmul.f32 3.8918573e-05, %v10119_v12  ;;  %v7054_v57 = vmul.f32 %v6944_v56, %v6636_v38  ;;  %v1305_v4 = vsel %vm7045_vm12, %v6948_v22, %v1301_v47  ;;  %v1328_v3 = vadd.f32 0.001143296, %v1327_v2 }
 0x2c0   :  { %v1212_v52 = vadd.f32 0.112945676, %v1211_v1  ;;  %v7060_v32 = vsel %vm3789_vm10, %v3581_v34, -1e+30  ;;  %v4862_v29 = vclamps-f32 %v991_v36, 1.0  ;;  %v1309_v48 = vor.u32 1.1754944e-38, %v1308_v43 }
 0x2c1   :  { %4971 = vrcp.f32 %v7049_v55  ;;  %v3917_v37 = vmax.f32 %v7001_v30, %v7060_v32  ;;  %vm3786_vm13 = vcmp.gt.f32.partialorder %v6961_v17, 0.0  ;;  %vm1307_vm14 = vcmp.eq.f32.partialorder %v1306_v24, 8.507059e+37 }
 0x2c2   :  { %v1329_v56 = vmul.f32 %v1328_v3, %v6626_v63  ;;  %v1370_v23 = vadd.f32 0.014752088, %v1369_v46  ;;  %v7069_v22 = vmul.f32 %v6946_v59, %v6643_v53  ;;  %v1310_v31 = vsel %vm1307_vm14, %v1309_v48, %v1305_v4  ;;  %v10121_v46 = vld [vmem:[#allocation79_spill] sm:$0xff] }
 0x2c3   :  { %v4970_v5 = vpop.eup %4969  ;;  %v1213_v16 = vmul.f32 %v1212_v52, %v10107_v40  ;;  %v1448_v43 = vadd.f32 0.001143296, %v1447_v26  ;;  %3918 = vmax.xlane.f32.xlu1 %v3917_v37  ;;  %v7074_v14 = vmul.f32 %v6954_v60, %v6654_v45  ;;  %v1005_v51 = vadd.f32 1.1283791, %v1004_v19  ;;  %v10122_v37 = vld [vmem:[#allocation37_spill] sm:$0xff] }
 0x2c4   :  { %v1018_v24 = vmul.f32 %v4970_v5, %v7012_v58  ;;  %v1330_v47 = vadd.f32 0.014752088, %v1329_v56  ;;  %v3514_v1 = vadd.f32 1.0, %v4862_v29  ;;  %v3659_v18 = vunpack.c.0.s8 %v6860_v41 }
 0x2c5   :  { %v10120_v54 = vunpack.c.0.s8 %v6978_v42  ;;  %v1214_v36 = vadd.f32 0.4994258, %v1213_v16  ;;  %v1311_v10 = vmul.f32 %v1310_v31, %v10121_v46  ;;  %v1371_v60 = vmul.f32 %v1370_v23, %v10114_v49 }
 0x2c6   :  { %v1019_v2 = vsub.f32 1.0, %v1018_v24  ;;  %v1331_v34 = vmul.f32 %v1330_v47, %v6626_v63  ;;  %v1026_v19 = vand.u32 2147483647, %v7012_v58  ;;  %v1028_v26 = vand.u32 2147483648, %v7012_v58 }
 0x2c7   :  { %v7080_v59 = vcvt.s32.f32 %v10120_v54  ;;  %v7085_v50 = vpop.eup %4971  ;;  %v1215_v4 = vmul.f32 %v1214_v36, %v10107_v40  ;;  %v1449_v3 = vmul.f32 %v1448_v43, %v10119_v12  ;;  %vm1023_vm15 = vweird.f32 %v4970_v5 }
 0x2c8   :  { %v1020_v52 = vmul.f32 %v4970_v5, %v1019_v2  ;;  %v1332_v29 = vadd.f32 0.112945676, %v1331_v34  ;;  %v1538_v48 = vmul.f32 %v7085_v50, %v7049_v55  ;;  %vm1022_vm1 = vweird.f32 %v7012_v58  ;;  %v10123_v2 = vld [vmem:[#allocation88_spill] sm:$0xff] }
 0x2c9   :  { %v3578_v56 = vmul.f32 %v3514_v1, %v10122_v37  ;;  %v3723_v23 = vcvt.s32.f32 %v3659_v18  ;;  %v7095_v31 = vadd.f32 1.0, %v1215_v4  ;;  %v1372_v40 = vadd.f32 0.112945676, %v1371_v60  ;;  %vm1024_vm2 = vmor %vm1022_vm1, %vm1023_vm15 }
 0x2ca   :  { %v1021_v16 = vadd.f32 %v4970_v5, %v1020_v52  ;;  %v1333_v24 = vmul.f32 %v1332_v29, %v6626_v63  ;;  %v1539_v47 = vsub.f32 1.0, %v1538_v48  ;;  %v1029_v43 = vor.u32 1.1754944e-38, %v1028_v26 }
 0x2cb   :  { %v4870_v54 = vclamps-f32 %v1311_v10, 1.0  ;;  %4973 = vrcp.f32 %v7095_v31  ;;  %v1450_v36 = vadd.f32 0.014752088, %v1449_v3  ;;  %v1006_v46 = vmul.f32 %v1005_v51, %v10123_v2 }
 0x2cc   :  { %v1025_v34 = vsel %vm1024_vm2, %v4970_v5, %v1021_v16  ;;  %vm1027_vm3 = vcmp.eq.f32.partialorder %v1026_v19, 8.507059e+37  ;;  %v1334_v58 = vadd.f32 0.4994258, %v1333_v24  ;;  %vm3787_vm4 = vcmp.gt.f32.partialorder %v3723_v23, 0.0  ;;  %v10124_v16 = vld [vmem:[#allocation39_spill] sm:$0xff] }
 0x2cd   :  { %v1030_v1 = vsel %vm1027_vm3, %v1029_v43, %v1025_v34  ;;  %v7102_v18 = vsel %vm3786_vm13, %v3578_v56, -1e+30  ;;  %v7105_v4 = vadd.f32 1.1283791, %v7017_v35  ;;  %vm3794_vm5 = vcmp.gt.f32.partialorder %v7080_v59, 0.0  ;;  %v10125_v43 = vld [vmem:[#allocation20_spill] sm:$0xff] }
 0x2ce   :  { %v1031_v10 = vmul.f32 %v1030_v1, %v1006_v46  ;;  %v1335_v60 = vmul.f32 %v1334_v58, %v6626_v63  ;;  %v1540_v26 = vmul.f32 %v7085_v50, %v1539_v47  ;;  %v1373_v5 = vmul.f32 %v1372_v40, %v10114_v49  ;;  %v10126_v34 = vld [vmem:[#allocation93_spill] sm:$0xff] }
 0x2cf   :  { %v1325_v51 = vadd.f32 1.1283791, %v7024_v0  ;;  %v7113_v19 = vadd.f32 1.1283791, %v7030_v25  ;;  %v3522_v17 = vadd.f32 1.0, %v4870_v54  ;;  %v1451_v3 = vmul.f32 %v1450_v36, %v10119_v12 }
 0x2d0   :  { %v4863_v52 = vclamps-f32 %v1031_v10, 1.0  ;;  %v7117_v35 = vadd.f32 1.1283791, %v7034_v61  ;;  %v7120_v29 = vadd.f32 1.1283791, %v7041_v9  ;;  %v7122_v63 = vadd.f32 1.0, %v1335_v60 }
 0x2d1   :  { %v7124_v48 = vpop.eup %4973  ;;  %v7127_v37 = vadd.f32 1.1283791, %v7054_v57  ;;  %vm1543_vm6 = vweird.f32 %v7085_v50  ;;  %v1567_v0 = vmul.f32 3.8918573e-05, %v6632_v21  ;;  %v3672_v25 = vunpack.c.3.s8 %v6978_v42 }
 0x2d2   :  { %v3515_v56 = vadd.f32 1.0, %v4863_v52  ;;  %4975 = vrcp.f32 %v7122_v63  ;;  %v1541_v61 = vadd.f32 %v7085_v50, %v1540_v26  ;;  %v1374_v9 = vadd.f32 0.4994258, %v1373_v5 }
 0x2d3   :  { %v3586_v24 = vmul.f32 %v3522_v17, %v10124_v16  ;;  %v1568_v47 = vadd.f32 0.001143296, %v1567_v0  ;;  %v1218_v40 = vmul.f32 %v7124_v48, %v7095_v31  ;;  %v1452_v57 = vadd.f32 0.112945676, %v1451_v3  ;;  %v7167_v17 = vld [vmem:[%s9790_s4 + $0x18] sm:$0xff] }
 0x2d4   :  { %v3579_v54 = vmul.f32 %v3515_v56, %v10125_v43  ;;  %vm1542_vm7 = vweird.f32 %v7049_v55  ;;  %v1546_v36 = vand.u32 2147483647, %v7049_v55  ;;  %v1548_v2 = vand.u32 2147483648, %v7049_v55 }
 0x2d5   :  { %v7142_v46 = vadd.f32 1.1283791, %v7069_v22  ;;  %v1326_v58 = vmul.f32 %v1325_v51, %v10126_v34  ;;  %vm7147_vm8 = vmor %vm1542_vm7, %vm1543_vm6  ;;  %v1569_v10 = vmul.f32 %v1568_v47, %v6632_v21  ;;  %v3664_v60 = vunpack.c.3.s8 %v6834_v7 }
 0x2d6   :  { %v7154_v26 = vsel %vm3787_vm4, %v3579_v54, -1e+30  ;;  %v1545_v55 = vsel %vm7147_vm8, %v7085_v50, %v1541_v61  ;;  %v7159_v22 = vcvt.s32.f32 %v3672_v25  ;;  %v1375_v5 = vmul.f32 %v1374_v9, %v10114_v49  ;;  %v10129_v9 = vld [vmem:[#allocation27_spill] sm:$0xff] }
 0x2d7   :  { %v3914_v51 = vmax.f32 %v7102_v18, %v7154_v26  ;;  %v1570_v7 = vadd.f32 0.014752088, %v1569_v10  ;;  %v1219_v23 = vsub.f32 1.0, %v1218_v40  ;;  %v1453_v3 = vmul.f32 %v1452_v57, %v10119_v12  ;;  %v10130_v10 = vld [vmem:[#allocation80_spill] sm:$0xff] }
 0x2d8   :  { %v4976_v52 = vpop.eup %4975  ;;  %v7172_v50 = vsel %vm3794_vm5, %v3586_v24, -1e+30  ;;  %vm1547_vm9 = vcmp.eq.f32.partialorder %v1546_v36, 8.507059e+37  ;;  %v1549_v0 = vor.u32 1.1754944e-38, %v1548_v2  ;;  %v7174_v49 = vadd.f32 1.0, %v1375_v5 }
 0x2d9   :  { %3915 = vmax.xlane.f32.xlu0 %v3914_v51  ;;  %v1338_v25 = vmul.f32 %v4976_v52, %v7122_v63  ;;  %v1571_v56 = vmul.f32 %v1570_v7, %v6632_v21  ;;  %v7178_v61 = vcvt.s32.f32 %v3664_v60  ;;  %v1607_v16 = vmul.f32 3.8918573e-05, %v10129_v9 }
 0x2da   :  { %v3667_v47 = vunpack.c.0.s8 %v7167_v17  ;;  %v1550_v40 = vsel %vm1547_vm9, %v1549_v0, %v1545_v55  ;;  %vm1222_vm10 = vweird.f32 %v7095_v31  ;;  %4977 = vrcp.f32 %v7174_v49 }
 0x2db   :  { %v1339_v59 = vsub.f32 1.0, %v1338_v25  ;;  %v1572_v24 = vadd.f32 0.112945676, %v1571_v56  ;;  %v1220_v57 = vmul.f32 %v7124_v48, %v1219_v23  ;;  %v1454_v43 = vadd.f32 0.4994258, %v1453_v3 }
 0x2dc   :  { %v1346_v54 = vand.u32 2147483647, %v7122_v63  ;;  %v1348_v36 = vand.u32 2147483648, %v7122_v63  ;;  %v1226_v2 = vand.u32 2147483647, %v7095_v31  ;;  %v1228_v34 = vand.u32 2147483648, %v7095_v31 }
 0x2dd   :  { %v1340_v1 = vmul.f32 %v4976_v52, %v1339_v59  ;;  %vm1343_vm11 = vweird.f32 %v4976_v52  ;;  %v1551_v60 = vmul.f32 %v1550_v40, %v10130_v10  ;;  %v1573_v55 = vmul.f32 %v1572_v24, %v6632_v21  ;;  %v10131_v40 = vld [vmem:[#allocation92_spill] sm:$0xff] }
 0x2de   :  { %vm1342_vm12 = vweird.f32 %v7122_v63  ;;  %v3731_v5 = vcvt.s32.f32 %v3667_v47  ;;  %vm1223_vm13 = vweird.f32 %v7124_v48  ;;  %v1247_v51 = vmul.f32 3.8918573e-05, %v6624_v11 }
 0x2df   :  { %v1341_v7 = vadd.f32 %v4976_v52, %v1340_v1  ;;  %v1574_v23 = vadd.f32 0.4994258, %v1573_v55  ;;  %v1221_v3 = vadd.f32 %v7124_v48, %v1220_v57  ;;  %v1455_v0 = vmul.f32 %v1454_v43, %v10119_v12  ;;  %vm1344_vm14 = vmor %vm1342_vm12, %vm1343_vm11 }
 0x2e0   :  { %v7196_v25 = vpop.eup %4977  ;;  %vm1347_vm15 = vcmp.eq.f32.partialorder %v1346_v54, 8.507059e+37  ;;  %v1349_v56 = vor.u32 1.1754944e-38, %v1348_v36  ;;  %v7200_v59 = vmul.f32 %v7105_v4, %v10131_v40  ;;  %v1248_v63 = vadd.f32 0.001143296, %v1247_v51  ;;  %vm7209_vm1 = vmor %vm1222_vm10, %vm1223_vm13 }
 0x2e1   :  { %v1345_v47 = vsel %vm1344_vm14, %v4976_v52, %v1341_v7  ;;  %v4876_v24 = vclamps-f32 %v1551_v60, 1.0  ;;  %v1575_v10 = vmul.f32 %v1574_v23, %v6632_v21  ;;  %v1378_v1 = vmul.f32 %v7196_v25, %v7174_v49 }
 0x2e2   :  { %v1350_v57 = vsel %vm1347_vm15, %v1349_v56, %v1345_v47  ;;  %v1249_v4 = vmul.f32 %v1248_v63, %v6624_v11  ;;  %v7214_v43 = vadd.f32 1.0, %v1455_v0  ;;  %v1608_v52 = vadd.f32 0.001143296, %v1607_v16  ;;  %v10134_v56 = vld [vmem:[#allocation98_spill] sm:$0xff] }
 0x2e3   :  { %v1351_v54 = vmul.f32 %v1350_v57, %v1326_v58  ;;  %v7216_v36 = vadd.f32 1.0, %v1575_v10  ;;  %v1225_v21 = vsel %vm7209_vm1, %v7124_v48, %v1221_v3  ;;  %v1379_v60 = vsub.f32 1.0, %v1378_v1  ;;  %v10136_v1 = vld [vmem:[#allocation65_spill] sm:$0xff] }
 0x2e4   :  { %vm1227_vm2 = vcmp.eq.f32.partialorder %v1226_v2, 8.507059e+37  ;;  %v1229_v55 = vor.u32 1.1754944e-38, %v1228_v34  ;;  %v1250_v31 = vadd.f32 0.014752088, %v1249_v4  ;;  %4979 = vrcp.f32 %v7214_v43 }
 0x2e5   :  { %v4871_v51 = vclamps-f32 %v1351_v54, 1.0  ;;  %4981 = vrcp.f32 %v7216_v36  ;;  %v3528_v7 = vadd.f32 1.0, %v4876_v24  ;;  %v3668_v23 = vunpack.c.1.s8 %v6978_v42  ;;  %v10135_v24 = vld [vmem:[#allocation18_spill] sm:$0xff]  ;;  %v10137_v54 = vld [vmem:[#allocation56_spill] sm:$0xff] }
 0x2e6   :  { %vm3800_vm3 = vcmp.gt.f32.partialorder %v7159_v22, 0.0  ;;  %v1230_v58 = vsel %vm1227_vm2, %v1229_v55, %v1225_v21  ;;  %v1251_v16 = vmul.f32 %v1250_v31, %v6624_v11  ;;  %v1380_v0 = vmul.f32 %v7196_v25, %v1379_v60 }
 0x2e7   :  { %v1609_v48 = vmul.f32 %v1608_v52, %v10129_v9  ;;  %v3523_v2 = vadd.f32 1.0, %v4871_v51  ;;  %vm3795_vm4 = vcmp.gt.f32.partialorder %v3731_v5, 0.0  ;;  %v3673_v34 = vunpack.c.3.s8 %v7167_v17 }
 0x2e8   :  { %v1386_v3 = vand.u32 2147483647, %v7174_v49  ;;  %v1566_v40 = vmul.f32 %v7120_v29, %v10134_v56  ;;  %v1252_v63 = vadd.f32 0.112945676, %v1251_v16  ;;  %v1381_v47 = vadd.f32 %v7196_v25, %v1380_v0 }
 0x2e9   :  { %vm1383_vm5 = vweird.f32 %v7196_v25  ;;  %v3587_v10 = vmul.f32 %v3523_v2, %v10135_v24  ;;  %v1231_v57 = vmul.f32 %v1230_v58, %v10136_v1  ;;  %v1388_v12 = vand.u32 2147483648, %v7174_v49 }
 0x2ea   :  { %v7237_v4 = vcvt.s32.f32 %v3668_v23  ;;  %v7239_v52 = vpop.eup %4979  ;;  %v3592_v21 = vmul.f32 %v3528_v7, %v10137_v54  ;;  %v1253_v60 = vmul.f32 %v1252_v63, %v6624_v11  ;;  %vm1382_vm6 = vweird.f32 %v7174_v49 }
 0x2eb   :  { %v1610_v29 = vadd.f32 0.014752088, %v1609_v48  ;;  %v4982_v55 = vpop.eup %4981  ;;  %v7245_v31 = vsel %vm3795_vm4, %v3587_v10, -1e+30  ;;  %v7247_v51 = vcvt.s32.f32 %v3673_v34  ;;  %vm7249_vm7 = vmor %vm1382_vm6, %vm1383_vm5  ;;  %vm7253_vm8 = vcmp.eq.f32.partialorder %v1386_v3, 8.507059e+37 }
 0x2ec   :  { %v1407_v7 = vmul.f32 3.8918573e-05, %v6628_v33  ;;  %v3926_v49 = vmax.f32 %v7172_v50, %v7245_v31  ;;  %v1578_v16 = vmul.f32 %v4982_v55, %v7216_v36  ;;  %v1254_v5 = vadd.f32 0.4994258, %v1253_v60 }
 0x2ed   :  { %v1385_v0 = vsel %vm7249_vm7, %v7196_v25, %v1381_v47  ;;  %v1586_v48 = vand.u32 2147483647, %v7216_v36  ;;  %v4868_v2 = vclamps-f32 %v1231_v57, 1.0  ;;  %v1389_v34 = vor.u32 1.1754944e-38, %v1388_v12  ;;  %v10142_v47 = vld [vmem:[#allocation54_spill] sm:$0xff] }
 0x2ee   :  { %v1408_v3 = vadd.f32 0.001143296, %v1407_v7  ;;  %3927 = vmax.xlane.f32.xlu2 %v3926_v49  ;;  %v1579_v56 = vsub.f32 1.0, %v1578_v16  ;;  %v1255_v63 = vmul.f32 %v1254_v5, %v6624_v11  ;;  %v1458_v24 = vmul.f32 %v7239_v52, %v7214_v43 }
 0x2ef   :  { %v1611_v10 = vmul.f32 %v1610_v29, %v10129_v9  ;;  %v1588_v1 = vand.u32 2147483648, %v7216_v36  ;;  %v1390_v54 = vsel %vm7253_vm8, %v1389_v34, %v1385_v0  ;;  %v1767_v57 = vmul.f32 3.8918573e-05, %v10142_v47  ;;  %v10143_v0 = vld [vmem:[#allocation61_spill] sm:$0xff] }
 0x2f0   :  { %v1409_v25 = vmul.f32 %v1408_v3, %v6628_v33  ;;  %v1580_v12 = vmul.f32 %v4982_v55, %v1579_v56  ;;  %vm1583_vm9 = vweird.f32 %v4982_v55  ;;  %v7274_v60 = vadd.f32 1.0, %v1255_v63  ;;  %v10144_v63 = vld [vmem:[#allocation43_spill] sm:$0xff] }
 0x2f1   :  { %v1612_v58 = vadd.f32 0.112945676, %v1611_v10  ;;  %v7278_v11 = vsel %vm3800_vm3, %v3592_v21, -1e+30  ;;  %v3520_v7 = vadd.f32 1.0, %v4868_v2  ;;  %v3670_v49 = vunpack.c.2.s8 %v6978_v42 }
 0x2f2   :  { %v1410_v29 = vadd.f32 0.014752088, %v1409_v25  ;;  %v1581_v16 = vadd.f32 %v4982_v55, %v1580_v12  ;;  %vm1582_vm10 = vweird.f32 %v7216_v36  ;;  %4983 = vrcp.f32 %v7274_v60 }
 0x2f3   :  { %v1459_v23 = vsub.f32 1.0, %v1458_v24  ;;  %vm1584_vm11 = vmor %vm1582_vm10, %vm1583_vm9  ;;  %v1589_v5 = vor.u32 1.1754944e-38, %v1588_v1  ;;  %vm3801_vm12 = vcmp.gt.f32.partialorder %v7247_v51, 0.0  ;;  %v1391_v34 = vmul.f32 %v1390_v54, %v10143_v0 }
 0x2f4   :  { %v1411_v22 = vmul.f32 %v1410_v29, %v6628_v33  ;;  %v1585_v21 = vsel %vm1584_vm11, %v4982_v55, %v1581_v16  ;;  %vm1587_vm13 = vcmp.eq.f32.partialorder %v1586_v48, 8.507059e+37  ;;  %v1613_v2 = vmul.f32 %v1612_v58, %v10129_v9 }
 0x2f5   :  { %v1768_v3 = vadd.f32 0.001143296, %v1767_v57  ;;  %v1590_v56 = vsel %vm1587_vm13, %v1589_v5, %v1585_v21  ;;  %v7288_v10 = vmul.f32 %v3520_v7, %v10144_v63  ;;  %v1468_v24 = vand.u32 2147483648, %v7214_v43 }
 0x2f6   :  { %v1412_v36 = vadd.f32 0.112945676, %v1411_v22  ;;  %v1591_v25 = vmul.f32 %v1590_v56, %v1566_v40  ;;  %v1460_v1 = vmul.f32 %v7239_v52, %v1459_v23  ;;  %vm1462_vm14 = vweird.f32 %v7214_v43 }
 0x2f7   :  { %v1487_v54 = vmul.f32 3.8918573e-05, %v6630_v15  ;;  %v4872_v12 = vclamps-f32 %v1391_v34, 1.0  ;;  %v1466_v48 = vand.u32 2147483647, %v7214_v43  ;;  %v3665_v7 = vunpack.c.3.s8 %v6860_v41 }
 0x2f8   :  { %v1413_v55 = vmul.f32 %v1412_v36, %v6628_v33  ;;  %v1614_v57 = vadd.f32 0.4994258, %v1613_v2  ;;  %v4984_v58 = vpop.eup %4983  ;;  %v4877_v29 = vclamps-f32 %v1591_v25, 1.0  ;;  %v1769_v5 = vmul.f32 %v1768_v3, %v10142_v47  ;;  %v10145_v36 = vld [vmem:[#allocation41_spill] sm:$0xff] }
 0x2f9   :  { %v1488_v16 = vadd.f32 0.001143296, %v1487_v54  ;;  %v1258_v40 = vmul.f32 %v4984_v58, %v7274_v60  ;;  %v1469_v0 = vor.u32 1.1754944e-38, %v1468_v24  ;;  %vm3792_vm15 = vcmp.gt.f32.partialorder %v7178_v61, 0.0 }
 0x2fa   :  { %v1414_v23 = vadd.f32 0.4994258, %v1413_v55  ;;  %v1615_v22 = vmul.f32 %v1614_v57, %v10129_v9  ;;  %v3529_v21 = vadd.f32 1.0, %v4877_v29  ;;  %v1461_v34 = vadd.f32 %v7239_v52, %v1460_v1 }
 0x2fb   :  { %vm1463_vm1 = vweird.f32 %v7239_v52  ;;  %v1489_v2 = vmul.f32 %v1488_v16, %v6630_v15  ;;  %v1259_v56 = vsub.f32 1.0, %v1258_v40  ;;  %v3524_v63 = vadd.f32 1.0, %v4872_v12 }
 0x2fc   :  { %v1415_v41 = vmul.f32 %v1414_v23, %v6628_v33  ;;  %v7305_v3 = vadd.f32 1.0, %v1615_v22  ;;  %v3593_v25 = vmul.f32 %v3529_v21, %v10145_v36  ;;  %v1268_v24 = vand.u32 2147483648, %v7274_v60  ;;  %vm7314_vm3 = vmor %vm1462_vm14, %vm1463_vm1  ;;  %v10148_v21 = vld [vmem:[#allocation48_spill] sm:$0xff] }
 0x2fd   :  { %v1490_v9 = vadd.f32 0.014752088, %v1489_v2  ;;  %v1770_v54 = vadd.f32 0.014752088, %v1769_v5  ;;  %v1260_v55 = vmul.f32 %v4984_v58, %v1259_v56  ;;  %vm1263_vm2 = vweird.f32 %v4984_v58 }
 0x2fe   :  { %v1266_v1 = vand.u32 2147483647, %v7274_v60  ;;  %v7310_v57 = vadd.f32 1.0, %v1415_v41  ;;  %v7320_v33 = vsel %vm3801_vm12, %v3593_v25, -1e+30  ;;  %v1465_v12 = vsel %vm7314_vm3, %v7239_v52, %v1461_v34  ;;  %v10149_v41 = vld [vmem:[#allocation35_spill] sm:$0xff] }
 0x2ff   :  { %v1491_v16 = vmul.f32 %v1490_v9, %v6630_v15  ;;  %4985 = vrcp.f32 %v7305_v3  ;;  %v3935_v5 = vmax.f32 %v7278_v11, %v7320_v33  ;;  %v1261_v43 = vadd.f32 %v4984_v58, %v1260_v55  ;;  %v10150_v25 = vld [vmem:[#allocation95_spill] sm:$0xff] }
 0x300   :  { %vm1262_vm4 = vweird.f32 %v7274_v60  ;;  %4987 = vrcp.f32 %v7310_v57  ;;  %v1269_v51 = vor.u32 1.1754944e-38, %v1268_v24  ;;  %vm1467_vm6 = vcmp.eq.f32.partialorder %v1466_v48, 8.507059e+37  ;;  %v10151_v24 = vld [vmem:[#allocation97_spill] sm:$0xff] }
 0x301   :  { %vm1264_vm5 = vmor %vm1262_vm4, %vm1263_vm2  ;;  %v1492_v40 = vadd.f32 0.112945676, %v1491_v16  ;;  %v1771_v23 = vmul.f32 %v1770_v54, %v10142_v47  ;;  %3936 = vmax.xlane.f32.xlu1 %v3935_v5  ;;  %vm1267_vm7 = vcmp.eq.f32.partialorder %v1266_v1, 8.507059e+37  ;;  %v1470_v22 = vsel %vm1467_vm6, %v1469_v0, %v1465_v12 }
 0x302   :  { %v1265_v52 = vsel %vm1264_vm5, %v4984_v58, %v1261_v43  ;;  %v1927_v34 = vmul.f32 3.8918573e-05, %v10148_v21  ;;  %v3729_v56 = vcvt.s32.f32 %v3665_v7  ;;  %v3588_v36 = vmul.f32 %v3524_v63, %v10149_v41  ;;  %v10152_v7 = vld [vmem:[#allocation77_spill] sm:$0xff] }
 0x303   :  { %v1270_v2 = vsel %vm1267_vm7, %v1269_v51, %v1265_v52  ;;  %v1493_v60 = vmul.f32 %v1492_v40, %v6630_v15  ;;  %v1406_v9 = vmul.f32 %v7113_v19, %v10150_v25  ;;  %v7339_v48 = vmul.f32 %v7117_v35, %v10151_v24  ;;  %v10153_v52 = vld [vmem:[#allocation28_spill] sm:$0xff] }
 0x304   :  { %v1271_v54 = vmul.f32 %v1270_v2, %v7200_v59  ;;  %vm3796_vm8 = vcmp.gt.f32.partialorder %v7237_v4, 0.0  ;;  %v3669_v0 = vunpack.c.1.s8 %v7167_v17  ;;  %v1471_v55 = vmul.f32 %v1470_v22, %v10152_v7 }
 0x305   :  { %v7343_v58 = vpop.eup %4985  ;;  %v1494_v63 = vadd.f32 0.4994258, %v1493_v60  ;;  %v1772_v1 = vadd.f32 0.112945676, %v1771_v23  ;;  %v7350_v19 = vsel %vm3792_vm15, %v7288_v10, -1e+30  ;;  %v7354_v35 = vcvt.s32.f32 %v3670_v49 }
 0x306   :  { %v4988_v29 = vpop.eup %4987  ;;  %v4869_v12 = vclamps-f32 %v1271_v54, 1.0  ;;  %v1928_v59 = vadd.f32 0.001143296, %v1927_v34  ;;  %vm3793_vm9 = vcmp.gt.f32.partialorder %v3729_v56, 0.0  ;;  %v7357_v16 = vsel %vm3796_vm8, %v3588_v36, -1e+30 }
 0x307   :  { %v1418_v4 = vmul.f32 %v4988_v29, %v7310_v57  ;;  %v1495_v5 = vmul.f32 %v1494_v63, %v6630_v15  ;;  %v1618_v51 = vmul.f32 %v7343_v58, %v7305_v3  ;;  %v1773_v61 = vmul.f32 %v1772_v1, %v10142_v47 }
 0x308   :  { %v3521_v43 = vadd.f32 1.0, %v4869_v12  ;;  %v1929_v10 = vmul.f32 %v1928_v59, %v10148_v21  ;;  %v7364_v42 = vcvt.s32.f32 %v3669_v0  ;;  %v4874_v49 = vclamps-f32 %v1471_v55, 1.0  ;;  %v10154_v55 = vld [vmem:[#allocation64_spill] sm:$0xff] }
 0x309   :  { %v1419_v40 = vsub.f32 1.0, %v1418_v4  ;;  %v7366_v23 = vadd.f32 1.0, %v1495_v5  ;;  %v1428_v34 = vand.u32 2147483648, %v7310_v57  ;;  %v1774_v2 = vadd.f32 0.4994258, %v1773_v61 }
 0x30a   :  { %v3585_v22 = vmul.f32 %v3521_v43, %v10153_v52  ;;  %v1930_v15 = vadd.f32 0.014752088, %v1929_v10  ;;  %vm1423_vm10 = vweird.f32 %v4988_v29  ;;  %v1426_v36 = vand.u32 2147483647, %v7310_v57  ;;  %v10162_v52 = vld [vmem:[#allocation50_spill] sm:$0xff] }
 0x30b   :  { %v1420_v41 = vmul.f32 %v4988_v29, %v1419_v40  ;;  %4989 = vrcp.f32 %v7366_v23  ;;  %vm1422_vm11 = vweird.f32 %v7310_v57  ;;  %v1619_v25 = vsub.f32 1.0, %v1618_v51 }
 0x30c   :  { %v7373_v60 = vsel %vm3793_vm9, %v3585_v22, -1e+30  ;;  %v1775_v24 = vmul.f32 %v1774_v2, %v10142_v47  ;;  %v1931_v7 = vmul.f32 %v1930_v15, %v10148_v21  ;;  %v2087_v63 = vmul.f32 3.8918573e-05, %v10154_v55  ;;  %vm1424_vm12 = vmor %vm1422_vm11, %vm1423_vm10 }
 0x30d   :  { %v3923_v54 = vmax.f32 %v7350_v19, %v7373_v60  ;;  %v1421_v0 = vadd.f32 %v4988_v29, %v1420_v41  ;;  %v1429_v1 = vor.u32 1.1754944e-38, %v1428_v34  ;;  %vm3797_vm13 = vcmp.gt.f32.partialorder %v7364_v42, 0.0 }
 0x30e   :  { %v1626_v56 = vand.u32 2147483647, %v7305_v3  ;;  %v7383_v12 = vadd.f32 1.0, %v1775_v24  ;;  %vm1427_vm14 = vcmp.eq.f32.partialorder %v1426_v36, 8.507059e+37  ;;  %v7385_v47 = vadd.f32 1.0, %v4874_v49 }
 0x30f   :  { %3924 = vmax.xlane.f32.xlu0 %v3923_v54  ;;  %v1425_v57 = vsel %vm1424_vm12, %v4988_v29, %v1421_v0  ;;  %v1932_v59 = vadd.f32 0.112945676, %v1931_v7  ;;  %v1620_v5 = vmul.f32 %v7343_v58, %v1619_v25  ;;  %vm1622_vm15 = vweird.f32 %v7305_v3  ;;  %v10157_v25 = vld [vmem:[#allocation59_spill] sm:$0xff] }
 0x310   :  { %v1430_v4 = vsel %vm1427_vm14, %v1429_v1, %v1425_v57  ;;  %4991 = vrcp.f32 %v7383_v12  ;;  %v1628_v61 = vand.u32 2147483648, %v7305_v3  ;;  %v1647_v10 = vmul.f32 3.8918573e-05, %v6636_v38 }
 0x311   :  { %v4990_v43 = vpop.eup %4989  ;;  %v1431_v51 = vmul.f32 %v1430_v4, %v1406_v9  ;;  %v2088_v40 = vadd.f32 0.001143296, %v2087_v63  ;;  %v3671_v49 = vunpack.c.2.s8 %v7167_v17  ;;  %vm7394_vm1 = vcmp.eq.f32.partialorder %v1626_v56, 8.507059e+37 }
 0x312   :  { %v1498_v29 = vmul.f32 %v4990_v43, %v7366_v23  ;;  %v1933_v22 = vmul.f32 %v1932_v59, %v10148_v21  ;;  %v1508_v2 = vand.u32 2147483648, %v7366_v23  ;;  %vm1623_vm2 = vweird.f32 %v7343_v58  ;;  %v10158_v59 = vld [vmem:[#allocation34_spill] sm:$0xff] }
 0x313   :  { %v4873_v34 = vclamps-f32 %v1431_v51, 1.0  ;;  %v1648_v9 = vadd.f32 0.001143296, %v1647_v10  ;;  %v1621_v41 = vadd.f32 %v7343_v58, %v1620_v5  ;;  %v2167_v24 = vmul.f32 3.8918573e-05, %v10157_v25  ;;  %vm7415_vm5 = vmor %vm1622_vm15, %vm1623_vm2 }
 0x314   :  { %v1499_v15 = vsub.f32 1.0, %v1498_v29  ;;  %v1934_v36 = vadd.f32 0.4994258, %v1933_v22  ;;  %v1629_v17 = vor.u32 1.1754944e-38, %v1628_v61  ;;  %v2089_v7 = vmul.f32 %v2088_v40, %v10154_v55 }
 0x315   :  { %v3525_v54 = vadd.f32 1.0, %v4873_v34  ;;  %v1649_v0 = vmul.f32 %v1648_v9, %v6636_v38  ;;  %vm1503_vm3 = vweird.f32 %v4990_v43  ;;  %v1506_v56 = vand.u32 2147483647, %v7366_v23 }
 0x316   :  { %v7405_v63 = vpop.eup %4991  ;;  %v1500_v1 = vmul.f32 %v4990_v43, %v1499_v15  ;;  %v1935_v57 = vmul.f32 %v1934_v36, %v10148_v21  ;;  %vm1502_vm4 = vweird.f32 %v7366_v23  ;;  %v1509_v40 = vor.u32 1.1754944e-38, %v1508_v2  ;;  %v7434_v2 = vld [vmem:[%s9790_s4 + $0x20] sm:$0xff]  ;;  %v10161_v36 = vld [vmem:[#allocation29_spill] sm:$0xff] }
 0x317   :  { %v3589_v4 = vmul.f32 %v3525_v54, %v10158_v59  ;;  %v1650_v51 = vadd.f32 0.014752088, %v1649_v0  ;;  %v1778_v61 = vmul.f32 %v7405_v63, %v7383_v12  ;;  %v1625_v21 = vsel %vm7415_vm5, %v7343_v58, %v1621_v41  ;;  %vm1504_vm6 = vmor %vm1502_vm4, %vm1503_vm3 }
 0x318   :  { %v1501_v10 = vadd.f32 %v4990_v43, %v1500_v1  ;;  %v2168_v29 = vadd.f32 0.001143296, %v2167_v24  ;;  %v2090_v34 = vadd.f32 0.014752088, %v2089_v7  ;;  %vm1507_vm7 = vcmp.eq.f32.partialorder %v1506_v56, 8.507059e+37 }
 0x319   :  { %v7426_v23 = vsel %vm3797_vm13, %v3589_v4, -1e+30  ;;  %v1651_v3 = vmul.f32 %v1650_v51, %v6636_v38  ;;  %v1779_v22 = vsub.f32 1.0, %v1778_v61  ;;  %v7436_v58 = vadd.f32 1.0, %v1935_v57  ;;  %v10163_v4 = vld [vmem:[#allocation67_spill] sm:$0xff] }
 0x31a   :  { %v3929_v9 = vmax.f32 %v7357_v16, %v7426_v23  ;;  %v1505_v15 = vsel %vm1504_vm6, %v4990_v43, %v1501_v10  ;;  %v7439_v42 = vadd.f32 1.1283791, %v7074_v14  ;;  %722 = vperm.xlu1 %4955, %v10161_v36   ;;  %v1630_v24 = vsel %vm7394_vm1, %v1629_v17, %v1625_v21  ;;  %v10165_v36 = vld [vmem:[#allocation30_spill] sm:$0xff] }
 0x31b   :  { %v1510_v41 = vsel %vm1507_vm7, %v1509_v40, %v1505_v15  ;;  %v1652_v54 = vadd.f32 0.112945676, %v1651_v3  ;;  %v1780_v0 = vmul.f32 %v7405_v63, %v1779_v22  ;;  %v2091_v7 = vmul.f32 %v2090_v34, %v10154_v55  ;;  %v10164_v3 = vld [vmem:[#allocation47_spill] sm:$0xff] }
 0x31c   :  { %3930 = vmax.xlane.f32.xlu2 %v3929_v9  ;;  %v1511_v43 = vmul.f32 %v1510_v41, %v7339_v48  ;;  %v2169_v1 = vmul.f32 %v2168_v29, %v10157_v25  ;;  %v3735_v56 = vcvt.s32.f32 %v3671_v49  ;;  %vm3798_vm8 = vcmp.gt.f32.partialorder %v7354_v35, 0.0 }
 0x31d   :  { %v1653_v14 = vmul.f32 %v1652_v54, %v6636_v38  ;;  %v3674_v57 = vunpack.c.0.s8 %v7434_v2  ;;  %v3590_v17 = vmul.f32 %v7385_v47, %v10162_v52  ;;  %4993 = vrcp.f32 %v7436_v58 }
 0x31e   :  { %v4875_v59 = vclamps-f32 %v1511_v43, 1.0  ;;  %v2092_v48 = vadd.f32 0.112945676, %v2091_v7  ;;  %v1631_v5 = vmul.f32 %v1630_v24, %v10163_v4  ;;  %vm1783_vm9 = vweird.f32 %v7405_v63 }
 0x31f   :  { %v1654_v51 = vadd.f32 0.4994258, %v1653_v14  ;;  %v2170_v61 = vadd.f32 0.014752088, %v2169_v1  ;;  %v1781_v10 = vadd.f32 %v7405_v63, %v1780_v0  ;;  %v1807_v40 = vmul.f32 3.8918573e-05, %v6643_v53 }
 0x320   :  { %v3527_v49 = vadd.f32 1.0, %v4875_v59  ;;  %v2093_v21 = vmul.f32 %v2092_v48, %v10154_v55  ;;  %vm3799_vm10 = vcmp.gt.f32.partialorder %v3735_v56, 0.0  ;;  %vm1782_vm11 = vweird.f32 %v7383_v12  ;;  %v7493_v59 = vld [vmem:[%s9790_s4 + $0x30] sm:$0xff] }
 0x321   :  { %v1655_v29 = vmul.f32 %v1654_v51, %v6636_v38  ;;  %v1788_v47 = vand.u32 2147483648, %v7383_v12  ;;  %v1786_v34 = vand.u32 2147483647, %v7383_v12  ;;  %v1808_v9 = vadd.f32 0.001143296, %v1807_v40  ;;  %vm7473_vm12 = vmor %vm1782_vm11, %vm1783_vm9 }
 0x322   :  { %v3591_v22 = vmul.f32 %v3527_v49, %v10164_v3  ;;  %v2094_v15 = vadd.f32 0.4994258, %v2093_v21  ;;  %v7466_v41 = vsel %vm3798_vm8, %v3590_v17, -1e+30  ;;  %v4878_v24 = vclamps-f32 %v1631_v5, 1.0  ;;  %v10168_v21 = vld [vmem:[#allocation99_spill] sm:$0xff] }
 0x323   :  { %727 = vperm.xlu0 %4954, %v10165_v36   ;;  %v7469_v54 = vadd.f32 1.0, %v1655_v29  ;;  %v2171_v43 = vmul.f32 %v2170_v61, %v10157_v25  ;;  %v7478_v12 = vpop.eup %4993  ;;  %v1785_v35 = vsel %vm7473_vm12, %v7405_v63, %v1781_v10  ;;  %v1809_v7 = vmul.f32 %v1808_v9, %v6643_v53  ;;  %v10169_v3 = vld [vmem:[#allocation101_spill] sm:$0xff]  ;;  %v10171_v9 = vld [vmem:[#allocation16_spill] sm:$0xff] }
 0x324   :  { %v7480_v0 = vsel %vm3799_vm10, %v3591_v22, -1e+30  ;;  %v2095_v1 = vmul.f32 %v2094_v15, %v10154_v55  ;;  %v1789_v14 = vor.u32 1.1754944e-38, %v1788_v47  ;;  %v2247_v52 = vmul.f32 3.8918573e-05, %v6640_v28 }
 0x325   :  { %v3932_v56 = vmax.f32 %v7466_v41, %v7480_v0  ;;  %4995 = vrcp.f32 %v7469_v54  ;;  %v7496_v17 = vcvt.s32.f32 %v3674_v57  ;;  %vm1787_vm13 = vcmp.eq.f32.partialorder %v1786_v34, 8.507059e+37 }
 0x326   :  { %v1810_v63 = vadd.f32 0.014752088, %v1809_v7  ;;  %v3678_v48 = vunpack.c.2.s8 %v7434_v2  ;;  %v1790_v55 = vsel %vm1787_vm13, %v1789_v14, %v1785_v35  ;;  %v1938_v4 = vmul.f32 %v7478_v12, %v7436_v58  ;;  %v10172_v35 = vld [vmem:[#allocation46_spill] sm:$0xff] }
 0x327   :  { %3933 = vmax.xlane.f32.xlu2 %v3932_v56  ;;  %v7501_v5 = vadd.f32 1.0, %v2095_v1  ;;  %v2172_v51 = vadd.f32 0.112945676, %v2171_v43  ;;  %v7505_v61 = vmul.f32 %v6779_v13, %v6647_v8  ;;  %v3530_v49 = vadd.f32 1.0, %v4878_v24  ;;  %v10170_v13 = vld [vmem:[#allocation103_spill] sm:$0xff] }
 0x328   :  { %v1811_v57 = vmul.f32 %v1810_v63, %v6643_v53  ;;  %v3682_v10 = vunpack.c.0.s8 %v7493_v59  ;;  %v7510_v40 = vadd.f32 0.05243302, %v6941_v39  ;;  %v1646_v29 = vmul.f32 %v7127_v37, %v10168_v21 }
 0x329   :  { %4997 = vrcp.f32 %v7501_v5  ;;  %v2248_v47 = vadd.f32 0.001143296, %v2247_v52  ;;  %v7517_v22 = vmul.f32 %v7142_v46, %v10169_v3  ;;  %v7521_v34 = vmul.f32 %v7439_v42, %v10170_v13  ;;  %v7549_v13 = vld [vmem:[%s9790_s4 + $0x28] sm:$0xff] }
 0x32a   :  { %v1791_v15 = vmul.f32 %v1790_v55, %v10171_v9  ;;  %v1812_v36 = vadd.f32 0.112945676, %v1811_v57  ;;  %vm3802_vm14 = vcmp.gt.f32.partialorder %v7496_v17, 0.0  ;;  %v7525_v39 = vcvt.s32.f32 %v3678_v48 }
 0x32b   :  { %v4996_v24 = vpop.eup %4995  ;;  %v1939_v37 = vsub.f32 1.0, %v1938_v4  ;;  %v2173_v38 = vmul.f32 %v2172_v51, %v10157_v25  ;;  %v3594_v46 = vmul.f32 %v3530_v49, %v10172_v35  ;;  %v7531_v1 = vcvt.s32.f32 %v3682_v10 }
 0x32c   :  { %v1658_v43 = vmul.f32 %v4996_v24, %v7469_v54  ;;  %v1813_v7 = vmul.f32 %v1812_v36, %v6643_v53  ;;  %vm1942_vm15 = vweird.f32 %v7436_v58  ;;  %v1946_v42 = vand.u32 2147483647, %v7436_v58 }
 0x32d   :  { %v1967_v56 = vmul.f32 3.8918573e-05, %v6654_v45  ;;  %v2249_v14 = vmul.f32 %v2248_v47, %v6640_v28  ;;  %v4882_v63 = vclamps-f32 %v1791_v15, 1.0  ;;  %v2174_v55 = vadd.f32 0.4994258, %v2173_v38 }
 0x32e   :  { %v1659_v52 = vsub.f32 1.0, %v1658_v43  ;;  %v1814_v48 = vadd.f32 0.4994258, %v1813_v7  ;;  %v1668_v51 = vand.u32 2147483648, %v7469_v54  ;;  %vm3806_vm1 = vcmp.gt.f32.partialorder %v7525_v39, 0.0  ;;  %v10183_v39 = vld [vmem:[#allocation14_spill] sm:$0xff] }
 0x32f   :  { %v7537_v4 = vpop.eup %4997  ;;  %v1940_v49 = vmul.f32 %v7478_v12, %v1939_v37  ;;  %v1948_v57 = vand.u32 2147483648, %v7436_v58  ;;  %v1968_v10 = vadd.f32 0.001143296, %v1967_v56  ;;  %vm1663_vm2 = vweird.f32 %v4996_v24 }
 0x330   :  { %v1660_v21 = vmul.f32 %v4996_v24, %v1659_v52  ;;  %v1666_v3 = vand.u32 2147483647, %v7469_v54  ;;  %v1815_v47 = vmul.f32 %v1814_v48, %v6643_v53  ;;  %vm1662_vm3 = vweird.f32 %v7469_v54 }
 0x331   :  { %v1969_v9 = vmul.f32 %v1968_v10, %v6654_v45  ;;  %v2175_v15 = vmul.f32 %v2174_v55, %v10157_v25  ;;  %v2250_v36 = vadd.f32 0.014752088, %v2249_v14  ;;  %v3534_v43 = vadd.f32 1.0, %v4882_v63  ;;  %vm1664_vm4 = vmor %vm1662_vm3, %vm1663_vm2 }
 0x332   :  { %v1661_v37 = vadd.f32 %v4996_v24, %v1660_v21  ;;  %v7553_v38 = vadd.f32 1.0, %v1815_v47  ;;  %v2098_v35 = vmul.f32 %v7537_v4, %v7501_v5  ;;  %v1669_v53 = vor.u32 1.1754944e-38, %v1668_v51  ;;  %v10174_v51 = vld [vmem:[#allocation72_spill] sm:$0xff] }
 0x333   :  { %v1941_v54 = vadd.f32 %v7478_v12, %v1940_v49  ;;  %vm1943_vm5 = vweird.f32 %v7478_v12  ;;  %v1970_v7 = vadd.f32 0.014752088, %v1969_v9  ;;  %vm1667_vm6 = vcmp.eq.f32.partialorder %v1666_v3, 8.507059e+37 }
 0x334   :  { %v1665_v56 = vsel %vm1664_vm4, %v4996_v24, %v1661_v37  ;;  %v3675_v52 = vunpack.c.0.s8 %v7549_v13  ;;  %4999 = vrcp.f32 %v7553_v38  ;;  %v7562_v63 = vadd.f32 1.0, %v2175_v15  ;;  %vm7572_vm7 = vmor %vm1942_vm15, %vm1943_vm5  ;;  %v10179_v15 = vld [vmem:[#allocation49_spill] sm:$0xff] }
 0x335   :  { %v1670_v25 = vsel %vm1667_vm6, %v1669_v53, %v1665_v56  ;;  %v1971_v14 = vmul.f32 %v1970_v7, %v6654_v45  ;;  %v2251_v48 = vmul.f32 %v2250_v36, %v6640_v28  ;;  %v7567_v55 = vsel %vm3802_vm14, %v3594_v46, -1e+30 }
 0x336   :  { %10173 = vst [vmem:[#allocation44_spill] sm:$0xff] %v7567_v55  ;;  %v3598_v49 = vmul.f32 %v3534_v43, %v10174_v51  ;;  %vm7576_vm8 = vcmp.eq.f32.partialorder %v1946_v42, 8.507059e+37  ;;  %v2099_v21 = vsub.f32 1.0, %v2098_v35  ;;  %v1671_v3 = vmul.f32 %v1670_v25, %v1646_v29 }
 0x337   :  { %v1945_v17 = vsel %vm7572_vm7, %v7478_v12, %v1941_v54  ;;  %v1972_v46 = vadd.f32 0.112945676, %v1971_v14  ;;  %v2106_v47 = vand.u32 2147483647, %v7501_v5  ;;  %v1949_v9 = vor.u32 1.1754944e-38, %v1948_v57 }
 0x338   :  { %vm2102_vm9 = vweird.f32 %v7501_v5  ;;  %v7587_v36 = vmul.f32 3.8918573e-05, %v10179_v15  ;;  %v7589_v42 = vcvt.s32.f32 %v3675_v52  ;;  %5001 = vrcp.f32 %v7562_v63  ;;  %v10191_v52 = vld [vmem:[#allocation76_spill] sm:$0xff] }
 0x339   :  { %v1973_v37 = vmul.f32 %v1972_v46, %v6654_v45  ;;  %v2252_v29 = vadd.f32 0.112945676, %v2251_v48  ;;  %v7595_v12 = vsel %vm3806_vm1, %v3598_v49, -1e+30  ;;  %v1950_v57 = vsel %vm7576_vm8, %v1949_v9, %v1945_v17  ;;  %v10184_v49 = vld [vmem:[#allocation82_spill] sm:$0xff]  ;;  %v10185_v9 = vld [vmem:[#allocation32_spill] sm:$0xff] }
 0x33a   :  { %v5000_v43 = vpop.eup %4999  ;;  %10180 = vst [vmem:[#allocation38_spill] sm:$0xff] %v7595_v12  ;;  %v2100_v35 = vmul.f32 %v7537_v4, %v2099_v21  ;;  %v2108_v53 = vand.u32 2147483648, %v7501_v5  ;;  %v4879_v54 = vclamps-f32 %v1671_v3, 1.0  ;;  %vm7602_vm10 = vcmp.eq.f32.partialorder %v2106_v47, 8.507059e+37 }
 0x33b   :  { %v1818_v7 = vmul.f32 %v5000_v43, %v7553_v38  ;;  %v1974_v56 = vadd.f32 0.4994258, %v1973_v37  ;;  %v3679_v25 = vunpack.c.2.s8 %v7549_v13  ;;  %vm2103_vm11 = vweird.f32 %v7537_v4 }
 0x33c   :  { %v2127_v14 = vmul.f32 3.8918573e-05, %v10183_v39  ;;  %v2253_v48 = vmul.f32 %v2252_v29, %v6640_v28  ;;  %vm3803_vm12 = vcmp.gt.f32.partialorder %v7589_v42, 0.0  ;;  %v1951_v24 = vmul.f32 %v1950_v57, %v10184_v49  ;;  %vm7625_vm14 = vmor %vm2102_vm9, %vm2103_vm11 }
 0x33d   :  { %v1819_v51 = vsub.f32 1.0, %v1818_v7  ;;  %v1975_v10 = vmul.f32 %v1974_v56, %v6654_v45  ;;  %v1826_v21 = vand.u32 2147483647, %v7553_v38  ;;  %v1828_v3 = vand.u32 2147483648, %v7553_v38 }
 0x33e   :  { %v2101_v17 = vadd.f32 %v7537_v4, %v2100_v35  ;;  %v2128_v46 = vadd.f32 0.001143296, %v2127_v14  ;;  %v7616_v47 = vpop.eup %5001  ;;  %v3531_v37 = vadd.f32 1.0, %v4879_v54  ;;  %vm1823_vm13 = vweird.f32 %v5000_v43 }
 0x33f   :  { %732 = vperm.xlu2 %4956, %v10185_v9   ;;  %v1820_v29 = vmul.f32 %v5000_v43, %v1819_v51  ;;  %v7619_v58 = vadd.f32 1.0, %v1975_v10  ;;  %v3743_v57 = vcvt.s32.f32 %v3679_v25  ;;  %v2109_v35 = vor.u32 1.1754944e-38, %v2108_v53  ;;  %v10188_v53 = vld [vmem:[#allocation21_spill] sm:$0xff] }
 0x340   :  { %v2129_v7 = vmul.f32 %v2128_v46, %v10183_v39  ;;  %v2254_v56 = vadd.f32 0.4994258, %v2253_v48  ;;  %vm1822_vm15 = vweird.f32 %v7553_v38  ;;  %v4886_v54 = vclamps-f32 %v1951_v24, 1.0  ;;  %v7642_v24 = vld [vmem:[%s9790_s4 + $0x38] sm:$0xff] }
 0x341   :  { %v1821_v14 = vadd.f32 %v5000_v43, %v1820_v29  ;;  %5003 = vrcp.f32 %v7619_v58  ;;  %vm1824_vm1 = vmor %vm1822_vm15, %vm1823_vm13  ;;  %v1829_v51 = vor.u32 1.1754944e-38, %v1828_v3  ;;  %v2105_v5 = vsel %vm7625_vm14, %v7537_v4, %v2101_v17 }
 0x342   :  { %v2130_v49 = vadd.f32 0.014752088, %v2129_v7  ;;  %v2178_v25 = vmul.f32 %v7616_v47, %v7562_v63  ;;  %v3595_v10 = vmul.f32 %v3531_v37, %v10188_v53  ;;  %vm1827_vm2 = vcmp.eq.f32.partialorder %v1826_v21, 8.507059e+37 }
 0x343   :  { %v1825_v46 = vsel %vm1824_vm1, %v5000_v43, %v1821_v14  ;;  %v3688_v48 = vunpack.c.3.s8 %v7493_v59  ;;  %vm3807_vm3 = vcmp.gt.f32.partialorder %v3743_v57, 0.0  ;;  %v2255_v4 = vmul.f32 %v2254_v56, %v6640_v28  ;;  %v10189_v14 = vld [vmem:[#allocation33_spill] sm:$0xff]  ;;  %v10197_v57 = vld [vmem:[#allocation58_spill] sm:$0xff] }
 0x344   :  { %v1830_v38 = vsel %vm1827_vm2, %v1829_v51, %v1825_v46  ;;  %v2131_v3 = vmul.f32 %v2130_v49, %v10183_v39  ;;  %v3538_v9 = vadd.f32 1.0, %v4886_v54  ;;  %v2110_v43 = vsel %vm7602_vm10, %v2109_v35, %v2105_v5  ;;  %v10192_v51 = vld [vmem:[#allocation108_spill] sm:$0xff] }
 0x345   :  { %v1831_v17 = vmul.f32 %v1830_v38, %v7517_v22  ;;  %vm2182_vm4 = vweird.f32 %v7562_v63  ;;  %v2179_v37 = vsub.f32 1.0, %v2178_v25  ;;  %v2186_v29 = vand.u32 2147483647, %v7562_v63 }
 0x346   :  { %v2132_v21 = vadd.f32 0.112945676, %v2131_v3  ;;  %v2188_v45 = vand.u32 2147483648, %v7562_v63  ;;  %v7655_v28 = vsel %vm3803_vm12, %v3595_v10, -1e+30  ;;  %v3683_v56 = vunpack.c.0.s8 %v7642_v24  ;;  %v10203_v63 = vld [vmem:[#allocation87_spill] sm:$0xff] }
 0x347   :  { %v5004_v7 = vpop.eup %5003  ;;  %737 = vperm.xlu2 %4956, %v10189_v14   ;;  %10190 = vst [vmem:[#allocation15_spill] sm:$0xff] %v7655_v28  ;;  %v4883_v22 = vclamps-f32 %v1831_v17, 1.0  ;;  %v2207_v35 = vmul.f32 3.8918573e-05, %v10191_v52  ;;  %v7661_v5 = vmul.f32 %v2110_v43, %v10192_v51  ;;  %v7664_v25 = vadd.f32 1.0, %v2255_v4  ;;  %v10193_v43 = vld [vmem:[#allocation31_spill] sm:$0xff] }
 0x348   :  { %v1978_v54 = vmul.f32 %v5004_v7, %v7619_v58  ;;  %v2133_v49 = vmul.f32 %v2132_v21, %v10183_v39  ;;  %vm3810_vm5 = vcmp.gt.f32.partialorder %v7531_v1, 0.0  ;;  %vm2183_vm6 = vweird.f32 %v7616_v47 }
 0x349   :  { %v3535_v53 = vadd.f32 1.0, %v4883_v22  ;;  %v2208_v42 = vadd.f32 0.001143296, %v2207_v35  ;;  %v1688_v10 = vadd.f32 0.001143296, %v7587_v36  ;;  %v3938_v46 = vmax.f32 %v7567_v55, %v7655_v28  ;;  %vm7692_vm9 = vmor %vm2182_vm4, %vm2183_vm6 }
 0x34a   :  { %v1979_v38 = vsub.f32 1.0, %v1978_v54  ;;  %v2134_v3 = vadd.f32 0.4994258, %v2133_v49  ;;  %v2180_v17 = vmul.f32 %v7616_v47, %v2179_v37  ;;  %v1986_v4 = vand.u32 2147483647, %v7619_v58 }
 0x34b   :  { %v3599_v14 = vmul.f32 %v3535_v53, %v10193_v43  ;;  %v1988_v21 = vand.u32 2147483648, %v7619_v58  ;;  %v2209_v22 = vmul.f32 %v2208_v42, %v10191_v52  ;;  %vm1983_vm7 = vweird.f32 %v5004_v7 }
 0x34c   :  { %v1980_v51 = vmul.f32 %v5004_v7, %v1979_v38  ;;  %v2135_v35 = vmul.f32 %v2134_v3, %v10183_v39  ;;  %5005 = vrcp.f32 %v7664_v25  ;;  %vm1982_vm8 = vweird.f32 %v7619_v58 }
 0x34d   :  { %3939 = vmax.xlane.f32.xlu0 %v3938_v46  ;;  %v7679_v36 = vsel %vm3807_vm3, %v3599_v14, -1e+30  ;;  %v2210_v37 = vadd.f32 0.014752088, %v2209_v22  ;;  %v1689_v54 = vmul.f32 %v1688_v10, %v10179_v15  ;;  %v2181_v38 = vadd.f32 %v7616_v47, %v2180_v17  ;;  %vm1984_vm10 = vmor %vm1982_vm8, %vm1983_vm7 }
 0x34e   :  { %10194 = vst [vmem:[#allocation62_spill] sm:$0xff] %v7679_v36  ;;  %v3944_v49 = vmax.f32 %v7595_v12, %v7679_v36  ;;  %v1981_v53 = vadd.f32 %v5004_v7, %v1980_v51  ;;  %v7685_v42 = vadd.f32 1.0, %v2135_v35  ;;  %v1989_v58 = vor.u32 1.1754944e-38, %v1988_v21 }
 0x34f   :  { %v3602_v10 = vmul.f32 %v3538_v9, %v10197_v57  ;;  %v2211_v46 = vmul.f32 %v2210_v37, %v10191_v52  ;;  %v1690_v3 = vadd.f32 0.014752088, %v1689_v54  ;;  %vm1987_vm11 = vcmp.eq.f32.partialorder %v1986_v4, 8.507059e+37 }
 0x350   :  { %3945 = vmax.xlane.f32.xlu1 %v3944_v49  ;;  %v1985_v43 = vsel %vm1984_vm10, %v5004_v7, %v1981_v53  ;;  %v3747_v14 = vcvt.s32.f32 %v3683_v56  ;;  %5007 = vrcp.f32 %v7685_v42  ;;  %vm7699_vm12 = vcmp.eq.f32.partialorder %v2186_v29, 8.507059e+37 }
 0x351   :  { %v1990_v17 = vsel %vm1987_vm11, %v1989_v58, %v1985_v43  ;;  %v2189_v22 = vor.u32 1.1754944e-38, %v2188_v45  ;;  %v2212_v51 = vadd.f32 0.112945676, %v2211_v46  ;;  %v4890_v21 = vclamps-f32 %v7661_v5, 1.0  ;;  %v10202_v43 = vld [vmem:[#allocation45_spill] sm:$0xff] }
 0x352   :  { %v7703_v35 = vpop.eup %5005  ;;  %v1991_v9 = vmul.f32 %v1990_v17, %v7521_v34  ;;  %v3687_v37 = vunpack.c.2.s8 %v7642_v24  ;;  %v2185_v7 = vsel %vm7692_vm9, %v7616_v47, %v2181_v38  ;;  %v10200_v56 = vunpack.c.2.s8 %v7493_v59 }
 0x353   :  { %v2213_v4 = vmul.f32 %v2212_v51, %v10191_v52  ;;  %v7718_v45 = vcvt.s32.f32 %v3688_v48  ;;  %v1691_v34 = vmul.f32 %v1690_v3, %v10179_v15  ;;  %vm3811_vm13 = vcmp.gt.f32.partialorder %v3747_v14, 0.0 }
 0x354   :  { %v7713_v29 = vcvt.s32.f32 %v10200_v56  ;;  %v4887_v54 = vclamps-f32 %v1991_v9, 1.0  ;;  %v7723_v5 = vsel %vm3810_vm5, %v3602_v10, -1e+30  ;;  %v2287_v47 = vmul.f32 3.8918573e-05, %v6645_v6  ;;  %v10204_v9 = vld [vmem:[#allocation94_spill] sm:$0xff] }
 0x355   :  { %10201 = vst [vmem:[#allocation26_spill] sm:$0xff] %v7723_v5  ;;  %v2190_v49 = vsel %vm7699_vm12, %v2189_v22, %v2185_v7  ;;  %v2214_v53 = vadd.f32 0.4994258, %v2213_v4  ;;  %v2258_v38 = vmul.f32 %v7703_v35, %v7664_v25  ;;  %v1692_v59 = vadd.f32 0.112945676, %v1691_v34 }
 0x356   :  { %v5008_v48 = vpop.eup %5007  ;;  %v3539_v39 = vadd.f32 1.0, %v4887_v54  ;;  %v3542_v58 = vadd.f32 1.0, %v4890_v21  ;;  %v7730_v57 = vcvt.s32.f32 %v3687_v37  ;;  %v2288_v46 = vadd.f32 0.001143296, %v2287_v47 }
 0x357   :  { %v2138_v1 = vmul.f32 %v5008_v48, %v7685_v42  ;;  %v2215_v10 = vmul.f32 %v2214_v53, %v10191_v52  ;;  %v1693_v3 = vmul.f32 %v1692_v59, %v10179_v15  ;;  %v1847_v17 = vmul.f32 3.8918573e-05, %v10202_v43 }
 0x358   :  { %v3603_v22 = vmul.f32 %v3539_v39, %v10203_v63  ;;  %v2146_v51 = vand.u32 2147483647, %v7685_v42  ;;  %v2191_v7 = vmul.f32 %v2190_v49, %v10204_v9  ;;  %v2289_v56 = vmul.f32 %v2288_v46, %v6645_v6 }
 0x359   :  { %v2139_v21 = vsub.f32 1.0, %v2138_v1  ;;  %v7740_v37 = vadd.f32 1.0, %v2215_v10  ;;  %v2259_v4 = vsub.f32 1.0, %v2258_v38  ;;  %v1694_v34 = vadd.f32 0.4994258, %v1693_v3  ;;  %v7757_v10 = vld [vmem:[%s9790_s4 + $0x40] sm:$0xff] }
 0x35a   :  { %v7743_v54 = vsel %vm3811_vm13, %v3603_v22, -1e+30  ;;  %vm2143_vm14 = vweird.f32 %v5008_v48  ;;  %v2148_v52 = vand.u32 2147483648, %v7685_v42  ;;  %v2290_v47 = vadd.f32 0.014752088, %v2289_v56 }
 0x35b   :  { %10205 = vst [vmem:[#allocation90_spill] sm:$0xff] %v7743_v54  ;;  %v3950_v53 = vmax.f32 %v7723_v5, %v7743_v54  ;;  %v2140_v59 = vmul.f32 %v5008_v48, %v2139_v21  ;;  %5009 = vrcp.f32 %v7740_v37  ;;  %v1848_v49 = vadd.f32 0.001143296, %v1847_v17 }
 0x35c   :  { %v4892_v39 = vclamps-f32 %v2191_v7, 1.0  ;;  %vm2262_vm15 = vweird.f32 %v7664_v25  ;;  %v2266_v38 = vand.u32 2147483647, %v7664_v25  ;;  %v2291_v14 = vmul.f32 %v2290_v47, %v6645_v6 }
 0x35d   :  { %3951 = vmax.xlane.f32.xlu0 %v3950_v53  ;;  %v2141_v46 = vadd.f32 %v5008_v48, %v2140_v59  ;;  %vm2142_vm1 = vweird.f32 %v7685_v42  ;;  %v2260_v1 = vmul.f32 %v7703_v35, %v2259_v4  ;;  %v1695_v3 = vmul.f32 %v1694_v34, %v10179_v15  ;;  %v10206_v34 = vld [vmem:[#allocation84_spill] sm:$0xff] }
 0x35e   :  { %vm2144_vm2 = vmor %vm2142_vm1, %vm2143_vm14  ;;  %vm2147_vm3 = vcmp.eq.f32.partialorder %v2146_v51, 8.507059e+37  ;;  %v2149_v17 = vor.u32 1.1754944e-38, %v2148_v52  ;;  %v2268_v63 = vand.u32 2147483648, %v7664_v25  ;;  %v2292_v22 = vadd.f32 0.112945676, %v2291_v14 }
 0x35f   :  { %v2145_v9 = vsel %vm2144_vm2, %v5008_v48, %v2141_v46  ;;  %vm2263_vm4 = vweird.f32 %v7703_v35  ;;  %v7763_v42 = vadd.f32 1.0, %v1695_v3  ;;  %v1849_v7 = vmul.f32 %v1848_v49, %v10202_v43  ;;  %v10211_v3 = vld [vmem:[#allocation51_spill] sm:$0xff] }
 0x360   :  { %v2150_v56 = vsel %vm2147_vm3, %v2149_v17, %v2145_v9  ;;  %vm3814_vm5 = vcmp.gt.f32.partialorder %v7713_v29, 0.0  ;;  %v2293_v21 = vmul.f32 %v2292_v22, %v6645_v6  ;;  %v3690_v15 = vunpack.c.0.s8 %v7757_v10  ;;  %vm7776_vm7 = vmor %vm2262_vm15, %vm2263_vm4 }
 0x361   :  { %v5010_v4 = vpop.eup %5009  ;;  %v2151_v51 = vmul.f32 %v2150_v56, %v6705_v62  ;;  %v3606_v52 = vmul.f32 %v3542_v58, %v10206_v34  ;;  %vm3815_vm6 = vcmp.gt.f32.partialorder %v7730_v57, 0.0  ;;  %v2261_v48 = vadd.f32 %v7703_v35, %v2260_v1 }
 0x362   :  { %v2218_v47 = vmul.f32 %v5010_v4, %v7740_v37  ;;  %v3544_v53 = vadd.f32 1.0, %v4892_v39  ;;  %v2294_v49 = vadd.f32 0.4994258, %v2293_v21  ;;  %5011 = vrcp.f32 %v7763_v42 }
 0x363   :  { %v4891_v14 = vclamps-f32 %v2151_v51, 1.0  ;;  %vm3816_vm8 = vcmp.gt.f32.partialorder %v7718_v45, 0.0  ;;  %vm7782_vm9 = vcmp.eq.f32.partialorder %v2266_v38, 8.507059e+37  ;;  %v2269_v58 = vor.u32 1.1754944e-38, %v2268_v63  ;;  %v10212_v51 = vld [vmem:[#allocation105_spill] sm:$0xff]  ;;  %v7843_v45 = vld [vmem:[%s9790_s4 + $0x48] sm:$0xff] }
 0x364   :  { %v1850_v46 = vadd.f32 0.014752088, %v1849_v7  ;;  %v2219_v1 = vsub.f32 1.0, %v2218_v47  ;;  %v2295_v39 = vmul.f32 %v2294_v49, %v6645_v6  ;;  %v1727_v25 = vmul.f32 3.8918573e-05, %v6638_v20 }
 0x365   :  { %v2007_v17 = vmul.f32 3.8918573e-05, %v10211_v3  ;;  %v3543_v22 = vadd.f32 1.0, %v4891_v14  ;;  %v2226_v9 = vand.u32 2147483647, %v7740_v37  ;;  %v2228_v56 = vand.u32 2147483648, %v7740_v37 }
 0x366   :  { %v2265_v38 = vsel %vm7776_vm7, %v7703_v35, %v2261_v48  ;;  %v2220_v21 = vmul.f32 %v5010_v4, %v2219_v1  ;;  %vm2223_vm10 = vweird.f32 %v5010_v4  ;;  %v7794_v63 = vadd.f32 1.0, %v2295_v39 }
 0x367   :  { %v1728_v7 = vadd.f32 0.001143296, %v1727_v25  ;;  %v3607_v6 = vmul.f32 %v3543_v22, %v10212_v51  ;;  %v7799_v34 = vsel %vm3814_vm5, %v3606_v52, -1e+30  ;;  %v3689_v47 = vunpack.c.3.s8 %v7642_v24  ;;  %v10215_v52 = vld [vmem:[#allocation75_spill] sm:$0xff] }
 0x368   :  { %10213 = vst [vmem:[#allocation42_spill] sm:$0xff] %v7799_v34  ;;  %v1851_v49 = vmul.f32 %v1850_v46, %v10202_v43  ;;  %v7803_v14 = vpop.eup %5011  ;;  %v2221_v54 = vadd.f32 %v5010_v4, %v2220_v21  ;;  %vm2222_vm11 = vweird.f32 %v7740_v37  ;;  %5013 = vrcp.f32 %v7794_v63 }
 0x369   :  { %v2008_v35 = vadd.f32 0.001143296, %v2007_v17  ;;  %v7809_v48 = vsel %vm3815_vm6, %v3607_v6, -1e+30  ;;  %vm2224_vm12 = vmor %vm2222_vm11, %vm2223_vm10  ;;  %v2229_v29 = vor.u32 1.1754944e-38, %v2228_v56  ;;  %v3608_v59 = vmul.f32 %v3544_v53, %v10215_v52  ;;  %v10216_v56 = vld [vmem:[#allocation114_spill] sm:$0xff] }
 0x36a   :  { %10214 = vst [vmem:[#allocation22_spill] sm:$0xff] %v7809_v48  ;;  %v2270_v1 = vsel %vm7782_vm9, %v2269_v58, %v2265_v38  ;;  %v3956_v46 = vmax.f32 %v7799_v34, %v7809_v48  ;;  %v2225_v39 = vsel %vm2224_vm12, %v5010_v4, %v2221_v54  ;;  %vm2227_vm13 = vcmp.eq.f32.partialorder %v2226_v9, 8.507059e+37 }
 0x36b   :  { %v1729_v37 = vmul.f32 %v1728_v7, %v6638_v20  ;;  %v2230_v25 = vsel %vm2227_vm13, %v2229_v29, %v2225_v39  ;;  %v3753_v17 = vcvt.s32.f32 %v3689_v47  ;;  %v1698_v57 = vmul.f32 %v7803_v14, %v7763_v42  ;;  %v10218_v39 = vld [vmem:[#allocation73_spill] sm:$0xff] }
 0x36c   :  { %v1852_v22 = vadd.f32 0.112945676, %v1851_v49  ;;  %3957 = vmax.xlane.f32.xlu1 %v3956_v46  ;;  %v2231_v21 = vmul.f32 %v2230_v25, %v10216_v56  ;;  %v2271_v53 = vmul.f32 %v2270_v1, %v6792_v27  ;;  %v2009_v58 = vmul.f32 %v2008_v35, %v10211_v3  ;;  %v10219_v25 = vld [vmem:[#allocation25_spill] sm:$0xff] }
 0x36d   :  { %v1730_v62 = vadd.f32 0.014752088, %v1729_v37  ;;  %v7823_v38 = vadd.f32 0.05243302, %v7505_v61  ;;  %v7827_v54 = vmul.f32 %v7510_v40, %v6638_v20  ;;  %v7829_v4 = vcvt.s32.f32 %v3690_v15 }
 0x36e   :  { %v1853_v9 = vmul.f32 %v1852_v22, %v10202_v43  ;;  %v5014_v7 = vpop.eup %5013  ;;  %v4893_v51 = vclamps-f32 %v2231_v21, 1.0  ;;  %v7834_v6 = vsel %vm3816_vm8, %v3608_v59, -1e+30  ;;  %v2010_v47 = vadd.f32 0.014752088, %v2009_v58 }
 0x36f   :  { %10217 = vst [vmem:[#allocation68_spill] sm:$0xff] %v7834_v6  ;;  %v1731_v27 = vmul.f32 %v1730_v62, %v6638_v20  ;;  %vm3817_vm14 = vcmp.gt.f32.partialorder %v3753_v17, 0.0  ;;  %v2298_v61 = vmul.f32 %v5014_v7, %v7794_v63  ;;  %v1699_v49 = vsub.f32 1.0, %v1698_v57 }
 0x370   :  { %v1854_v35 = vadd.f32 0.4994258, %v1853_v9  ;;  %v3545_v40 = vadd.f32 1.0, %v4893_v51  ;;  %v4894_v29 = vclamps-f32 %v2271_v53, 1.0  ;;  %v2011_v52 = vmul.f32 %v2010_v47, %v10211_v3 }
 0x371   :  { %v1732_v15 = vadd.f32 0.112945676, %v1731_v27  ;;  %v2299_v1 = vsub.f32 1.0, %v2298_v61  ;;  %v2308_v46 = vand.u32 2147483648, %v7794_v63  ;;  %v2327_v37 = vmul.f32 3.8918573e-05, %v10218_v39 }
 0x372   :  { %v1855_v59 = vmul.f32 %v1854_v35, %v10202_v43  ;;  %v3609_v57 = vmul.f32 %v3545_v40, %v10219_v25  ;;  %v2306_v22 = vand.u32 2147483647, %v7794_v63  ;;  %v2012_v21 = vadd.f32 0.112945676, %v2011_v52 }
 0x373   :  { %v1733_v56 = vmul.f32 %v1732_v15, %v6638_v20  ;;  %v2300_v53 = vmul.f32 %v5014_v7, %v2299_v1  ;;  %vm2303_vm15 = vweird.f32 %v5014_v7  ;;  %v1700_v62 = vmul.f32 %v7803_v14, %v1699_v49 }
 0x374   :  { %v7851_v58 = vadd.f32 1.0, %v1855_v59  ;;  %v7854_v9 = vsel %vm3817_vm14, %v3609_v57, -1e+30  ;;  %vm2302_vm1 = vweird.f32 %v7794_v63  ;;  %v3691_v43 = vunpack.c.0.s8 %v7843_v45 }
 0x375   :  { %10220 = vst [vmem:[#allocation13_spill] sm:$0xff] %v7854_v9  ;;  %v1734_v51 = vadd.f32 0.4994258, %v1733_v56  ;;  %v3959_v27 = vmax.f32 %v7834_v6, %v7854_v9  ;;  %v2301_v47 = vadd.f32 %v5014_v7, %v2300_v53  ;;  %v2309_v61 = vor.u32 1.1754944e-38, %v2308_v46  ;;  %vm2304_vm3 = vmor %vm2302_vm1, %vm2303_vm15  ;;  %v10224_v53 = vld [vmem:[#allocation127_spill] sm:$0xff] }
 0x376   :  { %vm1703_vm2 = vweird.f32 %v7803_v14  ;;  %5015 = vrcp.f32 %v7851_v58  ;;  %v2013_v17 = vmul.f32 %v2012_v21, %v10211_v3  ;;  %v2328_v35 = vadd.f32 0.001143296, %v2327_v37  ;;  %v10223_v21 = vld [vmem:[#allocation111_spill] sm:$0xff] }
 0x377   :  { %v1735_v49 = vmul.f32 %v1734_v51, %v6638_v20  ;;  %3960 = vmax.xlane.f32.xlu0 %v3959_v27  ;;  %v2305_v63 = vsel %vm2304_vm3, %v5014_v7, %v2301_v47  ;;  %vm2307_vm4 = vcmp.eq.f32.partialorder %v2306_v22, 8.507059e+37  ;;  %v1701_v40 = vadd.f32 %v7803_v14, %v1700_v62 }
 0x378   :  { %v1887_v15 = vmul.f32 3.8918573e-05, %v6647_v8  ;;  %v2310_v52 = vsel %vm2307_vm4, %v2309_v61, %v2305_v63  ;;  %v3546_v1 = vadd.f32 1.0, %v4894_v29  ;;  %v1708_v46 = vand.u32 2147483648, %v7763_v42 }
 0x379   :  { %v7867_v59 = vadd.f32 1.0, %v1735_v49  ;;  %v2311_v25 = vmul.f32 %v2310_v52, %v6811_v44  ;;  %vm1702_vm5 = vweird.f32 %v7763_v42  ;;  %v1706_v57 = vand.u32 2147483647, %v7763_v42  ;;  %v10226_v52 = vld [vmem:[#allocation23_spill] sm:$0xff] }
 0x37a   :  { %v1888_v37 = vadd.f32 0.001143296, %v1887_v15  ;;  %v3755_v56 = vcvt.s32.f32 %v3691_v43  ;;  %vm7874_vm6 = vmor %vm1702_vm5, %vm1703_vm2  ;;  %v2014_v29 = vadd.f32 0.4994258, %v2013_v17  ;;  %v2329_v22 = vmul.f32 %v2328_v35, %v10218_v39  ;;  %v10225_v17 = vld [vmem:[#allocation121_spill] sm:$0xff] }
 0x37b   :  { %5017 = vrcp.f32 %v7867_v59  ;;  %v2040_v44 = vmul.f32 %v10224_v53, %v10223_v21  ;;  %v4895_v62 = vclamps-f32 %v2311_v25, 1.0  ;;  %v1705_v42 = vsel %vm7874_vm6, %v7803_v14, %v1701_v40  ;;  %v10228_v53 = vld [vmem:[#allocation125_spill] sm:$0xff] }
 0x37c   :  { %v1889_v43 = vmul.f32 %v1888_v37, %v6647_v8  ;;  %v7886_v51 = vpop.eup %5015  ;;  %v1882_v27 = vmul.f32 %v7823_v38, %v6647_v8  ;;  %v1723_v47 = vadd.f32 0.18741608, %v7827_v54  ;;  %vm3818_vm7 = vcmp.gt.f32.partialorder %v7829_v4, 0.0  ;;  %v10227_v37 = vld [vmem:[#allocation126_spill] sm:$0xff]  ;;  %v10233_v4 = vld [vmem:[#allocation124_spill] sm:$0xff] }
 0x37d   :  { %v1709_v61 = vor.u32 1.1754944e-38, %v1708_v46  ;;  %v3547_v49 = vadd.f32 1.0, %v4895_v62  ;;  %v3610_v35 = vmul.f32 %v3546_v1, %v10225_v17  ;;  %vm1707_vm8 = vcmp.eq.f32.partialorder %v1706_v57, 8.507059e+37 }
 0x37e   :  { %v1890_v63 = vadd.f32 0.014752088, %v1889_v43  ;;  %vm3819_vm9 = vcmp.gt.f32.partialorder %v3755_v56, 0.0  ;;  %v2015_v14 = vmul.f32 %v2014_v29, %v10211_v3  ;;  %v2330_v40 = vadd.f32 0.014752088, %v2329_v22  ;;  %v10231_v22 = vld [vmem:[#allocation83_spill] sm:$0xff] }
 0x37f   :  { %v1710_v15 = vsel %vm1707_vm8, %v1709_v61, %v1705_v42  ;;  %v2443_v25 = vadd.f32 0.18741608, %v10226_v52  ;;  %v3611_v7 = vmul.f32 %v3547_v49, %v10227_v37  ;;  %v1858_v38 = vmul.f32 %v7886_v51, %v7851_v58 }
 0x380   :  { %v1891_v54 = vmul.f32 %v1890_v63, %v6647_v8  ;;  %v7900_v62 = vadd.f32 0.05243302, %v10228_v53  ;;  %v2041_v1 = vadd.f32 0.05243302, %v2040_v44  ;;  %v1883_v57 = vadd.f32 0.18741608, %v1882_v27 }
 0x381   :  { %v5018_v46 = vpop.eup %5017  ;;  %v1724_v56 = vmul.f32 %v1723_v47, %v6638_v20  ;;  %v7905_v3 = vsel %vm3818_vm7, %v3610_v35, -1e+30  ;;  %v7907_v29 = vsel %vm3819_vm9, %v3611_v7, -1e+30  ;;  %v1711_v42 = vmul.f32 %v1710_v15, %v10231_v22  ;;  %v10232_v27 = vld [vmem:[#allocation106_spill] sm:$0xff] }
 0x382   :  { %10229 = vst [vmem:[#allocation36_spill] sm:$0xff] %v7905_v3  ;;  %v1738_v43 = vmul.f32 %v5018_v46, %v7867_v59  ;;  %v3962_v61 = vmax.f32 %v7905_v3, %v7907_v29  ;;  %v1892_v49 = vadd.f32 0.112945676, %v1891_v54  ;;  %v7913_v17 = vadd.f32 1.0, %v2015_v14 }
 0x383   :  { %10230 = vst [vmem:[#allocation79_spill] sm:$0xff] %v7907_v29  ;;  %v2331_v44 = vmul.f32 %v2330_v40, %v10218_v39  ;;  %v7917_v20 = vmul.f32 %v2443_v25, %v10232_v27  ;;  %v7920_v47 = vadd.f32 0.00028619796, %v10233_v4  ;;  %v1859_v63 = vsub.f32 1.0, %v1858_v38 }
 0x384   :  { %v1739_v35 = vsub.f32 1.0, %v1738_v43  ;;  %v2042_v15 = vmul.f32 %v2041_v1, %v10223_v21  ;;  %v1725_v52 = vadd.f32 1.1283791, %v1724_v56  ;;  %3963 = vmax.xlane.f32.xlu1 %v3962_v61  ;;  %v1748_v37 = vand.u32 2147483648, %v7867_v59 }
 0x385   :  { %v1893_v7 = vmul.f32 %v1892_v49, %v6647_v8  ;;  %v4880_v14 = vclamps-f32 %v1711_v42, 1.0  ;;  %vm1743_vm10 = vweird.f32 %v5018_v46  ;;  %v1746_v40 = vand.u32 2147483647, %v7867_v59 }
 0x386   :  { %v1740_v54 = vmul.f32 %v5018_v46, %v1739_v35  ;;  %v1884_v25 = vmul.f32 %v1883_v57, %v6647_v8  ;;  %5019 = vrcp.f32 %v7913_v17  ;;  %v2332_v22 = vadd.f32 0.112945676, %v2331_v44  ;;  %v10234_v57 = vld [vmem:[#allocation100_spill] sm:$0xff] }
 0x387   :  { %v1894_v53 = vadd.f32 0.4994258, %v1893_v7  ;;  %vm1742_vm11 = vweird.f32 %v7867_v59  ;;  %v3676_v1 = vunpack.c.1.s8 %v7434_v2  ;;  %v1860_v56 = vmul.f32 %v7886_v51, %v1859_v63 }
 0x388   :  { %v1741_v38 = vadd.f32 %v5018_v46, %v1740_v54  ;;  %vm1744_vm12 = vmor %vm1742_vm11, %vm1743_vm10  ;;  %v1749_v43 = vor.u32 1.1754944e-38, %v1748_v37  ;;  %v3677_v42 = vunpack.c.1.s8 %v7549_v13  ;;  %v2047_v49 = vmul.f32 3.8918573e-05, %v10223_v21 }
 0x389   :  { %v1895_v61 = vmul.f32 %v1894_v53, %v6647_v8  ;;  %v1726_v4 = vmul.f32 %v1725_v52, %v10234_v57  ;;  %vm1747_vm13 = vcmp.eq.f32.partialorder %v1746_v40, 8.507059e+37  ;;  %v3532_v44 = vadd.f32 1.0, %v4880_v14  ;;  %v10235_v8 = vld [vmem:[#allocation53_spill] sm:$0xff]  ;;  %v10236_v14 = vld [vmem:[#allocation78_spill] sm:$0xff] }
 0x38a   :  { %v1745_v35 = vsel %vm1744_vm12, %v5018_v46, %v1741_v38  ;;  %v2048_v59 = vadd.f32 0.001143296, %v2047_v49  ;;  %v2333_v2 = vmul.f32 %v2332_v22, %v10218_v39  ;;  %v3740_v3 = vcvt.s32.f32 %v3676_v1 }
 0x38b   :  { %v1750_v7 = vsel %vm1747_vm13, %v1749_v43, %v1745_v35  ;;  %v7935_v54 = vadd.f32 1.0, %v1895_v61  ;;  %v1861_v37 = vadd.f32 %v7886_v51, %v1860_v56  ;;  %vm1863_vm14 = vweird.f32 %v7886_v51  ;;  %747 = vperm.xlu0 %4954, %v10235_v8   ;;  %v10237_v61 = vld [vmem:[#allocation66_spill] sm:$0xff] }
 0x38c   :  { %v1751_v63 = vmul.f32 %v1750_v7, %v1726_v4  ;;  %v7941_v53 = vpop.eup %5019  ;;  %v3741_v52 = vcvt.s32.f32 %v3677_v42  ;;  %v1868_v46 = vand.u32 2147483648, %v7851_v58  ;;  %v2407_v40 = vmul.f32 3.8918573e-05, %v10236_v14 }
 0x38d   :  { %5021 = vrcp.f32 %v7935_v54  ;;  %vm1862_vm15 = vweird.f32 %v7851_v58  ;;  %v1866_v22 = vand.u32 2147483647, %v7851_v58  ;;  %v2049_v1 = vmul.f32 %v2048_v59, %v10223_v21  ;;  %v10240_v59 = vld [vmem:[#allocation24_spill] sm:$0xff] }
 0x38e   :  { %v4881_v38 = vclamps-f32 %v1751_v63, 1.0  ;;  %v2043_v56 = vadd.f32 0.18741608, %v2042_v15  ;;  %v1885_v43 = vadd.f32 1.1283791, %v1884_v25  ;;  %v3596_v49 = vmul.f32 %v3532_v44, %v10237_v61  ;;  %vm7950_vm1 = vmor %vm1862_vm15, %vm1863_vm14  ;;  %v7974_v61 = vpop.permute.xlu0 %712 }
 0x38f   :  { %v2334_v42 = vadd.f32 0.4994258, %v2333_v2  ;;  %v1865_v35 = vsel %vm7950_vm1, %v7886_v51, %v1861_v37  ;;  %v2018_v7 = vmul.f32 %v7941_v53, %v7913_v17  ;;  %v2050_v58 = vadd.f32 0.014752088, %v2049_v1  ;;  %v5277_v2 = vld [vmem:[%s9790_s4 + $0x20] sm:$0xff]  ;;  %v10241_v51 = vld [vmem:[#allocation119_spill] sm:$0xff]  ;;  %v7968_v1 = vpop.permute.xlu1 %702 }
 0x390   :  { %v3533_v4 = vadd.f32 1.0, %v4881_v38  ;;  %vm3804_vm2 = vcmp.gt.f32.partialorder %v3740_v3, 0.0  ;;  %vm3805_vm3 = vcmp.gt.f32.partialorder %v3741_v52, 0.0  ;;  %v1869_v15 = vor.u32 1.1754944e-38, %v1868_v46 }
 0x391   :  { %v2408_v25 = vadd.f32 0.001143296, %v2407_v40  ;;  %vm1867_vm4 = vcmp.eq.f32.partialorder %v1866_v22, 8.507059e+37  ;;  %v3680_v63 = vunpack.c.3.s8 %v5277_v2  ;;  %v2051_v8 = vmul.f32 %v2050_v58, %v10223_v21 }
 0x392   :  { %v3597_v44 = vmul.f32 %v3533_v4, %v10240_v59  ;;  %v7966_v37 = vmul.f32 %v7920_v47, %v10241_v51  ;;  %v7971_v46 = vmul.f32 %v2043_v56, %v10223_v21  ;;  %v1870_v40 = vsel %vm1867_vm4, %v1869_v15, %v1865_v35  ;;  %v10244_v59 = vld [vmem:[#allocation102_spill] sm:$0xff] }
 0x393   :  { %v5022_v38 = vpop.eup %5021  ;;  %v2335_v22 = vmul.f32 %v2334_v42, %v10218_v39  ;;  %v7977_v57 = vsel %vm3804_vm2, %v3596_v49, -1e+30  ;;  %v2019_v47 = vsub.f32 1.0, %v2018_v7  ;;  %v1886_v2 = vmul.f32 %v1885_v43, %v10244_v59  ;;  %v10245_v39 = vld [vmem:[#allocation81_spill] sm:$0xff]  ;;  %v10246_v43 = vld [vmem:[#allocation19_spill] sm:$0xff] }
 0x394   :  { %10242 = vst [vmem:[#allocation37_spill] sm:$0xff] %v7977_v57  ;;  %v7980_v4 = vsel %vm3805_vm3, %v3597_v44, -1e+30  ;;  %v1898_v58 = vmul.f32 %v5022_v38, %v7935_v54  ;;  %v2052_v34 = vadd.f32 0.112945676, %v2051_v8  ;;  %v2409_v35 = vmul.f32 %v2408_v25, %v10236_v14 }
 0x395   :  { %10243 = vst [vmem:[#allocation88_spill] sm:$0xff] %v7980_v4  ;;  %v3941_v56 = vmax.f32 %v7977_v57, %v7980_v4  ;;  %v1871_v42 = vmul.f32 %v1870_v40, %v10245_v39  ;;  %v7988_v3 = vcvt.s32.f32 %v3680_v63  ;;  %v2026_v52 = vand.u32 2147483647, %v7913_v17  ;;  %v10283_v57 = vld [vmem:[#allocation107_spill] sm:$0xff] }
 0x396   :  { %v1899_v15 = vsub.f32 1.0, %v1898_v58  ;;  %v1908_v49 = vand.u32 2147483648, %v7935_v54  ;;  %v2053_v7 = vmul.f32 %v2052_v34, %v10223_v21  ;;  %v7993_v44 = vadd.f32 1.0, %v2335_v22 }
 0x397   :  { %3942 = vmax.xlane.f32.xlu2 %v3941_v56  ;;  %v2367_v59 = vmul.f32 3.8918573e-05, %v10246_v43  ;;  %vm1903_vm5 = vweird.f32 %v5022_v38  ;;  %v1906_v25 = vand.u32 2147483647, %v7935_v54  ;;  %v2020_v8 = vmul.f32 %v7941_v53, %v2019_v47 }
 0x398   :  { %v1900_v6 = vmul.f32 %v5022_v38, %v1899_v15  ;;  %v3681_v63 = vunpack.c.3.s8 %v7549_v13  ;;  %v2028_v40 = vand.u32 2147483648, %v7913_v17  ;;  %v2054_v58 = vadd.f32 0.4994258, %v2053_v7  ;;  %v3919_v15 = vpop.xlane.xlu1 %3918 }
 0x399   :  { %v2410_v56 = vadd.f32 0.014752088, %v2409_v35  ;;  %v4884_v39 = vclamps-f32 %v1871_v42, 1.0  ;;  %vm1902_vm6 = vweird.f32 %v7935_v54  ;;  %vm2023_vm7 = vweird.f32 %v7941_v53  ;;  %v3916_v42 = vpop.xlane.xlu0 %3915 }
 0x39a   :  { %v1901_v29 = vadd.f32 %v5022_v38, %v1900_v6  ;;  %vm1904_vm8 = vmor %vm1902_vm6, %vm1903_vm5  ;;  %v1909_v34 = vor.u32 1.1754944e-38, %v1908_v49  ;;  %v2055_v22 = vmul.f32 %v2054_v58, %v10223_v21  ;;  %5023 = vrcp.f32 %v7993_v44 }
 0x39b   :  { %v2368_v47 = vadd.f32 0.001143296, %v2367_v59  ;;  %vm1907_vm9 = vcmp.eq.f32.partialorder %v1906_v25, 8.507059e+37  ;;  %v2021_v13 = vadd.f32 %v7941_v53, %v2020_v8  ;;  %v4012_v35 = vsub.f32 %v7001_v30, %v3919_v15  ;;  %v10247_v59 = vld [vmem:[#allocation52_spill] sm:$0xff] }
 0x39c   :  { %v1905_v5 = vsel %vm1904_vm8, %v5022_v38, %v1901_v29  ;;  %v8006_v7 = vadd.f32 1.0, %v2055_v22  ;;  %v4013_v54 = vsub.f32 %v7060_v32, %v3919_v15  ;;  %v4010_v49 = vsub.f32 %v7102_v18, %v3916_v42 }
 0x39d   :  { %v1910_v6 = vsel %vm1907_vm9, %v1909_v34, %v1905_v5  ;;  %v3536_v21 = vadd.f32 1.0, %v4884_v39  ;;  %vm2022_vm10 = vweird.f32 %v7913_v17  ;;  %v4078_v58 = vmul.f32 1.442695, %v4012_v35  ;;  %742 = vperm.xlu1 %4955, %v10247_v59   ;;  %v10254_v59 = vld [vmem:[#allocation40_spill] sm:$0xff] }
 0x39e   :  { %v1911_v36 = vmul.f32 %v1910_v6, %v1886_v2  ;;  %v3745_v29 = vcvt.s32.f32 %v3681_v63  ;;  %5025 = vrcp.f32 %v8006_v7  ;;  %v2369_v30 = vmul.f32 %v2368_v47, %v10246_v43  ;;  %vm8018_vm12 = vmor %vm2022_vm10, %vm2023_vm7  ;;  %v10251_v47 = vld [vmem:[#allocation86_spill] sm:$0xff] }
 0x39f   :  { %v2411_v5 = vmul.f32 %v2410_v56, %v10236_v14  ;;  %vm3808_vm11 = vcmp.gt.f32.partialorder %v7988_v3, 0.0  ;;  %v4080_v18 = vmul.f32 1.442695, %v4013_v54  ;;  %v4011_v17 = vsub.f32 %v7154_v26, %v3916_v42  ;;  %v10250_v56 = vld [vmem:[#allocation57_spill] sm:$0xff]  ;;  %v10256_v3 = vld [vmem:[#allocation63_spill] sm:$0xff] }
 0x3a0   :  { %v4885_v38 = vclamps-f32 %v1911_v36, 1.0  ;;  %v8023_v2 = vpop.eup %5023  ;;  %v2025_v25 = vsel %vm8018_vm12, %v7941_v53, %v2021_v13  ;;  %vm2027_vm13 = vcmp.eq.f32.partialorder %v2026_v52, 8.507059e+37  ;;  %v2029_v8 = vor.u32 1.1754944e-38, %v2028_v40  ;;  %v5278_v40 = vld [vmem:[%s9790_s4 + $0x30] sm:$0xff] }
 0x3a1   :  { %v4074_v36 = vmul.f32 1.442695, %v4010_v49  ;;  %v3600_v39 = vmul.f32 %v3536_v21, %v10250_v56  ;;  %5027 = vpow2.f32 %v4078_v58  ;;  %v4076_v34 = vmul.f32 1.442695, %v4011_v17 }
 0x3a2   :  { %v3537_v63 = vadd.f32 1.0, %v4885_v38  ;;  %vm3809_vm14 = vcmp.gt.f32.partialorder %v3745_v29, 0.0  ;;  %5029 = vpow2.f32 %v4080_v18  ;;  %v2370_v22 = vadd.f32 0.014752088, %v2369_v30 }
 0x3a3   :  { %v2412_v15 = vadd.f32 0.112945676, %v2411_v5  ;;  %v2030_v35 = vsel %vm2027_vm13, %v2029_v8, %v2025_v25  ;;  %5031 = vpow2.f32 %v4074_v36  ;;  %v2338_v42 = vmul.f32 %v8023_v2, %v7993_v44  ;;  %v10257_v36 = vld [vmem:[#allocation104_spill] sm:$0xff] }
 0x3a4   :  { %v3601_v26 = vmul.f32 %v3537_v63, %v10251_v47  ;;  %v5026_v53 = vpop.eup %5025  ;;  %v2045_v52 = vadd.f32 1.1283791, %v7971_v46  ;;  %v3684_v13 = vunpack.c.1.s8 %v5278_v40  ;;  %5033 = vpow2.f32 %v4076_v34 }
 0x3a5   :  { %v2371_v6 = vmul.f32 %v2370_v22, %v10246_v43  ;;  %v2519_v54 = vadd.f32 0.0036580483, %v7966_v37  ;;  %v8040_v49 = vsel %vm3808_vm11, %v3600_v39, -1e+30  ;;  %v2058_v58 = vmul.f32 %v5026_v53, %v8006_v7  ;;  %v10255_v37 = vld [vmem:[#allocation17_spill] sm:$0xff] }
 0x3a6   :  { %10252 = vst [vmem:[#allocation39_spill] sm:$0xff] %v8040_v49  ;;  %v8043_v21 = vsel %vm3809_vm14, %v3601_v26, -1e+30  ;;  %v2031_v30 = vmul.f32 %v2030_v35, %v10254_v59  ;;  %v2413_v38 = vmul.f32 %v2412_v15, %v10236_v14  ;;  %v8052_v18 = vadd.f32 %v10255_v37, %v7968_v1  ;;  %v8063_v15 = vpop.permute.xlu2 %717 }
 0x3a7   :  { %10253 = vst [vmem:[#allocation20_spill] sm:$0xff] %v8043_v21  ;;  %v3947_v46 = vmax.f32 %v8040_v49, %v8043_v21  ;;  %v2372_v5 = vadd.f32 0.112945676, %v2371_v6  ;;  %v5028_v32 = vpop.eup %5027  ;;  %v8056_v29 = vadd.f32 %v10256_v3, %v7968_v1  ;;  %v2059_v17 = vsub.f32 1.0, %v2058_v58 }
 0x3a8   :  { %v2339_v25 = vsub.f32 1.0, %v2338_v42  ;;  %v5030_v8 = vpop.eup %5029  ;;  %v2046_v63 = vmul.f32 %v2045_v52, %v10257_v36  ;;  %v2068_v56 = vand.u32 2147483648, %v8006_v7  ;;  %v8060_v39 = vcvt.s32.f32 %v3684_v13  ;;  %v8078_v36 = vpop.f32.mrf.mxu1 }
 0x3a9   :  { %3948 = vmax.xlane.f32.xlu2 %v3947_v46  ;;  %v2373_v34 = vmul.f32 %v2372_v5, %v10246_v43  ;;  %v5032_v22 = vpop.eup %5031  ;;  %v2060_v47 = vmul.f32 %v5026_v53, %v2059_v17  ;;  %vm2063_vm15 = vweird.f32 %v5026_v53  ;;  %v2066_v1 = vand.u32 2147483647, %v8006_v7  ;;  %10260 = vst [vmem:[#allocation80_spill] sm:$0xff] %v8078_v36  ;;  %v10278_v36 = vld [vmem:[#allocation123_spill] sm:$0xff] }
 0x3aa   :  { %v2346_v26 = vand.u32 2147483647, %v7993_v44  ;;  %v5034_v35 = vpop.eup %5033  ;;  %v4888_v42 = vclamps-f32 %v2031_v30, 1.0  ;;  %vm2342_vm1 = vweird.f32 %v7993_v44  ;;  %v2414_v40 = vadd.f32 0.4994258, %v2413_v38 }
 0x3ab   :  { %v2374_v52 = vadd.f32 0.4994258, %v2373_v34  ;;  %v2061_v6 = vadd.f32 %v5026_v53, %v2060_v47  ;;  %vm2062_vm2 = vweird.f32 %v8006_v7  ;;  %v3685_v13 = vunpack.c.1.s8 %v7642_v24  ;;  %v5279_v24 = vld [vmem:[%s9786_s0 + $0xc0] sm:$0xff] }
 0x3ac   :  { %v2340_v58 = vmul.f32 %v8023_v2, %v2339_v25  ;;  %vm2064_vm3 = vmor %vm2062_vm2, %vm2063_vm15  ;;  %v2069_v46 = vor.u32 1.1754944e-38, %v2068_v56  ;;  %v8072_v5 = vpack.c.bf16 %v5028_v32, %v5032_v22  ;;  %v8074_v17 = vpack.c.bf16 %v5030_v8, %v5034_v35  ;;  %4822 = vmatmul.msk.f32.gmra.mxu1 %vm89_vm0, %v5279_v24  ;;  %v10261_v25 = vld [vmem:[#allocation85_spill] sm:$0xff]  ;;  %v3925_v22 = vpop.xlane.xlu0 %3924 }
 0x3ad   :  { %v2375_v59 = vmul.f32 %v2374_v52, %v10246_v43  ;;  %v2065_v30 = vsel %vm2064_vm3, %v5026_v53, %v2061_v6  ;;  %vm2067_vm4 = vcmp.eq.f32.partialorder %v2066_v1, 8.507059e+37  ;;  %vm2343_vm5 = vweird.f32 %v8023_v2  ;;  %v10269_v52 = vld [vmem:[#allocation91_spill] sm:$0xff] }
 0x3ae   :  { %10258 = vst [vmem:[#allocation93_spill] sm:$0xff] %v8072_v5  ;;  %v2348_v38 = vand.u32 2147483648, %v7993_v44  ;;  %v2070_v7 = vsel %vm2067_vm4, %v2069_v46, %v2065_v30  ;;  %v3540_v43 = vadd.f32 1.0, %v4888_v42  ;;  %4450 = vmatmul.bf16.vlgmr.msrb.gmra.mxu3 %v8072_v5  ;;  %4539 = vmatmul.bf16.vlgmr.msrb.gmra.mxu0 %v8074_v17  ;;  %v2447_v53 = vmul.f32 3.8918573e-05, %v10232_v27  ;;  %vm8101_vm0 = vmor %vm2342_vm1, %vm2343_vm5 }
 0x3af   :  { %10259 = vst [vmem:[#allocation27_spill] sm:$0xff] %v8074_v17  ;;  %v8084_v32 = vadd.f32 1.0, %v2375_v59  ;;  %v2482_v8 = vmul.f32 %v7900_v62, %v10261_v25  ;;  %v2071_v56 = vmul.f32 %v2070_v7, %v2046_v63  ;;  %v2341_v34 = vadd.f32 %v8023_v2, %v2340_v58 }
 0x3b0   :  { %v2415_v47 = vmul.f32 %v2414_v40, %v10236_v14  ;;  %v2520_v1 = vmul.f32 %v2519_v54, %v10241_v51  ;;  %v8095_v35 = vmul.f32 0.70710677, %v8052_v18  ;;  %v3749_v42 = vcvt.s32.f32 %v3685_v13  ;;  %v3922_v54 = vpop.xlane.xlu2 %3921  ;;  %v10266_v40 = vld [vmem:[#allocation71_spill] sm:$0xff] }
 0x3b1   :  { %5035 = vrcp.f32 %v8084_v32  ;;  %v8107_v62 = vmul.f32 0.70710677, %v8056_v29  ;;  %v4889_v14 = vclamps-f32 %v2071_v56, 1.0  ;;  %vm3812_vm6 = vcmp.gt.f32.partialorder %v8060_v39, 0.0 }
 0x3b2   :  { %vm8110_vm7 = vcmp.eq.f32.partialorder %v2346_v26, 8.507059e+37  ;;  %v3604_v6 = vmul.f32 %v3540_v43, %v10266_v40  ;;  %v2349_v44 = vor.u32 1.1754944e-38, %v2348_v38  ;;  %v4016_v13 = vsub.f32 %v7350_v19, %v3925_v22  ;;  %v10267_v43 = vld [vmem:[#allocation70_spill] sm:$0xff] }
 0x3b3   :  { %v2448_v58 = vadd.f32 0.001143296, %v2447_v53  ;;  %v3541_v46 = vadd.f32 1.0, %v4889_v14  ;;  %v2345_v59 = vsel %vm8101_vm0, %v8023_v2, %v2341_v34  ;;  %v4017_v30 = vsub.f32 %v7373_v60, %v3925_v22  ;;  %v10268_v53 = vld [vmem:[#allocation89_spill] sm:$0xff] }
 0x3b4   :  { %v8120_v24 = vadd.f32 1.0, %v2415_v47  ;;  %v8122_v7 = vadd.f32 0.18741608, %v2482_v8  ;;  %v2554_v26 = vmul.f32 %v8095_v35, %v8095_v35  ;;  %vm3813_vm8 = vcmp.gt.f32.partialorder %v3749_v42, 0.0 }
 0x3b5   :  { %v4014_v38 = vsub.f32 %v10267_v43, %v3922_v54  ;;  %v2521_v56 = vadd.f32 0.05243302, %v2520_v1  ;;  %v2594_v19 = vmul.f32 %v8107_v62, %v8107_v62  ;;  %v3605_v14 = vmul.f32 %v3541_v46, %v10268_v53  ;;  %v10272_v46 = vld [vmem:[#allocation118_spill] sm:$0xff] }
 0x3b6   :  { %v4015_v2 = vsub.f32 %v10269_v52, %v3922_v54  ;;  %v8133_v60 = vsel %vm3812_vm6, %v3604_v6, -1e+30  ;;  %v2350_v8 = vsel %vm8110_vm7, %v2349_v44, %v2345_v59  ;;  %v4086_v22 = vmul.f32 1.442695, %v4016_v13 }
 0x3b7   :  { %v5036_v34 = vpop.eup %5035  ;;  %10270 = vst [vmem:[#allocation92_spill] sm:$0xff] %v8133_v60  ;;  %v2449_v47 = vmul.f32 %v2448_v58, %v10232_v27  ;;  %v8138_v42 = vsel %vm3813_vm8, %v3605_v14, -1e+30  ;;  %v4088_v40 = vmul.f32 1.442695, %v4017_v30  ;;  %5037 = vrcp.f32 %v8120_v24  ;;  %v10274_v58 = vld [vmem:[#allocation116_spill] sm:$0xff] }
 0x3b8   :  { %10271 = vst [vmem:[#allocation98_spill] sm:$0xff] %v8138_v42  ;;  %v2378_v1 = vmul.f32 %v5036_v34, %v8084_v32  ;;  %v8144_v54 = vadd.f32 %v10256_v3, %v10272_v46  ;;  %v8146_v39 = vmin.f32 %v2554_v26, 16.0  ;;  %v3953_v63 = vmax.f32 %v8133_v60, %v8138_v42 }
 0x3b9   :  { %v4082_v6 = vmul.f32 1.442695, %v4014_v38  ;;  %v2522_v44 = vmul.f32 %v2521_v56, %v10241_v51  ;;  %v4084_v13 = vmul.f32 1.442695, %v4015_v2  ;;  %v2351_v59 = vmul.f32 %v2350_v8, %v10274_v58 }
 0x3ba   :  { %10273 = vst [vmem:[#allocation18_spill] sm:$0xff] %v8144_v54  ;;  %v2379_v43 = vsub.f32 1.0, %v2378_v1  ;;  %v8152_v53 = vmin.f32 %v2594_v19, 16.0  ;;  %3954 = vmax.xlane.f32.xlu2 %v3953_v63  ;;  %v2388_v30 = vand.u32 2147483648, %v8084_v32  ;;  %5039 = vpow2.f32 %v4086_v22  ;;  %v10275_v63 = vld [vmem:[#allocation122_spill] sm:$0xff] }
 0x3bb   :  { %v2450_v14 = vadd.f32 0.014752088, %v2449_v47  ;;  %vm2383_vm9 = vweird.f32 %v5036_v34  ;;  %v2386_v26 = vand.u32 2147483647, %v8084_v32  ;;  %5041 = vpow2.f32 %v4088_v40 }
 0x3bc   :  { %v2380_v52 = vmul.f32 %v5036_v34, %v2379_v43  ;;  %v8158_v38 = vadd.f32 %v10255_v37, %v8063_v15  ;;  %5043 = vpow2.f32 %v4082_v6  ;;  %v2567_v19 = vmul.f32 3.8918573e-05, %v8146_v39 }
 0x3bd   :  { %v2451_v56 = vmul.f32 %v2450_v14, %v10232_v27  ;;  %v8162_v2 = vpop.eup %5037  ;;  %5045 = vpow2.f32 %v4084_v13  ;;  %v4896_v8 = vclamps-f32 %v2351_v59, 1.0  ;;  %vm2382_vm10 = vweird.f32 %v8084_v32 }
 0x3be   :  { %v2381_v22 = vadd.f32 %v5036_v34, %v2380_v52  ;;  %vm2384_vm11 = vmor %vm2382_vm10, %vm2383_vm9  ;;  %v2389_v47 = vor.u32 1.1754944e-38, %v2388_v30  ;;  %v3692_v1 = vunpack.c.1.s8 %v7757_v10  ;;  %v3693_v40 = vunpack.c.1.s8 %v7843_v45 }
 0x3bf   :  { %v2452_v46 = vadd.f32 0.112945676, %v2451_v56  ;;  %v8168_v6 = vmul.f32 0.70710677, %v10275_v63  ;;  %v8172_v58 = vadd.f32 %v10256_v3, %v8063_v15  ;;  %vm2387_vm12 = vcmp.eq.f32.partialorder %v2386_v26, 8.507059e+37 }
 0x3c0   :  { %v2385_v43 = vsel %vm2384_vm11, %v5036_v34, %v2381_v22  ;;  %v5040_v13 = vpop.eup %5039  ;;  %v2418_v32 = vmul.f32 %v8162_v2, %v8120_v24  ;;  %v2568_v10 = vadd.f32 0.001143296, %v2567_v19  ;;  %v8178_v52 = vmul.f32 0.70710677, %v8144_v54 }
 0x3c1   :  { %10276 = vst [vmem:[#allocation65_spill] sm:$0xff] %v8168_v6  ;;  %v2390_v59 = vsel %vm2387_vm12, %v2389_v47, %v2385_v43  ;;  %v2453_v30 = vmul.f32 %v2452_v46, %v10232_v27  ;;  %v5042_v14 = vpop.eup %5041  ;;  %v2556_v56 = vmul.f32 2.1237322e-06, %v8146_v39  ;;  %v3548_v15 = vadd.f32 1.0, %v4896_v8 }
 0x3c2   :  { %10277 = vst [vmem:[#allocation56_spill] sm:$0xff] %v8178_v52  ;;  %v2391_v42 = vmul.f32 %v2390_v59, %v10278_v36  ;;  %v5044_v60 = vpop.eup %5043  ;;  %v2596_v34 = vmul.f32 2.1237322e-06, %v8152_v53  ;;  %v8184_v26 = vmul.f32 0.70710677, %v8158_v38  ;;  %v3756_v22 = vcvt.s32.f32 %v3692_v1 }
 0x3c3   :  { %v3757_v47 = vcvt.s32.f32 %v3693_v40  ;;  %v5046_v43 = vpop.eup %5045  ;;  %v8188_v19 = vadd.f32 %v10255_v37, %v7974_v61  ;;  %v8191_v46 = vmul.f32 0.70710677, %v8172_v58  ;;  %v2454_v49 = vadd.f32 0.4994258, %v2453_v30 }
 0x3c4   :  { %v4897_v21 = vclamps-f32 %v2391_v42, 1.0  ;;  %v8193_v36 = vpack.c.bf16 %v5040_v13, %v5044_v60  ;;  %v8195_v8 = vpack.c.bf16 %v5042_v14, %v5046_v43  ;;  %v2419_v59 = vsub.f32 1.0, %v2418_v32 }
 0x3c5   :  { %10279 = vst [vmem:[#allocation54_spill] sm:$0xff] %v8188_v19  ;;  %v2569_v12 = vmul.f32 %v2568_v10, %v8146_v39  ;;  %v2523_v4 = vadd.f32 0.18741608, %v2522_v44  ;;  %v8200_v1 = vadd.f32 %v10256_v3, %v7974_v61  ;;  %v3612_v28 = vmul.f32 %v3548_v15, %v10283_v57  ;;  %v10284_v44 = vld [vmem:[#allocation109_spill] sm:$0xff] }
 0x3c6   :  { %10280 = vst [vmem:[#allocation61_spill] sm:$0xff] %v8193_v36  ;;  %v3549_v40 = vadd.f32 1.0, %v4897_v21  ;;  %v2634_v55 = vmul.f32 %v8168_v6, %v8168_v6  ;;  %v2557_v42 = vadd.f32 0.00028619796, %v2556_v56  ;;  %vm3820_vm13 = vcmp.gt.f32.partialorder %v3756_v22, 0.0  ;;  %4455 = vmatmul.bf16.gmra.mxu3 %v8193_v36  ;;  %4544 = vmatmul.bf16.gmra.mxu0 %v8195_v8 }
 0x3c7   :  { %10281 = vst [vmem:[#allocation43_spill] sm:$0xff] %v8195_v8  ;;  %vm3821_vm14 = vcmp.gt.f32.partialorder %v3757_v47, 0.0  ;;  %v2794_v60 = vmul.f32 %v8184_v26, %v8184_v26  ;;  %v2834_v61 = vmul.f32 %v8191_v46, %v8191_v46  ;;  %v2455_v57 = vmul.f32 %v2454_v49, %v10232_v27 }
 0x3c8   :  { %10282 = vst [vmem:[#allocation41_spill] sm:$0xff] %v8200_v1  ;;  %v3613_v21 = vmul.f32 %v3549_v40, %v10284_v44  ;;  %v2597_v13 = vadd.f32 0.00028619796, %v2596_v34  ;;  %v8214_v32 = vmul.f32 0.70710677, %v8188_v19  ;;  %v2420_v30 = vmul.f32 %v8162_v2, %v2419_v59 }
 0x3c9   :  { %v2570_v10 = vadd.f32 0.014752088, %v2569_v12  ;;  %v2674_v14 = vmul.f32 %v8178_v52, %v8178_v52  ;;  %v8220_v56 = vmul.f32 0.70710677, %v8200_v1  ;;  %v8222_v15 = vsel %vm3820_vm13, %v3612_v28, -1e+30 }
 0x3ca   :  { %10285 = vst [vmem:[#allocation48_spill] sm:$0xff] %v8222_v15  ;;  %v8224_v22 = vsel %vm3821_vm14, %v3613_v21, -1e+30  ;;  %v2558_v47 = vmul.f32 %v2557_v42, %v8146_v39  ;;  %vm2422_vm15 = vweird.f32 %v8120_v24  ;;  %vm2423_vm1 = vweird.f32 %v8162_v2 }
 0x3cb   :  { %10286 = vst [vmem:[#allocation35_spill] sm:$0xff] %v8224_v22  ;;  %v3965_v27 = vmax.f32 %v8222_v15, %v8224_v22  ;;  %v8231_v12 = vmin.f32 %v2794_v60, 16.0  ;;  %v8233_v49 = vmin.f32 %v2834_v61, 16.0  ;;  %v2428_v34 = vand.u32 2147483648, %v8120_v24  ;;  %vm8247_vm2 = vmor %vm2422_vm15, %vm2423_vm1 }
 0x3cc   :  { %v8236_v43 = vadd.f32 1.0, %v2455_v57  ;;  %v2714_v28 = vmul.f32 %v8214_v32, %v8214_v32  ;;  %v2421_v59 = vadd.f32 %v8162_v2, %v2420_v30  ;;  %v2426_v40 = vand.u32 2147483647, %v8120_v24  ;;  %v10289_v57 = vld [vmem:[#allocation120_spill] sm:$0xff] }
 0x3cd   :  { %3966 = vmax.xlane.f32.xlu2 %v3965_v27  ;;  %v2571_v42 = vmul.f32 %v2570_v10, %v8146_v39  ;;  %v2598_v44 = vmul.f32 %v2597_v13, %v8152_v53  ;;  %v2754_v60 = vmul.f32 %v8220_v56, %v8220_v56  ;;  %v2796_v61 = vmul.f32 2.1237322e-06, %v8231_v12 }
 0x3ce   :  { %5047 = vrcp.f32 %v8236_v43  ;;  %v2405_v27 = vadd.f32 1.1283791, %v10289_v57  ;;  %v2445_v30 = vadd.f32 1.1283791, %v7917_v20  ;;  %v2484_v24 = vmul.f32 %v8122_v7, %v10261_v25 }
 0x3cf   :  { %v8256_v10 = vmin.f32 %v2634_v55, 16.0  ;;  %v8258_v13 = vmin.f32 %v2674_v14, 16.0  ;;  %v2559_v15 = vadd.f32 0.0036580483, %v2558_v47  ;;  %v2836_v22 = vmul.f32 2.1237322e-06, %v8233_v49 }
 0x3d0   :  { %v2429_v48 = vor.u32 1.1754944e-38, %v2428_v34  ;;  %v8261_v9 = vmin.f32 %v2714_v28, 16.0  ;;  %v2425_v8 = vsel %vm8247_vm2, %v8162_v2, %v2421_v59  ;;  %vm2427_vm3 = vcmp.eq.f32.partialorder %v2426_v40, 8.507059e+37  ;;  %v10290_v14 = vld [vmem:[#allocation69_spill] sm:$0xff]  ;;  %v10291_v47 = vld [vmem:[#allocation110_spill] sm:$0xff] }
 0x3d1   :  { %v2572_v57 = vadd.f32 0.112945676, %v2571_v42  ;;  %v2524_v20 = vmul.f32 %v2523_v4, %v10241_v51  ;;  %v2599_v36 = vadd.f32 0.0036580483, %v2598_v44  ;;  %v8267_v7 = vmin.f32 %v2754_v60, 16.0  ;;  %v10292_v42 = vld [vmem:[#allocation96_spill] sm:$0xff] }
 0x3d2   :  { %v2797_v55 = vadd.f32 0.00028619796, %v2796_v61  ;;  %v2406_v17 = vmul.f32 %v2405_v27, %v10290_v14  ;;  %v8271_v5 = vmul.f32 0.5, %v10291_v47  ;;  %v2636_v34 = vmul.f32 2.1237322e-06, %v8256_v10 }
 0x3d3   :  { %v2716_v28 = vmul.f32 2.1237322e-06, %v8261_v9  ;;  %v2676_v2 = vmul.f32 2.1237322e-06, %v8258_v13  ;;  %v2560_v59 = vmul.f32 %v2559_v15, %v8146_v39  ;;  %v2837_v40 = vadd.f32 0.00028619796, %v2836_v22 }
 0x3d4   :  { %v5048_v54 = vpop.eup %5047  ;;  %v2430_v4 = vsel %vm2427_vm3, %v2429_v48, %v2425_v8  ;;  %v2446_v44 = vmul.f32 %v2445_v30, %v10292_v42  ;;  %v2485_v60 = vadd.f32 1.1283791, %v2484_v24  ;;  %v2573_v21 = vmul.f32 %v2572_v57, %v8146_v39 }
 0x3d5   :  { %v2458_v61 = vmul.f32 %v5048_v54, %v8236_v43  ;;  %v2525_v27 = vadd.f32 1.1283791, %v2524_v20  ;;  %v2600_v14 = vmul.f32 %v2599_v36, %v8152_v53  ;;  %v2756_v47 = vmul.f32 2.1237322e-06, %v8267_v7  ;;  %v10293_v36 = vld [vmem:[#allocation74_spill] sm:$0xff] }
 0x3d6   :  { %v2798_v63 = vmul.f32 %v2797_v55, %v8231_v12  ;;  %v2637_v52 = vadd.f32 0.00028619796, %v2636_v34  ;;  %v2717_v6 = vadd.f32 0.00028619796, %v2716_v28  ;;  %v2431_v1 = vmul.f32 %v2430_v4, %v2406_v17  ;;  %v8294_v4 = vld [vmem:[%s9790_s4 + $0x40] sm:$0xff] }
 0x3d7   :  { %v2459_v15 = vsub.f32 1.0, %v2458_v61  ;;  %v2677_v22 = vadd.f32 0.00028619796, %v2676_v2  ;;  %v2561_v48 = vadd.f32 0.05243302, %v2560_v59  ;;  %v2838_v8 = vmul.f32 %v2837_v40, %v8233_v49 }
 0x3d8   :  { %v2468_v30 = vand.u32 2147483648, %v8236_v43  ;;  %vm2463_vm4 = vweird.f32 %v5048_v54  ;;  %v2466_v57 = vand.u32 2147483647, %v8236_v43  ;;  %v2574_v20 = vadd.f32 0.4994258, %v2573_v21 }
 0x3d9   :  { %v2460_v24 = vmul.f32 %v5048_v54, %v2459_v15  ;;  %v8287_v42 = vmul.f32 %v2485_v60, %v10293_v36  ;;  %v2601_v19 = vadd.f32 0.05243302, %v2600_v14  ;;  %v2757_v55 = vadd.f32 0.00028619796, %v2756_v47  ;;  %v10294_v15 = vld [vmem:[#allocation115_spill] sm:$0xff] }
 0x3da   :  { %v2799_v34 = vadd.f32 0.0036580483, %v2798_v63  ;;  %v2718_v17 = vmul.f32 %v2717_v6, %v8261_v9  ;;  %v4898_v28 = vclamps-f32 %v2431_v1, 1.0  ;;  %vm2462_vm5 = vweird.f32 %v8236_v43 }
 0x3db   :  { %v2461_v2 = vadd.f32 %v5048_v54, %v2460_v24  ;;  %v2839_v59 = vadd.f32 0.0036580483, %v2838_v8  ;;  %vm2464_vm0 = vmor %vm2462_vm5, %vm2463_vm4  ;;  %v2469_v40 = vor.u32 1.1754944e-38, %v2468_v30  ;;  %v3694_v60 = vunpack.c.2.s8 %v8294_v4 }
 0x3dc   :  { %v3695_v61 = vunpack.c.2.s8 %v7843_v45  ;;  %v2638_v63 = vmul.f32 %v2637_v52, %v8256_v10  ;;  %vm2467_vm6 = vcmp.eq.f32.partialorder %v2466_v57, 8.507059e+37  ;;  %v2575_v6 = vmul.f32 %v2574_v20, %v8146_v39 }
 0x3dd   :  { %v2465_v21 = vsel %vm2464_vm0, %v5048_v54, %v2461_v2  ;;  %v2562_v1 = vmul.f32 %v2561_v48, %v8146_v39  ;;  %v2758_v43 = vmul.f32 %v2757_v55, %v8267_v7  ;;  %v2800_v14 = vmul.f32 %v2799_v34, %v8231_v12 }
 0x3de   :  { %v2470_v47 = vsel %vm2467_vm6, %v2469_v40, %v2465_v21  ;;  %v8304_v8 = vmul.f32 %v2525_v27, %v10294_v15  ;;  %v2602_v30 = vmul.f32 %v2601_v19, %v8152_v53  ;;  %v3550_v45 = vadd.f32 1.0, %v4898_v28 }
 0x3df   :  { %v2471_v24 = vmul.f32 %v2470_v47, %v2446_v44  ;;  %v2719_v36 = vadd.f32 0.0036580483, %v2718_v17  ;;  %v2840_v54 = vmul.f32 %v2839_v59, %v8233_v49  ;;  %v3758_v52 = vcvt.s32.f32 %v3694_v60  ;;  %v10295_v44 = vld [vmem:[#allocation112_spill] sm:$0xff] }
 0x3e0   :  { %v3759_v57 = vcvt.s32.f32 %v3695_v61  ;;  %v2639_v20 = vadd.f32 0.0036580483, %v2638_v63  ;;  %v8308_v48 = vadd.f32 1.0, %v2575_v6  ;;  %v2487_v55 = vmul.f32 3.8918573e-05, %v10261_v25  ;;  %v10297_v63 = vld [vmem:[#allocation113_spill] sm:$0xff] }
 0x3e1   :  { %v4899_v2 = vclamps-f32 %v2471_v24, 1.0  ;;  %v2678_v34 = vmul.f32 %v2677_v22, %v8258_v13  ;;  %v2563_v40 = vadd.f32 0.18741608, %v2562_v1  ;;  %v2759_v27 = vadd.f32 0.0036580483, %v2758_v43  ;;  %v10296_v22 = vld [vmem:[#allocation55_spill] sm:$0xff]  ;;  %v8328_v24 = vpop.xlane.xlu2 %3927 }
 0x3e2   :  { %v2801_v21 = vadd.f32 0.05243302, %v2800_v14  ;;  %v2603_v15 = vadd.f32 0.18741608, %v2602_v30  ;;  %v3614_v28 = vmul.f32 %v3550_v45, %v10295_v44  ;;  %5049 = vrcp.f32 %v8308_v48 }
 0x3e3   :  { %v3551_v19 = vadd.f32 1.0, %v4899_v2  ;;  %v2720_v17 = vmul.f32 %v2719_v36, %v8261_v9  ;;  %v2841_v59 = vadd.f32 0.05243302, %v2840_v54  ;;  %vm3822_vm7 = vcmp.gt.f32.partialorder %v3758_v52, 0.0 }
 0x3e4   :  { %vm3823_vm8 = vcmp.gt.f32.partialorder %v3759_v57, 0.0  ;;  %v8316_v60 = vmul.f32 0.5, %v8052_v18  ;;  %v8319_v61 = vmul.f32 0.5, %v8056_v29  ;;  %v2488_v1 = vadd.f32 0.001143296, %v2487_v55 }
 0x3e5   :  { %752 = vperm.xlu2 %4956, %v10296_v22   ;;  %v3615_v6 = vmul.f32 %v3551_v19, %v10297_v63  ;;  %v8323_v43 = vadd.f32 0.0036580483, %v2678_v34  ;;  %v2564_v14 = vmul.f32 %v2563_v40, %v8146_v39  ;;  %v2760_v47 = vmul.f32 %v2759_v27, %v8267_v7 }
 0x3e6   :  { %v2802_v30 = vmul.f32 %v2801_v21, %v8231_v12  ;;  %v8331_v18 = vmul.f32 %v2639_v20, %v8256_v10  ;;  %v8333_v29 = vsel %vm3822_vm7, %v3614_v28, -1e+30  ;;  %v2607_v36 = vmul.f32 3.8918573e-05, %v8152_v53 }
 0x3e7   :  { %10298 = vst [vmem:[#allocation95_spill] sm:$0xff] %v8333_v29  ;;  %v8335_v45 = vsel %vm3823_vm8, %v3615_v6, -1e+30  ;;  %v2604_v54 = vmul.f32 %v2603_v15, %v8152_v53  ;;  %v2721_v52 = vadd.f32 0.05243302, %v2720_v17  ;;  %v2842_v39 = vmul.f32 %v2841_v59, %v8233_v49 }
 0x3e8   :  { %10299 = vst [vmem:[#allocation97_spill] sm:$0xff] %v8335_v45  ;;  %v3968_v57 = vmax.f32 %v8333_v29, %v8335_v45  ;;  %v8342_v2 = vpop.eup %5049  ;;  %v2608_v55 = vadd.f32 0.001143296, %v2607_v36  ;;  %v2489_v20 = vmul.f32 %v2488_v1, %v10261_v25  ;;  %v2807_v34 = vmul.f32 3.8918573e-05, %v8231_v12 }
 0x3e9   :  { %v2727_v40 = vmul.f32 3.8918573e-05, %v8261_v9  ;;  %v2565_v27 = vadd.f32 1.1283791, %v2564_v14  ;;  %v2761_v21 = vadd.f32 0.05243302, %v2760_v47  ;;  %v2578_v15 = vmul.f32 %v8342_v2, %v8308_v48 }
 0x3ea   :  { %v2803_v19 = vadd.f32 0.18741608, %v2802_v30  ;;  %3969 = vmax.xlane.f32.xlu0 %v3968_v57  ;;  %v8350_v44 = vmul.f32 0.5, %v8158_v38  ;;  %v2609_v28 = vmul.f32 %v2608_v55, %v8152_v53  ;;  %v2490_v17 = vadd.f32 0.014752088, %v2489_v20  ;;  %v10300_v47 = vld [vmem:[#allocation60_spill] sm:$0xff] }
 0x3eb   :  { %v2808_v59 = vadd.f32 0.001143296, %v2807_v34  ;;  %v2722_v22 = vmul.f32 %v2721_v52, %v8261_v9  ;;  %v2843_v63 = vadd.f32 0.18741608, %v2842_v39  ;;  %v2579_v6 = vsub.f32 1.0, %v2578_v15 }
 0x3ec   :  { %v2728_v1 = vadd.f32 0.001143296, %v2727_v40  ;;  %v4018_v14 = vsub.f32 %v7172_v50, %v8328_v24  ;;  %v2610_v30 = vadd.f32 0.014752088, %v2609_v28  ;;  %v2491_v36 = vmul.f32 %v2490_v17, %v10261_v25 }
 0x3ed   :  { %757 = vperm.xlu2 %4956, %v10300_v47   ;;  %v2809_v38 = vmul.f32 %v2808_v59, %v8231_v12  ;;  %v8360_v57 = vmul.f32 %v2565_v27, %v8095_v35  ;;  %v2605_v55 = vadd.f32 1.1283791, %v2604_v54  ;;  %v2762_v20 = vmul.f32 %v2761_v21, %v8267_v7  ;;  %v3937_v35 = vpop.xlane.xlu1 %3936  ;;  %v3931_v27 = vpop.xlane.xlu2 %3930 }
 0x3ee   :  { %v2804_v52 = vmul.f32 %v2803_v19, %v8231_v12  ;;  %v2611_v39 = vmul.f32 %v2610_v30, %v8152_v53  ;;  %v2492_v34 = vadd.f32 0.112945676, %v2491_v36  ;;  %v2729_v50 = vmul.f32 %v2728_v1, %v8261_v9 }
 0x3ef   :  { %v2810_v40 = vadd.f32 0.014752088, %v2809_v38  ;;  %v8366_v15 = vadd.f32 0.18741608, %v2722_v22  ;;  %v2844_v28 = vmul.f32 %v2843_v63, %v8233_v49  ;;  %v4019_v17 = vsub.f32 %v7245_v31, %v8328_v24 }
 0x3f0   :  { %v2580_v54 = vmul.f32 %v8342_v2, %v2579_v6  ;;  %v4090_v21 = vmul.f32 1.442695, %v4018_v14  ;;  %v2612_v59 = vadd.f32 0.112945676, %v2611_v39  ;;  %v2493_v19 = vmul.f32 %v2492_v34, %v10261_v25 }
 0x3f1   :  { %v2811_v47 = vmul.f32 %v2810_v40, %v8231_v12  ;;  %v2805_v30 = vadd.f32 1.1283791, %v2804_v52  ;;  %vm2582_vm9 = vweird.f32 %v8308_v48  ;;  %vm2583_vm10 = vweird.f32 %v8342_v2 }
 0x3f2   :  { %v2588_v22 = vand.u32 2147483648, %v8308_v48  ;;  %v4024_v63 = vsub.f32 %v7278_v11, %v3937_v35  ;;  %v2613_v31 = vmul.f32 %v2612_v59, %v8152_v53  ;;  %v2494_v24 = vadd.f32 0.4994258, %v2493_v19  ;;  %vm8382_vm11 = vmor %vm2582_vm9, %vm2583_vm10 }
 0x3f3   :  { %v2730_v1 = vadd.f32 0.014752088, %v2729_v50  ;;  %v4025_v6 = vsub.f32 %v7320_v33, %v3937_v35  ;;  %v2581_v14 = vadd.f32 %v8342_v2, %v2580_v54  ;;  %v2586_v36 = vand.u32 2147483647, %v8308_v48 }
 0x3f4   :  { %v2812_v38 = vadd.f32 0.112945676, %v2811_v47  ;;  %5051 = vpow2.f32 %v4090_v21  ;;  %v4092_v52 = vmul.f32 1.442695, %v4019_v17  ;;  %v2614_v34 = vadd.f32 0.4994258, %v2613_v31 }
 0x3f5   :  { %v2495_v11 = vmul.f32 %v2494_v24, %v10261_v25  ;;  %v4020_v40 = vsub.f32 %v7357_v16, %v3931_v27  ;;  %v4021_v50 = vsub.f32 %v7426_v23, %v3931_v27  ;;  %v2589_v59 = vor.u32 1.1754944e-38, %v2588_v22  ;;  %v8401_v47 = vpop.xlane.xlu2 %3933  ;;  %v8406_v22 = vld [vmem:[%s9790_s4 + $0x50] sm:$0xff] }
 0x3f6   :  { %v2813_v33 = vmul.f32 %v2812_v38, %v8231_v12  ;;  %v2615_v35 = vmul.f32 %v2614_v34, %v8152_v53  ;;  %v2527_v17 = vmul.f32 3.8918573e-05, %v10241_v51  ;;  %v2731_v54 = vmul.f32 %v2730_v1, %v8261_v9 }
 0x3f7   :  { %v8391_v48 = vadd.f32 1.0, %v2495_v11  ;;  %v4102_v21 = vmul.f32 1.442695, %v4024_v63  ;;  %v2585_v25 = vsel %vm8382_vm11, %v8342_v2, %v2581_v14  ;;  %vm2587_vm12 = vcmp.eq.f32.partialorder %v2586_v36, 8.507059e+37 }
 0x3f8   :  { %v2814_v16 = vadd.f32 0.4994258, %v2813_v33  ;;  %v2845_v19 = vadd.f32 1.1283791, %v2844_v28  ;;  %v4104_v23 = vmul.f32 1.442695, %v4025_v6  ;;  %v2590_v24 = vsel %vm2587_vm12, %v2589_v59, %v2585_v25 }
 0x3f9   :  { %v8398_v27 = vadd.f32 1.0, %v2615_v35  ;;  %5053 = vrcp.f32 %v8391_v48  ;;  %v4094_v53 = vmul.f32 1.442695, %v4020_v40  ;;  %v2528_v63 = vadd.f32 0.001143296, %v2527_v17 }
 0x3fa   :  { %5055 = vpow2.f32 %v4092_v52  ;;  %v2815_v2 = vmul.f32 %v2814_v16, %v8231_v12  ;;  %v8409_v31 = vpop.eup %5051  ;;  %v4096_v28 = vmul.f32 1.442695, %v4021_v50  ;;  %v2732_v1 = vadd.f32 0.112945676, %v2731_v54  ;;  %v8420_v12 = vpop.permute.xlu0 %727 }
 0x3fb   :  { %5057 = vrcp.f32 %v8398_v27  ;;  %v8413_v6 = vmul.f32 %v2605_v55, %v8107_v62  ;;  %v8415_v14 = vadd.f32 0.18741608, %v2762_v20  ;;  %v2529_v36 = vmul.f32 %v2528_v63, %v10241_v51 }
 0x3fc   :  { %5059 = vpow2.f32 %v4102_v21  ;;  %v4022_v38 = vsub.f32 %v7466_v41, %v8401_v47  ;;  %v3698_v52 = vunpack.c.0.s8 %v8406_v22  ;;  %v8423_v39 = vadd.f32 1.0, %v2815_v2 }
 0x3fd   :  { %5061 = vpow2.f32 %v4104_v23  ;;  %v8427_v34 = vmul.f32 %v8366_v15, %v8261_v9  ;;  %v2591_v62 = vmul.f32 %v2590_v24, %v8360_v57  ;;  %v2530_v55 = vadd.f32 0.014752088, %v2529_v36  ;;  %v8446_v57 = vld [vmem:[%s9790_s4 + $0x58] sm:$0xff] }
 0x3fe   :  { %5063 = vpow2.f32 %v4094_v53  ;;  %v8433_v11 = vmul.f32 %v2805_v30, %v8184_v26  ;;  %v8436_v41 = vmul.f32 %v2845_v19, %v8191_v46  ;;  %v2733_v40 = vmul.f32 %v2732_v1, %v8261_v9 }
 0x3ff   :  { %v8430_v20 = vpop.eup %5053  ;;  %5065 = vpow2.f32 %v4096_v28  ;;  %v8441_v15 = vadd.f32 %v10255_v37, %v8420_v12  ;;  %v2531_v30 = vmul.f32 %v2530_v55, %v10241_v51  ;;  %v8454_v33 = vmul.f32 1.442695, %v4022_v38 }
 0x400   :  { %v5056_v50 = vpop.eup %5055  ;;  %v2498_v26 = vmul.f32 %v8430_v20, %v8391_v48  ;;  %5067 = vrcp.f32 %v8423_v39  ;;  %v8456_v35 = vcvt.s32.f32 %v3698_v52  ;;  %v2847_v17 = vmul.f32 3.8918573e-05, %v8233_v49 }
 0x401   :  { %v5058_v46 = vpop.eup %5057  ;;  %v4902_v21 = vclamps-f32 %v2591_v62, 1.0  ;;  %v2532_v19 = vadd.f32 0.112945676, %v2531_v30  ;;  %v3699_v53 = vunpack.c.0.s8 %v8446_v57  ;;  %v2734_v2 = vadd.f32 0.4994258, %v2733_v40 }
 0x402   :  { %v8459_v54 = vpop.eup %5059  ;;  %v2618_v25 = vmul.f32 %v5058_v46, %v8398_v27  ;;  %v2499_v16 = vsub.f32 1.0, %v2498_v26  ;;  %v2848_v63 = vadd.f32 0.001143296, %v2847_v17  ;;  %v2647_v28 = vmul.f32 3.8918573e-05, %v8256_v10 }
 0x403   :  { %v8462_v23 = vpop.eup %5061  ;;  %vm2502_vm13 = vweird.f32 %v8391_v48  ;;  %v2533_v38 = vmul.f32 %v2532_v19, %v10241_v51  ;;  %v2628_v62 = vand.u32 2147483648, %v8398_v27  ;;  %vm2503_vm14 = vweird.f32 %v8430_v20 }
 0x404   :  { %v5064_v24 = vpop.eup %5063  ;;  %v2619_v1 = vsub.f32 1.0, %v2618_v25  ;;  %v2500_v36 = vmul.f32 %v8430_v20, %v2499_v16  ;;  %v2506_v55 = vand.u32 2147483647, %v8391_v48  ;;  %v2849_v26 = vmul.f32 %v2848_v63, %v8233_v49  ;;  %vm8482_vm2 = vmor %vm2502_vm13, %vm2503_vm14 }
 0x405   :  { %v5066_v52 = vpop.eup %5065  ;;  %vm2623_vm15 = vweird.f32 %v5058_v46  ;;  %v2626_v17 = vand.u32 2147483647, %v8398_v27  ;;  %v2534_v25 = vadd.f32 0.4994258, %v2533_v38  ;;  %vm2622_vm1 = vweird.f32 %v8398_v27 }
 0x406   :  { %v8473_v40 = vpop.eup %5067  ;;  %v2620_v30 = vmul.f32 %v5058_v46, %v2619_v1  ;;  %v2508_v16 = vand.u32 2147483648, %v8391_v48  ;;  %v2850_v19 = vadd.f32 0.014752088, %v2849_v26  ;;  %v2735_v59 = vmul.f32 %v2734_v2, %v8261_v9  ;;  %vm2624_vm3 = vmor %vm2622_vm1, %vm2623_vm15 }
 0x407   :  { %v2501_v29 = vadd.f32 %v8430_v20, %v2500_v36  ;;  %v2535_v1 = vmul.f32 %v2534_v25, %v10241_v51  ;;  %v8488_v38 = vpack.c.bf16 %v5064_v24, %v8409_v31  ;;  %v2629_v27 = vor.u32 1.1754944e-38, %v2628_v62 }
 0x408   :  { %v2621_v45 = vadd.f32 %v5058_v46, %v2620_v30  ;;  %v3554_v37 = vadd.f32 1.0, %v4902_v21  ;;  %v8490_v26 = vpack.c.bf16 %v5066_v52, %v5056_v50  ;;  %v2818_v9 = vmul.f32 %v8473_v40, %v8423_v39 }
 0x409   :  { %vm2627_vm4 = vcmp.eq.f32.partialorder %v2626_v17, 8.507059e+37  ;;  %v8494_v48 = vadd.f32 1.0, %v2535_v1  ;;  %4460 = vmatmul.bf16.gmra.mxu3 %v8488_v38  ;;  %v2851_v36 = vmul.f32 %v2850_v19, %v8233_v49  ;;  %v2509_v30 = vor.u32 1.1754944e-38, %v2508_v16 }
 0x40a   :  { %v2625_v2 = vsel %vm2624_vm3, %v5058_v46, %v2621_v45  ;;  %v3696_v31 = vunpack.c.3.s8 %v8294_v4  ;;  %4549 = vmatmul.bf16.gmra.mxu0 %v8490_v26  ;;  %v8500_v21 = vadd.f32 1.0, %v2735_v59  ;;  %v2505_v45 = vsel %vm8482_vm2, %v8430_v20, %v2501_v29 }
 0x40b   :  { %v2630_v51 = vsel %vm2627_vm4, %v2629_v27, %v2625_v2  ;;  %vm2507_vm5 = vcmp.eq.f32.partialorder %v2506_v55, 8.507059e+37  ;;  %5069 = vrcp.f32 %v8494_v48  ;;  %v3618_v46 = vmul.f32 %v3554_v37, %v8316_v60 }
 0x40c   :  { %v2631_v50 = vmul.f32 %v2630_v51, %v8413_v6  ;;  %v3763_v24 = vcvt.s32.f32 %v3699_v53  ;;  %v2819_v52 = vsub.f32 1.0, %v2818_v9  ;;  %v2852_v62 = vadd.f32 0.112945676, %v2851_v36 }
 0x40d   :  { %v8510_v4 = vadd.f32 %v10256_v3, %v8420_v12  ;;  %vm3826_vm0 = vcmp.gt.f32.partialorder %v8456_v35, 0.0  ;;  %v2648_v6 = vadd.f32 0.001143296, %v2647_v28  ;;  %v10305_v17 = vsub.f32 %v7480_v0, %v8401_v47 }
 0x40e   :  { %v4903_v59 = vclamps-f32 %v2631_v50, 1.0  ;;  %v2510_v20 = vsel %vm2507_vm5, %v2509_v30, %v2505_v45  ;;  %v2853_v55 = vmul.f32 %v2852_v62, %v8233_v49  ;;  %5071 = vrcp.f32 %v8500_v21 }
 0x40f   :  { %v4100_v29 = vmul.f32 1.442695, %v10305_v17  ;;  %5073 = vpow2.f32 %v8454_v33  ;;  %v8519_v60 = vcvt.s32.f32 %v3696_v31  ;;  %v2767_v12 = vmul.f32 3.8918573e-05, %v8267_v7 }
 0x410   :  { %v3555_v37 = vadd.f32 1.0, %v4903_v59  ;;  %vm3827_vm6 = vcmp.gt.f32.partialorder %v3763_v24, 0.0  ;;  %v8522_v53 = vsel %vm3826_vm0, %v3618_v46, -1e+30  ;;  %v2820_v35 = vmul.f32 %v8473_v40, %v2819_v52 }
 0x411   :  { %v2854_v28 = vadd.f32 0.4994258, %v2853_v55  ;;  %v5070_v0 = vpop.eup %5069  ;;  %v2511_v25 = vmul.f32 %v2510_v20, %v8287_v42  ;;  %vm2822_vm7 = vweird.f32 %v8423_v39  ;;  %v2649_v33 = vmul.f32 %v2648_v6, %v8256_v10 }
 0x412   :  { %v3619_v47 = vmul.f32 %v3555_v37, %v8319_v61  ;;  %v2538_v16 = vmul.f32 %v5070_v0, %v8494_v48  ;;  %vm2823_vm8 = vweird.f32 %v8473_v40  ;;  %v2826_v19 = vand.u32 2147483647, %v8423_v39  ;;  %v5281_v61 = vld [vmem:[%s9790_s4 + $0x48] sm:$0xff] }
 0x413   :  { %v2855_v63 = vmul.f32 %v2854_v28, %v8233_v49  ;;  %v3697_v27 = vunpack.c.3.s8 %v5281_v61  ;;  %v2828_v42 = vand.u32 2147483648, %v8423_v39  ;;  %v2768_v9 = vadd.f32 0.001143296, %v2767_v12  ;;  %vm8552_vm9 = vmor %vm2822_vm7, %vm2823_vm8 }
 0x414   :  { %v8533_v1 = vsel %vm3827_vm6, %v3619_v47, -1e+30  ;;  %v8539_v2 = vpop.eup %5071  ;;  %v2539_v51 = vsub.f32 1.0, %v2538_v16  ;;  %v2821_v30 = vadd.f32 %v8473_v40, %v2820_v35  ;;  %v4900_v50 = vclamps-f32 %v2511_v25, 1.0 }
 0x415   :  { %v3974_v36 = vmax.f32 %v8522_v53, %v8533_v1  ;;  %v8544_v31 = vadd.f32 1.0, %v2855_v63  ;;  %v5074_v49 = vpop.eup %5073  ;;  %v2546_v45 = vand.u32 2147483647, %v8494_v48  ;;  %v2548_v46 = vand.u32 2147483648, %v8494_v48 }
 0x416   :  { %v2769_v52 = vmul.f32 %v2768_v9, %v8267_v7  ;;  %v2540_v62 = vmul.f32 %v5070_v0, %v2539_v51  ;;  %vm2543_vm10 = vweird.f32 %v5070_v0  ;;  %v2650_v59 = vadd.f32 0.014752088, %v2649_v33  ;;  %v10308_v51 = vld [vmem:[#allocation117_spill] sm:$0xff] }
 0x417   :  { %3975 = vmax.xlane.f32.xlu0 %v3974_v36  ;;  %5075 = vrcp.f32 %v8544_v31  ;;  %v2829_v6 = vor.u32 1.1754944e-38, %v2828_v42  ;;  %v2738_v17 = vmul.f32 %v8539_v2, %v8500_v21  ;;  %vm2542_vm11 = vweird.f32 %v8494_v48 }
 0x418   :  { %5077 = vpow2.f32 %v4100_v29  ;;  %v2770_v20 = vadd.f32 0.014752088, %v2769_v52  ;;  %v2541_v55 = vadd.f32 %v5070_v0, %v2540_v62  ;;  %v2825_v39 = vsel %vm8552_vm9, %v8473_v40, %v2821_v30  ;;  %vm2544_vm13 = vmor %vm2542_vm11, %vm2543_vm10 }
 0x419   :  { %vm2827_vm12 = vcmp.eq.f32.partialorder %v2826_v19, 8.507059e+37  ;;  %v2549_v37 = vor.u32 1.1754944e-38, %v2548_v46  ;;  %v3761_v12 = vcvt.s32.f32 %v3697_v27  ;;  %vm3824_vm14 = vcmp.gt.f32.partialorder %v8519_v60, 0.0 }
 0x41a   :  { %v2771_v29 = vmul.f32 %v2770_v20, %v8267_v7  ;;  %v2545_v35 = vsel %vm2544_vm13, %v5070_v0, %v2541_v55  ;;  %vm2547_vm15 = vcmp.eq.f32.partialorder %v2546_v45, 8.507059e+37  ;;  %v3552_v28 = vadd.f32 1.0, %v4900_v50 }
 0x41b   :  { %v2651_v47 = vmul.f32 %v2650_v59, %v8256_v10  ;;  %v2550_v25 = vsel %vm2547_vm15, %v2549_v37, %v2545_v35  ;;  %v2830_v33 = vsel %vm2827_vm12, %v2829_v6, %v2825_v39  ;;  %v2739_v48 = vsub.f32 1.0, %v2738_v17 }
 0x41c   :  { %v2772_v16 = vadd.f32 0.112945676, %v2771_v29  ;;  %v2551_v40 = vmul.f32 %v2550_v25, %v8304_v8  ;;  %v3704_v19 = vunpack.c.3.s8 %v8406_v22  ;;  %vm2742_vm1 = vweird.f32 %v8500_v21 }
 0x41d   :  { %v5076_v63 = vpop.eup %5075  ;;  %v2652_v61 = vadd.f32 0.112945676, %v2651_v47  ;;  %vm3825_vm2 = vcmp.gt.f32.partialorder %v3761_v12, 0.0  ;;  %v2746_v42 = vand.u32 2147483647, %v8500_v21  ;;  %v3616_v30 = vmul.f32 %v3552_v28, %v10308_v51 }
 0x41e   :  { %v5078_v27 = vpop.eup %5077  ;;  %v2858_v0 = vmul.f32 %v5076_v63, %v8544_v31  ;;  %v2773_v9 = vmul.f32 %v2772_v16, %v8267_v7  ;;  %v4901_v36 = vclamps-f32 %v2551_v40, 1.0  ;;  %v2831_v50 = vmul.f32 %v2830_v33, %v8433_v11 }
 0x41f   :  { %v3705_v8 = vunpack.c.3.s8 %v8446_v57  ;;  %v2740_v46 = vmul.f32 %v8539_v2, %v2739_v48  ;;  %vm2743_vm3 = vweird.f32 %v8539_v2  ;;  %v2866_v62 = vand.u32 2147483647, %v8544_v31 }
 0x420   :  { %v2859_v45 = vsub.f32 1.0, %v2858_v0  ;;  %v2774_v24 = vadd.f32 0.4994258, %v2773_v9  ;;  %v3553_v52 = vadd.f32 1.0, %v4901_v36  ;;  %v2868_v59 = vand.u32 2147483648, %v8544_v31  ;;  %vm8609_vm7 = vmor %vm2742_vm1, %vm2743_vm3 }
 0x421   :  { %v2653_v6 = vmul.f32 %v2652_v61, %v8256_v10  ;;  %vm2863_vm4 = vweird.f32 %v5076_v63  ;;  %v8583_v11 = vpack.c.bf16 %v8459_v54, %v5074_v49  ;;  %v8588_v39 = vsel %vm3824_vm14, %v3616_v30, -1e+30 }
 0x422   :  { %v2860_v17 = vmul.f32 %v5076_v63, %v2859_v45  ;;  %v2775_v20 = vmul.f32 %v2774_v24, %v8267_v7  ;;  %v3617_v55 = vmul.f32 %v3553_v52, %v8271_v5  ;;  %v4908_v37 = vclamps-f32 %v2831_v50, 1.0 }
 0x423   :  { %10309 = vst [vmem:[#allocation77_spill] sm:$0xff] %v8583_v11  ;;  %v8591_v29 = vpack.c.bf16 %v8462_v23, %v5078_v27  ;;  %vm2862_vm5 = vweird.f32 %v8544_v31  ;;  %v2748_v28 = vand.u32 2147483648, %v8500_v21  ;;  %4465 = vmatmul.bf16.gmra.mxu3 %v8583_v11  ;;  %v2869_v5 = vor.u32 1.1754944e-38, %v2868_v59 }
 0x424   :  { %v2861_v35 = vadd.f32 %v5076_v63, %v2860_v17  ;;  %v8595_v47 = vadd.f32 1.0, %v2775_v20  ;;  %v8599_v54 = vsel %vm3825_vm2, %v3617_v55, -1e+30  ;;  %vm2864_vm0 = vmor %vm2862_vm5, %vm2863_vm4  ;;  %v2741_v60 = vadd.f32 %v8539_v2, %v2740_v46 }
 0x425   :  { %10310 = vst [vmem:[#allocation28_spill] sm:$0xff] %v8591_v29  ;;  %4554 = vmatmul.bf16.gmra.mxu0 %v8591_v29  ;;  %v2654_v23 = vadd.f32 0.4994258, %v2653_v6  ;;  %v3971_v49 = vmax.f32 %v8588_v39, %v8599_v54  ;;  %vm2867_vm6 = vcmp.eq.f32.partialorder %v2866_v62, 8.507059e+37  ;;  %v2725_v25 = vadd.f32 1.1283791, %v8427_v34 }
 0x426   :  { %v2865_v31 = vsel %vm2864_vm0, %v5076_v63, %v2861_v35  ;;  %5079 = vrcp.f32 %v8595_v47  ;;  %v8616_v33 = vmul.f32 0.70710677, %v8441_v15  ;;  %v3560_v16 = vadd.f32 1.0, %v4908_v37 }
 0x427   :  { %v2870_v48 = vsel %vm2867_vm6, %v2869_v5, %v2865_v31  ;;  %3972 = vmax.xlane.f32.xlu1 %v3971_v49  ;;  %v3768_v40 = vcvt.s32.f32 %v3704_v19  ;;  %vm8619_vm8 = vcmp.eq.f32.partialorder %v2746_v42, 8.507059e+37  ;;  %v2749_v21 = vor.u32 1.1754944e-38, %v2748_v28 }
 0x428   :  { %v2871_v63 = vmul.f32 %v2870_v48, %v8436_v41  ;;  %v3769_v27 = vcvt.s32.f32 %v3705_v8  ;;  %v2745_v0 = vsel %vm8609_vm7, %v8539_v2, %v2741_v60  ;;  %v2655_v34 = vmul.f32 %v2654_v23, %v8256_v10 }
 0x429   :  { %v2687_v9 = vmul.f32 3.8918573e-05, %v8258_v13  ;;  %v2641_v36 = vadd.f32 0.05243302, %v8331_v18  ;;  %v2680_v41 = vmul.f32 %v8323_v43, %v8258_v13  ;;  %v8632_v19 = vmul.f32 0.70710677, %v8510_v4 }
 0x42a   :  { %v4909_v42 = vclamps-f32 %v2871_v63, 1.0  ;;  %v2764_v51 = vmul.f32 %v8415_v14, %v8267_v7  ;;  %v873_v30 = vmul.f32 0.5, %v8172_v58  ;;  %v2954_v2 = vmul.f32 %v8616_v33, %v8616_v33 }
 0x42b   :  { %v3624_v50 = vmul.f32 %v3560_v16, %v8350_v44  ;;  %v2750_v18 = vsel %vm8619_vm8, %v2749_v21, %v2745_v0  ;;  %v8642_v43 = vadd.f32 1.0, %v2655_v34  ;;  %v2688_v46 = vadd.f32 0.001143296, %v2687_v9 }
 0x42c   :  { %v5080_v8 = vpop.eup %5079  ;;  %v3561_v45 = vadd.f32 1.0, %v4909_v42  ;;  %v2726_v24 = vmul.f32 %v2725_v25, %v8214_v32  ;;  %vm3832_vm9 = vcmp.gt.f32.partialorder %v3768_v40, 0.0  ;;  %vm3833_vm10 = vcmp.gt.f32.partialorder %v3769_v27, 0.0 }
 0x42d   :  { %v2778_v7 = vmul.f32 %v5080_v8, %v8595_v47  ;;  %v2681_v58 = vadd.f32 0.05243302, %v2680_v41  ;;  %v2994_v14 = vmul.f32 %v8632_v19, %v8632_v19  ;;  %5081 = vrcp.f32 %v8642_v43 }
 0x42e   :  { %v3625_v52 = vmul.f32 %v3561_v45, %v873_v30  ;;  %v2765_v44 = vadd.f32 1.1283791, %v2764_v51  ;;  %v8649_v62 = vmin.f32 %v2954_v2, 16.0  ;;  %v2751_v59 = vmul.f32 %v2750_v18, %v2726_v24  ;;  %v10316_v24 = vld [vmem:[#allocation41_spill] sm:$0xff] }
 0x42f   :  { %v2779_v6 = vsub.f32 1.0, %v2778_v7  ;;  %v8651_v17 = vsel %vm3832_vm9, %v3624_v50, -1e+30  ;;  %v2788_v32 = vand.u32 2147483648, %v8595_v47  ;;  %v2689_v55 = vmul.f32 %v2688_v46, %v8258_v13 }
 0x430   :  { %v8653_v20 = vsel %vm3833_vm10, %v3625_v52, -1e+30  ;;  %vm2783_vm11 = vweird.f32 %v5080_v8  ;;  %v2786_v28 = vand.u32 2147483647, %v8595_v47  ;;  %v2642_v5 = vmul.f32 %v2641_v36, %v8256_v10 }
 0x431   :  { %v3983_v37 = vmax.f32 %v8651_v17, %v8653_v20  ;;  %v2780_v35 = vmul.f32 %v5080_v8, %v2779_v6  ;;  %v2682_v60 = vmul.f32 %v2681_v58, %v8258_v13  ;;  %v8662_v23 = vmin.f32 %v2994_v14, 16.0 }
 0x432   :  { %v2690_v49 = vadd.f32 0.014752088, %v2689_v55  ;;  %v2956_v31 = vmul.f32 2.1237322e-06, %v8649_v62  ;;  %v4906_v12 = vclamps-f32 %v2751_v59, 1.0  ;;  %vm2782_vm12 = vweird.f32 %v8595_v47 }
 0x433   :  { %3984 = vmax.xlane.f32.xlu0 %v3983_v37  ;;  %v2781_v25 = vadd.f32 %v5080_v8, %v2780_v35  ;;  %v8666_v48 = vpop.eup %5081  ;;  %vm2784_vm13 = vmor %vm2782_vm12, %vm2783_vm11  ;;  %v2789_v16 = vor.u32 1.1754944e-38, %v2788_v32  ;;  %v3702_v63 = vunpack.c.2.s8 %v8406_v22  ;;  %v3703_v40 = vunpack.c.2.s8 %v8446_v57 }
 0x434   :  { %v2691_v61 = vmul.f32 %v2690_v49, %v8258_v13  ;;  %v2766_v21 = vmul.f32 %v2765_v44, %v8220_v56  ;;  %vm2787_vm14 = vcmp.eq.f32.partialorder %v2786_v28, 8.507059e+37  ;;  %v2658_v0 = vmul.f32 %v8666_v48, %v8642_v43  ;;  %v10315_v56 = vld [vmem:[#allocation54_spill] sm:$0xff] }
 0x435   :  { %v2785_v27 = vsel %vm2784_vm13, %v5080_v8, %v2781_v25  ;;  %v2996_v34 = vmul.f32 2.1237322e-06, %v8662_v23  ;;  %v2957_v36 = vadd.f32 0.00028619796, %v2956_v31  ;;  %v3558_v42 = vadd.f32 1.0, %v4906_v12  ;;  %v723_v31 = vpop.permute.xlu1 %722 }
 0x436   :  { %v2790_v47 = vsel %vm2787_vm14, %v2789_v16, %v2785_v27  ;;  %v2692_v9 = vadd.f32 0.112945676, %v2691_v61  ;;  %v2659_v51 = vsub.f32 1.0, %v2658_v0  ;;  %v3766_v30 = vcvt.s32.f32 %v3702_v63  ;;  %v733_v27 = vpop.permute.xlu2 %732  ;;  %v10319_v0 = vld [vmem:[#allocation17_spill] sm:$0xff] }
 0x437   :  { %v2791_v41 = vmul.f32 %v2790_v47, %v2766_v21  ;;  %v3767_v2 = vcvt.s32.f32 %v3703_v40  ;;  %v2643_v45 = vadd.f32 0.18741608, %v2642_v5  ;;  %v2683_v18 = vadd.f32 0.18741608, %v2682_v60 }
 0x438   :  { %v2693_v50 = vmul.f32 %v2692_v9, %v8258_v13  ;;  %v870_v8 = vmul.f32 0.5, %v10315_v56  ;;  %v871_v7 = vmul.f32 0.5, %v10316_v24  ;;  %v2997_v58 = vadd.f32 0.00028619796, %v2996_v34  ;;  %v10321_v24 = vld [vmem:[#allocation56_spill] sm:$0xff] }
 0x439   :  { %v4907_v46 = vclamps-f32 %v2791_v41, 1.0  ;;  %v2958_v52 = vmul.f32 %v2957_v36, %v8649_v62  ;;  %v2660_v6 = vmul.f32 %v8666_v48, %v2659_v51  ;;  %vm3830_vm15 = vcmp.gt.f32.partialorder %v3766_v30, 0.0  ;;  %v10320_v30 = vld [vmem:[#allocation65_spill] sm:$0xff] }
 0x43a   :  { %v2694_v14 = vadd.f32 0.4994258, %v2693_v50  ;;  %v3622_v59 = vmul.f32 %v3558_v42, %v870_v8  ;;  %vm3831_vm1 = vcmp.gt.f32.partialorder %v3767_v2, 0.0  ;;  %v2967_v55 = vmul.f32 3.8918573e-05, %v8649_v62 }
 0x43b   :  { %v3559_v44 = vadd.f32 1.0, %v4907_v46  ;;  %v2644_v37 = vmul.f32 %v2643_v45, %v8256_v10  ;;  %vm2662_vm2 = vweird.f32 %v8642_v43  ;;  %vm2663_vm3 = vweird.f32 %v8666_v48 }
 0x43c   :  { %v2695_v32 = vmul.f32 %v2694_v14, %v8258_v13  ;;  %v2684_v28 = vmul.f32 %v2683_v18, %v8258_v13  ;;  %v2668_v5 = vand.u32 2147483648, %v8642_v43  ;;  %v2968_v49 = vadd.f32 0.001143296, %v2967_v55  ;;  %vm8698_vm4 = vmor %vm2662_vm2, %vm2663_vm3 }
 0x43d   :  { %v3623_v35 = vmul.f32 %v3559_v44, %v871_v7  ;;  %v8689_v12 = vsel %vm3830_vm15, %v3622_v59, -1e+30  ;;  %v2661_v16 = vadd.f32 %v8666_v48, %v2660_v6  ;;  %v2666_v10 = vand.u32 2147483647, %v8642_v43 }
 0x43e   :  { %v8687_v60 = vadd.f32 1.0, %v2695_v32  ;;  %v2959_v63 = vadd.f32 0.0036580483, %v2958_v52  ;;  %v2998_v40 = vmul.f32 %v2997_v58, %v8662_v23  ;;  %v2645_v21 = vadd.f32 1.1283791, %v2644_v37 }
 0x43f   :  { %v8691_v25 = vsel %vm3831_vm1, %v3623_v35, -1e+30  ;;  %v8704_v34 = vadd.f32 %v10319_v0, %v723_v31  ;;  %v2669_v47 = vor.u32 1.1754944e-38, %v2668_v5  ;;  %v2969_v43 = vmul.f32 %v2968_v49, %v8649_v62 }
 0x440   :  { %v3980_v13 = vmax.f32 %v8689_v12, %v8691_v25  ;;  %5083 = vrcp.f32 %v8687_v60  ;;  %v2685_v9 = vadd.f32 1.1283791, %v2684_v28  ;;  %v2665_v36 = vsel %vm8698_vm4, %v8666_v48, %v2661_v16 }
 0x441   :  { %vm2667_vm5 = vcmp.eq.f32.partialorder %v2666_v10, 8.507059e+37  ;;  %v2960_v41 = vmul.f32 %v2959_v63, %v8649_v62  ;;  %v2999_v42 = vadd.f32 0.0036580483, %v2998_v40  ;;  %v2970_v51 = vadd.f32 0.014752088, %v2969_v43 }
 0x442   :  { %3981 = vmax.xlane.f32.xlu1 %v3980_v13  ;;  %v2646_v2 = vmul.f32 %v2645_v21, %v10320_v30  ;;  %v8713_v50 = vadd.f32 %v10319_v0, %v733_v27  ;;  %v3007_v45 = vmul.f32 3.8918573e-05, %v8662_v23  ;;  %v8717_v56 = vadd.f32 %v10256_v3, %v733_v27 }
 0x443   :  { %v8720_v8 = vmul.f32 0.70710677, %v8704_v34  ;;  %v2670_v48 = vsel %vm2667_vm5, %v2669_v47, %v2665_v36  ;;  %v2971_v46 = vmul.f32 %v2970_v51, %v8649_v62  ;;  %v2686_v7 = vmul.f32 %v2685_v9, %v10321_v24 }
 0x444   :  { %v3008_v14 = vadd.f32 0.001143296, %v3007_v45  ;;  %v2961_v52 = vadd.f32 0.05243302, %v2960_v41  ;;  %v3000_v44 = vmul.f32 %v2999_v42, %v8662_v23  ;;  %v8727_v59 = vadd.f32 %v10256_v3, %v723_v31 }
 0x445   :  { %v2972_v6 = vadd.f32 0.112945676, %v2971_v46  ;;  %v8730_v32 = vmul.f32 0.70710677, %v8713_v50  ;;  %v2671_v55 = vmul.f32 %v2670_v48, %v2646_v2  ;;  %v8734_v28 = vmul.f32 0.70710677, %v8717_v56 }
 0x446   :  { %v5084_v18 = vpop.eup %5083  ;;  %v3009_v35 = vmul.f32 %v3008_v14, %v8662_v23  ;;  %v2874_v5 = vmul.f32 %v8720_v8, %v8720_v8  ;;  %v2708_v49 = vand.u32 2147483648, %v8687_v60  ;;  %v2706_v10 = vand.u32 2147483647, %v8687_v60 }
 0x447   :  { %v2698_v58 = vmul.f32 %v5084_v18, %v8687_v60  ;;  %v2973_v16 = vmul.f32 %v2972_v6, %v8649_v62  ;;  %vm2703_vm0 = vweird.f32 %v5084_v18  ;;  %v2962_v40 = vmul.f32 %v2961_v52, %v8649_v62 }
 0x448   :  { %v3010_v63 = vadd.f32 0.014752088, %v3009_v35  ;;  %v3001_v13 = vadd.f32 0.05243302, %v3000_v44  ;;  %v8743_v61 = vmul.f32 0.70710677, %v8727_v59  ;;  %vm2702_vm6 = vweird.f32 %v8687_v60 }
 0x449   :  { %v2699_v37 = vsub.f32 1.0, %v2698_v58  ;;  %v2974_v21 = vadd.f32 0.4994258, %v2973_v16  ;;  %v4904_v27 = vclamps-f32 %v2671_v55, 1.0  ;;  %vm2704_vm7 = vmor %vm2702_vm6, %vm2703_vm0  ;;  %v2709_v9 = vor.u32 1.1754944e-38, %v2708_v49  ;;  %v10322_v44 = vld [vmem:[#allocation122_spill] sm:$0xff] }
 0x44a   :  { %v3011_v43 = vmul.f32 %v3010_v63, %v8662_v23  ;;  %v3700_v36 = vunpack.c.1.s8 %v8406_v22  ;;  %v3701_v41 = vunpack.c.1.s8 %v8446_v57  ;;  %v8750_v51 = vmin.f32 %v2874_v5, 16.0  ;;  %v10323_v5 = vld [vmem:[#allocation18_spill] sm:$0xff] }
 0x44b   :  { %v2700_v31 = vmul.f32 %v5084_v18, %v2699_v37  ;;  %v2975_v42 = vmul.f32 %v2974_v21, %v8649_v62  ;;  %vm2707_vm8 = vcmp.eq.f32.partialorder %v2706_v10, 8.507059e+37  ;;  %v3002_v45 = vmul.f32 %v3001_v13, %v8662_v23 }
 0x44c   :  { %v3012_v2 = vadd.f32 0.112945676, %v3011_v43  ;;  %v2914_v60 = vmul.f32 %v8743_v61, %v8743_v61  ;;  %v3034_v22 = vmul.f32 %v8730_v32, %v8730_v32  ;;  %v3556_v57 = vadd.f32 1.0, %v4904_v27 }
 0x44d   :  { %v2701_v47 = vadd.f32 %v5084_v18, %v2700_v31  ;;  %v8755_v46 = vadd.f32 1.0, %v2975_v42  ;;  %v2963_v14 = vadd.f32 0.18741608, %v2962_v40  ;;  %v3764_v52 = vcvt.s32.f32 %v3700_v36 }
 0x44e   :  { %v3013_v58 = vmul.f32 %v3012_v2, %v8662_v23  ;;  %v868_v6 = vmul.f32 0.5, %v10322_v44  ;;  %v2876_v55 = vmul.f32 2.1237322e-06, %v8750_v51  ;;  %v869_v49 = vmul.f32 0.5, %v10323_v5 }
 0x44f   :  { %v2705_v30 = vsel %vm2704_vm7, %v5084_v18, %v2701_v47  ;;  %v3765_v18 = vcvt.s32.f32 %v3701_v41  ;;  %5085 = vrcp.f32 %v8755_v46  ;;  %v3003_v16 = vadd.f32 0.18741608, %v3002_v45 }
 0x450   :  { %v2710_v48 = vsel %vm2707_vm8, %v2709_v9, %v2705_v30  ;;  %v3014_v35 = vadd.f32 0.4994258, %v3013_v58  ;;  %v8764_v31 = vmin.f32 %v2914_v60, 16.0  ;;  %v3620_v63 = vmul.f32 %v3556_v57, %v868_v6 }
 0x451   :  { %v2711_v24 = vmul.f32 %v2710_v48, %v2686_v7  ;;  %v3074_v7 = vmul.f32 %v8734_v28, %v8734_v28  ;;  %v2964_v13 = vmul.f32 %v2963_v14, %v8649_v62  ;;  %v8770_v21 = vmin.f32 %v3034_v22, 16.0 }
 0x452   :  { %v3015_v40 = vmul.f32 %v3014_v35, %v8662_v23  ;;  %vm3828_vm9 = vcmp.gt.f32.partialorder %v3764_v52, 0.0  ;;  %vm3829_vm10 = vcmp.gt.f32.partialorder %v3765_v18, 0.0  ;;  %v2877_v27 = vadd.f32 0.00028619796, %v2876_v55  ;;  %v10324_v35 = vld [vmem:[#allocation93_spill] sm:$0xff] }
 0x453   :  { %v4905_v37 = vclamps-f32 %v2711_v24, 1.0  ;;  %v2887_v9 = vmul.f32 3.8918573e-05, %v8750_v51  ;;  %v3004_v41 = vmul.f32 %v3003_v16, %v8662_v23  ;;  %v2916_v42 = vmul.f32 2.1237322e-06, %v8764_v31 }
 0x454   :  { %v8772_v43 = vadd.f32 1.0, %v3015_v40  ;;  %v8777_v30 = vsel %vm3828_vm9, %v3620_v63, -1e+30  ;;  %v2965_v45 = vadd.f32 1.1283791, %v2964_v13  ;;  %v8783_v60 = vmin.f32 %v3074_v7, 16.0 }
 0x455   :  { %v3557_v10 = vadd.f32 1.0, %v4905_v37  ;;  %v5086_v36 = vpop.eup %5085  ;;  %v8788_v22 = vmul.f32 2.1237322e-06, %v8770_v21  ;;  %v2878_v23 = vmul.f32 %v2877_v27, %v8750_v51  ;;  %v2888_v57 = vadd.f32 0.001143296, %v2887_v9 }
 0x456   :  { %v2978_v62 = vmul.f32 %v5086_v36, %v8755_v46  ;;  %5087 = vrcp.f32 %v8772_v43  ;;  %v3005_v58 = vadd.f32 1.1283791, %v3004_v41  ;;  %v2917_v14 = vadd.f32 0.00028619796, %v2916_v42 }
 0x457   :  { %v3621_v47 = vmul.f32 %v3557_v10, %v869_v49  ;;  %v2988_v52 = vand.u32 2147483648, %v8755_v46  ;;  %vm2983_vm11 = vweird.f32 %v5086_v36  ;;  %v2986_v44 = vand.u32 2147483647, %v8755_v46  ;;  %v10325_v49 = vld [vmem:[#allocation27_spill] sm:$0xff] }
 0x458   :  { %v2979_v24 = vsub.f32 1.0, %v2978_v62  ;;  %v2889_v6 = vmul.f32 %v2888_v57, %v8750_v51  ;;  %v2966_v55 = vmul.f32 %v2965_v45, %v8616_v33  ;;  %v3076_v37 = vmul.f32 2.1237322e-06, %v8783_v60  ;;  %v738_v62 = vpop.permute.xlu2 %737 }
 0x459   :  { %v8779_v2 = vsel %vm3829_vm10, %v3621_v47, -1e+30  ;;  %v4234_v5 = vunpack.c.l.bf16 %v10324_v35  ;;  %v4235_v16 = vunpack.c.l.bf16 %v10325_v49  ;;  %v2879_v10 = vadd.f32 0.0036580483, %v2878_v23 }
 0x45a   :  { %v3977_v48 = vmax.f32 %v8777_v30, %v8779_v2  ;;  %v2980_v18 = vmul.f32 %v5086_v36, %v2979_v24  ;;  %vm2982_vm12 = vweird.f32 %v8755_v46  ;;  %v2890_v40 = vadd.f32 0.014752088, %v2889_v6  ;;  %v8807_v46 = vld [vmem:[%s9790_s4 + $0x60] sm:$0xff] }
 0x45b   :  { %v3006_v13 = vmul.f32 %v3005_v58, %v8632_v19  ;;  %vm2984_vm13 = vmor %vm2982_vm12, %vm2983_vm11  ;;  %v2989_v27 = vor.u32 1.1754944e-38, %v2988_v52  ;;  %v2927_v33 = vmul.f32 3.8918573e-05, %v8764_v31  ;;  %v2918_v9 = vmul.f32 %v2917_v14, %v8764_v31 }
 0x45c   :  { %3978 = vmax.xlane.f32.xlu2 %v3977_v48  ;;  %v5088_v7 = vpop.eup %5087  ;;  %v2981_v63 = vadd.f32 %v5086_v36, %v2980_v18  ;;  %vm2987_vm14 = vcmp.eq.f32.partialorder %v2986_v44, 8.507059e+37  ;;  %v2891_v42 = vmul.f32 %v2890_v40, %v8750_v51  ;;  %v4298_v19 = vadd.f32 %v4235_v16, %v4234_v5  ;;  %v8815_v18 = vld [vmem:[%s9790_s4 + $0x68] sm:$0xff] }
 0x45d   :  { %v3018_v47 = vmul.f32 %v5088_v7, %v8772_v43  ;;  %v2928_v23 = vadd.f32 0.001143296, %v2927_v33  ;;  %v2880_v24 = vmul.f32 %v2879_v10, %v8750_v51  ;;  %v3028_v58 = vand.u32 2147483648, %v8772_v43 }
 0x45e   :  { %v2985_v41 = vsel %vm2984_vm13, %v5086_v36, %v2981_v63  ;;  %v2892_v14 = vadd.f32 0.112945676, %v2891_v42  ;;  %vm3023_vm15 = vweird.f32 %v5088_v7  ;;  %v3026_v52 = vand.u32 2147483647, %v8772_v43 }
 0x45f   :  { %v2990_v45 = vsel %vm2987_vm14, %v2989_v27, %v2985_v41  ;;  %v3019_v48 = vsub.f32 1.0, %v3018_v47  ;;  %v2929_v44 = vmul.f32 %v2928_v23, %v8764_v31  ;;  %v8819_v6 = vadd.f32 %v10319_v0, %v738_v62 }
 0x460   :  { %v2991_v57 = vmul.f32 %v2990_v45, %v2966_v55  ;;  %v3708_v55 = vunpack.c.1.s8 %v8807_v46  ;;  %v2893_v16 = vmul.f32 %v2892_v14, %v8750_v51  ;;  %v2919_v10 = vadd.f32 0.0036580483, %v2918_v9 }
 0x461   :  { %v3020_v36 = vmul.f32 %v5088_v7, %v3019_v48  ;;  %vm3022_vm1 = vweird.f32 %v8772_v43  ;;  %v2930_v40 = vadd.f32 0.014752088, %v2929_v44  ;;  %v2881_v27 = vadd.f32 0.05243302, %v2880_v24 }
 0x462   :  { %v4912_v5 = vclamps-f32 %v2991_v57, 1.0  ;;  %vm3024_vm2 = vmor %vm3022_vm1, %vm3023_vm15  ;;  %v3029_v47 = vor.u32 1.1754944e-38, %v3028_v58  ;;  %v3709_v33 = vunpack.c.1.s8 %v8815_v18  ;;  %v2894_v41 = vadd.f32 0.4994258, %v2893_v16 }
 0x463   :  { %v3021_v63 = vadd.f32 %v5088_v7, %v3020_v36  ;;  %vm3027_vm3 = vcmp.eq.f32.partialorder %v3026_v52, 8.507059e+37  ;;  %v2931_v48 = vmul.f32 %v2930_v40, %v8764_v31  ;;  %v3772_v57 = vcvt.s32.f32 %v3708_v55 }
 0x464   :  { %4299 = vadd.xlane.f32.xlu2 %v4298_v19  ;;  %v3564_v45 = vadd.f32 1.0, %v4912_v5  ;;  %v876_v19 = vmul.f32 0.5, %v8441_v15  ;;  %v2895_v9 = vmul.f32 %v2894_v41, %v8750_v51  ;;  %v3037_v43 = vadd.f32 0.00028619796, %v8788_v22 }
 0x465   :  { %v3025_v42 = vsel %vm3024_vm2, %v5088_v7, %v3021_v63  ;;  %v2920_v24 = vmul.f32 %v2919_v10, %v8764_v31  ;;  %v2932_v58 = vadd.f32 0.112945676, %v2931_v48  ;;  %v3077_v36 = vadd.f32 0.00028619796, %v3076_v37 }
 0x466   :  { %v3030_v23 = vsel %vm3027_vm3, %v3029_v47, %v3025_v42  ;;  %v8831_v44 = vmul.f32 0.70710677, %v8819_v6  ;;  %v3773_v7 = vcvt.s32.f32 %v3709_v33  ;;  %v8833_v52 = vadd.f32 1.0, %v2895_v9 }
 0x467   :  { %v3031_v14 = vmul.f32 %v3030_v23, %v3006_v13  ;;  %v2882_v5 = vmul.f32 %v2881_v27, %v8750_v51  ;;  %v3628_v16 = vmul.f32 %v3564_v45, %v876_v19  ;;  %v2933_v55 = vmul.f32 %v2932_v58, %v8764_v31  ;;  %v10326_v45 = vld [vmem:[#allocation61_spill] sm:$0xff]  ;;  %v10327_v19 = vld [vmem:[#allocation43_spill] sm:$0xff] }
 0x468   :  { %v877_v63 = vmul.f32 0.5, %v8510_v4  ;;  %v8839_v22 = vadd.f32 %v10256_v3, %v738_v62  ;;  %vm3836_vm4 = vcmp.gt.f32.partialorder %v3772_v57, 0.0  ;;  %5089 = vrcp.f32 %v8833_v52 }
 0x469   :  { %v4913_v15 = vclamps-f32 %v3031_v14, 1.0  ;;  %v3038_v37 = vmul.f32 %v3037_v43, %v8770_v21  ;;  %v2921_v13 = vadd.f32 0.05243302, %v2920_v24  ;;  %v2934_v40 = vadd.f32 0.4994258, %v2933_v55 }
 0x46a   :  { %v3078_v47 = vmul.f32 %v3077_v36, %v8783_v60  ;;  %v3114_v27 = vmul.f32 %v8831_v44, %v8831_v44  ;;  %vm3837_vm5 = vcmp.gt.f32.partialorder %v3773_v7, 0.0  ;;  %v2883_v33 = vadd.f32 0.18741608, %v2882_v5 }
 0x46b   :  { %v3565_v10 = vadd.f32 1.0, %v4913_v15  ;;  %v8846_v4 = vsel %vm3836_vm4, %v3628_v16, -1e+30  ;;  %v2935_v62 = vmul.f32 %v2934_v40, %v8764_v31  ;;  %v8850_v42 = vmul.f32 0.70710677, %v8839_v22 }
 0x46c   :  { %v4240_v48 = vunpack.c.h.bf16 %v10326_v45  ;;  %v4241_v23 = vunpack.c.h.bf16 %v10327_v19  ;;  %v3039_v57 = vadd.f32 0.0036580483, %v3038_v37  ;;  %v2922_v9 = vmul.f32 %v2921_v13, %v8764_v31 }
 0x46d   :  { %v3629_v41 = vmul.f32 %v3565_v10, %v877_v63  ;;  %v8857_v24 = vadd.f32 1.0, %v2935_v62  ;;  %v3079_v58 = vadd.f32 0.0036580483, %v3078_v47  ;;  %v8859_v36 = vmin.f32 %v3114_v27, 16.0 }
 0x46e   :  { %v5090_v14 = vpop.eup %5089  ;;  %v4307_v5 = vadd.f32 %v4241_v23, %v4240_v48  ;;  %v2884_v15 = vmul.f32 %v2883_v33, %v8750_v51  ;;  %v3154_v55 = vmul.f32 %v8850_v42, %v8850_v42  ;;  %v3040_v63 = vmul.f32 %v3039_v57, %v8770_v21 }
 0x46f   :  { %v8855_v43 = vsel %vm3837_vm5, %v3629_v41, -1e+30  ;;  %v2898_v16 = vmul.f32 %v5090_v14, %v8833_v52  ;;  %5091 = vrcp.f32 %v8857_v24  ;;  %v2923_v37 = vadd.f32 0.18741608, %v2922_v9 }
 0x470   :  { %10328 = vst [vmem:[#allocation64_spill] sm:$0xff] %v8855_v43  ;;  %v3989_v7 = vmax.f32 %v8846_v4, %v8855_v43  ;;  %4308 = vadd.xlane.f32.xlu2 %v4307_v5  ;;  %v3080_v10 = vmul.f32 %v3079_v58, %v8783_v60  ;;  %v3116_v40 = vmul.f32 2.1237322e-06, %v8859_v36  ;;  %v2908_v47 = vand.u32 2147483648, %v8833_v52 }
 0x471   :  { %v2899_v13 = vsub.f32 1.0, %v2898_v16  ;;  %v3047_v51 = vmul.f32 3.8918573e-05, %v8770_v21  ;;  %v2885_v27 = vadd.f32 1.1283791, %v2884_v15  ;;  %vm2903_vm0 = vweird.f32 %v5090_v14 }
 0x472   :  { %3990 = vmax.xlane.f32.xlu0 %v3989_v7  ;;  %v2906_v41 = vand.u32 2147483647, %v8833_v52  ;;  %v8874_v62 = vmin.f32 %v3154_v55, 16.0  ;;  %v3041_v57 = vadd.f32 0.05243302, %v3040_v63  ;;  %v2924_v9 = vmul.f32 %v2923_v37, %v8764_v31  ;;  %v8881_v55 = vpop.xlane.xlu0 %3939 }
 0x473   :  { %v2900_v33 = vmul.f32 %v5090_v14, %v2899_v13  ;;  %v3048_v48 = vadd.f32 0.001143296, %v3047_v51  ;;  %vm2902_vm6 = vweird.f32 %v8833_v52  ;;  %v3081_v58 = vadd.f32 0.05243302, %v3080_v10 }
 0x474   :  { %vm2904_vm7 = vmor %vm2902_vm6, %vm2903_vm0  ;;  %v2909_v5 = vor.u32 1.1754944e-38, %v2908_v47  ;;  %v2886_v13 = vmul.f32 %v2885_v27, %v8720_v8  ;;  %v3117_v19 = vadd.f32 0.00028619796, %v3116_v40  ;;  %vm2907_vm8 = vcmp.eq.f32.partialorder %v2906_v41, 8.507059e+37 }
 0x475   :  { %v5092_v23 = vpop.eup %5091  ;;  %v2901_v7 = vadd.f32 %v5090_v14, %v2900_v33  ;;  %v3049_v15 = vmul.f32 %v3048_v48, %v8770_v21  ;;  %v3156_v63 = vmul.f32 2.1237322e-06, %v8874_v62  ;;  %v2925_v52 = vadd.f32 1.1283791, %v2924_v9 }
 0x476   :  { %v2938_v16 = vmul.f32 %v5092_v23, %v8857_v24  ;;  %v2948_v47 = vand.u32 2147483648, %v8857_v24  ;;  %v3087_v45 = vmul.f32 3.8918573e-05, %v8783_v60  ;;  %vm2943_vm9 = vweird.f32 %v5092_v23 }
 0x477   :  { %v2905_v51 = vsel %vm2904_vm7, %v5090_v14, %v2901_v7  ;;  %v3050_v33 = vadd.f32 0.014752088, %v3049_v15  ;;  %v2946_v8 = vand.u32 2147483647, %v8857_v24  ;;  %v3118_v14 = vmul.f32 %v3117_v19, %v8859_v36 }
 0x478   :  { %v2910_v31 = vsel %vm2907_vm8, %v2909_v5, %v2905_v51  ;;  %v2939_v37 = vsub.f32 1.0, %v2938_v16  ;;  %v3706_v41 = vunpack.c.0.s8 %v8807_v46  ;;  %v3088_v48 = vadd.f32 0.001143296, %v3087_v45 }
 0x479   :  { %v2911_v10 = vmul.f32 %v2910_v31, %v2886_v13  ;;  %v3051_v40 = vmul.f32 %v3050_v33, %v8770_v21  ;;  %v3157_v7 = vadd.f32 0.00028619796, %v3156_v63  ;;  %vm2942_vm10 = vweird.f32 %v8857_v24 }
 0x47a   :  { %v2940_v43 = vmul.f32 %v5092_v23, %v2939_v37  ;;  %v2926_v16 = vmul.f32 %v2925_v52, %v8743_v61  ;;  %vm2944_vm11 = vmor %vm2942_vm10, %vm2943_vm9  ;;  %v2949_v15 = vor.u32 1.1754944e-38, %v2948_v47  ;;  %v3707_v13 = vunpack.c.0.s8 %v8815_v18 }
 0x47b   :  { %v4910_v27 = vclamps-f32 %v2911_v10, 1.0  ;;  %v3052_v9 = vadd.f32 0.112945676, %v3051_v40  ;;  %v3089_v51 = vmul.f32 %v3088_v48, %v8783_v60  ;;  %vm2947_vm12 = vcmp.eq.f32.partialorder %v2946_v8, 8.507059e+37  ;;  %v8898_v40 = vpop.xlane.xlu0 %3951 }
 0x47c   :  { %v2941_v5 = vadd.f32 %v5092_v23, %v2940_v43  ;;  %v3042_v45 = vmul.f32 %v3041_v57, %v8770_v21  ;;  %v3770_v43 = vcvt.s32.f32 %v3706_v41  ;;  %v3082_v24 = vmul.f32 %v3081_v58, %v8783_v60 }
 0x47d   :  { %v3562_v19 = vadd.f32 1.0, %v4910_v27  ;;  %v3053_v37 = vmul.f32 %v3052_v9, %v8770_v21  ;;  %v3090_v33 = vadd.f32 0.014752088, %v3089_v51  ;;  %v874_v61 = vmul.f32 0.5, %v8704_v34  ;;  %v8903_v9 = vpop.xlane.xlu1 %3945 }
 0x47e   :  { %v2945_v31 = vsel %vm2944_vm11, %v5092_v23, %v2941_v5  ;;  %v3119_v47 = vadd.f32 0.0036580483, %v3118_v14  ;;  %v3771_v48 = vcvt.s32.f32 %v3707_v13  ;;  %v3158_v8 = vmul.f32 %v3157_v7, %v8874_v62 }
 0x47f   :  { %v2950_v63 = vsel %vm2947_vm12, %v2949_v15, %v2945_v31  ;;  %v3054_v10 = vadd.f32 0.4994258, %v3053_v37  ;;  %v3091_v23 = vmul.f32 %v3090_v33, %v8783_v60  ;;  %v3626_v5 = vmul.f32 %v3562_v19, %v874_v61 }
 0x480   :  { %v2951_v52 = vmul.f32 %v2950_v63, %v2926_v16  ;;  %v3043_v41 = vadd.f32 0.18741608, %v3042_v45  ;;  %vm3834_vm13 = vcmp.gt.f32.partialorder %v3770_v43, 0.0  ;;  %v3083_v34 = vadd.f32 0.18741608, %v3082_v24 }
 0x481   :  { %v3055_v57 = vmul.f32 %v3054_v10, %v8770_v21  ;;  %v3092_v58 = vadd.f32 0.112945676, %v3091_v23  ;;  %v875_v16 = vmul.f32 0.5, %v8727_v59  ;;  %v3120_v13 = vmul.f32 %v3119_v47, %v8859_v36 }
 0x482   :  { %v4911_v27 = vclamps-f32 %v2951_v52, 1.0  ;;  %vm3835_vm14 = vcmp.gt.f32.partialorder %v3771_v48, 0.0  ;;  %v3159_v7 = vadd.f32 0.0036580483, %v3158_v8  ;;  %v8908_v19 = vsel %vm3834_vm13, %v3626_v5, -1e+30 }
 0x483   :  { %v3056_v15 = vadd.f32 1.0, %v3055_v57  ;;  %v3093_v51 = vmul.f32 %v3092_v58, %v8783_v60  ;;  %10329 = vst [vmem:[#allocation59_spill] sm:$0xff] %v8908_v19  ;;  %v3044_v37 = vmul.f32 %v3043_v41, %v8770_v21  ;;  %v3084_v63 = vmul.f32 %v3083_v34, %v8783_v60  ;;  %v8919_v47 = vpop.xlane.xlu0 %3960  ;;  %v10331_v41 = vld [vmem:[#allocation13_spill] sm:$0xff] }
 0x484   :  { %v3563_v14 = vadd.f32 1.0, %v4911_v27  ;;  %v3121_v24 = vadd.f32 0.05243302, %v3120_v13  ;;  %v3160_v61 = vmul.f32 %v3159_v7, %v8874_v62  ;;  %v3127_v52 = vmul.f32 3.8918573e-05, %v8859_v36  ;;  %v10332_v7 = vld [vmem:[#allocation22_spill] sm:$0xff] }
 0x485   :  { %5093 = vrcp.f32 %v3056_v15  ;;  %v3094_v45 = vadd.f32 0.4994258, %v3093_v51  ;;  %v3045_v10 = vadd.f32 1.1283791, %v3044_v37  ;;  %v3085_v23 = vadd.f32 1.1283791, %v3084_v63  ;;  %v8923_v27 = vpop.xlane.xlu1 %3957 }
 0x486   :  { %v3627_v31 = vmul.f32 %v3563_v14, %v875_v16  ;;  %v3128_v8 = vadd.f32 0.001143296, %v3127_v52  ;;  %v3161_v57 = vadd.f32 0.05243302, %v3160_v61  ;;  %v4041_v58 = vsub.f32 %v10331_v41, %v8919_v47 }
 0x487   :  { %v3095_v33 = vmul.f32 %v3094_v45, %v8783_v60  ;;  %v3122_v60 = vmul.f32 %v3121_v24, %v8859_v36  ;;  %v8931_v16 = vmul.f32 0.5, %v8713_v50  ;;  %v3046_v14 = vmul.f32 %v3045_v10, %v8730_v32 }
 0x488   :  { %v8912_v43 = vsel %vm3835_vm14, %v3627_v31, -1e+30  ;;  %v3129_v34 = vmul.f32 %v3128_v8, %v8859_v36  ;;  %v8935_v51 = vmul.f32 %v3085_v23, %v8734_v28  ;;  %v4039_v31 = vsub.f32 %v10332_v7, %v8923_v27  ;;  %v10333_v28 = vld [vmem:[#allocation44_spill] sm:$0xff] }
 0x489   :  { %10330 = vst [vmem:[#allocation34_spill] sm:$0xff] %v8912_v43  ;;  %v3986_v59 = vmax.f32 %v8908_v19, %v8912_v43  ;;  %v8921_v21 = vadd.f32 1.0, %v3095_v33  ;;  %v3068_v37 = vand.u32 2147483648, %v3056_v15  ;;  %v3167_v33 = vmul.f32 3.8918573e-05, %v8874_v62 }
 0x48a   :  { %v3130_v45 = vadd.f32 0.014752088, %v3129_v34  ;;  %v8940_v24 = vadd.f32 0.18741608, %v3122_v60  ;;  %v3162_v50 = vmul.f32 %v3161_v57, %v8874_v62  ;;  %v4136_v61 = vmul.f32 1.442695, %v4041_v58  ;;  %v3943_v34 = vpop.xlane.xlu2 %3942 }
 0x48b   :  { %3987 = vmax.xlane.f32.xlu1 %v3986_v59  ;;  %v5094_v48 = vpop.eup %5093  ;;  %5095 = vrcp.f32 %v8921_v21  ;;  %v3066_v59 = vand.u32 2147483647, %v3056_v15  ;;  %v4026_v10 = vsub.f32 %v10333_v28, %v8881_v55  ;;  %vm3062_vm1 = vweird.f32 %v3056_v15 }
 0x48c   :  { %v3058_v5 = vmul.f32 %v5094_v48, %v3056_v15  ;;  %vm3063_vm15 = vweird.f32 %v5094_v48  ;;  %v3131_v32 = vmul.f32 %v3130_v45, %v8859_v36  ;;  %v3168_v8 = vadd.f32 0.001143296, %v3167_v33 }
 0x48d   :  { %vm3064_vm2 = vmor %vm3062_vm1, %vm3063_vm15  ;;  %v4132_v57 = vmul.f32 1.442695, %v4039_v31  ;;  %vm3067_vm3 = vcmp.eq.f32.partialorder %v3066_v59, 8.507059e+37  ;;  %5097 = vpow2.f32 %v4136_v61  ;;  %v10337_v59 = vld [vmem:[#allocation88_spill] sm:$0xff]  ;;  %vm3102_vm5 = vweird.f32 %v8921_v21 }
 0x48e   :  { %v3059_v13 = vsub.f32 1.0, %v3058_v5  ;;  %v10334_v5 = vld [vmem:[#allocation15_spill] sm:$0xff]  ;;  %v3132_v7 = vadd.f32 0.112945676, %v3131_v32  ;;  %v3169_v45 = vmul.f32 %v3168_v8, %v8874_v62  ;;  %v3106_v32 = vand.u32 2147483647, %v8921_v21 }
 0x48f   :  { %v4027_v41 = vsub.f32 %v10334_v5, %v8881_v55  ;;  %v3108_v55 = vand.u32 2147483648, %v8921_v21  ;;  %v3710_v8 = vunpack.c.2.s8 %v8807_v46  ;;  %5099 = vpow2.f32 %v4132_v57 }
 0x490   :  { %v3060_v63 = vmul.f32 %v5094_v48, %v3059_v13  ;;  %v3069_v13 = vor.u32 1.1754944e-38, %v3068_v37  ;;  %v3133_v15 = vmul.f32 %v3132_v7, %v8859_v36  ;;  %v3170_v5 = vadd.f32 0.014752088, %v3169_v45 }
 0x491   :  { %v5096_v52 = vpop.eup %5095  ;;  %v3109_v7 = vor.u32 1.1754944e-38, %v3108_v55  ;;  %vm3107_vm6 = vcmp.eq.f32.partialorder %v3106_v32, 8.507059e+37  ;;  %v3774_v57 = vcvt.s32.f32 %v3710_v8  ;;  %v3163_v55 = vadd.f32 0.18741608, %v3162_v50 }
 0x492   :  { %v3061_v23 = vadd.f32 %v5094_v48, %v3060_v63  ;;  %v3098_v60 = vmul.f32 %v5096_v52, %v8921_v21  ;;  %v10335_v63 = vld [vmem:[#allocation37_spill] sm:$0xff]  ;;  %vm3103_vm4 = vweird.f32 %v5096_v52  ;;  %v3134_v31 = vadd.f32 0.4994258, %v3133_v15 }
 0x493   :  { %v4028_v33 = vsub.f32 %v10335_v63, %v3943_v34  ;;  %vm3104_vm0 = vmor %vm3102_vm5, %vm3103_vm4  ;;  %v879_v21 = vmul.f32 0.5, %v8717_v56  ;;  %vm3838_vm7 = vcmp.gt.f32.partialorder %v3774_v57, 0.0  ;;  %v4246_v50 = vunpack.c.l.bf16 %v8583_v11 }
 0x494   :  { %v3065_v58 = vsel %vm3064_vm2, %v5094_v48, %v3061_v23  ;;  %v3099_v28 = vsub.f32 1.0, %v3098_v60  ;;  %v8954_v48 = vpop.f32.mrf.mxu1  ;;  %v4029_v23 = vsub.f32 %v10337_v59, %v3943_v34  ;;  %v4108_v59 = vmul.f32 1.442695, %v4027_v41 }
 0x495   :  { %v3070_v43 = vsel %vm3067_vm3, %v3069_v13, %v3065_v58  ;;  %10336 = vst [vmem:[#allocation29_spill] sm:$0xff] %v8954_v48  ;;  %v3171_v13 = vmul.f32 %v3170_v5, %v8874_v62  ;;  %v3711_v58 = vunpack.c.2.s8 %v8815_v18  ;;  %v4247_v41 = vunpack.c.l.bf16 %v8591_v29 }
 0x496   :  { %v3071_v19 = vmul.f32 %v3070_v43, %v3046_v14  ;;  %v3100_v37 = vmul.f32 %v5096_v52, %v3099_v28  ;;  %v3135_v43 = vmul.f32 %v3134_v31, %v8859_v36  ;;  %v4110_v14 = vmul.f32 1.442695, %v4028_v33  ;;  %v5098_v28 = vpop.eup %5097 }
 0x497   :  { %v3172_v45 = vadd.f32 0.112945676, %v3171_v13  ;;  %v4112_v63 = vmul.f32 1.442695, %v4029_v23  ;;  %v4106_v31 = vmul.f32 1.442695, %v4026_v10  ;;  %v3775_v13 = vcvt.s32.f32 %v3711_v58  ;;  %v5100_v32 = vpop.eup %5099 }
 0x498   :  { %v4914_v61 = vclamps-f32 %v3071_v19, 1.0  ;;  %v3101_v60 = vadd.f32 %v5096_v52, %v3100_v37  ;;  %v8962_v34 = vadd.f32 1.0, %v3135_v43  ;;  %v8972_v10 = vpack.c.bf16 %v5098_v28, %v5100_v32 }
 0x499   :  { %v3173_v37 = vmul.f32 %v3172_v45, %v8874_v62  ;;  %v3164_v43 = vmul.f32 %v3163_v55, %v8874_v62  ;;  %vm3839_vm8 = vcmp.gt.f32.partialorder %v3775_v13, 0.0  ;;  %v4316_v28 = vadd.f32 %v4247_v41, %v4246_v50 }
 0x49a   :  { %v3105_v15 = vsel %vm3104_vm0, %v5096_v52, %v3101_v60  ;;  %v3566_v19 = vadd.f32 1.0, %v4914_v61  ;;  %5101 = vrcp.f32 %v8962_v34  ;;  %v3124_v61 = vmul.f32 %v8940_v24, %v8859_v36  ;;  %10338 = vst [vmem:[#allocation50_spill] sm:$0xff] %v8972_v10  ;;  %v3949_v60 = vpop.xlane.xlu2 %3948 }
 0x49b   :  { %v3110_v5 = vsel %vm3107_vm6, %v3109_v7, %v3105_v15  ;;  %v3174_v52 = vadd.f32 0.4994258, %v3173_v37  ;;  %5103 = vpow2.f32 %v4110_v14  ;;  %v10340_v14 = vld [vmem:[#allocation38_spill] sm:$0xff]  ;;  %4317 = vadd.xlane.f32.xlu2 %v4316_v28  ;;  %v3165_v55 = vadd.f32 1.1283791, %v3164_v43 }
 0x49c   :  { %v3111_v33 = vmul.f32 %v3110_v5, %v8935_v51  ;;  %v3630_v8 = vmul.f32 %v3566_v19, %v8931_v16  ;;  %5105 = vpow2.f32 %v4112_v63  ;;  %v8977_v36 = vpop.f32.mrf.mxu1  ;;  %4574 = vmatmul.bf16.vlgmr.msrb.gmra.mxu1 %v8972_v10  ;;  %v4030_v7 = vsub.f32 %v10340_v14, %v8903_v9  ;;  %v10342_v19 = vld [vmem:[#allocation62_spill] sm:$0xff] }
 0x49d   :  { %v3175_v56 = vmul.f32 %v3174_v52, %v8874_v62  ;;  %5107 = vpow2.f32 %v4106_v31  ;;  %10339 = vst [vmem:[#allocation67_spill] sm:$0xff] %v8977_v36  ;;  %v4031_v63 = vsub.f32 %v10342_v19, %v8903_v9  ;;  %v3125_v31 = vadd.f32 1.1283791, %v3124_v61  ;;  %v10344_v52 = vld [vmem:[#allocation39_spill] sm:$0xff] }
 0x49e   :  { %v4915_v23 = vclamps-f32 %v3111_v33, 1.0  ;;  %5109 = vpow2.f32 %v4108_v59  ;;  %v8985_v45 = vsel %vm3838_vm7, %v3630_v8, -1e+30  ;;  %v4114_v59 = vmul.f32 1.442695, %v4030_v7 }
 0x49f   :  { %v8979_v16 = vadd.f32 1.0, %v3175_v56  ;;  %10341 = vst [vmem:[#allocation47_spill] sm:$0xff] %v8985_v45  ;;  %v3148_v13 = vand.u32 2147483648, %v8962_v34  ;;  %v4032_v32 = vsub.f32 %v10344_v52, %v3949_v60  ;;  %v3146_v9 = vand.u32 2147483647, %v8962_v34  ;;  %v10345_v56 = vld [vmem:[#allocation20_spill] sm:$0xff] }
 0x4a0   :  { %v3567_v51 = vadd.f32 1.0, %v4915_v23  ;;  %v5102_v24 = vpop.eup %5101  ;;  %v4116_v61 = vmul.f32 1.442695, %v4031_v63  ;;  %v3126_v43 = vmul.f32 %v3125_v31, %v8831_v44  ;;  %vm3142_vm10 = vweird.f32 %v8962_v34  ;;  %v10348_v44 = vld [vmem:[#allocation26_spill] sm:$0xff] }
 0x4a1   :  { %v3138_v15 = vmul.f32 %v5102_v24, %v8962_v34  ;;  %5111 = vrcp.f32 %v8979_v16  ;;  %v5104_v62 = vpop.eup %5103  ;;  %vm3143_vm9 = vweird.f32 %v5102_v24  ;;  %v3149_v28 = vor.u32 1.1754944e-38, %v3148_v13  ;;  %v10351_v52 = vld [vmem:[#allocation90_spill] sm:$0xff] }
 0x4a2   :  { %v3631_v58 = vmul.f32 %v3567_v51, %v879_v21  ;;  %v5106_v37 = vpop.eup %5105  ;;  %v4033_v51 = vsub.f32 %v10345_v56, %v3949_v60  ;;  %vm3144_vm11 = vmor %vm3142_vm10, %vm3143_vm9  ;;  %v4118_v19 = vmul.f32 1.442695, %v4032_v32  ;;  %v3955_v60 = vpop.xlane.xlu2 %3954  ;;  %5113 = vpow2.f32 %v4114_v59  ;;  %v10350_v59 = vld [vmem:[#allocation98_spill] sm:$0xff] }
 0x4a3   :  { %v3139_v57 = vsub.f32 1.0, %v3138_v15  ;;  %v5108_v33 = vpop.eup %5107  ;;  %vm3147_vm12 = vcmp.eq.f32.partialorder %v3146_v9, 8.507059e+37  ;;  %5115 = vpow2.f32 %v4116_v61  ;;  %v4034_v34 = vsub.f32 %v10348_v44, %v8898_v40  ;;  %v9018_v56 = vpop.xlane.xlu1 %3963  ;;  %v10352_v44 = vld [vmem:[#allocation79_spill] sm:$0xff] }
 0x4a4   :  { %v8991_v5 = vsel %vm3839_vm8, %v3631_v58, -1e+30  ;;  %v5110_v23 = vpop.eup %5109  ;;  %v8999_v50 = vpack.c.bf16 %v5104_v62, %v5108_v33  ;;  %v3166_v58 = vmul.f32 %v3165_v55, %v8850_v42  ;;  %v4120_v63 = vmul.f32 1.442695, %v4033_v51  ;;  %v10349_v33 = vld [vmem:[#allocation92_spill] sm:$0xff] }
 0x4a5   :  { %10343 = vst [vmem:[#allocation30_spill] sm:$0xff] %v8991_v5  ;;  %v3992_v21 = vmax.f32 %v8985_v45, %v8991_v5  ;;  %v3140_v8 = vmul.f32 %v5102_v24, %v3139_v57  ;;  %v9001_v41 = vpack.c.bf16 %v5106_v37, %v5110_v23  ;;  %v3188_v57 = vand.u32 2147483648, %v8979_v16 }
 0x4a6   :  { %10346 = vst [vmem:[#allocation99_spill] sm:$0xff] %v8999_v50  ;;  %4470 = vmatmul.bf16.gmra.mxu3 %v8999_v50  ;;  %v4036_v55 = vsub.f32 %v10349_v33, %v3955_v60  ;;  %5117 = vpow2.f32 %v4118_v19  ;;  %v4035_v32 = vsub.f32 %v10351_v52, %v8898_v40  ;;  %v4122_v9 = vmul.f32 1.442695, %v4034_v34  ;;  %v10354_v52 = vld [vmem:[#allocation42_spill] sm:$0xff] }
 0x4a7   :  { %3993 = vmax.xlane.f32.xlu1 %v3992_v21  ;;  %10347 = vst [vmem:[#allocation101_spill] sm:$0xff] %v9001_v41  ;;  %v5112_v14 = vpop.eup %5111  ;;  %v3141_v7 = vadd.f32 %v5102_v24, %v3140_v8  ;;  %4559 = vmatmul.bf16.gmra.mxu0 %v9001_v41  ;;  %v3186_v21 = vand.u32 2147483647, %v8979_v16  ;;  %v3712_v8 = vunpack.c.3.s8 %v8807_v46  ;;  %5119 = vpow2.f32 %v4120_v63 }
 0x4a8   :  { %v3178_v15 = vmul.f32 %v5112_v14, %v8979_v16  ;;  %vm3183_vm13 = vweird.f32 %v5112_v14  ;;  %vm3182_vm14 = vweird.f32 %v8979_v16  ;;  %v4252_v61 = vunpack.c.h.bf16 %v8999_v50 }
 0x4a9   :  { %v3145_v62 = vsel %vm3144_vm11, %v5102_v24, %v3141_v7  ;;  %v4037_v24 = vsub.f32 %v10350_v59, %v3955_v60  ;;  %vm3184_vm15 = vmor %vm3182_vm14, %vm3183_vm13  ;;  %v3189_v7 = vor.u32 1.1754944e-38, %v3188_v57  ;;  %v4253_v40 = vunpack.c.h.bf16 %v9001_v41 }
 0x4aa   :  { %v3150_v37 = vsel %vm3147_vm12, %v3149_v28, %v3145_v62  ;;  %v3179_v42 = vsub.f32 1.0, %v3178_v15  ;;  %v3713_v28 = vunpack.c.3.s8 %v8815_v18  ;;  %v4126_v15 = vmul.f32 1.442695, %v4036_v55  ;;  %v9027_v33 = vpop.xlane.xlu2 %3966 }
 0x4ab   :  { %v3151_v31 = vmul.f32 %v3150_v37, %v3126_v43  ;;  %v5114_v43 = vpop.eup %5113  ;;  %vm3187_vm1 = vcmp.eq.f32.partialorder %v3186_v21, 8.507059e+37  ;;  %v4128_v62 = vmul.f32 1.442695, %v4037_v24  ;;  %v880_v63 = vmul.f32 0.5, %v8819_v6 }
 0x4ac   :  { %v3180_v13 = vmul.f32 %v5112_v14, %v3179_v42  ;;  %v5116_v19 = vpop.eup %5115  ;;  %v4043_v16 = vsub.f32 %v10352_v44, %v9018_v56  ;;  %v3776_v37 = vcvt.s32.f32 %v3712_v8  ;;  %5121 = vpow2.f32 %v4122_v9 }
 0x4ad   :  { %v4916_v23 = vclamps-f32 %v3151_v31, 1.0  ;;  %v5118_v42 = vpop.eup %5117  ;;  %v4124_v31 = vmul.f32 1.442695, %v4035_v32  ;;  %v4325_v18 = vadd.f32 %v4253_v40, %v4252_v61  ;;  %v3777_v21 = vcvt.s32.f32 %v3713_v28 }
 0x4ae   :  { %v3181_v51 = vadd.f32 %v5112_v14, %v3180_v13  ;;  %v5120_v55 = vpop.eup %5119  ;;  %5123 = vpow2.f32 %v4126_v15  ;;  %v10353_v13 = vld [vmem:[#allocation68_spill] sm:$0xff]  ;;  %v4140_v32 = vmul.f32 1.442695, %v4043_v16  ;;  %vm3840_vm2 = vcmp.gt.f32.partialorder %v3776_v37, 0.0 }
 0x4af   :  { %v3568_v46 = vadd.f32 1.0, %v4916_v23  ;;  %v4040_v6 = vsub.f32 %v10353_v13, %v8919_v47  ;;  %5125 = vpow2.f32 %v4128_v62  ;;  %4326 = vadd.xlane.f32.xlu2 %v4325_v18  ;;  %v4038_v23 = vsub.f32 %v10354_v52, %v8923_v27  ;;  %v748_v47 = vpop.permute.xlu0 %747  ;;  %v9070_v13 = vpop.f32.mrf.mxu3 }
 0x4b0   :  { %v3185_v60 = vsel %vm3184_vm15, %v5112_v14, %v3181_v51  ;;  %v881_v14 = vmul.f32 0.5, %v8839_v22  ;;  %5127 = vpow2.f32 %v4124_v31  ;;  %v9036_v22 = vpack.c.bf16 %v5118_v42, %v5114_v43 }
 0x4b1   :  { %v3190_v34 = vsel %vm3187_vm1, %v3189_v7, %v3185_v60  ;;  %v3632_v24 = vmul.f32 %v3568_v46, %v880_v63  ;;  %v9038_v51 = vpack.c.bf16 %v5120_v55, %v5116_v19  ;;  %vm3841_vm3 = vcmp.gt.f32.partialorder %v3777_v21, 0.0  ;;  %v9044_v60 = vpop.f32.mrf.mxu1  ;;  %v9068_v21 = vpop.f32.mrf.mxu0 }
 0x4b2   :  { %v3191_v57 = vmul.f32 %v3190_v34, %v3166_v58  ;;  %v10355_v58 = vld [vmem:[#allocation35_spill] sm:$0xff]  ;;  %10356 = vst [vmem:[#allocation103_spill] sm:$0xff] %v9036_v22  ;;  %v5122_v7 = vpop.eup %5121  ;;  %v4134_v28 = vmul.f32 1.442695, %v4040_v6  ;;  %v4130_v46 = vmul.f32 1.442695, %v4038_v23  ;;  %5129 = vpow2.f32 %v4140_v32 }
 0x4b3   :  { %v4045_v8 = vsub.f32 %v10355_v58, %v9027_v33  ;;  %10357 = vst [vmem:[#allocation16_spill] sm:$0xff] %v9038_v51  ;;  %v9040_v40 = vsel %vm3840_vm2, %v3632_v24, -1e+30  ;;  %v9049_v62 = vadd.f32 %v10319_v0, %v748_v47  ;;  %v9052_v63 = vadd.f32 %v10256_v3, %v748_v47 }
 0x4b4   :  { %v4917_v59 = vclamps-f32 %v3191_v57, 1.0  ;;  %10358 = vst [vmem:[#allocation46_spill] sm:$0xff] %v9040_v40  ;;  %v5124_v27 = vpop.eup %5123 }
 0x4b5   :  { %v4144_v61 = vmul.f32 1.442695, %v4045_v8  ;;  %v5126_v43 = vpop.eup %5125  ;;  %v9056_v34 = vpack.c.bf16 %v5124_v27, %v5122_v7  ;;  %v9061_v42 = vmul.f32 0.70710677, %v9049_v62  ;;  %v9064_v31 = vmul.f32 0.70710677, %v9052_v63 }
 0x4b6   :  { %v3569_v9 = vadd.f32 1.0, %v4917_v59  ;;  %4475 = vmatmul.bf16.gmra.mxu3 %v9036_v22  ;;  %v5128_v16 = vpop.eup %5127  ;;  %v4265_v7 = vunpack.c.h.bf16 %v8972_v10 }
 0x4b7   :  { %4564 = vmatmul.bf16.gmra.mxu0 %v9038_v51  ;;  %5131 = vpow2.f32 %v4144_v61  ;;  %10360 = vst [vmem:[#allocation49_spill] sm:$0xff] %v9056_v34  ;;  %v9058_v37 = vpack.c.bf16 %v5126_v43, %v5128_v16  ;;  %v4258_v55 = vunpack.c.l.bf16 %v9056_v34  ;;  %v3274_v24 = vmul.f32 %v9061_v42, %v9061_v42 }
 0x4b8   :  { %v3633_v15 = vmul.f32 %v3569_v9, %v881_v14  ;;  %5133 = vpow2.f32 %v4134_v28  ;;  %v5130_v57 = vpop.eup %5129  ;;  %v3314_v52 = vmul.f32 %v9064_v31, %v9064_v31  ;;  %v743_v28 = vpop.permute.xlu1 %742 }
 0x4b9   :  { %10361 = vst [vmem:[#allocation14_spill] sm:$0xff] %v9058_v37  ;;  %5135 = vpow2.f32 %v4130_v46  ;;  %v4259_v14 = vunpack.c.l.bf16 %v9058_v37  ;;  %v9078_v32 = vpop.f32.mrf.mxu1  ;;  %v9083_v9 = vmin.f32 %v3274_v24, 16.0  ;;  %v9093_v27 = vpop.f32.mrf.mxu0  ;;  %v9098_v16 = vadd.f32 %v10319_v0, %v743_v28 }
 0x4ba   :  { %v9046_v19 = vsel %vm3841_vm3, %v3633_v15, -1e+30  ;;  %10363 = vst [vmem:[#allocation32_spill] sm:$0xff] %v9078_v32  ;;  %v9085_v47 = vmin.f32 %v3314_v52, 16.0  ;;  %v9091_v15 = vpop.f32.mrf.mxu3 }
 0x4bb   :  { %10359 = vst [vmem:[#allocation72_spill] sm:$0xff] %v9046_v19  ;;  %v3995_v44 = vmax.f32 %v9040_v40, %v9046_v19  ;;  %v4334_v23 = vadd.f32 %v4259_v14, %v4258_v55  ;;  %v3276_v46 = vmul.f32 2.1237322e-06, %v9083_v9 }
 0x4bc   :  { %10365 = vst [vmem:[#allocation33_spill] sm:$0xff] %v9091_v15  ;;  %v3316_v43 = vmul.f32 2.1237322e-06, %v9085_v47 }
 0x4bd   :  { %3996 = vmax.xlane.f32.xlu0 %v3995_v44  ;;  %v5132_v18 = vpop.eup %5131  ;;  %4335 = vadd.xlane.f32.xlu2 %v4334_v23  ;;  %10366 = vst [vmem:[#allocation76_spill] sm:$0xff] %v9093_v27 }
 0x4be   :  { %v9072_v6 = vpack.c.bf16 %v5132_v18, %v5130_v57  ;;  %v5134_v59 = vpop.eup %5133  ;;  %v9101_v57 = vadd.f32 %v10256_v3, %v743_v28  ;;  %v3277_v18 = vadd.f32 0.00028619796, %v3276_v46  ;;  %v3317_v55 = vadd.f32 0.00028619796, %v3316_v43 }
 0x4bf   :  { %v5136_v58 = vpop.eup %5135  ;;  %v3287_v43 = vmul.f32 3.8918573e-05, %v9083_v9 }
 0x4c0   :  { %10362 = vst [vmem:[#allocation82_spill] sm:$0xff] %v9072_v6  ;;  %4579 = vmatmul.bf16.gmra.mxu1 %v9072_v6  ;;  %v9081_v8 = vpack.c.bf16 %v5134_v59, %v5136_v58  ;;  %v9106_v59 = vmul.f32 0.70710677, %v9098_v16  ;;  %v9109_v24 = vmul.f32 0.70710677, %v9101_v57  ;;  %v3278_v23 = vmul.f32 %v3277_v18, %v9083_v9 }
 0x4c1   :  { %v9103_v14 = vpop.f32.mrf.mxu1  ;;  %v3318_v58 = vmul.f32 %v3317_v55, %v9085_v47  ;;  %v3288_v32 = vadd.f32 0.001143296, %v3287_v43 }
 0x4c2   :  { %10364 = vst [vmem:[#allocation21_spill] sm:$0xff] %v9081_v8  ;;  %v4264_v61 = vunpack.c.h.bf16 %v9081_v8  ;;  %v4456_v52 = vpop.f32.mrf.mxu3  ;;  %v3234_v46 = vmul.f32 %v9109_v24, %v9109_v24 }
 0x4c3   :  { %10367 = vst [vmem:[#allocation108_spill] sm:$0xff] %v9103_v14  ;;  %v3319_v14 = vadd.f32 0.0036580483, %v3318_v58  ;;  %v3289_v27 = vmul.f32 %v3288_v32, %v9083_v9 }
 0x4c4   :  { %v4343_v44 = vadd.f32 %v4265_v7, %v4264_v61  ;;  %v3194_v61 = vmul.f32 %v9106_v59, %v9106_v59  ;;  %v4545_v7 = vpop.f32.mrf.mxu0  ;;  %v9125_v55 = vmin.f32 %v3234_v46, 16.0 }
 0x4c5   :  { %v9115_v28 = vadd.f32 %v4545_v7, %v4456_v52  ;;  %v3320_v7 = vmul.f32 %v3319_v14, %v9085_v47  ;;  %v3290_v15 = vadd.f32 0.014752088, %v3289_v27 }
 0x4c6   :  { %4480 = vmatmul.bf16.gmra.mxu3 %v9056_v34  ;;  %4344 = vadd.xlane.f32.xlu2 %v4343_v44  ;;  %v3279_v44 = vadd.f32 0.0036580483, %v3278_v23  ;;  %v9120_v36 = vmin.f32 %v3194_v61, 16.0  ;;  %v3327_v23 = vmul.f32 3.8918573e-05, %v9085_v47 }
 0x4c7   :  { %4569 = vmatmul.bf16.gmra.mxu0 %v9058_v37  ;;  %10368 = vst [vmem:[#allocation31_spill] sm:$0xff] %v9115_v28  ;;  %v3236_v58 = vmul.f32 2.1237322e-06, %v9125_v55  ;;  %v3291_v61 = vmul.f32 %v3290_v15, %v9083_v9  ;;  %v3321_v48 = vadd.f32 0.05243302, %v3320_v7 }
 0x4c8   :  { %v3280_v52 = vmul.f32 %v3279_v44, %v9083_v9  ;;  %v3196_v28 = vmul.f32 2.1237322e-06, %v9120_v36  ;;  %v3328_v10 = vadd.f32 0.001143296, %v3327_v23 }
 0x4c9   :  { %v9123_v18 = vpop.f32.mrf.mxu1  ;;  %v3237_v41 = vadd.f32 0.00028619796, %v3236_v58  ;;  %v3322_v27 = vmul.f32 %v3321_v48, %v9085_v47 }
 0x4ca   :  { %10369 = vst [vmem:[#allocation58_spill] sm:$0xff] %v9123_v18  ;;  %v3281_v43 = vadd.f32 0.05243302, %v3280_v52  ;;  %v3197_v46 = vadd.f32 0.00028619796, %v3196_v28  ;;  %v3329_v32 = vmul.f32 %v3328_v10, %v9085_v47 }
 0x4cb   :  { %v3238_v28 = vmul.f32 %v3237_v41, %v9125_v55  ;;  %v3323_v23 = vadd.f32 0.18741608, %v3322_v27 }
 0x4cc   :  { %v3282_v14 = vmul.f32 %v3281_v43, %v9083_v9  ;;  %v3330_v50 = vadd.f32 0.014752088, %v3329_v32  ;;  %v3198_v37 = vmul.f32 %v3197_v46, %v9120_v36  ;;  %v10372_v46 = vld [vmem:[#allocation48_spill] sm:$0xff] }
 0x4cd   :  { %v3324_v41 = vmul.f32 %v3323_v23, %v9085_v47 }
 0x4ce   :  { %v3331_v52 = vmul.f32 %v3330_v50, %v9085_v47  ;;  %v3283_v10 = vadd.f32 0.18741608, %v3282_v14  ;;  %v3199_v43 = vadd.f32 0.0036580483, %v3198_v37  ;;  %v753_v14 = vpop.permute.xlu2 %752  ;;  %v9155_v37 = vpop.xlane.xlu0 %3969 }
 0x4cf   :  { %v3325_v23 = vadd.f32 1.1283791, %v3324_v41 }
 0x4d0   :  { %v3332_v58 = vadd.f32 0.112945676, %v3331_v52  ;;  %v3284_v50 = vmul.f32 %v3283_v10, %v9083_v9 }
 0x4d1   :  { %v9138_v6 = vpop.f32.mrf.mxu1 }
 0x4d2   :  { %10370 = vst [vmem:[#allocation45_spill] sm:$0xff] %v9138_v6  ;;  %v3333_v32 = vmul.f32 %v3332_v58, %v9085_v47  ;;  %v3239_v6 = vadd.f32 0.0036580483, %v3238_v28  ;;  %v3207_v28 = vmul.f32 3.8918573e-05, %v9120_v36 }
 0x4d3   :  { %v3285_v10 = vadd.f32 1.1283791, %v3284_v50 }
 0x4d4   :  { %v3334_v27 = vadd.f32 0.4994258, %v3333_v32  ;;  %v10374_v32 = vld [vmem:[#allocation95_spill] sm:$0xff] }
 0x4d6   :  { %4485 = vmatmul.bf16.gmra.mxu3 %v9081_v8  ;;  %v3292_v8 = vadd.f32 0.112945676, %v3291_v61  ;;  %v3335_v52 = vmul.f32 %v3334_v27, %v9085_v47  ;;  %v3208_v27 = vadd.f32 0.001143296, %v3207_v28 }
 0x4d8   :  { %v3293_v44 = vmul.f32 %v3292_v8, %v9083_v9  ;;  %v10371_v8 = vld [vmem:[#allocation36_spill] sm:$0xff] }
 0x4d9   :  { %v4042_v61 = vsub.f32 %v10371_v8, %v9018_v56  ;;  %v3200_v56 = vmul.f32 %v3199_v43, %v9120_v36  ;;  %v9166_v8 = vadd.f32 %v10256_v3, %v753_v14 }
 0x4da   :  { %v3294_v15 = vadd.f32 0.4994258, %v3293_v44  ;;  %v4044_v44 = vsub.f32 %v10372_v46, %v9027_v33  ;;  %v3240_v33 = vmul.f32 %v3239_v6, %v9125_v55  ;;  %v4046_v46 = vsub.f32 %v10374_v32, %v9155_v37 }
 0x4db   :  { %v3201_v47 = vadd.f32 0.05243302, %v3200_v56  ;;  %v9182_v56 = vmul.f32 %v3325_v23, %v9064_v31 }
 0x4dc   :  { %v3295_v7 = vmul.f32 %v3294_v15, %v9083_v9  ;;  %v4138_v15 = vmul.f32 1.442695, %v4042_v61  ;;  %v4142_v58 = vmul.f32 1.442695, %v4044_v44  ;;  %v9163_v9 = vadd.f32 %v10319_v0, %v753_v14  ;;  %v3973_v14 = vpop.xlane.xlu1 %3972 }
 0x4dd   :  { %v9168_v61 = vadd.f32 1.0, %v3335_v52  ;;  %v9175_v44 = vmul.f32 0.5, %v9049_v62  ;;  %v3241_v50 = vadd.f32 0.05243302, %v3240_v33  ;;  %v9185_v52 = vmul.f32 0.70710677, %v9166_v8 }
 0x4de   :  { %v9146_v48 = vadd.f32 1.0, %v3295_v7  ;;  %v9159_v7 = vpop.f32.mrf.mxu1  ;;  %v9178_v41 = vmul.f32 0.70710677, %v9163_v9  ;;  %v9188_v32 = vmul.f32 %v3201_v47, %v9120_v36  ;;  %v4146_v62 = vmul.f32 1.442695, %v4046_v46 }
 0x4df   :  { %10373 = vst [vmem:[#allocation87_spill] sm:$0xff] %v9159_v7  ;;  %v4048_v7 = vsub.f32 %v8588_v39, %v3973_v14  ;;  %v4049_v47 = vsub.f32 %v8599_v54, %v3973_v14  ;;  %v9215_v14 = vld [vmem:[%s9790_s4 + $0x70] sm:$0xff]  ;;  %v3346_v11 = vand.u32 2147483647, %v9168_v61  ;;  %vm3342_vm8 = vweird.f32 %v9168_v61 }
 0x4e0   :  { %5137 = vrcp.f32 %v9146_v48  ;;  %v3308_v33 = vand.u32 2147483648, %v9146_v48  ;;  %v3354_v23 = vmul.f32 %v9178_v41, %v9178_v41  ;;  %vm3302_vm5 = vweird.f32 %v9146_v48 }
 0x4e1   :  { %5139 = vpow2.f32 %v4138_v15  ;;  %v3286_v15 = vmul.f32 %v3285_v10, %v9061_v42  ;;  %v3306_v42 = vand.u32 2147483647, %v9146_v48  ;;  %v9197_v10 = vmul.f32 %v3241_v50, %v9125_v55 }
 0x4e2   :  { %5141 = vrcp.f32 %v9168_v61  ;;  %v3309_v50 = vor.u32 1.1754944e-38, %v3308_v33  ;;  %v3348_v33 = vand.u32 2147483648, %v9168_v61  ;;  %v3716_v5 = vunpack.c.1.s8 %v9215_v14 }
 0x4e3   :  { %5143 = vpow2.f32 %v4142_v58  ;;  %v3209_v58 = vmul.f32 %v3208_v27, %v9120_v36  ;;  %v10375_v27 = vld [vmem:[#allocation97_spill] sm:$0xff]  ;;  %vm3307_vm6 = vcmp.eq.f32.partialorder %v3306_v42, 8.507059e+37  ;;  %vm3347_vm10 = vcmp.eq.f32.partialorder %v3346_v11, 8.507059e+37 }
 0x4e4   :  { %v4047_v18 = vsub.f32 %v10375_v27, %v9155_v37  ;;  %5145 = vpow2.f32 %v4146_v62  ;;  %v4152_v27 = vmul.f32 1.442695, %v4049_v47 }
 0x4e5   :  { %v3210_v46 = vadd.f32 0.014752088, %v3209_v58 }
 0x4e6   :  { %v5138_v43 = vpop.eup %5137  ;;  %v9208_v22 = vpop.f32.mrf.mxu1  ;;  %v4148_v42 = vmul.f32 1.442695, %v4047_v18 }
 0x4e7   :  { %v3298_v6 = vmul.f32 %v5138_v43, %v9146_v48  ;;  %vm3303_vm4 = vweird.f32 %v5138_v43  ;;  %v9194_v31 = vpop.eup %5139  ;;  %10376 = vst [vmem:[#allocation94_spill] sm:$0xff] %v9208_v22  ;;  %v4150_v48 = vmul.f32 1.442695, %v4048_v7  ;;  %v9225_v7 = vld [vmem:[%s9790_s4 + $0x78] sm:$0xff] }
 0x4e8   :  { %vm3304_vm0 = vmor %vm3302_vm5, %vm3303_vm4 }
 0x4e9   :  { %v3299_v28 = vsub.f32 1.0, %v3298_v6  ;;  %v5142_v6 = vpop.eup %5141  ;;  %5147 = vpow2.f32 %v4150_v48  ;;  %v3780_v48 = vcvt.s32.f32 %v3716_v5  ;;  %v3243_v5 = vadd.f32 0.18741608, %v9197_v10 }
 0x4ea   :  { %v9206_v51 = vpop.eup %5143  ;;  %v3338_v54 = vmul.f32 %v5142_v6, %v9168_v61  ;;  %vm3343_vm7 = vweird.f32 %v5142_v6  ;;  %5149 = vpow2.f32 %v4152_v27  ;;  %v3203_v27 = vadd.f32 0.18741608, %v9188_v32 }
 0x4eb   :  { %v3300_v34 = vmul.f32 %v5138_v43, %v3299_v28  ;;  %v3247_v28 = vmul.f32 3.8918573e-05, %v9125_v55  ;;  %vm3344_vm9 = vmor %vm3342_vm8, %vm3343_vm7  ;;  %5151 = vpow2.f32 %v4148_v42  ;;  %vm3844_vm11 = vcmp.gt.f32.partialorder %v3780_v48, 0.0 }
 0x4ec   :  { %v3339_v22 = vsub.f32 1.0, %v3338_v54  ;;  %v885_v32 = vmul.f32 0.5, %v9052_v63  ;;  %v3204_v10 = vmul.f32 %v3203_v27, %v9120_v36 }
 0x4ed   :  { %v3301_v39 = vadd.f32 %v5138_v43, %v3300_v34  ;;  %v3211_v34 = vmul.f32 %v3210_v46, %v9120_v36  ;;  %v3248_v58 = vadd.f32 0.001143296, %v3247_v28  ;;  %v5146_v46 = vpop.eup %5145 }
 0x4ee   :  { %v3340_v29 = vmul.f32 %v5142_v6, %v3339_v22  ;;  %v9231_v22 = vpop.f32.mrf.mxu0 }
 0x4ef   :  { %v3305_v37 = vsel %vm3304_vm0, %v5138_v43, %v3301_v39  ;;  %v3212_v62 = vadd.f32 0.112945676, %v3211_v34  ;;  %v3249_v45 = vmul.f32 %v3248_v58, %v9125_v55  ;;  %v3717_v34 = vunpack.c.1.s8 %v9225_v7  ;;  %v9239_v58 = vpop.f32.mrf.mxu1  ;;  %v5148_v11 = vpop.eup %5147 }
 0x4f0   :  { %v3310_v19 = vsel %vm3307_vm6, %v3309_v50, %v3305_v37  ;;  %v3341_v39 = vadd.f32 %v5142_v6, %v3340_v29  ;;  %v3349_v50 = vor.u32 1.1754944e-38, %v3348_v33  ;;  %v9237_v37 = vmin.f32 %v3354_v23, 16.0  ;;  %10377 = vst [vmem:[#allocation84_spill] sm:$0xff] %v9239_v58  ;;  %v758_v33 = vpop.permute.xlu2 %757 }
 0x4f1   :  { %v3311_v40 = vmul.f32 %v3310_v19, %v3286_v15  ;;  %v3213_v43 = vmul.f32 %v3212_v62, %v9120_v36  ;;  %v9228_v15 = vpop.f32.mrf.mxu3  ;;  %v3250_v47 = vadd.f32 0.014752088, %v3249_v45  ;;  %v3394_v62 = vmul.f32 %v9185_v52, %v9185_v52 }
 0x4f2   :  { %v3781_v42 = vcvt.s32.f32 %v3717_v34 }
 0x4f3   :  { %v4920_v19 = vclamps-f32 %v3311_v40, 1.0  ;;  %v3214_v28 = vadd.f32 0.4994258, %v3213_v43  ;;  %v3251_v18 = vmul.f32 %v3250_v47, %v9125_v55  ;;  %v3345_v40 = vsel %vm3344_vm9, %v5142_v6, %v3341_v39  ;;  %v5150_v47 = vpop.eup %5149 }
 0x4f4   :  { %v3350_v29 = vsel %vm3347_vm10, %v3349_v50, %v3345_v40  ;;  %v5152_v34 = vpop.eup %5151  ;;  %v3244_v40 = vmul.f32 %v3243_v5, %v9125_v55  ;;  %vm3845_vm12 = vcmp.gt.f32.partialorder %v3781_v42, 0.0 }
 0x4f5   :  { %v3572_v54 = vadd.f32 1.0, %v4920_v19  ;;  %v3215_v45 = vmul.f32 %v3214_v28, %v9120_v36  ;;  %v3252_v61 = vadd.f32 0.112945676, %v3251_v18  ;;  %v3351_v43 = vmul.f32 %v3350_v29, %v9182_v56 }
 0x4f6   :  { %v3356_v28 = vmul.f32 2.1237322e-06, %v9237_v37  ;;  %v9254_v56 = vadd.f32 %v10319_v0, %v758_v33  ;;  %v9257_v18 = vmin.f32 %v3394_v62, 16.0  ;;  %v4550_v29 = vpop.f32.mrf.mxu0  ;;  %v9270_v36 = vpack.c.bf16 %v9206_v51, %v9194_v31 }
 0x4f7   :  { %v9245_v6 = vadd.f32 1.0, %v3215_v45  ;;  %v3636_v23 = vmul.f32 %v3572_v54, %v9175_v44  ;;  %v3253_v19 = vmul.f32 %v3252_v61, %v9125_v55  ;;  %v4921_v39 = vclamps-f32 %v3351_v43, 1.0  ;;  %v9292_v42 = vpop.f32.mrf.mxu1 }
 0x4f8   :  { %v9260_v44 = vadd.f32 %v10256_v3, %v758_v33  ;;  %v9266_v61 = vpack.c.bf16 %v5150_v47, %v5152_v34  ;;  %v9272_v3 = vpack.c.bf16 %v5148_v11, %v5146_v46  ;;  %v3357_v27 = vadd.f32 0.00028619796, %v3356_v28  ;;  %4490 = vmatmul.bf16.gmra.mxu3 %v9270_v36  ;;  %10379 = vst [vmem:[#allocation105_spill] sm:$0xff] %v9292_v42 }
 0x4f9   :  { %5153 = vrcp.f32 %v9245_v6  ;;  %v3254_v50 = vadd.f32 0.4994258, %v3253_v19  ;;  %v3573_v54 = vadd.f32 1.0, %v4921_v39  ;;  %v9263_v48 = vsel %vm3844_vm11, %v3636_v23, -1e+30  ;;  %v4461_v45 = vpop.f32.mrf.mxu3 }
 0x4fa   :  { %v9276_v33 = vadd.f32 %v4550_v29, %v4461_v45  ;;  %v3367_v43 = vmul.f32 3.8918573e-05, %v9237_v37  ;;  %4584 = vmatmul.bf16.gmra.mxu1 %v9266_v61  ;;  %v4270_v51 = vunpack.c.l.bf16 %v9272_v3  ;;  %v4271_v31 = vunpack.c.l.bf16 %v9266_v61 }
 0x4fb   :  { %v3255_v63 = vmul.f32 %v3254_v50, %v9125_v55  ;;  %v3637_v0 = vmul.f32 %v3573_v54, %v885_v32  ;;  %v9280_v55 = vmul.f32 0.70710677, %v9254_v56  ;;  %v3205_v19 = vadd.f32 1.1283791, %v3204_v10 }
 0x4fc   :  { %10378 = vst [vmem:[#allocation51_spill] sm:$0xff] %v9276_v33  ;;  %v3245_v47 = vadd.f32 1.1283791, %v3244_v40  ;;  %v3396_v39 = vmul.f32 2.1237322e-06, %v9257_v18  ;;  %v4352_v32 = vadd.f32 %v4271_v31, %v4270_v51  ;;  %v3358_v28 = vmul.f32 %v3357_v27, %v9237_v37 }
 0x4fd   :  { %v9274_v62 = vadd.f32 1.0, %v3255_v63  ;;  %v9282_v23 = vsel %vm3845_vm12, %v3637_v0, -1e+30  ;;  %v3368_v54 = vadd.f32 0.001143296, %v3367_v43  ;;  %v3434_v63 = vmul.f32 %v9280_v55, %v9280_v55 }
 0x4fe   :  { %v4001_v46 = vmax.f32 %v9263_v48, %v9282_v23  ;;  %v9297_v34 = vmul.f32 0.70710677, %v9260_v44  ;;  %v3228_v45 = vand.u32 2147483648, %v9245_v6  ;;  %4353 = vadd.xlane.f32.xlu2 %v4352_v32  ;;  %v3226_v10 = vand.u32 2147483647, %v9245_v6 }
 0x4ff   :  { %v5154_v5 = vpop.eup %5153  ;;  %5155 = vrcp.f32 %v9274_v62  ;;  %v3369_v40 = vmul.f32 %v3368_v54, %v9237_v37  ;;  %v3206_v29 = vmul.f32 %v3205_v19, %v9106_v59  ;;  %v3246_v27 = vmul.f32 %v3245_v47, %v9109_v24 }
 0x500   :  { %v3218_v11 = vmul.f32 %v5154_v5, %v9245_v6  ;;  %4002 = vmax.xlane.f32.xlu0 %v4001_v46  ;;  %vm3223_vm13 = vweird.f32 %v5154_v5  ;;  %v3397_v43 = vadd.f32 0.00028619796, %v3396_v39  ;;  %v3359_v31 = vadd.f32 0.0036580483, %v3358_v28 }
 0x501   :  { %vm3222_vm14 = vweird.f32 %v9245_v6  ;;  %v9307_v42 = vmin.f32 %v3434_v63, 16.0  ;;  %v3229_v32 = vor.u32 1.1754944e-38, %v3228_v45  ;;  %v3407_v58 = vmul.f32 3.8918573e-05, %v9257_v18 }
 0x502   :  { %v3219_v50 = vsub.f32 1.0, %v3218_v11  ;;  %v3370_v11 = vadd.f32 0.014752088, %v3369_v40  ;;  %vm3224_vm15 = vmor %vm3222_vm14, %vm3223_vm13  ;;  %v3474_v59 = vmul.f32 %v9297_v34, %v9297_v34  ;;  %vm3227_vm1 = vcmp.eq.f32.partialorder %v3226_v10, 8.507059e+37  ;;  %v9317_v40 = vpop.f32.mrf.mxu1 }
 0x503   :  { %v3398_v47 = vmul.f32 %v3397_v43, %v9257_v18  ;;  %v3408_v28 = vadd.f32 0.001143296, %v3407_v58  ;;  %v3360_v54 = vmul.f32 %v3359_v31, %v9237_v37  ;;  %v3268_v45 = vand.u32 2147483648, %v9274_v62 }
 0x504   :  { %v3220_v0 = vmul.f32 %v5154_v5, %v3219_v50  ;;  %v3371_v24 = vmul.f32 %v3370_v11, %v9237_v37  ;;  %v3714_v11 = vunpack.c.0.s8 %v9215_v14  ;;  %vm3262_vm3 = vweird.f32 %v9274_v62 }
 0x505   :  { %v5156_v51 = vpop.eup %5155  ;;  %v3409_v10 = vmul.f32 %v3408_v28, %v9257_v18  ;;  %v3399_v31 = vadd.f32 0.0036580483, %v3398_v47 }
 0x506   :  { %v3221_v46 = vadd.f32 %v5154_v5, %v3220_v0  ;;  %v3258_v50 = vmul.f32 %v5156_v51, %v9274_v62  ;;  %v3372_v0 = vadd.f32 0.112945676, %v3371_v24  ;;  %vm3263_vm2 = vweird.f32 %v5156_v51 }
 0x507   :  { %vm3264_vm4 = vmor %vm3262_vm3, %vm3263_vm2  ;;  %v3715_v24 = vunpack.c.0.s8 %v9225_v7 }
 0x508   :  { %v3225_v19 = vsel %vm3224_vm15, %v5154_v5, %v3221_v46  ;;  %v3259_v6 = vsub.f32 1.0, %v3258_v50  ;;  %v3266_v5 = vand.u32 2147483647, %v9274_v62  ;;  %v9321_v46 = vmin.f32 %v3474_v59, 16.0  ;;  %4495 = vmatmul.bf16.gmra.mxu3 %v9272_v3 }
 0x509   :  { %v3230_v39 = vsel %vm3227_vm1, %v3229_v32, %v3225_v19  ;;  %v3373_v58 = vmul.f32 %v3372_v0, %v9237_v37  ;;  %v3410_v32 = vadd.f32 0.014752088, %v3409_v10  ;;  %v3361_v50 = vadd.f32 0.05243302, %v3360_v54 }
 0x50a   :  { %v3231_v63 = vmul.f32 %v3230_v39, %v3206_v29  ;;  %v3260_v33 = vmul.f32 %v5156_v51, %v3259_v6  ;;  %v3269_v19 = vor.u32 1.1754944e-38, %v3268_v45  ;;  %vm3267_vm5 = vcmp.eq.f32.partialorder %v3266_v5, 8.507059e+37 }
 0x50b   :  { %v3374_v39 = vadd.f32 0.4994258, %v3373_v58  ;;  %v3411_v28 = vmul.f32 %v3410_v32, %v9257_v18  ;;  %v882_v54 = vmul.f32 0.5, %v9098_v16  ;;  %v3400_v45 = vmul.f32 %v3399_v31, %v9257_v18  ;;  %v9340_v31 = vpop.f32.mrf.mxu1 }
 0x50c   :  { %v4918_v43 = vclamps-f32 %v3231_v63, 1.0  ;;  %v3261_v29 = vadd.f32 %v5156_v51, %v3260_v33  ;;  %v3436_v63 = vmul.f32 2.1237322e-06, %v9307_v42  ;;  %v3778_v33 = vcvt.s32.f32 %v3714_v11  ;;  %10380 = vst [vmem:[#allocation75_spill] sm:$0xff] %v9340_v31 }
 0x50d   :  { %v3375_v62 = vmul.f32 %v3374_v39, %v9237_v37  ;;  %v3412_v10 = vadd.f32 0.112945676, %v3411_v28  ;;  %v3476_v5 = vmul.f32 2.1237322e-06, %v9321_v46  ;;  %v883_v16 = vmul.f32 0.5, %v9101_v57 }
 0x50e   :  { %v3265_v6 = vsel %vm3264_vm4, %v5156_v51, %v3261_v29  ;;  %v3570_v59 = vadd.f32 1.0, %v4918_v43  ;;  %v3362_v51 = vmul.f32 %v3361_v50, %v9237_v37  ;;  %v3779_v43 = vcvt.s32.f32 %v3715_v24  ;;  %v5282_v24 = vld [vmem:[%s9788_s2] sm:$0x7] }
 0x50f   :  { %v3270_v47 = vsel %vm3267_vm5, %v3269_v19, %v3265_v6  ;;  %v9335_v58 = vadd.f32 1.0, %v3375_v62  ;;  %v3413_v19 = vmul.f32 %v3412_v10, %v9257_v18  ;;  %v3437_v11 = vadd.f32 0.00028619796, %v3436_v63  ;;  %v10382_v62 = vld [vmem:[#allocation80_spill] sm:$0xff] }
 0x510   :  { %v3271_v0 = vmul.f32 %v3270_v47, %v3246_v27  ;;  %v3634_v32 = vmul.f32 %v3570_v59, %v882_v54  ;;  %vm3842_vm0 = vcmp.gt.f32.partialorder %v3778_v33, 0.0  ;;  %v3401_v27 = vadd.f32 0.05243302, %v3400_v45 }
 0x511   :  { %5157 = vrcp.f32 %v9335_v58  ;;  %v3414_v50 = vadd.f32 0.4994258, %v3413_v19  ;;  %v3363_v6 = vadd.f32 0.18741608, %v3362_v51  ;;  %v3477_v28 = vadd.f32 0.00028619796, %v3476_v5 }
 0x512   :  { %v4919_v29 = vclamps-f32 %v3271_v0, 1.0  ;;  %vm3843_vm6 = vcmp.gt.f32.partialorder %v3779_v43, 0.0  ;;  %v9345_v59 = vperm.slane %v5282_v24, 1  ;;  %v9347_v47 = vsel %vm3842_vm0, %v3634_v32, -1e+30  ;;  %v3976_v32 = vpop.xlane.xlu0 %3975 }
 0x513   :  { %10381 = vst [vmem:[#allocation114_spill] sm:$0xff] %v9347_v47  ;;  %v3415_v33 = vmul.f32 %v3414_v50, %v9257_v18  ;;  %v3438_v57 = vmul.f32 %v3437_v11, %v9307_v42  ;;  %v3402_v45 = vmul.f32 %v3401_v27, %v9257_v18  ;;  %v3364_v5 = vmul.f32 %v3363_v6, %v9237_v37 }
 0x514   :  { %v3571_v39 = vadd.f32 1.0, %v4919_v29  ;;  %v317_v54 = vadd.f32 %v10382_v62, %v9345_v59  ;;  %v3478_v43 = vmul.f32 %v3477_v28, %v9321_v46  ;;  %v9367_v11 = vstv %s9791_s5  ;;  %s5310_s5 = smov [#allocation3]  }
 0x515   :  { %v9356_v10 = vadd.f32 1.0, %v3415_v33  ;;  %v9374_v37 = vadd.f32 %v9044_v60, %v9345_v59  ;;  %v3365_v6 = vadd.f32 1.1283791, %v3364_v5  ;;  %v4050_v24 = vsub.f32 %v8522_v53, %v3976_v32  ;;  %v9378_v33 = vpop.f32.mrf.mxu1  ;;  %s4752_s30 = sshll.u32 %s5310_s5, 4  ;;  %s4753_s30 = int_to_ptr.vmem [resolvable:$true] %s4752_s30 }
 0x516   :  { %v3635_v63 = vmul.f32 %v3571_v39, %v883_v16  ;;  %v3439_v16 = vadd.f32 0.0036580483, %v3438_v57  ;;  %v9370_v27 = vmul.f32 %v9367_v11, %v317_v54  ;;  %v3403_v39 = vadd.f32 0.18741608, %v3402_v45  ;;  %10384 = vst [vmem:[#allocation25_spill] sm:$0xff] %v9378_v33 }
 0x517   :  { %v5158_v51 = vpop.eup %5157  ;;  %5159 = vrcp.f32 %v9356_v10  ;;  %v3479_v28 = vadd.f32 0.0036580483, %v3478_v43  ;;  %v3386_v57 = vand.u32 2147483647, %v9335_v58  ;;  %v3447_v54 = vmul.f32 3.8918573e-05, %v9307_v42 }
 0x518   :  { %v9354_v0 = vsel %vm3843_vm6, %v3635_v63, -1e+30  ;;  %v3378_v19 = vmul.f32 %v5158_v51, %v9335_v58  ;;  %v3388_v63 = vand.u32 2147483648, %v9335_v58  ;;  %vm3383_vm7 = vweird.f32 %v5158_v51 }
 0x519   :  { %10383 = vst [vmem:[#allocation73_spill] sm:$0xff] %v9354_v0  ;;  %v3998_v29 = vmax.f32 %v9347_v47, %v9354_v0  ;;  %v9386_v60 = vmul.f32 0.5, %v9166_v8  ;;  %v3440_v45 = vmul.f32 %v3439_v16, %v9307_v42  ;;  %v4051_v53 = vsub.f32 %v8533_v1, %v3976_v32 }
 0x51a   :  { %v3379_v50 = vsub.f32 1.0, %v3378_v19  ;;  %v3404_v43 = vmul.f32 %v3403_v39, %v9257_v18  ;;  %vm3382_vm8 = vweird.f32 %v9335_v58  ;;  %v3480_v33 = vmul.f32 %v3479_v28, %v9321_v46 }
 0x51b   :  { %3999 = vmax.xlane.f32.xlu1 %v3998_v29  ;;  %v9383_v29 = vmul.f32 0.5, %v9163_v9  ;;  %v4154_v31 = vmul.f32 1.442695, %v4050_v24  ;;  %vm3384_vm9 = vmor %vm3382_vm8, %vm3383_vm7  ;;  %v3389_v9 = vor.u32 1.1754944e-38, %v3388_v63  ;;  %v3366_v8 = vmul.f32 %v3365_v6, %v9178_v41 }
 0x51c   :  { %v3380_v62 = vmul.f32 %v5158_v51, %v3379_v50  ;;  %v3448_v50 = vadd.f32 0.001143296, %v3447_v54  ;;  %vm3387_vm10 = vcmp.eq.f32.partialorder %v3386_v57, 8.507059e+37  ;;  %v3441_v32 = vadd.f32 0.05243302, %v3440_v45 }
 0x51d   :  { %v5160_v5 = vpop.eup %5159  ;;  %v9396_v16 = vmul.f32 1.442695, %v4051_v53  ;;  %v3405_v58 = vadd.f32 1.1283791, %v3404_v43  ;;  %v3428_v28 = vand.u32 2147483648, %v9356_v10  ;;  %v3718_v57 = vunpack.c.2.s8 %v9215_v14 }
 0x51e   :  { %v3381_v19 = vadd.f32 %v5158_v51, %v3380_v62  ;;  %v3418_v0 = vmul.f32 %v5160_v5, %v9356_v10  ;;  %v3449_v1 = vmul.f32 %v3448_v50, %v9307_v42  ;;  %vm3423_vm11 = vweird.f32 %v5160_v5 }
 0x51f   :  { %v3426_v63 = vand.u32 2147483647, %v9356_v10  ;;  %v3487_v41 = vmul.f32 3.8918573e-05, %v9321_v46  ;;  %vm3422_vm12 = vweird.f32 %v9356_v10  ;;  %v3406_v43 = vmul.f32 %v3405_v58, %v9185_v52 }
 0x520   :  { %v3385_v47 = vsel %vm3384_vm9, %v5158_v51, %v3381_v19  ;;  %v3419_v39 = vsub.f32 1.0, %v3418_v0  ;;  %v3450_v24 = vadd.f32 0.014752088, %v3449_v1  ;;  %v3481_v51 = vadd.f32 0.05243302, %v3480_v33  ;;  %v9406_v19 = vpop.f32.mrf.mxu1  ;;  %vm3424_vm13 = vmor %vm3422_vm12, %vm3423_vm11  ;;  %v3979_v33 = vpop.xlane.xlu2 %3978 }
 0x521   :  { %v3390_v18 = vsel %vm3387_vm10, %v3389_v9, %v3385_v47  ;;  %v3442_v47 = vmul.f32 %v3441_v32, %v9307_v42  ;;  %v3488_v53 = vadd.f32 0.001143296, %v3487_v41  ;;  %v3429_v50 = vor.u32 1.1754944e-38, %v3428_v28 }
 0x522   :  { %v3391_v62 = vmul.f32 %v3390_v18, %v3366_v8  ;;  %v3420_v54 = vmul.f32 %v5160_v5, %v3419_v39  ;;  %v3451_v45 = vmul.f32 %v3450_v24, %v9307_v42  ;;  %v3719_v9 = vunpack.c.2.s8 %v9225_v7 }
 0x523   :  { %vm3427_vm14 = vcmp.eq.f32.partialorder %v3426_v63, 8.507059e+37  ;;  %v3489_v39 = vmul.f32 %v3488_v53, %v9321_v46  ;;  %v3482_v32 = vmul.f32 %v3481_v51, %v9321_v46  ;;  %v3782_v10 = vcvt.s32.f32 %v3718_v57 }
 0x524   :  { %v4922_v6 = vclamps-f32 %v3391_v62, 1.0  ;;  %v3421_v0 = vadd.f32 %v5160_v5, %v3420_v54  ;;  %v3452_v8 = vadd.f32 0.112945676, %v3451_v45  ;;  %5161 = vpow2.f32 %v4154_v31  ;;  %v3985_v54 = vpop.xlane.xlu0 %3984 }
 0x525   :  { %v4052_v58 = vsub.f32 %v8777_v30, %v3979_v33  ;;  %v3490_v28 = vadd.f32 0.014752088, %v3489_v39  ;;  %v3783_v41 = vcvt.s32.f32 %v3719_v9  ;;  %v4053_v45 = vsub.f32 %v8779_v2, %v3979_v33 }
 0x526   :  { %v3425_v1 = vsel %vm3424_vm13, %v5160_v5, %v3421_v0  ;;  %v3574_v18 = vadd.f32 1.0, %v4922_v6  ;;  %v3453_v24 = vmul.f32 %v3452_v8, %v9307_v42  ;;  %v4236_v5 = vunpack.c.h.bf16 %v10324_v35 }
 0x527   :  { %v3430_v62 = vsel %vm3427_vm14, %v3429_v50, %v3425_v1  ;;  %v3443_v6 = vadd.f32 0.18741608, %v3442_v47  ;;  %v3491_v57 = vmul.f32 %v3490_v28, %v9321_v46  ;;  %v3483_v53 = vadd.f32 0.18741608, %v3482_v32  ;;  %v3982_v50 = vpop.xlane.xlu1 %3981 }
 0x528   :  { %v3431_v52 = vmul.f32 %v3430_v62, %v3406_v43  ;;  %v3454_v63 = vadd.f32 0.4994258, %v3453_v24  ;;  %v3638_v51 = vmul.f32 %v3574_v18, %v9383_v29  ;;  %vm3846_vm15 = vcmp.gt.f32.partialorder %v3782_v10, 0.0  ;;  %v9429_v32 = vpop.f32.mrf.mxu1 }
 0x529   :  { %v4237_v31 = vunpack.c.h.bf16 %v10325_v49  ;;  %v4056_v43 = vsub.f32 %v8651_v17, %v3985_v54  ;;  %v4158_v2 = vmul.f32 1.442695, %v4052_v58  ;;  %v3492_v33 = vadd.f32 0.112945676, %v3491_v57 }
 0x52a   :  { %v4923_v0 = vclamps-f32 %v3431_v52, 1.0  ;;  %v3455_v30 = vmul.f32 %v3454_v63, %v9307_v42  ;;  %v4057_v35 = vsub.f32 %v8653_v20, %v3985_v54  ;;  %vm3847_vm1 = vcmp.gt.f32.partialorder %v3783_v41, 0.0  ;;  %v5162_v29 = vpop.eup %5161 }
 0x52b   :  { %v4160_v47 = vmul.f32 1.442695, %v4053_v45  ;;  %v3444_v1 = vmul.f32 %v3443_v6, %v9307_v42  ;;  %v9425_v49 = vsel %vm3846_vm15, %v3638_v51, -1e+30  ;;  %v3493_v39 = vmul.f32 %v3492_v33, %v9321_v46 }
 0x52c   :  { %v3575_v9 = vadd.f32 1.0, %v4923_v0  ;;  %v9421_v8 = vadd.f32 1.0, %v3455_v30  ;;  %v3484_v17 = vmul.f32 %v3483_v53, %v9321_v46  ;;  %v4054_v62 = vsub.f32 %v8689_v12, %v3982_v50  ;;  %v10385_v30 = vld [vmem:[#allocation64_spill] sm:$0xff] }
 0x52d   :  { %v4055_v20 = vsub.f32 %v8691_v25, %v3982_v50  ;;  %v4166_v10 = vmul.f32 1.442695, %v4056_v43  ;;  %v3494_v42 = vadd.f32 0.4994258, %v3493_v39  ;;  %v4168_v52 = vmul.f32 1.442695, %v4057_v35  ;;  %v3991_v25 = vpop.xlane.xlu0 %3990 }
 0x52e   :  { %v3639_v18 = vmul.f32 %v3575_v9, %v9386_v60  ;;  %5163 = vrcp.f32 %v9421_v8  ;;  %v9438_v60 = vmul.f32 %v9367_v11, %v9374_v37  ;;  %v3445_v28 = vadd.f32 1.1283791, %v3444_v1 }
 0x52f   :  { %5165 = vpow2.f32 %v4158_v2  ;;  %v3495_v12 = vmul.f32 %v3494_v42, %v9321_v46  ;;  %v4242_v54 = vunpack.c.l.bf16 %v8488_v38  ;;  %v4243_v41 = vunpack.c.l.bf16 %v8490_v26  ;;  %v4300_v46 = vpop.xlane.xlu2 %4299  ;;  %v10386_v2 = vld [vmem:[#allocation77_spill] sm:$0xff]  ;;  %v3988_v42 = vpop.xlane.xlu1 %3987 }
 0x530   :  { %v9434_v24 = vsel %vm3847_vm1, %v3639_v18, -1e+30  ;;  %5167 = vpow2.f32 %v4160_v47  ;;  %v3485_v45 = vadd.f32 1.1283791, %v3484_v17  ;;  %v9447_v63 = vadd.f32 %v9068_v21, %v9070_v13  ;;  %v9466_v39 = vpop.f32.mrf.mxu1 }
 0x531   :  { %v4004_v58 = vmax.f32 %v9425_v49, %v9434_v24  ;;  %5169 = vpow2.f32 %v9396_v16  ;;  %v4162_v37 = vmul.f32 1.442695, %v4054_v62  ;;  %v4164_v6 = vmul.f32 1.442695, %v4055_v20 }
 0x532   :  { %5171 = vpow2.f32 %v4166_v10  ;;  %v4301_v0 = vadd.f32 %v4237_v31, %v4236_v5  ;;  %v9450_v51 = vadd.f32 1.0, %v3495_v12  ;;  %v4060_v53 = vsub.f32 %v8846_v4, %v3991_v25  ;;  %v10387_v4 = vld [vmem:[#allocation28_spill] sm:$0xff]  ;;  %v10388_v12 = vld [vmem:[#allocation59_spill] sm:$0xff] }
 0x533   :  { %4005 = vmax.xlane.f32.xlu1 %v4004_v58  ;;  %5173 = vpow2.f32 %v4168_v52  ;;  %v4061_v43 = vsub.f32 %v10385_v30, %v3991_v25  ;;  %v4394_v50 = vmax.f32 %v4300_v46, 1e-30  ;;  %v3446_v21 = vmul.f32 %v3445_v28, %v9280_v55 }
 0x534   :  { %v5164_v57 = vpop.eup %5163  ;;  %5175 = vrcp.f32 %v9450_v51  ;;  %v9457_v16 = vadd.f32 %v4243_v41, %v4242_v54  ;;  %v9460_v31 = vmul.f32 %v3485_v45, %v9297_v34  ;;  %v4248_v33 = vunpack.c.h.bf16 %v10386_v2  ;;  %v10389_v54 = vld [vmem:[#allocation34_spill] sm:$0xff] }
 0x535   :  { %v5166_v9 = vpop.eup %5165  ;;  %v3458_v13 = vmul.f32 %v5164_v57, %v9421_v8  ;;  %5177 = vpow2.f32 %v4162_v37  ;;  %v3468_v1 = vand.u32 2147483648, %v9421_v8  ;;  %v3720_v55 = vunpack.c.3.s8 %v9215_v14 }
 0x536   :  { %v5168_v5 = vpop.eup %5167  ;;  %5179 = vpow2.f32 %v4164_v6  ;;  %v3466_v17 = vand.u32 2147483647, %v9421_v8  ;;  %v4174_v62 = vmul.f32 1.442695, %v4060_v53  ;;  %v4176_v20 = vmul.f32 1.442695, %v4061_v43 }
 0x537   :  { %v3459_v47 = vsub.f32 1.0, %v3458_v13  ;;  %v5170_v18 = vpop.eup %5169  ;;  %5181 = vrcp.f32 %v4394_v50  ;;  %vm3463_vm2 = vweird.f32 %v5164_v57  ;;  %v9471_v52 = vpack.c.bf16 %v5166_v9, %v5162_v29  ;;  %v9495_v9 = vpop.f32.mrf.mxu0 }
 0x538   :  { %v9469_v34 = vpop.eup %5171  ;;  %v9473_v58 = vpack.c.bf16 %v5168_v5, %v5170_v18  ;;  %vm3462_vm3 = vweird.f32 %v9421_v8  ;;  %v3721_v14 = vunpack.c.3.s8 %v9225_v7  ;;  %v4058_v25 = vsub.f32 %v10388_v12, %v3988_v42  ;;  %v9497_v13 = vpop.f32.mrf.mxu3 }
 0x539   :  { %v3460_v10 = vmul.f32 %v5164_v57, %v3459_v47  ;;  %v9475_v28 = vpop.eup %5173  ;;  %v4059_v41 = vsub.f32 %v10389_v54, %v3988_v42  ;;  %v3469_v6 = vor.u32 1.1754944e-38, %v3468_v1  ;;  %v3506_v29 = vand.u32 2147483647, %v9450_v51  ;;  %4500 = vmatmul.bf16.gmra.mxu3 %v9471_v52  ;;  %vm3464_vm4 = vmor %vm3462_vm3, %vm3463_vm2 }
 0x53a   :  { %v9481_v45 = vpop.eup %5175  ;;  %v9484_v46 = vcvt.s32.f32 %v3720_v55  ;;  %4589 = vmatmul.bf16.gmra.mxu1 %v9473_v58  ;;  %5183 = vpow2.f32 %v4174_v62  ;;  %v4170_v30 = vmul.f32 1.442695, %v4058_v25  ;;  %vm3467_vm5 = vcmp.eq.f32.partialorder %v3466_v17, 8.507059e+37  ;;  %v3994_v25 = vpop.xlane.xlu1 %3993 }
 0x53b   :  { %4302 = vadd.xlane.f32.xlu1 %v4301_v0  ;;  %v3461_v37 = vadd.f32 %v5164_v57, %v3460_v10  ;;  %v4309_v0 = vpop.xlane.xlu2 %4308  ;;  %v9488_v8 = vpop.eup %5177  ;;  %v3498_v53 = vmul.f32 %v9481_v45, %v9450_v51  ;;  %v4172_v43 = vmul.f32 1.442695, %v4059_v41  ;;  %5185 = vpow2.f32 %v4176_v20 }
 0x53c   :  { %v9493_v50 = vpop.eup %5179  ;;  %v4397_v47 = vmax.f32 %v4309_v0, 1e-30  ;;  %vm3502_vm0 = vweird.f32 %v9450_v51  ;;  %5187 = vpow2.f32 %v4170_v30  ;;  %v3508_v62 = vand.u32 2147483648, %v9450_v51  ;;  %v3997_v41 = vpop.xlane.xlu0 %3996 }
 0x53d   :  { %v3465_v5 = vsel %vm3464_vm4, %v5164_v57, %v3461_v37  ;;  %v5182_v1 = vpop.eup %5181  ;;  %v3499_v18 = vsub.f32 1.0, %v3498_v53  ;;  %5189 = vpow2.f32 %v4172_v43  ;;  %vm3503_vm6 = vweird.f32 %v9481_v45  ;;  %v9511_v37 = vpop.f32.mrf.mxu1  ;;  %v10393_v53 = vld [vmem:[#allocation30_spill] sm:$0xff] }
 0x53e   :  { %v3470_v55 = vsel %vm3467_vm5, %v3469_v6, %v3465_v5  ;;  %v4652_v42 = vmul.f32 %v5182_v1, %v9447_v63  ;;  %vm9504_vm7 = vcmp.eq.f32.partialorder %v3506_v29, 8.507059e+37  ;;  %5191 = vrcp.f32 %v4397_v47  ;;  %v10392_v29 = vld [vmem:[#allocation47_spill] sm:$0xff]  ;;  %v10394_v43 = vld [vmem:[#allocation46_spill] sm:$0xff]  ;;  %vm9522_vm8 = vmor %vm3502_vm0, %vm3503_vm6 }
 0x53f   :  { %v3471_v10 = vmul.f32 %v3470_v55, %v3446_v21  ;;  %v3500_v12 = vmul.f32 %v9481_v45, %v3499_v18  ;;  %v4276_v21 = vunpack.c.h.bf16 %v9471_v52  ;;  %v4277_v54 = vunpack.c.h.bf16 %v9473_v58 }
 0x540   :  { %v4684_v20 = vadd.f32 %v4652_v42, %v9370_v27  ;;  %v5184_v63 = vpop.eup %5183  ;;  %v4062_v0 = vsub.f32 %v10392_v29, %v3994_v25  ;;  %v4063_v30 = vsub.f32 %v10393_v53, %v3994_v25  ;;  %v4064_v5 = vsub.f32 %v10394_v43, %v3997_v41 }
 0x541   :  { %v4924_v17 = vclamps-f32 %v3471_v10, 1.0  ;;  %v3501_v6 = vadd.f32 %v9481_v45, %v3500_v12  ;;  %v5186_v27 = vpop.eup %5185  ;;  %v3509_v1 = vor.u32 1.1754944e-38, %v3508_v62  ;;  %v4361_v18 = vadd.f32 %v4277_v54, %v4276_v21 }
 0x542   :  { %4716 = vst [vmem:[#allocation3] sm:$0xff] %v4684_v20  ;;  %v5188_v12 = vpop.eup %5187  ;;  %v4178_v29 = vmul.f32 1.442695, %v4062_v0  ;;  %v4180_v53 = vmul.f32 1.442695, %v4063_v30  ;;  %v888_v35 = vmul.f32 0.5, %v9254_v56  ;;  %v4548_v62 = vadd.f32 %v9231_v22, %v9228_v15  ;;  %v4466_v0 = vpop.f32.mrf.mxu3 }
 0x543   :  { %4311 = vadd.xlane.f32.xlu1 %v9457_v16  ;;  %v3576_v55 = vadd.f32 1.0, %v4924_v17  ;;  %v10397_v16 = vld [vmem:[#allocation72_spill] sm:$0xff]  ;;  %v4318_v42 = vpop.xlane.xlu2 %4317  ;;  %v3505_v25 = vsel %vm9522_vm8, %v9481_v45, %v3501_v6  ;;  %v4182_v43 = vmul.f32 1.442695, %v4064_v5  ;;  %v5190_v51 = vpop.eup %5189  ;;  %4362 = vadd.xlane.f32.xlu2 %v4361_v18  ;;  %v889_v54 = vmul.f32 0.5, %v9260_v44 }
 0x544   :  { %v4065_v10 = vsub.f32 %v10397_v16, %v3997_v41  ;;  %v3510_v17 = vsel %vm9504_vm7, %v3509_v1, %v3505_v25  ;;  %v5192_v21 = vpop.eup %5191  ;;  %5193 = vpow2.f32 %v4178_v29  ;;  %v4400_v45 = vmax.f32 %v4318_v42, 1e-30  ;;  %v4555_v6 = vpop.f32.mrf.mxu0  ;;  %v10400_v1 = vld [vmem:[#allocation16_spill] sm:$0xff] }
 0x545   :  { %v3511_v41 = vmul.f32 %v3510_v17, %v9460_v31  ;;  %v3785_v56 = vcvt.s32.f32 %v3721_v14  ;;  %v10398_v15 = vunpack.c.h.bf16 %v10387_v4  ;;  %v4655_v57 = vmul.f32 %v5192_v21, %v4548_v62  ;;  %v9559_v14 = vpop.f32.mrf.mxu1 }
 0x546   :  { %v4184_v20 = vmul.f32 1.442695, %v4065_v10  ;;  %5195 = vpow2.f32 %v4180_v53  ;;  %v3640_v5 = vmul.f32 %v3576_v55, %v888_v35  ;;  %vm3848_vm9 = vcmp.gt.f32.partialorder %v9484_v46, 0.0 }
 0x547   :  { %v4319_v22 = vadd.f32 %v10398_v15, %v4248_v33  ;;  %v4925_v30 = vclamps-f32 %v3511_v41, 1.0  ;;  %5197 = vpow2.f32 %v4182_v43  ;;  %v4687_v44 = vadd.f32 %v4655_v57, %v9438_v60 }
 0x548   :  { %5199 = vpow2.f32 %v4184_v20  ;;  %v9545_v31 = vpack.c.bf16 %v5184_v63, %v5188_v12  ;;  %v9547_v47 = vpack.c.bf16 %v5186_v27, %v5190_v51  ;;  %v9551_v2 = vpack.c.bf16 %v9469_v34, %v9488_v8  ;;  %v10399_v34 = vld [vmem:[#allocation103_spill] sm:$0xff] }
 0x549   :  { %v3577_v7 = vadd.f32 1.0, %v4925_v30  ;;  %5201 = vrcp.f32 %v4400_v45  ;;  %v9555_v33 = vpack.c.bf16 %v9475_v28, %v9493_v50  ;;  %vm3849_vm10 = vcmp.gt.f32.partialorder %v3785_v56, 0.0  ;;  %4719 = vst [vmem:[#allocation3 + $0x18] sm:$0xff] %v4687_v44  ;;  %v10401_v50 = vld [vmem:[#allocation58_spill] sm:$0xff]  ;;  %v10403_v45 = vld [vmem:[#allocation43_spill] sm:$0xff] }
 0x54a   :  { %v4282_v60 = vunpack.c.l.bf16 %v9545_v31  ;;  %v4283_v4 = vunpack.c.l.bf16 %v9547_v47  ;;  %v5194_v35 = vpop.eup %5193  ;;  %v9563_v27 = vsel %vm3848_vm9, %v3640_v5, -1e+30  ;;  %v4254_v8 = vunpack.c.l.bf16 %v10399_v34  ;;  %4505 = vmatmul.bf16.gmra.mxu3 %v9551_v2  ;;  %v9579_v62 = vpop.f32.mrf.mxu3  ;;  %v10405_v30 = vld [vmem:[#allocation14_spill] sm:$0xff] }
 0x54b   :  { %4320 = vadd.xlane.f32.xlu1 %v4319_v22  ;;  %v3641_v63 = vmul.f32 %v3577_v7, %v889_v54  ;;  %v4255_v55 = vunpack.c.l.bf16 %v10400_v1  ;;  %4594 = vmatmul.bf16.gmra.mxu1 %v9555_v33  ;;  %v335_v18 = vadd.f32 %v10401_v50, %v9345_v59  ;;  %v4556_v12 = vadd.f32 %v4555_v6, %v4466_v0  ;;  %v10402_v54 = vld [vmem:[#allocation61_spill] sm:$0xff] }
 0x54c   :  { %v5196_v28 = vpop.eup %5195  ;;  %v4370_v16 = vadd.f32 %v4283_v4, %v4282_v60  ;;  %v9577_v51 = vpop.f32.mrf.mxu0  ;;  %v4238_v41 = vunpack.c.l.bf16 %v10402_v54  ;;  %v4239_v6 = vunpack.c.l.bf16 %v10403_v45  ;;  %v10404_v22 = vld [vmem:[#allocation49_spill] sm:$0xff]  ;;  %v4261_v5 = vunpack.c.h.bf16 %v10405_v30 }
 0x54d   :  { %v5198_v10 = vpop.eup %5197  ;;  %v9572_v42 = vsel %vm3849_vm10, %v3641_v63, -1e+30  ;;  %v4328_v53 = vadd.f32 %v4255_v55, %v4254_v8  ;;  %v533_v43 = vmul.f32 %v9367_v11, %v335_v18  ;;  %v4260_v57 = vunpack.c.h.bf16 %v10404_v22  ;;  %v9591_v7 = vpop.f32.mrf.mxu1 }
 0x54e   :  { %v5200_v46 = vpop.eup %5199  ;;  %v4007_v25 = vmax.f32 %v9563_v27, %v9572_v42  ;;  %4371 = vadd.xlane.f32.xlu2 %v4370_v16  ;;  %v9581_v20 = vpack.c.bf16 %v5198_v10, %v5194_v35  ;;  %v4304_v60 = vadd.f32 %v4239_v6, %v4238_v41  ;;  %v4327_v4 = vpop.xlane.xlu2 %4326  ;;  %v4244_v50 = vunpack.c.h.bf16 %v8488_v38  ;;  %v10406_v10 = vld [vmem:[#allocation82_spill] sm:$0xff]  ;;  %v10408_v6 = vld [vmem:[#allocation99_spill] sm:$0xff] }
 0x54f   :  { %v5202_v29 = vpop.eup %5201  ;;  %v9583_v21 = vpack.c.bf16 %v5200_v46, %v5196_v28  ;;  %v4337_v35 = vadd.f32 %v4261_v5, %v4260_v57  ;;  %v4403_v55 = vmax.f32 %v4327_v4, 1e-30  ;;  %v4245_v18 = vunpack.c.h.bf16 %v8490_v26 }
 0x550   :  { %4008 = vmax.xlane.f32.xlu0 %v4007_v25  ;;  %v4658_v17 = vmul.f32 %v5202_v29, %v4556_v12  ;;  %v4288_v56 = vunpack.c.h.bf16 %v9581_v20  ;;  %v4266_v16 = vunpack.c.l.bf16 %v9270_v36  ;;  %v4267_v46 = vunpack.c.l.bf16 %v10406_v10 }
 0x551   :  { %v4289_v15 = vunpack.c.h.bf16 %v9583_v21  ;;  %5203 = vrcp.f32 %v4403_v55  ;;  %v4313_v12 = vadd.f32 %v4245_v18, %v4244_v50  ;;  %v4274_v26 = vunpack.c.l.bf16 %v9471_v52 }
 0x552   :  { %v4690_v0 = vadd.f32 %v4658_v17, %v533_v43  ;;  %v4471_v8 = vpop.f32.mrf.mxu3  ;;  %v4346_v29 = vadd.f32 %v4267_v46, %v4266_v16  ;;  %v4275_v17 = vunpack.c.l.bf16 %v9473_v58  ;;  %v4280_v41 = vunpack.c.h.bf16 %v9551_v2 }
 0x553   :  { %4329 = vadd.xlane.f32.xlu1 %v4328_v53  ;;  %v4379_v44 = vadd.f32 %v4289_v15, %v4288_v56  ;;  %v10407_v53 = vld [vmem:[#allocation94_spill] sm:$0xff]  ;;  %v4281_v45 = vunpack.c.h.bf16 %v9555_v33  ;;  %v10409_v56 = vld [vmem:[#allocation101_spill] sm:$0xff]  ;;  %v4272_v5 = vunpack.c.h.bf16 %v9272_v3  ;;  %v4273_v52 = vunpack.c.h.bf16 %v9266_v61 }
 0x554   :  { %4722 = vst [vmem:[#allocation3 + $0x30] sm:$0xff] %v4690_v0  ;;  %v4560_v63 = vpop.f32.mrf.mxu0  ;;  %v344_v43 = vadd.f32 %v10407_v53, %v9345_v59  ;;  %v4250_v0 = vunpack.c.l.bf16 %v10408_v6  ;;  %v4251_v15 = vunpack.c.l.bf16 %v10409_v56  ;;  %v9611_v57 = vadd.f32 %v4275_v17, %v4274_v26  ;;  %v10410_v17 = vld [vmem:[#allocation21_spill] sm:$0xff] }
 0x555   :  { %v9593_v28 = vadd.f32 %v4560_v63, %v4471_v8  ;;  %v9601_v25 = vpop.f32.mrf.mxu1  ;;  %v4355_v63 = vadd.f32 %v4273_v52, %v4272_v5  ;;  %v4256_v18 = vunpack.c.h.bf16 %v10399_v34  ;;  %v4257_v3 = vunpack.c.h.bf16 %v10400_v1 }
 0x556   :  { %4380 = vadd.xlane.f32.xlu2 %v4379_v44  ;;  %v9615_v44 = vadd.f32 %v4281_v45, %v4280_v41  ;;  %v536_v58 = vmul.f32 %v9367_v11, %v344_v43  ;;  %v4322_v4 = vadd.f32 %v4251_v15, %v4250_v0  ;;  %v4278_v16 = vunpack.c.l.bf16 %v9551_v2 }
 0x557   :  { %v5204_v30 = vpop.eup %5203  ;;  %v4279_v46 = vunpack.c.l.bf16 %v9555_v33  ;;  %v4287_v34 = vunpack.c.l.bf16 %v9583_v21  ;;  %v4262_v2 = vunpack.c.l.bf16 %v10410_v17  ;;  %v4284_v0 = vunpack.c.h.bf16 %v9545_v31 }
 0x558   :  { %4305 = vadd.xlane.f32.xlu0 %v4304_v60  ;;  %v4285_v56 = vunpack.c.h.bf16 %v9547_v47  ;;  %v4268_v5 = vunpack.c.h.bf16 %v9270_v36  ;;  %v4269_v52 = vunpack.c.h.bf16 %v10406_v10 }
 0x559   :  { %v4364_v53 = vadd.f32 %v4279_v46, %v4278_v16 }
 0x55a   :  { %4510 = vmatmul.bf16.gmra.mxu3 %v9545_v31  ;;  %v4473_v54 = vpop.f32.mrf.mxu3  ;;  %v4373_v15 = vadd.f32 %v4285_v56, %v4284_v0 }
 0x55b   :  { %4338 = vadd.xlane.f32.xlu1 %v4337_v35  ;;  %4599 = vmatmul.bf16.gmra.mxu1 %v9547_v47 }
 0x55c   :  { %v4562_v38 = vpop.f32.mrf.mxu0 }
 0x55d   :  { %v4563_v22 = vadd.f32 %v4562_v38, %v4473_v54  ;;  %v9618_v55 = vpop.f32.mrf.mxu1  ;;  %v4286_v38 = vunpack.c.l.bf16 %v9581_v20  ;;  %v10411_v54 = vld [vmem:[#allocation50_spill] sm:$0xff] }
 0x55e   :  { %v4263_v33 = vunpack.c.l.bf16 %v10411_v54 }
 0x55f   :  { %v4661_v60 = vmul.f32 %v5204_v30, %v4563_v22  ;;  %v4376_v45 = vadd.f32 %v4287_v34, %v4286_v38  ;;  %v10413_v38 = vld [vmem:[#allocation73_spill] sm:$0xff] }
 0x560   :  { %4314 = vadd.xlane.f32.xlu0 %v4313_v12  ;;  %v4331_v12 = vadd.f32 %v4257_v3, %v4256_v18 }
 0x561   :  { %v4693_v35 = vadd.f32 %v4661_v60, %v536_v58 }
 0x562   :  { %v4476_v50 = vpop.f32.mrf.mxu3 }
 0x563   :  { %4347 = vadd.xlane.f32.xlu1 %v4346_v29  ;;  %4725 = vst [vmem:[#allocation3 + $0x48] sm:$0xff] %v4693_v35  ;;  %v4336_v29 = vpop.xlane.xlu2 %4335  ;;  %v4349_v35 = vadd.f32 %v4269_v52, %v4268_v5 }
 0x564   :  { %v4565_v8 = vpop.f32.mrf.mxu0  ;;  %v4406_v1 = vmax.f32 %v4336_v29, 1e-30 }
 0x565   :  { %v9622_v61 = vadd.f32 %v4565_v8, %v4476_v50  ;;  %v9634_v6 = vpop.f32.mrf.mxu1 }
 0x566   :  { %5205 = vrcp.f32 %v4406_v1 }
 0x568   :  { %4323 = vadd.xlane.f32.xlu0 %v4322_v4 }
 0x56a   :  { %4515 = vmatmul.bf16.gmra.mxu3 %v9581_v20  ;;  %v4478_v26 = vpop.f32.mrf.mxu3  ;;  %v4340_v20 = vadd.f32 %v4263_v33, %v4262_v2 }
 0x56b   :  { %4356 = vadd.xlane.f32.xlu1 %v4355_v63  ;;  %4604 = vmatmul.bf16.gmra.mxu1 %v9583_v21  ;;  %v353_v21 = vadd.f32 %v9317_v40, %v9345_v59  ;;  %v4345_v50 = vpop.xlane.xlu2 %4344 }
 0x56c   :  { %v4567_v43 = vpop.f32.mrf.mxu0  ;;  %v5206_v60 = vpop.eup %5205  ;;  %v4409_v3 = vmax.f32 %v4345_v50, 1e-30 }
 0x56d   :  { %v9632_v41 = vadd.f32 %v4567_v43, %v4478_v26  ;;  %v539_v31 = vmul.f32 %v9367_v11, %v353_v21  ;;  %v9643_v47 = vpop.f32.mrf.mxu1 }
 0x56e   :  { %5207 = vrcp.f32 %v4409_v3 }
 0x570   :  { %4332 = vadd.xlane.f32.xlu0 %v4331_v12 }
 0x572   :  { %v4481_v30 = vpop.f32.mrf.mxu3 }
 0x573   :  { %4365 = vadd.xlane.f32.xlu1 %v4364_v53  ;;  %v4003_v40 = vpop.xlane.xlu0 %4002  ;;  %v10412_v53 = vld [vmem:[#allocation114_spill] sm:$0xff] }
 0x574   :  { %v4570_v22 = vpop.f32.mrf.mxu0  ;;  %v4068_v18 = vsub.f32 %v9263_v48, %v4003_v40  ;;  %v4069_v36 = vsub.f32 %v9282_v23, %v4003_v40  ;;  %v362_v23 = vadd.f32 %v9406_v19, %v9345_v59 }
 0x575   :  { %v4571_v58 = vadd.f32 %v4570_v22, %v4481_v30  ;;  %v4575_v10 = vpop.f32.mrf.mxu1 }
 0x576   :  { %v4190_v16 = vmul.f32 1.442695, %v4068_v18  ;;  %v4192_v46 = vmul.f32 1.442695, %v4069_v36 }
 0x577   :  { %v4664_v4 = vmul.f32 %v5206_v60, %v4571_v58 }
 0x578   :  { %4341 = vadd.xlane.f32.xlu0 %v4340_v20  ;;  %5209 = vpow2.f32 %v4190_v16  ;;  %v542_v20 = vmul.f32 %v9367_v11, %v362_v23 }
 0x579   :  { %v4696_v63 = vadd.f32 %v4664_v4, %v539_v31  ;;  %5211 = vpow2.f32 %v4192_v46  ;;  %v10414_v46 = vld [vmem:[#allocation29_spill] sm:$0xff] }
 0x57a   :  { %v9645_v8 = vpop.f32.mrf.mxu3 }
 0x57b   :  { %4374 = vadd.xlane.f32.xlu1 %v4373_v15  ;;  %4728 = vst [vmem:[#allocation3 + $0x60] sm:$0xff] %v4696_v63 }
 0x57d   :  { %v4577_v17 = vpop.f32.mrf.mxu1 }
 0x580   :  { %4350 = vadd.xlane.f32.xlu0 %v4349_v35 }
 0x582   :  { %v4486_v29 = vpop.f32.mrf.mxu3 }
 0x583   :  { %v9652_v1 = vadd.f32 %v4575_v10, %v4486_v29  ;;  %v4354_v10 = vpop.xlane.xlu2 %4353  ;;  %v10415_v29 = vld [vmem:[#allocation33_spill] sm:$0xff] }
 0x584   :  { %v4412_v16 = vmax.f32 %v4354_v10, 1e-30 }
 0x585   :  { %v9658_v4 = vpop.f32.mrf.mxu1 }
 0x588   :  { %4359 = vadd.xlane.f32.xlu0 %v9611_v57  ;;  %v5208_v57 = vpop.eup %5207 }
 0x589   :  { %v5210_v54 = vpop.eup %5209 }
 0x58a   :  { %v4488_v2 = vpop.f32.mrf.mxu3  ;;  %v5212_v0 = vpop.eup %5211 }
 0x58b   :  { %v4578_v33 = vadd.f32 %v4577_v17, %v4488_v2 }
 0x58d   :  { %v4667_v15 = vmul.f32 %v5208_v57, %v4578_v33  ;;  %v4582_v40 = vpop.f32.mrf.mxu1  ;;  %v371_v57 = vadd.f32 %v9511_v37, %v9345_v59 }
 0x58e   :  { %v4000_v12 = vpop.xlane.xlu1 %3999 }
 0x58f   :  { %v4066_v43 = vsub.f32 %v10412_v53, %v4000_v12  ;;  %v4067_v34 = vsub.f32 %v10413_v38, %v4000_v12  ;;  %v4699_v30 = vadd.f32 %v4667_v15, %v542_v20  ;;  %v320_v12 = vadd.f32 %v10414_v46, %v9345_v59  ;;  %v10416_v53 = vld [vmem:[#allocation76_spill] sm:$0xff] }
 0x590   :  { %4368 = vadd.xlane.f32.xlu0 %v9615_v44  ;;  %v545_v15 = vmul.f32 %v9367_v11, %v371_v57 }
 0x591   :  { %v4186_v26 = vmul.f32 1.442695, %v4066_v43  ;;  %v4188_v48 = vmul.f32 1.442695, %v4067_v34  ;;  %4731 = vst [vmem:[#allocation3 + $0x78] sm:$0xff] %v4699_v30  ;;  %v4543_v43 = vadd.f32 %v10416_v53, %v10415_v29 }
 0x592   :  { %v9660_v35 = vpop.f32.mrf.mxu3 }
 0x593   :  { %5213 = vpow2.f32 %v4186_v26 }
 0x594   :  { %5215 = vpow2.f32 %v4188_v48  ;;  %v528_v48 = vmul.f32 %v9367_v11, %v320_v12 }
 0x595   :  { %v4585_v3 = vpop.f32.mrf.mxu1 }
 0x598   :  { %4377 = vadd.xlane.f32.xlu0 %v4376_v45 }
 0x599   :  { %v5214_v56 = vpop.eup %5213 }
 0x59a   :  { %v5216_v21 = vpop.eup %5215  ;;  %v4230_v22 = vpack.c.bf16 %v5210_v54, %v5214_v56  ;;  %v4493_v50 = vpop.f32.mrf.mxu3  ;;  %v10417_v54 = vld [vmem:[#allocation32_spill] sm:$0xff] }
 0x59b   :  { %v4231_v5 = vpack.c.bf16 %v5212_v0, %v5216_v21  ;;  %v9662_v18 = vadd.f32 %v4582_v40, %v4493_v50  ;;  %v329_v33 = vadd.f32 %v10417_v54, %v9345_v59  ;;  %v10419_v40 = vld [vmem:[#allocation45_spill] sm:$0xff] }
 0x59c   :  { %4520 = vmatmul.bf16.gmra.mxu3 %v4230_v22  ;;  %v4290_v52 = vunpack.c.l.bf16 %v4230_v22  ;;  %v4292_v19 = vunpack.c.h.bf16 %v4230_v22  ;;  %v338_v50 = vadd.f32 %v10419_v40, %v9345_v59 }
 0x59d   :  { %4609 = vmatmul.bf16.gmra.mxu1 %v4231_v5  ;;  %v4293_v44 = vunpack.c.h.bf16 %v4231_v5  ;;  %v4291_v58 = vunpack.c.l.bf16 %v4231_v5  ;;  %v9673_v0 = vpop.f32.mrf.mxu1  ;;  %v531_v37 = vmul.f32 %v9367_v11, %v329_v33 }
 0x59e   :  { %v534_v29 = vmul.f32 %v9367_v11, %v338_v50  ;;  %v10422_v50 = vld [vmem:[#allocation75_spill] sm:$0xff] }
 0x59f   :  { %v4382_v60 = vadd.f32 %v4291_v58, %v4290_v52  ;;  %v4385_v31 = vadd.f32 %v4293_v44, %v4292_v19  ;;  %v10418_v44 = vld [vmem:[#allocation51_spill] sm:$0xff] }
 0x5a1   :  { %4383 = vadd.xlane.f32.xlu1 %v4382_v60  ;;  %4386 = vadd.xlane.f32.xlu0 %v4385_v31 }
 0x5a2   :  { %v4496_v2 = vpop.f32.mrf.mxu3 }
 0x5a3   :  { %v4586_v56 = vadd.f32 %v4585_v3, %v4496_v2 }
 0x5a6   :  { %v4006_v63 = vpop.xlane.xlu1 %4005 }
 0x5a7   :  { %v4070_v5 = vsub.f32 %v9425_v49, %v4006_v63  ;;  %v4071_v19 = vsub.f32 %v9434_v24, %v4006_v63  ;;  %v4558_v24 = vadd.f32 %v9577_v51, %v9579_v62 }
 0x5a9   :  { %v4196_v10 = vmul.f32 1.442695, %v4071_v19 }
 0x5ae   :  { %v4303_v36 = vpop.xlane.xlu1 %4302 }
 0x5af   :  { %v4395_v45 = vmax.f32 %v4303_v36, 1e-30  ;;  %v4194_v36 = vmul.f32 1.442695, %v4070_v5  ;;  %v10421_v5 = vld [vmem:[#allocation67_spill] sm:$0xff] }
 0x5b1   :  { %5217 = vrcp.f32 %v4395_v45  ;;  %v9682_v45 = vpop.f32.mrf.mxu3 }
 0x5b2   :  { %5219 = vrcp.f32 %v4412_v16 }
 0x5b6   :  { %v4312_v38 = vpop.xlane.xlu1 %4311 }
 0x5b7   :  { %v5218_v34 = vpop.eup %5217  ;;  %v4398_v26 = vmax.f32 %v4312_v38, 1e-30  ;;  %v9684_v49 = vpop.f32.mrf.mxu1 }
 0x5b8   :  { %v4653_v23 = vmul.f32 %v5218_v34, %v4543_v43  ;;  %v5220_v20 = vpop.eup %5219 }
 0x5b9   :  { %5221 = vrcp.f32 %v4398_v26  ;;  %v4670_v21 = vmul.f32 %v5220_v20, %v4586_v56  ;;  %v4363_v26 = vpop.xlane.xlu2 %4362 }
 0x5ba   :  { %v4685_v17 = vadd.f32 %v4653_v23, %v528_v48  ;;  %v4415_v51 = vmax.f32 %v4363_v26, 1e-30 }
 0x5bb   :  { %v4702_v60 = vadd.f32 %v4670_v21, %v545_v15 }
 0x5bc   :  { %4717 = vst [vmem:[#allocation3 + $0x8] sm:$0xff] %v4685_v17  ;;  %v9691_v62 = vpop.f32.mrf.mxu3 }
 0x5bd   :  { %4734 = vst [vmem:[#allocation3 + $0x90] sm:$0xff] %v4702_v60 }
 0x5be   :  { %v4321_v22 = vpop.xlane.xlu1 %4320 }
 0x5bf   :  { %v5222_v30 = vpop.eup %5221  ;;  %v4401_v52 = vmax.f32 %v4321_v22, 1e-30  ;;  %v4592_v23 = vpop.f32.mrf.mxu1 }
 0x5c0   :  { %v4656_v58 = vmul.f32 %v5222_v30, %v10418_v44 }
 0x5c1   :  { %5223 = vrcp.f32 %v4401_v52  ;;  %v323_v52 = vadd.f32 %v10421_v5, %v9345_v59 }
 0x5c2   :  { %v4688_v31 = vadd.f32 %v4656_v58, %v531_v37  ;;  %5225 = vpow2.f32 %v4194_v36  ;;  %v380_v58 = vadd.f32 %v9601_v25, %v9345_v59  ;;  %v356_v36 = vadd.f32 %v10422_v50, %v9345_v59 }
 0x5c3   :  { %v4009_v3 = vpop.xlane.xlu0 %4008  ;;  %5227 = vpow2.f32 %v4196_v10 }
 0x5c4   :  { %4720 = vst [vmem:[#allocation3 + $0x20] sm:$0xff] %v4688_v31  ;;  %v4072_v63 = vsub.f32 %v9563_v27, %v4009_v3  ;;  %v4073_v16 = vsub.f32 %v9572_v42, %v4009_v3  ;;  %v10420_v27 = vld [vmem:[#allocation84_spill] sm:$0xff]  ;;  %v4503_v40 = vpop.f32.mrf.mxu3 }
 0x5c5   :  { %v347_v42 = vadd.f32 %v10420_v27, %v9345_v59  ;;  %v4593_v3 = vadd.f32 %v4592_v23, %v4503_v40  ;;  %v4372_v40 = vpop.xlane.xlu2 %4371 }
 0x5c6   :  { %v4330_v46 = vpop.xlane.xlu1 %4329  ;;  %v4198_v43 = vmul.f32 1.442695, %v4072_v63  ;;  %v4200_v38 = vmul.f32 1.442695, %v4073_v16  ;;  %v529_v16 = vmul.f32 %v9367_v11, %v323_v52  ;;  %v4581_v52 = vadd.f32 %v9658_v4, %v9660_v35 }
 0x5c7   :  { %v5224_v12 = vpop.eup %5223  ;;  %v4404_v53 = vmax.f32 %v4330_v46, 1e-30  ;;  %v537_v21 = vmul.f32 %v9367_v11, %v347_v42  ;;  %v4572_v46 = vpop.f32.mrf.mxu0  ;;  %v4418_v4 = vmax.f32 %v4372_v40, 1e-30 }
 0x5c8   :  { %v4659_v34 = vmul.f32 %v5224_v12, %v4558_v24  ;;  %v5226_v57 = vpop.eup %5225  ;;  %v9703_v24 = vpop.f32.mrf.mxu1 }
 0x5c9   :  { %5229 = vrcp.f32 %v4404_v53  ;;  %v5228_v2 = vpop.eup %5227 }
 0x5ca   :  { %5231 = vpow2.f32 %v4198_v43  ;;  %v4691_v48 = vadd.f32 %v4659_v34, %v534_v29  ;;  %v4573_v29 = vadd.f32 %v4572_v46, %v9645_v8  ;;  %v4588_v46 = vadd.f32 %v9673_v0, %v9682_v45  ;;  %v10426_v0 = vld [vmem:[#allocation105_spill] sm:$0xff] }
 0x5cb   :  { %5233 = vpow2.f32 %v4200_v38  ;;  %v4306_v17 = vpop.xlane.xlu0 %4305  ;;  %v350_v45 = vadd.f32 %v10426_v0, %v9345_v59 }
 0x5cc   :  { %4723 = vst [vmem:[#allocation3 + $0x38] sm:$0xff] %v4691_v48  ;;  %v4396_v54 = vmax.f32 %v4306_v17, 1e-30  ;;  %5235 = vrcp.f32 %v4415_v51  ;;  %v548_v48 = vmul.f32 %v9367_v11, %v380_v58  ;;  %v10423_v51 = vld [vmem:[#allocation31_spill] sm:$0xff] }
 0x5ce   :  { %v4339_v33 = vpop.xlane.xlu1 %4338  ;;  %5237 = vrcp.f32 %v4396_v54 }
 0x5cf   :  { %v5230_v56 = vpop.eup %5229  ;;  %v4407_v20 = vmax.f32 %v4339_v33, 1e-30  ;;  %v10424_v33 = vld [vmem:[#allocation108_spill] sm:$0xff] }
 0x5d0   :  { %v5232_v15 = vpop.eup %5231  ;;  %v4662_v22 = vmul.f32 %v5230_v56, %v9622_v61  ;;  %v332_v56 = vadd.f32 %v10424_v33, %v9345_v59 }
 0x5d1   :  { %v5234_v30 = vpop.eup %5233  ;;  %v4232_v37 = vpack.c.bf16 %v5232_v15, %v5226_v57  ;;  %5239 = vrcp.f32 %v4407_v20  ;;  %v540_v57 = vmul.f32 %v9367_v11, %v356_v36  ;;  %v4506_v20 = vpop.f32.mrf.mxu3  ;;  %v365_v15 = vadd.f32 %v9429_v32, %v9345_v59 }
 0x5d2   :  { %v4233_v19 = vpack.c.bf16 %v5234_v30, %v5228_v2  ;;  %v4694_v44 = vadd.f32 %v4662_v22, %v537_v21  ;;  %v5236_v63 = vpop.eup %5235  ;;  %v9714_v21 = vpop.f32.mrf.mxu1  ;;  %v4553_v22 = vadd.f32 %v9495_v9, %v9497_v13  ;;  %v532_v58 = vmul.f32 %v9367_v11, %v332_v56  ;;  %v10425_v13 = vld [vmem:[#allocation87_spill] sm:$0xff] }
 0x5d3   :  { %4525 = vmatmul.bf16.gmra.mxu3 %v4232_v37  ;;  %v4296_v60 = vunpack.c.h.bf16 %v4232_v37  ;;  %v4294_v31 = vunpack.c.l.bf16 %v4232_v37  ;;  %v4315_v12 = vpop.xlane.xlu0 %4314  ;;  %v4673_v42 = vmul.f32 %v5236_v63, %v4593_v3  ;;  %v543_v32 = vmul.f32 %v9367_v11, %v365_v15 }
 0x5d4   :  { %4614 = vmatmul.bf16.gmra.mxu1 %v4233_v19  ;;  %v4297_v61 = vunpack.c.h.bf16 %v4233_v19  ;;  %v4295_v10 = vunpack.c.l.bf16 %v4233_v19  ;;  %4726 = vst [vmem:[#allocation3 + $0x50] sm:$0xff] %v4694_v44  ;;  %v5238_v25 = vpop.eup %5237  ;;  %v4399_v53 = vmax.f32 %v4315_v12, 1e-30  ;;  %v538_v15 = vmul.f32 %v9367_v11, %v350_v45 }
 0x5d5   :  { %v4654_v27 = vmul.f32 %v5238_v25, %v10423_v51  ;;  %v4705_v54 = vadd.f32 %v4673_v42, %v548_v48  ;;  %v389_v48 = vadd.f32 %v9643_v47, %v9345_v59 }
 0x5d6   :  { %v4391_v43 = vadd.f32 %v4297_v61, %v4296_v60  ;;  %v4388_v38 = vadd.f32 %v4295_v10, %v4294_v31  ;;  %v4348_v34 = vpop.xlane.xlu1 %4347  ;;  %5241 = vrcp.f32 %v4399_v53  ;;  %v341_v61 = vadd.f32 %v10425_v13, %v9345_v59 }
 0x5d7   :  { %v5240_v26 = vpop.eup %5239  ;;  %v4410_v23 = vmax.f32 %v4348_v34, 1e-30  ;;  %v4686_v2 = vadd.f32 %v4654_v27, %v529_v16  ;;  %4737 = vst [vmem:[#allocation3 + $0xa8] sm:$0xff] %v4705_v54  ;;  %v374_v10 = vadd.f32 %v9559_v14, %v9345_v59 }
 0x5d8   :  { %4392 = vadd.xlane.f32.xlu1 %v4391_v43  ;;  %4389 = vadd.xlane.f32.xlu2 %v4388_v38  ;;  %v4665_v17 = vmul.f32 %v5240_v26, %v4573_v29  ;;  %v535_v53 = vmul.f32 %v9367_v11, %v341_v61 }
 0x5d9   :  { %5243 = vrcp.f32 %v4410_v23  ;;  %4718 = vst [vmem:[#allocation3 + $0x10] sm:$0xff] %v4686_v2  ;;  %v9724_v35 = vpop.f32.mrf.mxu3  ;;  %v546_v34 = vmul.f32 %v9367_v11, %v374_v10  ;;  %v551_v2 = vmul.f32 %v9367_v11, %v389_v48 }
 0x5da   :  { %v4697_v8 = vadd.f32 %v4665_v17, %v540_v57  ;;  %v4600_v63 = vpop.f32.mrf.mxu1 }
 0x5db   :  { %v4324_v30 = vpop.xlane.xlu0 %4323 }
 0x5dc   :  { %4729 = vst [vmem:[#allocation3 + $0x68] sm:$0xff] %v4697_v8  ;;  %v5242_v5 = vpop.eup %5241  ;;  %v4402_v37 = vmax.f32 %v4324_v30, 1e-30  ;;  %v4596_v8 = vadd.f32 %v9703_v24, %v4506_v20  ;;  %v10427_v24 = vld [vmem:[#allocation25_spill] sm:$0xff] }
 0x5dd   :  { %v4657_v60 = vmul.f32 %v5242_v5, %v4553_v22  ;;  %v359_v20 = vadd.f32 %v10427_v24, %v9345_v59 }
 0x5de   :  { %v4357_v19 = vpop.xlane.xlu1 %4356  ;;  %5245 = vrcp.f32 %v4402_v37 }
 0x5df   :  { %v5244_v44 = vpop.eup %5243  ;;  %v4413_v31 = vmax.f32 %v4357_v19, 1e-30  ;;  %v4689_v36 = vadd.f32 %v4657_v60, %v532_v58  ;;  %v10428_v60 = vld [vmem:[#allocation6_spill] sm:$0xff] }
 0x5e0   :  { %v4668_v50 = vmul.f32 %v5244_v44, %v4581_v52 }
 0x5e1   :  { %5247 = vrcp.f32 %v4413_v31  ;;  %4721 = vst [vmem:[#allocation3 + $0x28] sm:$0xff] %v4689_v36  ;;  %v4511_v27 = vpop.f32.mrf.mxu3  ;;  %v392_v31 = vadd.f32 %v10428_v60, %v9345_v59 }
 0x5e2   :  { %v4700_v9 = vadd.f32 %v4668_v50, %v543_v32  ;;  %5249 = vrcp.f32 %v4418_v4  ;;  %v4601_v42 = vadd.f32 %v4600_v63, %v4511_v27  ;;  %v4602_v30 = vpop.f32.mrf.mxu1  ;;  %v4381_v4 = vpop.xlane.xlu2 %4380  ;;  %v4591_v27 = vadd.f32 %v9684_v49, %v9691_v62 }
 0x5e3   :  { %v4333_v3 = vpop.xlane.xlu0 %4332  ;;  %v552_v61 = vmul.f32 %v9367_v11, %v392_v31  ;;  %v4598_v49 = vadd.f32 %v9714_v21, %v9724_v35 }
 0x5e4   :  { %4732 = vst [vmem:[#allocation3 + $0x80] sm:$0xff] %v4700_v9  ;;  %v5246_v16 = vpop.eup %5245  ;;  %v4405_v12 = vmax.f32 %v4333_v3, 1e-30  ;;  %v541_v9 = vmul.f32 %v9367_v11, %v359_v20  ;;  %v10431_v20 = vld [vmem:[#allocation9_spill] sm:$0xff] }
 0x5e5   :  { %v4660_v43 = vmul.f32 %v5246_v16, %v9593_v28  ;;  %v383_v28 = vadd.f32 %v9618_v55, %v9345_v59 }
 0x5e6   :  { %v4366_v25 = vpop.xlane.xlu1 %4365  ;;  %5251 = vrcp.f32 %v4405_v12  ;;  %v4421_v12 = vmax.f32 %v4381_v4, 1e-30 }
 0x5e7   :  { %v5248_v29 = vpop.eup %5247  ;;  %v4416_v38 = vmax.f32 %v4366_v25, 1e-30  ;;  %v4692_v26 = vadd.f32 %v4660_v43, %v535_v53  ;;  %v549_v55 = vmul.f32 %v9367_v11, %v383_v28 }
 0x5e8   :  { %v4671_v14 = vmul.f32 %v5248_v29, %v4588_v46  ;;  %v5250_v23 = vpop.eup %5249  ;;  %v368_v46 = vadd.f32 %v9466_v39, %v9345_v59  ;;  %v377_v39 = vadd.f32 %v9591_v7, %v9345_v59 }
 0x5e9   :  { %5253 = vrcp.f32 %v4416_v38  ;;  %4724 = vst [vmem:[#allocation3 + $0x40] sm:$0xff] %v4692_v26  ;;  %v4676_v47 = vmul.f32 %v5250_v23, %v4601_v42  ;;  %v4513_v58 = vpop.f32.mrf.mxu3 }
 0x5ea   :  { %v4703_v51 = vadd.f32 %v4671_v14, %v546_v34  ;;  %v4605_v63 = vpop.f32.mrf.mxu1  ;;  %v10429_v14 = vld [vmem:[#allocation8_spill] sm:$0xff] }
 0x5eb   :  { %v4342_v57 = vpop.xlane.xlu0 %4341  ;;  %v4708_v37 = vadd.f32 %v4676_v47, %v551_v2  ;;  %v398_v26 = vadd.f32 %v10429_v14, %v9345_v59 }
 0x5ec   :  { %4735 = vst [vmem:[#allocation3 + $0x98] sm:$0xff] %v4703_v51  ;;  %v5252_v17 = vpop.eup %5251  ;;  %v4408_v54 = vmax.f32 %v4342_v57, 1e-30 }
 0x5ed   :  { %v4663_v22 = vmul.f32 %v5252_v17, %v9632_v41  ;;  %4740 = vst [vmem:[#allocation3 + $0xc0] sm:$0xff] %v4708_v37  ;;  %v4603_v41 = vadd.f32 %v4602_v30, %v4513_v58  ;;  %v547_v17 = vmul.f32 %v9367_v11, %v377_v39  ;;  %v401_v58 = vadd.f32 %v10431_v20, %v9345_v59 }
 0x5ee   :  { %v4375_v33 = vpop.xlane.xlu1 %4374  ;;  %5255 = vrcp.f32 %v4408_v54 }
 0x5ef   :  { %v5254_v56 = vpop.eup %5253  ;;  %v4419_v5 = vmax.f32 %v4375_v33, 1e-30  ;;  %v4695_v19 = vadd.f32 %v4663_v22, %v538_v15 }
 0x5f0   :  { %v4674_v52 = vmul.f32 %v5254_v56, %v4596_v8  ;;  %v386_v8 = vadd.f32 %v9634_v6, %v9345_v59 }
 0x5f1   :  { %5257 = vrcp.f32 %v4419_v5  ;;  %4727 = vst [vmem:[#allocation3 + $0x58] sm:$0xff] %v4695_v19  ;;  %v4516_v25 = vpop.f32.mrf.mxu3  ;;  %v10430_v5 = vld [vmem:[#allocation7_spill] sm:$0xff] }
 0x5f2   :  { %v4706_v44 = vadd.f32 %v4674_v52, %v549_v55  ;;  %v4607_v48 = vpop.f32.mrf.mxu1  ;;  %v550_v56 = vmul.f32 %v9367_v11, %v386_v8  ;;  %v395_v55 = vadd.f32 %v10430_v5, %v9345_v59  ;;  %v4606_v52 = vadd.f32 %v4605_v63, %v4516_v25 }
 0x5f3   :  { %v4351_v32 = vpop.xlane.xlu0 %4350 }
 0x5f4   :  { %4738 = vst [vmem:[#allocation3 + $0xb0] sm:$0xff] %v4706_v44  ;;  %v5256_v40 = vpop.eup %5255  ;;  %v4411_v50 = vmax.f32 %v4351_v32, 1e-30  ;;  %v553_v19 = vmul.f32 %v9367_v11, %v395_v55 }
 0x5f5   :  { %v4666_v13 = vmul.f32 %v5256_v40, %v9652_v1  ;;  %v544_v1 = vmul.f32 %v9367_v11, %v368_v46  ;;  %v555_v40 = vmul.f32 %v9367_v11, %v401_v58 }
 0x5f6   :  { %5259 = vrcp.f32 %v4411_v50 }
 0x5f7   :  { %v5258_v36 = vpop.eup %5257  ;;  %v4698_v3 = vadd.f32 %v4666_v13, %v541_v9  ;;  %5261 = vrcp.f32 %v4421_v12  ;;  %v10432_v9 = vld [vmem:[#allocation10_spill] sm:$0xff] }
 0x5f8   :  { %v4677_v10 = vmul.f32 %v5258_v36, %v4603_v41  ;;  %v404_v13 = vadd.f32 %v10432_v9, %v9345_v59 }
 0x5f9   :  { %4730 = vst [vmem:[#allocation3 + $0x70] sm:$0xff] %v4698_v3  ;;  %v4518_v51 = vpop.f32.mrf.mxu3 }
 0x5fa   :  { %v4709_v16 = vadd.f32 %v4677_v10, %v552_v61  ;;  %v4608_v0 = vadd.f32 %v4607_v48, %v4518_v51  ;;  %v556_v63 = vmul.f32 %v9367_v11, %v404_v13 }
 0x5fb   :  { %v4360_v29 = vpop.xlane.xlu0 %4359 }
 0x5fc   :  { %4741 = vst [vmem:[#allocation3 + $0xc8] sm:$0xff] %v4709_v16  ;;  %v5260_v53 = vpop.eup %5259  ;;  %v4414_v43 = vmax.f32 %v4360_v29, 1e-30 }
 0x5fd   :  { %v4669_v38 = vmul.f32 %v5260_v53, %v9662_v18  ;;  %v5262_v45 = vpop.eup %5261  ;;  %v554_v18 = vmul.f32 %v9367_v11, %v398_v26 }
 0x5fe   :  { %5263 = vrcp.f32 %v4414_v43  ;;  %v4679_v57 = vmul.f32 %v5262_v45, %v4608_v0  ;;  %v10433_v43 = vld [vmem:[#allocation11_spill] sm:$0xff]  ;;  %v10434_v0 = vld [vmem:[#allocation12_spill] sm:$0xff] }
 0x5ff   :  { %v4701_v34 = vadd.f32 %v4669_v38, %v544_v1  ;;  %v407_v1 = vadd.f32 %v10433_v43, %v9345_v59  ;;  %v410_v45 = vadd.f32 %v10434_v0, %v9345_v59 }
 0x600   :  { %v4711_v54 = vadd.f32 %v4679_v57, %v554_v18 }
 0x601   :  { %4733 = vst [vmem:[#allocation3 + $0x88] sm:$0xff] %v4701_v34  ;;  %v557_v39 = vmul.f32 %v9367_v11, %v407_v1 }
 0x602   :  { %4743 = vst [vmem:[#allocation3 + $0xd8] sm:$0xff] %v4711_v54 }
 0x603   :  { %v4369_v28 = vpop.xlane.xlu0 %4368 }
 0x604   :  { %v5264_v42 = vpop.eup %5263  ;;  %v4417_v23 = vmax.f32 %v4369_v28, 1e-30 }
 0x605   :  { %v4672_v2 = vmul.f32 %v5264_v42, %v4591_v27 }
 0x606   :  { %5265 = vrcp.f32 %v4417_v23  ;;  %v558_v23 = vmul.f32 %v9367_v11, %v410_v45 }
 0x607   :  { %v4704_v7 = vadd.f32 %v4672_v2, %v547_v17 }
 0x609   :  { %4736 = vst [vmem:[#allocation3 + $0xa0] sm:$0xff] %v4704_v7 }
 0x60b   :  { %v4378_v62 = vpop.xlane.xlu0 %4377 }
 0x60c   :  { %v5266_v47 = vpop.eup %5265  ;;  %v4420_v33 = vmax.f32 %v4378_v62, 1e-30 }
 0x60d   :  { %v4675_v15 = vmul.f32 %v5266_v47, %v4598_v49 }
 0x60e   :  { %5267 = vrcp.f32 %v4420_v33 }
 0x60f   :  { %v4707_v22 = vadd.f32 %v4675_v15, %v550_v56 }
 0x611   :  { %4739 = vst [vmem:[#allocation3 + $0xb8] sm:$0xff] %v4707_v22 }
 0x614   :  { %v4384_v30 = vpop.xlane.xlu1 %4383  ;;  %v5268_v6 = vpop.eup %5267 }
 0x615   :  { %v4422_v37 = vmax.f32 %v4384_v30, 1e-30  ;;  %v4678_v44 = vmul.f32 %v5268_v6, %v4606_v52  ;;  %v4387_v35 = vpop.xlane.xlu0 %4386 }
 0x616   :  { %v4423_v60 = vmax.f32 %v4387_v35, 1e-30 }
 0x617   :  { %5269 = vrcp.f32 %v4422_v37  ;;  %v4710_v21 = vadd.f32 %v4678_v44, %v553_v19 }
 0x618   :  { %5271 = vrcp.f32 %v4423_v60 }
 0x619   :  { %4742 = vst [vmem:[#allocation3 + $0xd0] sm:$0xff] %v4710_v21 }
 0x61a   :  { %v4610_v24 = vpop.f32.mrf.mxu1 }
 0x61d   :  { %v5270_v32 = vpop.eup %5269 }
 0x61e   :  { %v5272_v3 = vpop.eup %5271 }
 0x61f   :  { %v4521_v31 = vpop.f32.mrf.mxu3 }
 0x620   :  { %v4611_v41 = vadd.f32 %v4610_v24, %v4521_v31 }
 0x622   :  { %v4680_v50 = vmul.f32 %v5270_v32, %v4611_v41  ;;  %v4612_v61 = vpop.f32.mrf.mxu1 }
 0x624   :  { %v4712_v36 = vadd.f32 %v4680_v50, %v555_v40 }
 0x626   :  { %4744 = vst [vmem:[#allocation3 + $0xe0] sm:$0xff] %v4712_v36 }
 0x627   :  { %v4523_v4 = vpop.f32.mrf.mxu3 }
 0x628   :  { %v4613_v10 = vadd.f32 %v4612_v61, %v4523_v4 }
 0x62a   :  { %v4681_v16 = vmul.f32 %v5272_v3, %v4613_v10 }
 0x62c   :  { %v4713_v46 = vadd.f32 %v4681_v16, %v556_v63 }
 0x62e   :  { %4745 = vst [vmem:[#allocation3 + $0xe8] sm:$0xff] %v4713_v46 }
 0x64b   :  { %v4390_v12 = vpop.xlane.xlu2 %4389  ;;  %v4393_v29 = vpop.xlane.xlu1 %4392 }
 0x64c   :  { %v4424_v25 = vmax.f32 %v4390_v12, 1e-30  ;;  %v4425_v38 = vmax.f32 %v4393_v29, 1e-30 }
 0x64e   :  { %5273 = vrcp.f32 %v4424_v25 }
 0x64f   :  { %5275 = vrcp.f32 %v4425_v38 }
 0x651   :  { %v4615_v53 = vpop.f32.mrf.mxu1 }
 0x654   :  { %v5274_v26 = vpop.eup %5273 }
 0x655   :  { %v5276_v18 = vpop.eup %5275 }
 0x656   :  { %v4526_v34 = vpop.f32.mrf.mxu3 }
 0x657   :  { %v4616_v14 = vadd.f32 %v4615_v53, %v4526_v34 }
 0x659   :  { %v4682_v48 = vmul.f32 %v5274_v26, %v4616_v14  ;;  %v4617_v27 = vpop.f32.mrf.mxu1 }
 0x65b   :  { %v4714_v51 = vadd.f32 %v4682_v48, %v557_v39 }
 0x65d   :  { %4746 = vst [vmem:[#allocation3 + $0xf0] sm:$0xff] %v4714_v51 }
 0x65e   :  { %v4528_v28 = vpop.f32.mrf.mxu3 }
 0x65f   :  { %v4618_v42 = vadd.f32 %v4617_v27, %v4528_v28 }
 0x661   :  { %v4683_v57 = vmul.f32 %v5276_v18, %v4618_v42 }
 0x663   :  { %v4715_v17 = vadd.f32 %v4683_v57, %v558_v23 }
 0x665   :  { %4747 = vst [vmem:[#allocation3 + $0xf8] sm:$0xff] %v4715_v17 }
 0x666   :  { %4760 = dma.vmem_to_hbm [thread:$0]  %s4753_s30, 4096, %s4755_s9, [#allocation4], %s5311_s10, %s5311_s10, %s5312_s11  }
 0x667   :  { %5307 = dma.done.wait [#allocation4], 4096  }
 0x668   :  { %5308 = vsyncadd [#allocation4], 4294963200 }
 0x669   :  { %4765 = vsyncpa [#allocation4], 1 }

</bundles_post_ra>
